<compile_context>
chip_gen: v7x
topology: tpu7x:2x2x1
jax: 0.10.0
libtpu: 0.0.40
codegen_flags: <defaults>
</compile_context>

<pallas_src>
import functools

import jax
import jax.numpy as jnp
from jax import lax
from jax.experimental import pallas as pl
from jax.experimental.pallas import tpu as pltpu


# ------------------------------------------------------------------
# The fused mega-kernel (one grid step == one batch element)
# ------------------------------------------------------------------
def _total_kernel(xcat_ref,
                  w_emb_ref, b_emb_ref,
                  ln1g_ref, ln1b_ref, wqkv_ref, bqkv_ref, wproj_ref, bproj_ref,
                  ln2g_ref, ln2b_ref, wfc1_ref, bfc1_ref, wfc2_ref, bfc2_ref,
                  whead_ref, bhead_ref, wcls_ref, bcls_ref,
                  mse_ref, cls_ref,
                  emb_pad, head_pad, qkv_scratch,
                  *, num_heads, H, W, eps):
    f32 = jnp.float32
    S = H * W
    E = wqkv_ref.shape[1]
    dh = E // num_heads
    scale = 1.0 / float(dh) ** 0.5
    pad = W + 1                                   # flat-index padding for 3x3 taps
    taps = [(dy, dx) for dy in (-1, 0, 1) for dx in (-1, 0, 1)]

    # w-coordinate of every flat spatial token (for row-wrap masking)
    col = lax.broadcasted_iota(jnp.int32, (1, S), 1) % W

    def tap_view(pad_ref, dy, dx):
        """Zero-padded 3x3 neighborhood shift of a (C, S) feature map."""
        a = pad + dy * W + dx                     # static lane offset
        sh = pad_ref[:, a:a + S]
        # mask tokens whose (w + dx) falls outside the image row
        if dx == 1:
            sh = jnp.where(col < (W - 1), sh, 0.0)
        elif dx == -1:
            sh = jnp.where(col >= 1, sh, 0.0)
        return sh

    # -------- 1. fused DAT conv embeddings (msf | fu | pan) --------
    emb_pad[...] = jnp.zeros(emb_pad.shape, f32)
    emb_pad[:, pad:pad + S] = xcat_ref[...].astype(f32)

    e3 = b_emb_ref.shape[0]                       # 3*E
    emb = jnp.zeros((e3, S), f32)
    for t, (dy, dx) in enumerate(taps):           # static 3x3 taps
        emb = emb + jnp.dot(w_emb_ref[t], tap_view(emb_pad, dy, dx),
                            preferred_element_type=f32)
    emb = emb + b_emb_ref[...]
    msf_init = emb[0:E]                           # (E, S)
    fu_emb = emb[E:2 * E]
    pan_init = emb[2 * E:3 * E]
    tok = msf_init + fu_emb + pan_init            # (E, S)

    # -------- 2. transformer block (channels-on-sublane layout) --------
    mu = jnp.mean(tok, axis=0, keepdims=True)
    var = jnp.mean((tok - mu) ** 2, axis=0, keepdims=True)
    hn = (tok - mu) * lax.rsqrt(var + eps) * ln1g_ref[...] + ln1b_ref[...]

    qkv_scratch[...] = jnp.dot(wqkv_ref[...], hn,
                               preferred_element_type=f32) + bqkv_ref[...]

    def head_body(h, acc):
        start = pl.multiple_of(h * dh, dh)
        q = qkv_scratch[pl.ds(start, dh), :]                       # (dh, S)
        k = qkv_scratch[pl.ds(E + start, dh), :]
        v = qkv_scratch[pl.ds(2 * E + start, dh), :]
        s = lax.dot_general(q * scale, k, (((0,), (0,)), ((), ())),
                            preferred_element_type=f32)            # (Sq, Sk)
        m = jnp.max(s, axis=-1, keepdims=True)
        p = jnp.exp(s - m)
        l = jnp.sum(p, axis=-1, keepdims=True)
        p = (p * pl.reciprocal(l, approx=True)).astype(jnp.bfloat16)   # EUP recip
        o = lax.dot_general(v.astype(jnp.bfloat16), p, (((1,), (1,)), ((), ())),
                            preferred_element_type=f32)            # (dh, S)
        wp = wproj_ref[pl.ds(start, dh), :].astype(jnp.bfloat16)   # (dh, E)
        return acc + lax.dot_general(wp, o.astype(jnp.bfloat16),
                                     (((0,), (0,)), ((), ())),
                                     preferred_element_type=f32)   # (E, S)

    attn = lax.fori_loop(0, num_heads, head_body, jnp.zeros((E, S), f32),
                         unroll=True)
    h1 = tok + attn + bproj_ref[...]

    mu2 = jnp.mean(h1, axis=0, keepdims=True)
    var2 = jnp.mean((h1 - mu2) ** 2, axis=0, keepdims=True)
    hn2 = (h1 - mu2) * lax.rsqrt(var2 + eps) * ln2g_ref[...] + ln2b_ref[...]
    mlp = jnp.dot(wfc1_ref[...], hn2, preferred_element_type=f32) + bfc1_ref[...]
    # TODO(synk): PyTorch nn.GELU default is the exact erf form; tanh approx used.
    mlp = jax.nn.gelu(mlp, approximate=True)
    mlp = jnp.dot(wfc2_ref[...], mlp, preferred_element_type=f32) + bfc2_ref[...]
    out = h1 + mlp                                                 # (E, S)

    # -------- 3. mean pool + classifier --------
    pooled = jnp.mean(out, axis=1, keepdims=True)                  # (E, 1)
    cls_ref[...] = (jnp.dot(wcls_ref[...], pooled,
                            preferred_element_type=f32)
                    + bcls_ref[...]).astype(cls_ref.dtype)

    # -------- 4. SqueezeBodyEdge reconstruction heads (fused 3x3 convs) --------
    head_pad[...] = jnp.zeros(head_pad.shape, f32)
    head_pad[0:E, pad:pad + S] = out + msf_init
    head_pad[E:2 * E, pad:pad + S] = out + pan_init

    ch = bhead_ref.shape[0]                        # in_chans_4 + in_chans_1
    mse = jnp.zeros((ch, S), f32)
    for t, (dy, dx) in enumerate(taps):
        mse = mse + jnp.dot(whead_ref[t], tap_view(head_pad, dy, dx),
                            preferred_element_type=f32)
    mse_ref[...] = (mse + bhead_ref[...]).astype(mse_ref.dtype)


# ------------------------------------------------------------------
# pallas_call wrapper
# ------------------------------------------------------------------
_PARAM_ORDER = ("w_emb", "b_emb",
                "ln1_g", "ln1_b", "w_qkv_t", "b_qkv", "w_proj_io", "b_proj",
                "ln2_g", "ln2_b", "w_fc1_t", "b_fc1", "w_fc2_t", "b_fc2",
                "w_head", "b_head", "w_cls", "b_cls")


def _bcast_spec(arr):
    nd = arr.ndim
    return pl.BlockSpec(arr.shape, lambda b: (0,) * nd)


def fused_total_model(x_cat, p, *, H, W, num_heads, eps=1e-5):
    B, cin, S = x_cat.shape
    E = p["ln1_g"].shape[0]
    F = p["w_fc1_t"].shape[0]
    n_out = p["b_head"].shape[0]
    ncls = p["w_cls"].shape[0]
    dh = E // num_heads
    spad = S + 2 * (W + 1)

    # rough cost hint so XLA schedules the surrounding reshapes around the call
    flops = B * (
        2 * 9 * (3 * E) * cin * S              # embedding convs
        + 2 * (3 * E) * E * S                  # QKV projection
        + num_heads * (2 * dh * S * S * 2      # QK^T and PV
                       + 2 * dh * E * S)       # output projection
        + 2 * E * F * S * 2                    # MLP
        + 2 * 9 * n_out * (2 * E) * S          # reconstruction-head convs
        + 2 * E * ncls)                        # classifier
    transcendentals = B * (num_heads * S * S + F * S)
    bytes_accessed = int(int(x_cat.size) * 4 + B * n_out * S * 4 + B * ncls * 4
                         + sum(int(v.size) * 4 for v in p.values()))

    kernel = functools.partial(_total_kernel, num_heads=num_heads, H=H, W=W,
                               eps=eps)
    weight_specs = [_bcast_spec(p[k]) for k in _PARAM_ORDER]

    mse, cls = pl.pallas_call(
        kernel,
        out_shape=(jax.ShapeDtypeStruct((B, n_out, S), jnp.float32),
                   jax.ShapeDtypeStruct((B, ncls, 1), jnp.float32)),
        grid_spec=pltpu.PrefetchScalarGridSpec(
            num_scalar_prefetch=0,
            grid=(B,),
            in_specs=[pl.BlockSpec((None, cin, S), lambda b: (b, 0, 0))]
                     + weight_specs,
            out_specs=(pl.BlockSpec((None, n_out, S), lambda b: (b, 0, 0)),
                       pl.BlockSpec((None, ncls, 1), lambda b: (b, 0, 0))),
            scratch_shapes=[
                pltpu.VMEM((cin, spad), jnp.float32),      # padded embed input
                pltpu.VMEM((2 * E, spad), jnp.float32),    # padded head input
                pltpu.VMEM((3 * E, S), jnp.float32),       # QKV slab
            ],
        ),
        compiler_params=pltpu.CompilerParams(dimension_semantics=("parallel",)),
        cost_estimate=pl.CostEstimate(flops=int(flops),
                                      transcendentals=int(transcendentals),
                                      bytes_accessed=bytes_accessed),
    )(x_cat, *[p[k] for k in _PARAM_ORDER])
    return mse, cls


# ------------------------------------------------------------------
# Parameters (deterministic init, stored directly in kernel layouts)
# ------------------------------------------------------------------
def init_params(key, in_chans_4, in_chans_1, embed_dim, expansion_factor,
                num_classes):
    E = embed_dim
    F = expansion_factor * E
    ks = iter(jax.random.split(key, 16))
    std = 0.02

    def w(shape):
        return (std * jax.random.normal(next(ks), shape)).astype(jnp.float32)

    def zeros(*shape):
        return jnp.zeros(shape, jnp.float32)

    # 3x3 conv kernels in PyTorch (out, in, kh, kw) layout
    k_msf = w((E, in_chans_4, 3, 3))
    k_fu = w((E, in_chans_4, 3, 3))
    k_pan = w((E, in_chans_1, 3, 3))
    # pack into per-tap block-diagonal weight (9, 3E, in4+in4+in1):
    # rows [0:E) -> msf_init, [E:2E) -> fu_emb, [2E:3E) -> pan_init
    emb_taps = []
    for dy in range(3):
        for dx in range(3):
            wm = k_msf[:, :, dy, dx]
            wf = k_fu[:, :, dy, dx]
            wp = k_pan[:, :, dy, dx]
            r0 = jnp.concatenate(
                [wm, jnp.zeros((E, in_chans_4 + in_chans_1), jnp.float32)], axis=1)
            r1 = jnp.concatenate(
                [jnp.zeros((E, in_chans_4), jnp.float32), wf,
                 jnp.zeros((E, in_chans_1), jnp.float32)], axis=1)
            r2 = jnp.concatenate(
                [jnp.zeros((E, 2 * in_chans_4), jnp.float32), wp], axis=1)
            emb_taps.append(jnp.concatenate([r0, r1, r2], axis=0))
    w_emb = jnp.stack(emb_taps)                               # (9, 3E, cin_tot)

    # SqueezeBodyEdge reconstruction-head 3x3 convs, packed block-diagonally:
    # input rows [0:E) = x+msf_init branch, [E:2E) = x+pan_init branch
    k_msf_h = w((in_chans_4, E, 3, 3))
    k_pan_h = w((in_chans_1, E, 3, 3))
    head_taps = []
    for dy in range(3):
        for dx in range(3):
            wm = k_msf_h[:, :, dy, dx]
            wp = k_pan_h[:, :, dy, dx]
            r0 = jnp.concatenate([wm, jnp.zeros((in_chans_4, E), jnp.float32)],
                                 axis=1)
            r1 = jnp.concatenate([jnp.zeros((in_chans_1, E), jnp.float32), wp],
                                 axis=1)
            head_taps.append(jnp.concatenate([r0, r1], axis=0))
    w_head = jnp.stack(head_taps)                             # (9, in4+in1, 2E)

    p = {
        # DAT conv embeddings
        "w_emb": w_emb, "b_emb": zeros(3 * E, 1),
        # transformer block (weights stored as (out, in) / per-head sliceable)
        "ln1_g": jnp.ones((E, 1), jnp.float32), "ln1_b": zeros(E, 1),
        "w_qkv_t": w((3 * E, E)), "b_qkv": zeros(3 * E, 1),
        "w_proj_io": w((E, E)), "b_proj": zeros(E, 1),
        "ln2_g": jnp.ones((E, 1), jnp.float32), "ln2_b": zeros(E, 1),
        "w_fc1_t": w((F, E)), "b_fc1": zeros(F, 1),
        "w_fc2_t": w((E, F)), "b_fc2": zeros(E, 1),
        # SqueezeBodyEdge reconstruction heads + classifier
        # (seg_flow_warp / seg_edge are discarded by Total_model.forward, so the
        #  body/edge flow-warp branch is not computed.)
        "w_head": w_head, "b_head": zeros(in_chans_4 + in_chans_1, 1),
        "w_cls": w((num_classes, E)), "b_cls": zeros(num_classes, 1),
    }
    return p


# ------------------------------------------------------------------
# Forward pass
# ------------------------------------------------------------------
def total_model_forward(p, msf_nchw, fu_nchw, pan_nchw, *, num_heads):
    msf = msf_nchw.astype(jnp.float32)
    fu = fu_nchw.astype(jnp.float32)
    pan = pan_nchw.astype(jnp.float32)
    B, c4, H, W = msf.shape
    c1 = pan.shape[1]
    S = H * W

    # NCHW -> (B, C, H*W): channels on the sublane axis, spatial tokens on the
    # 128-lane axis.  No transpose needed, and the kernel's (C, S) output slabs
    # reshape straight back to NCHW.
    x_cat = jnp.concatenate(
        [msf.reshape(B, c4, S), fu.reshape(B, c4, S), pan.reshape(B, c1, S)],
        axis=1)

    mse, cls = fused_total_model(x_cat, p, H=H, W=W, num_heads=num_heads)

    cls_prd = cls.reshape(B, -1)
    mse_msf = mse[:, :c4, :].reshape(B, c4, H, W)
    mse_pan = mse[:, c4:, :].reshape(B, c1, H, W)
    return cls_prd, mse_msf, mse_pan


# ------------------------------------------------------------------
# Main
# ------------------------------------------------------------------
if __name__ == "__main__":
    # opt-like small config
    B = 2
    img_size = 16
    in_chans_4 = 4
    in_chans_1 = 1
    embed_dim = 32
    num_heads = 4
    expansion_factor = 2
    num_classes = 8

    key = jax.random.PRNGKey(0)
    k_param, k_msf, k_fu, k_pan = jax.random.split(key, 4)

    params = init_params(k_param, in_chans_4, in_chans_1, embed_dim,
                         expansion_factor, num_classes)

    # PyTorch-convention NCHW inputs
    msf = jax.random.normal(k_msf, (B, in_chans_4, img_size, img_size), jnp.float32)
    fu = jax.random.normal(k_fu, (B, in_chans_4, img_size, img_size), jnp.float32)
    pan = jax.random.normal(k_pan, (B, in_chans_1, img_size, img_size), jnp.float32)

    fwd = jax.jit(functools.partial(total_model_forward, num_heads=num_heads))
    cls_prd, mse_msf, mse_pan = fwd(params, msf, fu, pan)
    jax.block_until_ready((cls_prd, mse_msf, mse_pan))

    assert cls_prd.shape == (B, num_classes)
    assert mse_msf.shape == (B, in_chans_4, img_size, img_size)
    assert mse_pan.shape == (B, in_chans_1, img_size, img_size)
    print("KERNEL_OK")
</pallas_src>

<mosaic_0001>
module attributes {stable_mosaic.version = 11 : i64} {
  func.func @_total_kernel(%arg0: i32, %arg1: memref<1x9x256xf32, #tpu.memory_space<vmem>>, %arg2: memref<9x96x9xf32, #tpu.memory_space<vmem>>, %arg3: memref<96x1xf32, #tpu.memory_space<vmem>>, %arg4: memref<32x1xf32, #tpu.memory_space<vmem>>, %arg5: memref<32x1xf32, #tpu.memory_space<vmem>>, %arg6: memref<96x32xf32, #tpu.memory_space<vmem>>, %arg7: memref<96x1xf32, #tpu.memory_space<vmem>>, %arg8: memref<32x32xf32, #tpu.memory_space<vmem>>, %arg9: memref<32x1xf32, #tpu.memory_space<vmem>>, %arg10: memref<32x1xf32, #tpu.memory_space<vmem>>, %arg11: memref<32x1xf32, #tpu.memory_space<vmem>>, %arg12: memref<64x32xf32, #tpu.memory_space<vmem>>, %arg13: memref<64x1xf32, #tpu.memory_space<vmem>>, %arg14: memref<32x64xf32, #tpu.memory_space<vmem>>, %arg15: memref<32x1xf32, #tpu.memory_space<vmem>>, %arg16: memref<9x5x64xf32, #tpu.memory_space<vmem>>, %arg17: memref<5x1xf32, #tpu.memory_space<vmem>>, %arg18: memref<8x32xf32, #tpu.memory_space<vmem>>, %arg19: memref<8x1xf32, #tpu.memory_space<vmem>>, %arg20: memref<1x5x256xf32, #tpu.memory_space<vmem>>, %arg21: memref<1x8x1xf32, #tpu.memory_space<vmem>>, %arg22: memref<9x290xf32, #tpu.memory_space<vmem>>, %arg23: memref<64x290xf32, #tpu.memory_space<vmem>>, %arg24: memref<96x256xf32, #tpu.memory_space<vmem>>) attributes {dimension_semantics = [#tpu.dimension_semantics<parallel>], iteration_bounds = array<i64: 2>, scalar_prefetch = 0 : i64, scratch_operands = 3 : i64, tpu.core_type = #tpu.core_type<tc>, window_params = [{transform_indices = @transform_0, window_bounds = array<i64: 1, 9, 256>}, {pipeline_mode = #tpu.pipeline_mode<synchronous>, transform_indices = @transform_1, window_bounds = array<i64: 9, 96, 9>}, {pipeline_mode = #tpu.pipeline_mode<synchronous>, transform_indices = @transform_2, window_bounds = array<i64: 96, 1>}, {pipeline_mode = #tpu.pipeline_mode<synchronous>, transform_indices = @transform_3, window_bounds = array<i64: 32, 1>}, {pipeline_mode = #tpu.pipeline_mode<synchronous>, transform_indices = @transform_4, window_bounds = array<i64: 32, 1>}, {pipeline_mode = #tpu.pipeline_mode<synchronous>, transform_indices = @transform_5, window_bounds = array<i64: 96, 32>}, {pipeline_mode = #tpu.pipeline_mode<synchronous>, transform_indices = @transform_6, window_bounds = array<i64: 96, 1>}, {pipeline_mode = #tpu.pipeline_mode<synchronous>, transform_indices = @transform_7, window_bounds = array<i64: 32, 32>}, {pipeline_mode = #tpu.pipeline_mode<synchronous>, transform_indices = @transform_8, window_bounds = array<i64: 32, 1>}, {pipeline_mode = #tpu.pipeline_mode<synchronous>, transform_indices = @transform_9, window_bounds = array<i64: 32, 1>}, {pipeline_mode = #tpu.pipeline_mode<synchronous>, transform_indices = @transform_10, window_bounds = array<i64: 32, 1>}, {pipeline_mode = #tpu.pipeline_mode<synchronous>, transform_indices = @transform_11, window_bounds = array<i64: 64, 32>}, {pipeline_mode = #tpu.pipeline_mode<synchronous>, transform_indices = @transform_12, window_bounds = array<i64: 64, 1>}, {pipeline_mode = #tpu.pipeline_mode<synchronous>, transform_indices = @transform_13, window_bounds = array<i64: 32, 64>}, {pipeline_mode = #tpu.pipeline_mode<synchronous>, transform_indices = @transform_14, window_bounds = array<i64: 32, 1>}, {pipeline_mode = #tpu.pipeline_mode<synchronous>, transform_indices = @transform_15, window_bounds = array<i64: 9, 5, 64>}, {pipeline_mode = #tpu.pipeline_mode<synchronous>, transform_indices = @transform_16, window_bounds = array<i64: 5, 1>}, {pipeline_mode = #tpu.pipeline_mode<synchronous>, transform_indices = @transform_17, window_bounds = array<i64: 8, 32>}, {pipeline_mode = #tpu.pipeline_mode<synchronous>, transform_indices = @transform_18, window_bounds = array<i64: 8, 1>}, {transform_indices = @transform_19, window_bounds = array<i64: 1, 5, 256>}, {transform_indices = @transform_20, window_bounds = array<i64: 1, 8, 1>}]} {
    %0 = tpu.iota {dimensions = array<i32: 1>} : vector<1x256xi32>
    %c16_i32 = arith.constant 16 : i32
    %c0_i32 = arith.constant 0 : i32
    %1 = arith.cmpi eq, %c16_i32, %c0_i32 : i32
    %c1_i32 = arith.constant 1 : i32
    %2 = arith.select %1, %c1_i32, %c16_i32 : i32
    %3 = vector.broadcast %2 : i32 to vector<1x256xi32>
    %4 = arith.remsi %0, %3 : vector<1x256xi32>
    %c0_i32_0 = arith.constant 0 : i32
    %5 = vector.broadcast %c0_i32_0 : i32 to vector<1x256xi32>
    %6 = arith.cmpi ne, %4, %5 : vector<1x256xi32>
    %c0_i32_1 = arith.constant 0 : i32
    %7 = vector.broadcast %c0_i32_1 : i32 to vector<1x256xi32>
    %8 = arith.cmpi slt, %4, %7 : vector<1x256xi32>
    %c0_i32_2 = arith.constant 0 : i32
    %9 = arith.cmpi slt, %2, %c0_i32_2 : i32
    %10 = vector.broadcast %9 : i1 to vector<1x256xi1>
    %11 = vector.broadcast %10 : vector<1x256xi1> to vector<1x256xi1>
    %12 = arith.xori %8, %11 : vector<1x256xi1>
    %13 = arith.andi %12, %6 : vector<1x256xi1>
    %14 = vector.broadcast %2 : i32 to vector<1x256xi32>
    %15 = arith.addi %4, %14 : vector<1x256xi32>
    %16 = arith.select %13, %15, %4 : vector<1x256xi1>, vector<1x256xi32>
    %cst = arith.constant 0.000000e+00 : f32
    %17 = vector.broadcast %cst : f32 to vector<9x290xf32>
    %c0 = arith.constant 0 : index
    %c0_3 = arith.constant 0 : index
    %18 = vector.load %arg22[%c0, %c0_3] : memref<9x290xf32, #tpu.memory_space<vmem>>, vector<9x290xf32>
    tpu.vector_store %arg22[%c0, %c0_3], %17 {strides = array<i32>} : memref<9x290xf32, #tpu.memory_space<vmem>>, vector<9x290xf32>,
    %c0_4 = arith.constant 0 : index
    %c0_5 = arith.constant 0 : index
    %c0_6 = arith.constant 0 : index
    %19 = vector.load %arg1[%c0_4, %c0_5, %c0_6] : memref<1x9x256xf32, #tpu.memory_space<vmem>>, vector<1x9x256xf32>
    %20 = vector.shape_cast %19 : vector<1x9x256xf32> to vector<9x256xf32>
    %c0_7 = arith.constant 0 : index
    %c17 = arith.constant 17 : index
    %21 = vector.load %arg22[%c0_7, %c17] : memref<9x290xf32, #tpu.memory_space<vmem>>, vector<9x256xf32>
    tpu.vector_store %arg22[%c0_7, %c17], %20 {strides = array<i32>} : memref<9x290xf32, #tpu.memory_space<vmem>>, vector<9x256xf32>,
    %cst_8 = arith.constant 0.000000e+00 : f32
    %22 = vector.broadcast %cst_8 : f32 to vector<96x256xf32>
    %c0_9 = arith.constant 0 : index
    %c0_10 = arith.constant 0 : index
    %c0_11 = arith.constant 0 : index
    %23 = vector.load %arg2[%c0_9, %c0_10, %c0_11] : memref<9x96x9xf32, #tpu.memory_space<vmem>>, vector<1x96x9xf32>
    %24 = vector.shape_cast %23 : vector<1x96x9xf32> to vector<96x9xf32>
    %c0_12 = arith.constant 0 : index
    %c0_13 = arith.constant 0 : index
    %25 = vector.load %arg22[%c0_12, %c0_13] : memref<9x290xf32, #tpu.memory_space<vmem>>, vector<9x256xf32>
    %c1_i32_14 = arith.constant 1 : i32
    %26 = vector.broadcast %c1_i32_14 : i32 to vector<1x256xi32>
    %27 = arith.cmpi sge, %16, %26 : vector<1x256xi32>
    %cst_15 = arith.constant 0.000000e+00 : f32
    %28 = vector.shape_cast %27 : vector<1x256xi1> to vector<1x256xi1>
    %29 = vector.broadcast %28 : vector<1x256xi1> to vector<9x256xi1>
    %30 = vector.broadcast %cst_15 : f32 to vector<9x256xf32>
    %31 = arith.select %29, %25, %30 : vector<9x256xi1>, vector<9x256xf32>
    %cst_16 = arith.constant dense<0.000000e+00> : vector<96x256xf32>
    %32 = tpu.matmul %24, %31, %cst_16 {dimension_numbers = #tpu.dot_dimension_numbers<[1], [0], [0], [1], [0, 0, 1, 1], [], []>} : vector<96x9xf32>, vector<9x256xf32>, vector<96x256xf32> -> vector<96x256xf32>
    %33 = arith.addf %22, %32 : vector<96x256xf32>
    %c1 = arith.constant 1 : index
    %c0_17 = arith.constant 0 : index
    %c0_18 = arith.constant 0 : index
    %34 = vector.load %arg2[%c1, %c0_17, %c0_18] : memref<9x96x9xf32, #tpu.memory_space<vmem>>, vector<1x96x9xf32>
    %35 = vector.shape_cast %34 : vector<1x96x9xf32> to vector<96x9xf32>
    %c0_19 = arith.constant 0 : index
    %c1_20 = arith.constant 1 : index
    %36 = vector.load %arg22[%c0_19, %c1_20] : memref<9x290xf32, #tpu.memory_space<vmem>>, vector<9x256xf32>
    %cst_21 = arith.constant dense<0.000000e+00> : vector<96x256xf32>
    %37 = tpu.matmul %35, %36, %cst_21 {dimension_numbers = #tpu.dot_dimension_numbers<[1], [0], [0], [1], [0, 0, 1, 1], [], []>} : vector<96x9xf32>, vector<9x256xf32>, vector<96x256xf32> -> vector<96x256xf32>
    %38 = arith.addf %33, %37 : vector<96x256xf32>
    %c2 = arith.constant 2 : index
    %c0_22 = arith.constant 0 : index
    %c0_23 = arith.constant 0 : index
    %39 = vector.load %arg2[%c2, %c0_22, %c0_23] : memref<9x96x9xf32, #tpu.memory_space<vmem>>, vector<1x96x9xf32>
    %40 = vector.shape_cast %39 : vector<1x96x9xf32> to vector<96x9xf32>
    %c0_24 = arith.constant 0 : index
    %c2_25 = arith.constant 2 : index
    %41 = vector.load %arg22[%c0_24, %c2_25] : memref<9x290xf32, #tpu.memory_space<vmem>>, vector<9x256xf32>
    %c15_i32 = arith.constant 15 : i32
    %42 = vector.broadcast %c15_i32 : i32 to vector<1x256xi32>
    %43 = arith.cmpi slt, %16, %42 : vector<1x256xi32>
    %cst_26 = arith.constant 0.000000e+00 : f32
    %44 = vector.shape_cast %43 : vector<1x256xi1> to vector<1x256xi1>
    %45 = vector.broadcast %44 : vector<1x256xi1> to vector<9x256xi1>
    %46 = vector.broadcast %cst_26 : f32 to vector<9x256xf32>
    %47 = arith.select %45, %41, %46 : vector<9x256xi1>, vector<9x256xf32>
    %cst_27 = arith.constant dense<0.000000e+00> : vector<96x256xf32>
    %48 = tpu.matmul %40, %47, %cst_27 {dimension_numbers = #tpu.dot_dimension_numbers<[1], [0], [0], [1], [0, 0, 1, 1], [], []>} : vector<96x9xf32>, vector<9x256xf32>, vector<96x256xf32> -> vector<96x256xf32>
    %49 = arith.addf %38, %48 : vector<96x256xf32>
    %c3 = arith.constant 3 : index
    %c0_28 = arith.constant 0 : index
    %c0_29 = arith.constant 0 : index
    %50 = vector.load %arg2[%c3, %c0_28, %c0_29] : memref<9x96x9xf32, #tpu.memory_space<vmem>>, vector<1x96x9xf32>
    %51 = vector.shape_cast %50 : vector<1x96x9xf32> to vector<96x9xf32>
    %c0_30 = arith.constant 0 : index
    %c16 = arith.constant 16 : index
    %52 = vector.load %arg22[%c0_30, %c16] : memref<9x290xf32, #tpu.memory_space<vmem>>, vector<9x256xf32>
    %c1_i32_31 = arith.constant 1 : i32
    %53 = vector.broadcast %c1_i32_31 : i32 to vector<1x256xi32>
    %54 = arith.cmpi sge, %16, %53 : vector<1x256xi32>
    %cst_32 = arith.constant 0.000000e+00 : f32
    %55 = vector.shape_cast %54 : vector<1x256xi1> to vector<1x256xi1>
    %56 = vector.broadcast %55 : vector<1x256xi1> to vector<9x256xi1>
    %57 = vector.broadcast %cst_32 : f32 to vector<9x256xf32>
    %58 = arith.select %56, %52, %57 : vector<9x256xi1>, vector<9x256xf32>
    %cst_33 = arith.constant dense<0.000000e+00> : vector<96x256xf32>
    %59 = tpu.matmul %51, %58, %cst_33 {dimension_numbers = #tpu.dot_dimension_numbers<[1], [0], [0], [1], [0, 0, 1, 1], [], []>} : vector<96x9xf32>, vector<9x256xf32>, vector<96x256xf32> -> vector<96x256xf32>
    %60 = arith.addf %49, %59 : vector<96x256xf32>
    %c4 = arith.constant 4 : index
    %c0_34 = arith.constant 0 : index
    %c0_35 = arith.constant 0 : index
    %61 = vector.load %arg2[%c4, %c0_34, %c0_35] : memref<9x96x9xf32, #tpu.memory_space<vmem>>, vector<1x96x9xf32>
    %62 = vector.shape_cast %61 : vector<1x96x9xf32> to vector<96x9xf32>
    %c0_36 = arith.constant 0 : index
    %c17_37 = arith.constant 17 : index
    %63 = vector.load %arg22[%c0_36, %c17_37] : memref<9x290xf32, #tpu.memory_space<vmem>>, vector<9x256xf32>
    %cst_38 = arith.constant dense<0.000000e+00> : vector<96x256xf32>
    %64 = tpu.matmul %62, %63, %cst_38 {dimension_numbers = #tpu.dot_dimension_numbers<[1], [0], [0], [1], [0, 0, 1, 1], [], []>} : vector<96x9xf32>, vector<9x256xf32>, vector<96x256xf32> -> vector<96x256xf32>
    %65 = arith.addf %60, %64 : vector<96x256xf32>
    %c5 = arith.constant 5 : index
    %c0_39 = arith.constant 0 : index
    %c0_40 = arith.constant 0 : index
    %66 = vector.load %arg2[%c5, %c0_39, %c0_40] : memref<9x96x9xf32, #tpu.memory_space<vmem>>, vector<1x96x9xf32>
    %67 = vector.shape_cast %66 : vector<1x96x9xf32> to vector<96x9xf32>
    %c0_41 = arith.constant 0 : index
    %c18 = arith.constant 18 : index
    %68 = vector.load %arg22[%c0_41, %c18] : memref<9x290xf32, #tpu.memory_space<vmem>>, vector<9x256xf32>
    %c15_i32_42 = arith.constant 15 : i32
    %69 = vector.broadcast %c15_i32_42 : i32 to vector<1x256xi32>
    %70 = arith.cmpi slt, %16, %69 : vector<1x256xi32>
    %cst_43 = arith.constant 0.000000e+00 : f32
    %71 = vector.shape_cast %70 : vector<1x256xi1> to vector<1x256xi1>
    %72 = vector.broadcast %71 : vector<1x256xi1> to vector<9x256xi1>
    %73 = vector.broadcast %cst_43 : f32 to vector<9x256xf32>
    %74 = arith.select %72, %68, %73 : vector<9x256xi1>, vector<9x256xf32>
    %cst_44 = arith.constant dense<0.000000e+00> : vector<96x256xf32>
    %75 = tpu.matmul %67, %74, %cst_44 {dimension_numbers = #tpu.dot_dimension_numbers<[1], [0], [0], [1], [0, 0, 1, 1], [], []>} : vector<96x9xf32>, vector<9x256xf32>, vector<96x256xf32> -> vector<96x256xf32>
    %76 = arith.addf %65, %75 : vector<96x256xf32>
    %c6 = arith.constant 6 : index
    %c0_45 = arith.constant 0 : index
    %c0_46 = arith.constant 0 : index
    %77 = vector.load %arg2[%c6, %c0_45, %c0_46] : memref<9x96x9xf32, #tpu.memory_space<vmem>>, vector<1x96x9xf32>
    %78 = vector.shape_cast %77 : vector<1x96x9xf32> to vector<96x9xf32>
    %c0_47 = arith.constant 0 : index
    %c32 = arith.constant 32 : index
    %79 = vector.load %arg22[%c0_47, %c32] : memref<9x290xf32, #tpu.memory_space<vmem>>, vector<9x256xf32>
    %c1_i32_48 = arith.constant 1 : i32
    %80 = vector.broadcast %c1_i32_48 : i32 to vector<1x256xi32>
    %81 = arith.cmpi sge, %16, %80 : vector<1x256xi32>
    %cst_49 = arith.constant 0.000000e+00 : f32
    %82 = vector.shape_cast %81 : vector<1x256xi1> to vector<1x256xi1>
    %83 = vector.broadcast %82 : vector<1x256xi1> to vector<9x256xi1>
    %84 = vector.broadcast %cst_49 : f32 to vector<9x256xf32>
    %85 = arith.select %83, %79, %84 : vector<9x256xi1>, vector<9x256xf32>
    %cst_50 = arith.constant dense<0.000000e+00> : vector<96x256xf32>
    %86 = tpu.matmul %78, %85, %cst_50 {dimension_numbers = #tpu.dot_dimension_numbers<[1], [0], [0], [1], [0, 0, 1, 1], [], []>} : vector<96x9xf32>, vector<9x256xf32>, vector<96x256xf32> -> vector<96x256xf32>
    %87 = arith.addf %76, %86 : vector<96x256xf32>
    %c7 = arith.constant 7 : index
    %c0_51 = arith.constant 0 : index
    %c0_52 = arith.constant 0 : index
    %88 = vector.load %arg2[%c7, %c0_51, %c0_52] : memref<9x96x9xf32, #tpu.memory_space<vmem>>, vector<1x96x9xf32>
    %89 = vector.shape_cast %88 : vector<1x96x9xf32> to vector<96x9xf32>
    %c0_53 = arith.constant 0 : index
    %c33 = arith.constant 33 : index
    %90 = vector.load %arg22[%c0_53, %c33] : memref<9x290xf32, #tpu.memory_space<vmem>>, vector<9x256xf32>
    %cst_54 = arith.constant dense<0.000000e+00> : vector<96x256xf32>
    %91 = tpu.matmul %89, %90, %cst_54 {dimension_numbers = #tpu.dot_dimension_numbers<[1], [0], [0], [1], [0, 0, 1, 1], [], []>} : vector<96x9xf32>, vector<9x256xf32>, vector<96x256xf32> -> vector<96x256xf32>
    %92 = arith.addf %87, %91 : vector<96x256xf32>
    %c8 = arith.constant 8 : index
    %c0_55 = arith.constant 0 : index
    %c0_56 = arith.constant 0 : index
    %93 = vector.load %arg2[%c8, %c0_55, %c0_56] : memref<9x96x9xf32, #tpu.memory_space<vmem>>, vector<1x96x9xf32>
    %94 = vector.shape_cast %93 : vector<1x96x9xf32> to vector<96x9xf32>
    %c0_57 = arith.constant 0 : index
    %c34 = arith.constant 34 : index
    %95 = vector.load %arg22[%c0_57, %c34] : memref<9x290xf32, #tpu.memory_space<vmem>>, vector<9x256xf32>
    %c15_i32_58 = arith.constant 15 : i32
    %96 = vector.broadcast %c15_i32_58 : i32 to vector<1x256xi32>
    %97 = arith.cmpi slt, %16, %96 : vector<1x256xi32>
    %cst_59 = arith.constant 0.000000e+00 : f32
    %98 = vector.shape_cast %97 : vector<1x256xi1> to vector<1x256xi1>
    %99 = vector.broadcast %98 : vector<1x256xi1> to vector<9x256xi1>
    %100 = vector.broadcast %cst_59 : f32 to vector<9x256xf32>
    %101 = arith.select %99, %95, %100 : vector<9x256xi1>, vector<9x256xf32>
    %cst_60 = arith.constant dense<0.000000e+00> : vector<96x256xf32>
    %102 = tpu.matmul %94, %101, %cst_60 {dimension_numbers = #tpu.dot_dimension_numbers<[1], [0], [0], [1], [0, 0, 1, 1], [], []>} : vector<96x9xf32>, vector<9x256xf32>, vector<96x256xf32> -> vector<96x256xf32>
    %103 = arith.addf %92, %102 : vector<96x256xf32>
    %c0_61 = arith.constant 0 : index
    %c0_62 = arith.constant 0 : index
    %104 = vector.load %arg3[%c0_61, %c0_62] : memref<96x1xf32, #tpu.memory_space<vmem>>, vector<96x1xf32>
    %105 = vector.broadcast %104 : vector<96x1xf32> to vector<96x256xf32>
    %106 = arith.addf %103, %105 : vector<96x256xf32>
    %107 = vector.extract_strided_slice %106 {offsets = [0, 0], sizes = [32, 256], strides = [1, 1]} : vector<96x256xf32> to vector<32x256xf32>
    %108 = vector.extract_strided_slice %106 {offsets = [32, 0], sizes = [32, 256], strides = [1, 1]} : vector<96x256xf32> to vector<32x256xf32>
    %109 = vector.extract_strided_slice %106 {offsets = [64, 0], sizes = [32, 256], strides = [1, 1]} : vector<96x256xf32> to vector<32x256xf32>
    %110 = arith.addf %107, %108 : vector<32x256xf32>
    %111 = arith.addf %110, %109 : vector<32x256xf32>
    %cst_63 = arith.constant dense<0.000000e+00> : vector<256xf32>
    %112 = vector.multi_reduction <add>, %111, %cst_63 [0] : vector<32x256xf32> to vector<256xf32>
    %113 = vector.shape_cast %112 : vector<256xf32> to vector<1x256xf32>
    %cst_64 = arith.constant 3.200000e+01 : f32
    %114 = vector.broadcast %cst_64 : f32 to vector<1x256xf32>
    %115 = arith.divf %113, %114 : vector<1x256xf32>
    %116 = vector.broadcast %115 : vector<1x256xf32> to vector<32x256xf32>
    %117 = arith.subf %111, %116 : vector<32x256xf32>
    %118 = arith.mulf %117, %117 : vector<32x256xf32>
    %cst_65 = arith.constant dense<0.000000e+00> : vector<256xf32>
    %119 = vector.multi_reduction <add>, %118, %cst_65 [0] : vector<32x256xf32> to vector<256xf32>
    %120 = vector.shape_cast %119 : vector<256xf32> to vector<1x256xf32>
    %cst_66 = arith.constant 3.200000e+01 : f32
    %121 = vector.broadcast %cst_66 : f32 to vector<1x256xf32>
    %122 = arith.divf %120, %121 : vector<1x256xf32>
    %123 = vector.broadcast %115 : vector<1x256xf32> to vector<32x256xf32>
    %124 = arith.subf %111, %123 : vector<32x256xf32>
    %cst_67 = arith.constant 9.99999974E-6 : f32
    %125 = vector.broadcast %cst_67 : f32 to vector<1x256xf32>
    %126 = arith.addf %122, %125 : vector<1x256xf32>
    %127 = math.rsqrt %126 : vector<1x256xf32>
    %128 = vector.broadcast %127 : vector<1x256xf32> to vector<32x256xf32>
    %129 = arith.mulf %124, %128 : vector<32x256xf32>
    %c0_68 = arith.constant 0 : index
    %c0_69 = arith.constant 0 : index
    %130 = vector.load %arg4[%c0_68, %c0_69] : memref<32x1xf32, #tpu.memory_space<vmem>>, vector<32x1xf32>
    %131 = vector.broadcast %130 : vector<32x1xf32> to vector<32x256xf32>
    %132 = arith.mulf %129, %131 : vector<32x256xf32>
    %c0_70 = arith.constant 0 : index
    %c0_71 = arith.constant 0 : index
    %133 = vector.load %arg5[%c0_70, %c0_71] : memref<32x1xf32, #tpu.memory_space<vmem>>, vector<32x1xf32>
    %134 = vector.broadcast %133 : vector<32x1xf32> to vector<32x256xf32>
    %135 = arith.addf %132, %134 : vector<32x256xf32>
    %c0_72 = arith.constant 0 : index
    %c0_73 = arith.constant 0 : index
    %136 = vector.load %arg6[%c0_72, %c0_73] : memref<96x32xf32, #tpu.memory_space<vmem>>, vector<96x32xf32>
    %cst_74 = arith.constant dense<0.000000e+00> : vector<96x256xf32>
    %137 = tpu.matmul %136, %135, %cst_74 {dimension_numbers = #tpu.dot_dimension_numbers<[1], [0], [0], [1], [0, 0, 1, 1], [], []>} : vector<96x32xf32>, vector<32x256xf32>, vector<96x256xf32> -> vector<96x256xf32>
    %c0_75 = arith.constant 0 : index
    %c0_76 = arith.constant 0 : index
    %138 = vector.load %arg7[%c0_75, %c0_76] : memref<96x1xf32, #tpu.memory_space<vmem>>, vector<96x1xf32>
    %139 = vector.broadcast %138 : vector<96x1xf32> to vector<96x256xf32>
    %140 = arith.addf %137, %139 : vector<96x256xf32>
    %c0_77 = arith.constant 0 : index
    %c0_78 = arith.constant 0 : index
    %141 = vector.load %arg24[%c0_77, %c0_78] : memref<96x256xf32, #tpu.memory_space<vmem>>, vector<96x256xf32>
    tpu.vector_store %arg24[%c0_77, %c0_78], %140 {strides = array<i32>} : memref<96x256xf32, #tpu.memory_space<vmem>>, vector<96x256xf32>,
    %cst_79 = arith.constant 0.000000e+00 : f32
    %142 = vector.broadcast %cst_79 : f32 to vector<32x256xf32>
    %c0_i32_80 = arith.constant 0 : i32
    %c8_i32 = arith.constant 8 : i32
    %143 = arith.muli %c0_i32_80, %c8_i32 : i32
    %144 = tpu.assume_multiple %143, 8 : i32
    %145 = arith.index_cast %144 : i32 to index
    %c0_81 = arith.constant 0 : index
    %146 = vector.load %arg24[%145, %c0_81] : memref<96x256xf32, #tpu.memory_space<vmem>>, vector<8x256xf32>
    %c32_i32 = arith.constant 32 : i32
    %147 = arith.addi %c32_i32, %144 : i32
    %148 = arith.index_cast %147 : i32 to index
    %c0_82 = arith.constant 0 : index
    %149 = vector.load %arg24[%148, %c0_82] : memref<96x256xf32, #tpu.memory_space<vmem>>, vector<8x256xf32>
    %c64_i32 = arith.constant 64 : i32
    %150 = arith.addi %c64_i32, %144 : i32
    %151 = arith.index_cast %150 : i32 to index
    %c0_83 = arith.constant 0 : index
    %152 = vector.load %arg24[%151, %c0_83] : memref<96x256xf32, #tpu.memory_space<vmem>>, vector<8x256xf32>
    %cst_84 = arith.constant 0.353553385 : f32
    %153 = vector.broadcast %cst_84 : f32 to vector<8x256xf32>
    %154 = arith.mulf %146, %153 : vector<8x256xf32>
    %cst_85 = arith.constant dense<0.000000e+00> : vector<256x256xf32>
    %155 = tpu.matmul %154, %149, %cst_85 {dimension_numbers = #tpu.dot_dimension_numbers<[0], [0], [1], [1], [0, 1, 1, 1], [], []>} : vector<8x256xf32>, vector<8x256xf32>, vector<256x256xf32> -> vector<256x256xf32>
    %cst_86 = arith.constant dense<0xFF800000> : vector<256xf32>
    %156 = vector.multi_reduction <maximumf>, %155, %cst_86 [1] : vector<256x256xf32> to vector<256xf32>
    %157 = vector.shape_cast %156 : vector<256xf32> to vector<256x1xf32>
    %158 = vector.broadcast %157 : vector<256x1xf32> to vector<256x256xf32>
    %159 = arith.subf %155, %158 : vector<256x256xf32>
    %160 = math.exp %159 : vector<256x256xf32>
    %cst_87 = arith.constant dense<0.000000e+00> : vector<256xf32>
    %161 = vector.multi_reduction <add>, %160, %cst_87 [1] : vector<256x256xf32> to vector<256xf32>
    %162 = vector.shape_cast %161 : vector<256xf32> to vector<256x1xf32>
    %163 = tpu.reciprocal %162 {approx = true} : vector<256x1xf32> -> vector<256x1xf32>
    %164 = vector.broadcast %163 : vector<256x1xf32> to vector<256x256xf32>
    %165 = arith.mulf %160, %164 : vector<256x256xf32>
    %166 = arith.truncf %165 : vector<256x256xf32> to vector<256x256xbf16>
    %167 = arith.truncf %152 : vector<8x256xf32> to vector<8x256xbf16>
    %cst_88 = arith.constant dense<0.000000e+00> : vector<8x256xf32>
    %168 = tpu.matmul %167, %166, %cst_88 {dimension_numbers = #tpu.dot_dimension_numbers<[1], [1], [0], [0], [0, 0, 1, 0], [], []>} : vector<8x256xbf16>, vector<256x256xbf16>, vector<8x256xf32> -> vector<8x256xf32>
    %169 = arith.index_cast %144 : i32 to index
    %c0_89 = arith.constant 0 : index
    %170 = vector.load %arg8[%169, %c0_89] : memref<32x32xf32, #tpu.memory_space<vmem>>, vector<8x32xf32>
    %171 = arith.truncf %170 : vector<8x32xf32> to vector<8x32xbf16>
    %172 = arith.truncf %168 : vector<8x256xf32> to vector<8x256xbf16>
    %cst_90 = arith.constant dense<0.000000e+00> : vector<32x256xf32>
    %173 = tpu.matmul %171, %172, %cst_90 {dimension_numbers = #tpu.dot_dimension_numbers<[0], [0], [1], [1], [0, 1, 1, 1], [], []>} : vector<8x32xbf16>, vector<8x256xbf16>, vector<32x256xf32> -> vector<32x256xf32>
    %174 = arith.addf %142, %173 : vector<32x256xf32>
    %c1_i32_91 = arith.constant 1 : i32
    %c8_i32_92 = arith.constant 8 : i32
    %175 = arith.muli %c1_i32_91, %c8_i32_92 : i32
    %176 = tpu.assume_multiple %175, 8 : i32
    %177 = arith.index_cast %176 : i32 to index
    %c0_93 = arith.constant 0 : index
    %178 = vector.load %arg24[%177, %c0_93] : memref<96x256xf32, #tpu.memory_space<vmem>>, vector<8x256xf32>
    %c32_i32_94 = arith.constant 32 : i32
    %179 = arith.addi %c32_i32_94, %176 : i32
    %180 = arith.index_cast %179 : i32 to index
    %c0_95 = arith.constant 0 : index
    %181 = vector.load %arg24[%180, %c0_95] : memref<96x256xf32, #tpu.memory_space<vmem>>, vector<8x256xf32>
    %c64_i32_96 = arith.constant 64 : i32
    %182 = arith.addi %c64_i32_96, %176 : i32
    %183 = arith.index_cast %182 : i32 to index
    %c0_97 = arith.constant 0 : index
    %184 = vector.load %arg24[%183, %c0_97] : memref<96x256xf32, #tpu.memory_space<vmem>>, vector<8x256xf32>
    %cst_98 = arith.constant 0.353553385 : f32
    %185 = vector.broadcast %cst_98 : f32 to vector<8x256xf32>
    %186 = arith.mulf %178, %185 : vector<8x256xf32>
    %cst_99 = arith.constant dense<0.000000e+00> : vector<256x256xf32>
    %187 = tpu.matmul %186, %181, %cst_99 {dimension_numbers = #tpu.dot_dimension_numbers<[0], [0], [1], [1], [0, 1, 1, 1], [], []>} : vector<8x256xf32>, vector<8x256xf32>, vector<256x256xf32> -> vector<256x256xf32>
    %cst_100 = arith.constant dense<0xFF800000> : vector<256xf32>
    %188 = vector.multi_reduction <maximumf>, %187, %cst_100 [1] : vector<256x256xf32> to vector<256xf32>
    %189 = vector.shape_cast %188 : vector<256xf32> to vector<256x1xf32>
    %190 = vector.broadcast %189 : vector<256x1xf32> to vector<256x256xf32>
    %191 = arith.subf %187, %190 : vector<256x256xf32>
    %192 = math.exp %191 : vector<256x256xf32>
    %cst_101 = arith.constant dense<0.000000e+00> : vector<256xf32>
    %193 = vector.multi_reduction <add>, %192, %cst_101 [1] : vector<256x256xf32> to vector<256xf32>
    %194 = vector.shape_cast %193 : vector<256xf32> to vector<256x1xf32>
    %195 = tpu.reciprocal %194 {approx = true} : vector<256x1xf32> -> vector<256x1xf32>
    %196 = vector.broadcast %195 : vector<256x1xf32> to vector<256x256xf32>
    %197 = arith.mulf %192, %196 : vector<256x256xf32>
    %198 = arith.truncf %197 : vector<256x256xf32> to vector<256x256xbf16>
    %199 = arith.truncf %184 : vector<8x256xf32> to vector<8x256xbf16>
    %cst_102 = arith.constant dense<0.000000e+00> : vector<8x256xf32>
    %200 = tpu.matmul %199, %198, %cst_102 {dimension_numbers = #tpu.dot_dimension_numbers<[1], [1], [0], [0], [0, 0, 1, 0], [], []>} : vector<8x256xbf16>, vector<256x256xbf16>, vector<8x256xf32> -> vector<8x256xf32>
    %201 = arith.index_cast %176 : i32 to index
    %c0_103 = arith.constant 0 : index
    %202 = vector.load %arg8[%201, %c0_103] : memref<32x32xf32, #tpu.memory_space<vmem>>, vector<8x32xf32>
    %203 = arith.truncf %202 : vector<8x32xf32> to vector<8x32xbf16>
    %204 = arith.truncf %200 : vector<8x256xf32> to vector<8x256xbf16>
    %cst_104 = arith.constant dense<0.000000e+00> : vector<32x256xf32>
    %205 = tpu.matmul %203, %204, %cst_104 {dimension_numbers = #tpu.dot_dimension_numbers<[0], [0], [1], [1], [0, 1, 1, 1], [], []>} : vector<8x32xbf16>, vector<8x256xbf16>, vector<32x256xf32> -> vector<32x256xf32>
    %206 = arith.addf %174, %205 : vector<32x256xf32>
    %c2_i32 = arith.constant 2 : i32
    %c8_i32_105 = arith.constant 8 : i32
    %207 = arith.muli %c2_i32, %c8_i32_105 : i32
    %208 = tpu.assume_multiple %207, 8 : i32
    %209 = arith.index_cast %208 : i32 to index
    %c0_106 = arith.constant 0 : index
    %210 = vector.load %arg24[%209, %c0_106] : memref<96x256xf32, #tpu.memory_space<vmem>>, vector<8x256xf32>
    %c32_i32_107 = arith.constant 32 : i32
    %211 = arith.addi %c32_i32_107, %208 : i32
    %212 = arith.index_cast %211 : i32 to index
    %c0_108 = arith.constant 0 : index
    %213 = vector.load %arg24[%212, %c0_108] : memref<96x256xf32, #tpu.memory_space<vmem>>, vector<8x256xf32>
    %c64_i32_109 = arith.constant 64 : i32
    %214 = arith.addi %c64_i32_109, %208 : i32
    %215 = arith.index_cast %214 : i32 to index
    %c0_110 = arith.constant 0 : index
    %216 = vector.load %arg24[%215, %c0_110] : memref<96x256xf32, #tpu.memory_space<vmem>>, vector<8x256xf32>
    %cst_111 = arith.constant 0.353553385 : f32
    %217 = vector.broadcast %cst_111 : f32 to vector<8x256xf32>
    %218 = arith.mulf %210, %217 : vector<8x256xf32>
    %cst_112 = arith.constant dense<0.000000e+00> : vector<256x256xf32>
    %219 = tpu.matmul %218, %213, %cst_112 {dimension_numbers = #tpu.dot_dimension_numbers<[0], [0], [1], [1], [0, 1, 1, 1], [], []>} : vector<8x256xf32>, vector<8x256xf32>, vector<256x256xf32> -> vector<256x256xf32>
    %cst_113 = arith.constant dense<0xFF800000> : vector<256xf32>
    %220 = vector.multi_reduction <maximumf>, %219, %cst_113 [1] : vector<256x256xf32> to vector<256xf32>
    %221 = vector.shape_cast %220 : vector<256xf32> to vector<256x1xf32>
    %222 = vector.broadcast %221 : vector<256x1xf32> to vector<256x256xf32>
    %223 = arith.subf %219, %222 : vector<256x256xf32>
    %224 = math.exp %223 : vector<256x256xf32>
    %cst_114 = arith.constant dense<0.000000e+00> : vector<256xf32>
    %225 = vector.multi_reduction <add>, %224, %cst_114 [1] : vector<256x256xf32> to vector<256xf32>
    %226 = vector.shape_cast %225 : vector<256xf32> to vector<256x1xf32>
    %227 = tpu.reciprocal %226 {approx = true} : vector<256x1xf32> -> vector<256x1xf32>
    %228 = vector.broadcast %227 : vector<256x1xf32> to vector<256x256xf32>
    %229 = arith.mulf %224, %228 : vector<256x256xf32>
    %230 = arith.truncf %229 : vector<256x256xf32> to vector<256x256xbf16>
    %231 = arith.truncf %216 : vector<8x256xf32> to vector<8x256xbf16>
    %cst_115 = arith.constant dense<0.000000e+00> : vector<8x256xf32>
    %232 = tpu.matmul %231, %230, %cst_115 {dimension_numbers = #tpu.dot_dimension_numbers<[1], [1], [0], [0], [0, 0, 1, 0], [], []>} : vector<8x256xbf16>, vector<256x256xbf16>, vector<8x256xf32> -> vector<8x256xf32>
    %233 = arith.index_cast %208 : i32 to index
    %c0_116 = arith.constant 0 : index
    %234 = vector.load %arg8[%233, %c0_116] : memref<32x32xf32, #tpu.memory_space<vmem>>, vector<8x32xf32>
    %235 = arith.truncf %234 : vector<8x32xf32> to vector<8x32xbf16>
    %236 = arith.truncf %232 : vector<8x256xf32> to vector<8x256xbf16>
    %cst_117 = arith.constant dense<0.000000e+00> : vector<32x256xf32>
    %237 = tpu.matmul %235, %236, %cst_117 {dimension_numbers = #tpu.dot_dimension_numbers<[0], [0], [1], [1], [0, 1, 1, 1], [], []>} : vector<8x32xbf16>, vector<8x256xbf16>, vector<32x256xf32> -> vector<32x256xf32>
    %238 = arith.addf %206, %237 : vector<32x256xf32>
    %c3_i32 = arith.constant 3 : i32
    %c8_i32_118 = arith.constant 8 : i32
    %239 = arith.muli %c3_i32, %c8_i32_118 : i32
    %240 = tpu.assume_multiple %239, 8 : i32
    %241 = arith.index_cast %240 : i32 to index
    %c0_119 = arith.constant 0 : index
    %242 = vector.load %arg24[%241, %c0_119] : memref<96x256xf32, #tpu.memory_space<vmem>>, vector<8x256xf32>
    %c32_i32_120 = arith.constant 32 : i32
    %243 = arith.addi %c32_i32_120, %240 : i32
    %244 = arith.index_cast %243 : i32 to index
    %c0_121 = arith.constant 0 : index
    %245 = vector.load %arg24[%244, %c0_121] : memref<96x256xf32, #tpu.memory_space<vmem>>, vector<8x256xf32>
    %c64_i32_122 = arith.constant 64 : i32
    %246 = arith.addi %c64_i32_122, %240 : i32
    %247 = arith.index_cast %246 : i32 to index
    %c0_123 = arith.constant 0 : index
    %248 = vector.load %arg24[%247, %c0_123] : memref<96x256xf32, #tpu.memory_space<vmem>>, vector<8x256xf32>
    %cst_124 = arith.constant 0.353553385 : f32
    %249 = vector.broadcast %cst_124 : f32 to vector<8x256xf32>
    %250 = arith.mulf %242, %249 : vector<8x256xf32>
    %cst_125 = arith.constant dense<0.000000e+00> : vector<256x256xf32>
    %251 = tpu.matmul %250, %245, %cst_125 {dimension_numbers = #tpu.dot_dimension_numbers<[0], [0], [1], [1], [0, 1, 1, 1], [], []>} : vector<8x256xf32>, vector<8x256xf32>, vector<256x256xf32> -> vector<256x256xf32>
    %cst_126 = arith.constant dense<0xFF800000> : vector<256xf32>
    %252 = vector.multi_reduction <maximumf>, %251, %cst_126 [1] : vector<256x256xf32> to vector<256xf32>
    %253 = vector.shape_cast %252 : vector<256xf32> to vector<256x1xf32>
    %254 = vector.broadcast %253 : vector<256x1xf32> to vector<256x256xf32>
    %255 = arith.subf %251, %254 : vector<256x256xf32>
    %256 = math.exp %255 : vector<256x256xf32>
    %cst_127 = arith.constant dense<0.000000e+00> : vector<256xf32>
    %257 = vector.multi_reduction <add>, %256, %cst_127 [1] : vector<256x256xf32> to vector<256xf32>
    %258 = vector.shape_cast %257 : vector<256xf32> to vector<256x1xf32>
    %259 = tpu.reciprocal %258 {approx = true} : vector<256x1xf32> -> vector<256x1xf32>
    %260 = vector.broadcast %259 : vector<256x1xf32> to vector<256x256xf32>
    %261 = arith.mulf %256, %260 : vector<256x256xf32>
    %262 = arith.truncf %261 : vector<256x256xf32> to vector<256x256xbf16>
    %263 = arith.truncf %248 : vector<8x256xf32> to vector<8x256xbf16>
    %cst_128 = arith.constant dense<0.000000e+00> : vector<8x256xf32>
    %264 = tpu.matmul %263, %262, %cst_128 {dimension_numbers = #tpu.dot_dimension_numbers<[1], [1], [0], [0], [0, 0, 1, 0], [], []>} : vector<8x256xbf16>, vector<256x256xbf16>, vector<8x256xf32> -> vector<8x256xf32>
    %265 = arith.index_cast %240 : i32 to index
    %c0_129 = arith.constant 0 : index
    %266 = vector.load %arg8[%265, %c0_129] : memref<32x32xf32, #tpu.memory_space<vmem>>, vector<8x32xf32>
    %267 = arith.truncf %266 : vector<8x32xf32> to vector<8x32xbf16>
    %268 = arith.truncf %264 : vector<8x256xf32> to vector<8x256xbf16>
    %cst_130 = arith.constant dense<0.000000e+00> : vector<32x256xf32>
    %269 = tpu.matmul %267, %268, %cst_130 {dimension_numbers = #tpu.dot_dimension_numbers<[0], [0], [1], [1], [0, 1, 1, 1], [], []>} : vector<8x32xbf16>, vector<8x256xbf16>, vector<32x256xf32> -> vector<32x256xf32>
    %270 = arith.addf %238, %269 : vector<32x256xf32>
    %c4_i32 = arith.constant 4 : i32
    %271 = arith.addf %111, %270 : vector<32x256xf32>
    %c0_131 = arith.constant 0 : index
    %c0_132 = arith.constant 0 : index
    %272 = vector.load %arg9[%c0_131, %c0_132] : memref<32x1xf32, #tpu.memory_space<vmem>>, vector<32x1xf32>
    %273 = vector.broadcast %272 : vector<32x1xf32> to vector<32x256xf32>
    %274 = arith.addf %271, %273 : vector<32x256xf32>
    %cst_133 = arith.constant dense<0.000000e+00> : vector<256xf32>
    %275 = vector.multi_reduction <add>, %274, %cst_133 [0] : vector<32x256xf32> to vector<256xf32>
    %276 = vector.shape_cast %275 : vector<256xf32> to vector<1x256xf32>
    %cst_134 = arith.constant 3.200000e+01 : f32
    %277 = vector.broadcast %cst_134 : f32 to vector<1x256xf32>
    %278 = arith.divf %276, %277 : vector<1x256xf32>
    %279 = vector.broadcast %278 : vector<1x256xf32> to vector<32x256xf32>
    %280 = arith.subf %274, %279 : vector<32x256xf32>
    %281 = arith.mulf %280, %280 : vector<32x256xf32>
    %cst_135 = arith.constant dense<0.000000e+00> : vector<256xf32>
    %282 = vector.multi_reduction <add>, %281, %cst_135 [0] : vector<32x256xf32> to vector<256xf32>
    %283 = vector.shape_cast %282 : vector<256xf32> to vector<1x256xf32>
    %cst_136 = arith.constant 3.200000e+01 : f32
    %284 = vector.broadcast %cst_136 : f32 to vector<1x256xf32>
    %285 = arith.divf %283, %284 : vector<1x256xf32>
    %286 = vector.broadcast %278 : vector<1x256xf32> to vector<32x256xf32>
    %287 = arith.subf %274, %286 : vector<32x256xf32>
    %cst_137 = arith.constant 9.99999974E-6 : f32
    %288 = vector.broadcast %cst_137 : f32 to vector<1x256xf32>
    %289 = arith.addf %285, %288 : vector<1x256xf32>
    %290 = math.rsqrt %289 : vector<1x256xf32>
    %291 = vector.broadcast %290 : vector<1x256xf32> to vector<32x256xf32>
    %292 = arith.mulf %287, %291 : vector<32x256xf32>
    %c0_138 = arith.constant 0 : index
    %c0_139 = arith.constant 0 : index
    %293 = vector.load %arg10[%c0_138, %c0_139] : memref<32x1xf32, #tpu.memory_space<vmem>>, vector<32x1xf32>
    %294 = vector.broadcast %293 : vector<32x1xf32> to vector<32x256xf32>
    %295 = arith.mulf %292, %294 : vector<32x256xf32>
    %c0_140 = arith.constant 0 : index
    %c0_141 = arith.constant 0 : index
    %296 = vector.load %arg11[%c0_140, %c0_141] : memref<32x1xf32, #tpu.memory_space<vmem>>, vector<32x1xf32>
    %297 = vector.broadcast %296 : vector<32x1xf32> to vector<32x256xf32>
    %298 = arith.addf %295, %297 : vector<32x256xf32>
    %c0_142 = arith.constant 0 : index
    %c0_143 = arith.constant 0 : index
    %299 = vector.load %arg12[%c0_142, %c0_143] : memref<64x32xf32, #tpu.memory_space<vmem>>, vector<64x32xf32>
    %cst_144 = arith.constant dense<0.000000e+00> : vector<64x256xf32>
    %300 = tpu.matmul %299, %298, %cst_144 {dimension_numbers = #tpu.dot_dimension_numbers<[1], [0], [0], [1], [0, 0, 1, 1], [], []>} : vector<64x32xf32>, vector<32x256xf32>, vector<64x256xf32> -> vector<64x256xf32>
    %c0_145 = arith.constant 0 : index
    %c0_146 = arith.constant 0 : index
    %301 = vector.load %arg13[%c0_145, %c0_146] : memref<64x1xf32, #tpu.memory_space<vmem>>, vector<64x1xf32>
    %302 = vector.broadcast %301 : vector<64x1xf32> to vector<64x256xf32>
    %303 = arith.addf %300, %302 : vector<64x256xf32>
    %304 = arith.mulf %303, %303 : vector<64x256xf32>
    %305 = arith.mulf %303, %304 : vector<64x256xf32>
    %cst_147 = arith.constant 4.471500e-02 : f32
    %306 = vector.broadcast %cst_147 : f32 to vector<64x256xf32>
    %307 = arith.mulf %306, %305 : vector<64x256xf32>
    %308 = arith.addf %303, %307 : vector<64x256xf32>
    %cst_148 = arith.constant 0.797884583 : f32
    %309 = vector.broadcast %cst_148 : f32 to vector<64x256xf32>
    %310 = arith.mulf %309, %308 : vector<64x256xf32>
    %311 = math.tanh %310 : vector<64x256xf32>
    %cst_149 = arith.constant 1.000000e+00 : f32
    %312 = vector.broadcast %cst_149 : f32 to vector<64x256xf32>
    %313 = arith.addf %312, %311 : vector<64x256xf32>
    %cst_150 = arith.constant 5.000000e-01 : f32
    %314 = vector.broadcast %cst_150 : f32 to vector<64x256xf32>
    %315 = arith.mulf %314, %313 : vector<64x256xf32>
    %316 = arith.mulf %303, %315 : vector<64x256xf32>
    %c0_151 = arith.constant 0 : index
    %c0_152 = arith.constant 0 : index
    %317 = vector.load %arg14[%c0_151, %c0_152] : memref<32x64xf32, #tpu.memory_space<vmem>>, vector<32x64xf32>
    %cst_153 = arith.constant dense<0.000000e+00> : vector<32x256xf32>
    %318 = tpu.matmul %317, %316, %cst_153 {dimension_numbers = #tpu.dot_dimension_numbers<[1], [0], [0], [1], [0, 0, 1, 1], [], []>} : vector<32x64xf32>, vector<64x256xf32>, vector<32x256xf32> -> vector<32x256xf32>
    %c0_154 = arith.constant 0 : index
    %c0_155 = arith.constant 0 : index
    %319 = vector.load %arg15[%c0_154, %c0_155] : memref<32x1xf32, #tpu.memory_space<vmem>>, vector<32x1xf32>
    %320 = vector.broadcast %319 : vector<32x1xf32> to vector<32x256xf32>
    %321 = arith.addf %318, %320 : vector<32x256xf32>
    %322 = arith.addf %274, %321 : vector<32x256xf32>
    %cst_156 = arith.constant dense<0.000000e+00> : vector<32xf32>
    %323 = vector.multi_reduction <add>, %322, %cst_156 [1] : vector<32x256xf32> to vector<32xf32>
    %324 = vector.shape_cast %323 : vector<32xf32> to vector<32x1xf32>
    %cst_157 = arith.constant 2.560000e+02 : f32
    %325 = vector.broadcast %cst_157 : f32 to vector<32x1xf32>
    %326 = arith.divf %324, %325 : vector<32x1xf32>
    %c0_158 = arith.constant 0 : index
    %c0_159 = arith.constant 0 : index
    %327 = vector.load %arg18[%c0_158, %c0_159] : memref<8x32xf32, #tpu.memory_space<vmem>>, vector<8x32xf32>
    %cst_160 = arith.constant dense<0.000000e+00> : vector<8x1xf32>
    %328 = tpu.matmul %327, %326, %cst_160 {dimension_numbers = #tpu.dot_dimension_numbers<[1], [0], [0], [1], [0, 0, 1, 1], [], []>} : vector<8x32xf32>, vector<32x1xf32>, vector<8x1xf32> -> vector<8x1xf32>
    %c0_161 = arith.constant 0 : index
    %c0_162 = arith.constant 0 : index
    %329 = vector.load %arg19[%c0_161, %c0_162] : memref<8x1xf32, #tpu.memory_space<vmem>>, vector<8x1xf32>
    %330 = arith.addf %328, %329 : vector<8x1xf32>
    %c0_163 = arith.constant 0 : index
    %c0_164 = arith.constant 0 : index
    %c0_165 = arith.constant 0 : index
    %331 = vector.load %arg21[%c0_163, %c0_164, %c0_165] : memref<1x8x1xf32, #tpu.memory_space<vmem>>, vector<1x8x1xf32>
    %332 = vector.shape_cast %331 : vector<1x8x1xf32> to vector<8x1xf32>
    %333 = vector.shape_cast %330 : vector<8x1xf32> to vector<1x8x1xf32>
    tpu.vector_store %arg21[%c0_163, %c0_164, %c0_165], %333 {strides = array<i32>} : memref<1x8x1xf32, #tpu.memory_space<vmem>>, vector<1x8x1xf32>,
    %cst_166 = arith.constant 0.000000e+00 : f32
    %334 = vector.broadcast %cst_166 : f32 to vector<64x290xf32>
    %c0_167 = arith.constant 0 : index
    %c0_168 = arith.constant 0 : index
    %335 = vector.load %arg23[%c0_167, %c0_168] : memref<64x290xf32, #tpu.memory_space<vmem>>, vector<64x290xf32>
    tpu.vector_store %arg23[%c0_167, %c0_168], %334 {strides = array<i32>} : memref<64x290xf32, #tpu.memory_space<vmem>>, vector<64x290xf32>,
    %336 = arith.addf %322, %107 : vector<32x256xf32>
    %c0_169 = arith.constant 0 : index
    %c17_170 = arith.constant 17 : index
    %337 = vector.load %arg23[%c0_169, %c17_170] : memref<64x290xf32, #tpu.memory_space<vmem>>, vector<32x256xf32>
    tpu.vector_store %arg23[%c0_169, %c17_170], %336 {strides = array<i32>} : memref<64x290xf32, #tpu.memory_space<vmem>>, vector<32x256xf32>,
    %338 = arith.addf %322, %109 : vector<32x256xf32>
    %c32_171 = arith.constant 32 : index
    %c17_172 = arith.constant 17 : index
    %339 = vector.load %arg23[%c32_171, %c17_172] : memref<64x290xf32, #tpu.memory_space<vmem>>, vector<32x256xf32>
    tpu.vector_store %arg23[%c32_171, %c17_172], %338 {strides = array<i32>} : memref<64x290xf32, #tpu.memory_space<vmem>>, vector<32x256xf32>,
    %cst_173 = arith.constant 0.000000e+00 : f32
    %340 = vector.broadcast %cst_173 : f32 to vector<5x256xf32>
    %c0_174 = arith.constant 0 : index
    %c0_175 = arith.constant 0 : index
    %c0_176 = arith.constant 0 : index
    %341 = vector.load %arg16[%c0_174, %c0_175, %c0_176] : memref<9x5x64xf32, #tpu.memory_space<vmem>>, vector<1x5x64xf32>
    %342 = vector.shape_cast %341 : vector<1x5x64xf32> to vector<5x64xf32>
    %c0_177 = arith.constant 0 : index
    %c0_178 = arith.constant 0 : index
    %343 = vector.load %arg23[%c0_177, %c0_178] : memref<64x290xf32, #tpu.memory_space<vmem>>, vector<64x256xf32>
    %c1_i32_179 = arith.constant 1 : i32
    %344 = vector.broadcast %c1_i32_179 : i32 to vector<1x256xi32>
    %345 = arith.cmpi sge, %16, %344 : vector<1x256xi32>
    %cst_180 = arith.constant 0.000000e+00 : f32
    %346 = vector.shape_cast %345 : vector<1x256xi1> to vector<1x256xi1>
    %347 = vector.broadcast %346 : vector<1x256xi1> to vector<64x256xi1>
    %348 = vector.broadcast %cst_180 : f32 to vector<64x256xf32>
    %349 = arith.select %347, %343, %348 : vector<64x256xi1>, vector<64x256xf32>
    %cst_181 = arith.constant dense<0.000000e+00> : vector<5x256xf32>
    %350 = tpu.matmul %342, %349, %cst_181 {dimension_numbers = #tpu.dot_dimension_numbers<[1], [0], [0], [1], [0, 0, 1, 1], [], []>} : vector<5x64xf32>, vector<64x256xf32>, vector<5x256xf32> -> vector<5x256xf32>
    %351 = arith.addf %340, %350 : vector<5x256xf32>
    %c1_182 = arith.constant 1 : index
    %c0_183 = arith.constant 0 : index
    %c0_184 = arith.constant 0 : index
    %352 = vector.load %arg16[%c1_182, %c0_183, %c0_184] : memref<9x5x64xf32, #tpu.memory_space<vmem>>, vector<1x5x64xf32>
    %353 = vector.shape_cast %352 : vector<1x5x64xf32> to vector<5x64xf32>
    %c0_185 = arith.constant 0 : index
    %c1_186 = arith.constant 1 : index
    %354 = vector.load %arg23[%c0_185, %c1_186] : memref<64x290xf32, #tpu.memory_space<vmem>>, vector<64x256xf32>
    %cst_187 = arith.constant dense<0.000000e+00> : vector<5x256xf32>
    %355 = tpu.matmul %353, %354, %cst_187 {dimension_numbers = #tpu.dot_dimension_numbers<[1], [0], [0], [1], [0, 0, 1, 1], [], []>} : vector<5x64xf32>, vector<64x256xf32>, vector<5x256xf32> -> vector<5x256xf32>
    %356 = arith.addf %351, %355 : vector<5x256xf32>
    %c2_188 = arith.constant 2 : index
    %c0_189 = arith.constant 0 : index
    %c0_190 = arith.constant 0 : index
    %357 = vector.load %arg16[%c2_188, %c0_189, %c0_190] : memref<9x5x64xf32, #tpu.memory_space<vmem>>, vector<1x5x64xf32>
    %358 = vector.shape_cast %357 : vector<1x5x64xf32> to vector<5x64xf32>
    %c0_191 = arith.constant 0 : index
    %c2_192 = arith.constant 2 : index
    %359 = vector.load %arg23[%c0_191, %c2_192] : memref<64x290xf32, #tpu.memory_space<vmem>>, vector<64x256xf32>
    %c15_i32_193 = arith.constant 15 : i32
    %360 = vector.broadcast %c15_i32_193 : i32 to vector<1x256xi32>
    %361 = arith.cmpi slt, %16, %360 : vector<1x256xi32>
    %cst_194 = arith.constant 0.000000e+00 : f32
    %362 = vector.shape_cast %361 : vector<1x256xi1> to vector<1x256xi1>
    %363 = vector.broadcast %362 : vector<1x256xi1> to vector<64x256xi1>
    %364 = vector.broadcast %cst_194 : f32 to vector<64x256xf32>
    %365 = arith.select %363, %359, %364 : vector<64x256xi1>, vector<64x256xf32>
    %cst_195 = arith.constant dense<0.000000e+00> : vector<5x256xf32>
    %366 = tpu.matmul %358, %365, %cst_195 {dimension_numbers = #tpu.dot_dimension_numbers<[1], [0], [0], [1], [0, 0, 1, 1], [], []>} : vector<5x64xf32>, vector<64x256xf32>, vector<5x256xf32> -> vector<5x256xf32>
    %367 = arith.addf %356, %366 : vector<5x256xf32>
    %c3_196 = arith.constant 3 : index
    %c0_197 = arith.constant 0 : index
    %c0_198 = arith.constant 0 : index
    %368 = vector.load %arg16[%c3_196, %c0_197, %c0_198] : memref<9x5x64xf32, #tpu.memory_space<vmem>>, vector<1x5x64xf32>
    %369 = vector.shape_cast %368 : vector<1x5x64xf32> to vector<5x64xf32>
    %c0_199 = arith.constant 0 : index
    %c16_200 = arith.constant 16 : index
    %370 = vector.load %arg23[%c0_199, %c16_200] : memref<64x290xf32, #tpu.memory_space<vmem>>, vector<64x256xf32>
    %c1_i32_201 = arith.constant 1 : i32
    %371 = vector.broadcast %c1_i32_201 : i32 to vector<1x256xi32>
    %372 = arith.cmpi sge, %16, %371 : vector<1x256xi32>
    %cst_202 = arith.constant 0.000000e+00 : f32
    %373 = vector.shape_cast %372 : vector<1x256xi1> to vector<1x256xi1>
    %374 = vector.broadcast %373 : vector<1x256xi1> to vector<64x256xi1>
    %375 = vector.broadcast %cst_202 : f32 to vector<64x256xf32>
    %376 = arith.select %374, %370, %375 : vector<64x256xi1>, vector<64x256xf32>
    %cst_203 = arith.constant dense<0.000000e+00> : vector<5x256xf32>
    %377 = tpu.matmul %369, %376, %cst_203 {dimension_numbers = #tpu.dot_dimension_numbers<[1], [0], [0], [1], [0, 0, 1, 1], [], []>} : vector<5x64xf32>, vector<64x256xf32>, vector<5x256xf32> -> vector<5x256xf32>
    %378 = arith.addf %367, %377 : vector<5x256xf32>
    %c4_204 = arith.constant 4 : index
    %c0_205 = arith.constant 0 : index
    %c0_206 = arith.constant 0 : index
    %379 = vector.load %arg16[%c4_204, %c0_205, %c0_206] : memref<9x5x64xf32, #tpu.memory_space<vmem>>, vector<1x5x64xf32>
    %380 = vector.shape_cast %379 : vector<1x5x64xf32> to vector<5x64xf32>
    %c0_207 = arith.constant 0 : index
    %c17_208 = arith.constant 17 : index
    %381 = vector.load %arg23[%c0_207, %c17_208] : memref<64x290xf32, #tpu.memory_space<vmem>>, vector<64x256xf32>
    %cst_209 = arith.constant dense<0.000000e+00> : vector<5x256xf32>
    %382 = tpu.matmul %380, %381, %cst_209 {dimension_numbers = #tpu.dot_dimension_numbers<[1], [0], [0], [1], [0, 0, 1, 1], [], []>} : vector<5x64xf32>, vector<64x256xf32>, vector<5x256xf32> -> vector<5x256xf32>
    %383 = arith.addf %378, %382 : vector<5x256xf32>
    %c5_210 = arith.constant 5 : index
    %c0_211 = arith.constant 0 : index
    %c0_212 = arith.constant 0 : index
    %384 = vector.load %arg16[%c5_210, %c0_211, %c0_212] : memref<9x5x64xf32, #tpu.memory_space<vmem>>, vector<1x5x64xf32>
    %385 = vector.shape_cast %384 : vector<1x5x64xf32> to vector<5x64xf32>
    %c0_213 = arith.constant 0 : index
    %c18_214 = arith.constant 18 : index
    %386 = vector.load %arg23[%c0_213, %c18_214] : memref<64x290xf32, #tpu.memory_space<vmem>>, vector<64x256xf32>
    %c15_i32_215 = arith.constant 15 : i32
    %387 = vector.broadcast %c15_i32_215 : i32 to vector<1x256xi32>
    %388 = arith.cmpi slt, %16, %387 : vector<1x256xi32>
    %cst_216 = arith.constant 0.000000e+00 : f32
    %389 = vector.shape_cast %388 : vector<1x256xi1> to vector<1x256xi1>
    %390 = vector.broadcast %389 : vector<1x256xi1> to vector<64x256xi1>
    %391 = vector.broadcast %cst_216 : f32 to vector<64x256xf32>
    %392 = arith.select %390, %386, %391 : vector<64x256xi1>, vector<64x256xf32>
    %cst_217 = arith.constant dense<0.000000e+00> : vector<5x256xf32>
    %393 = tpu.matmul %385, %392, %cst_217 {dimension_numbers = #tpu.dot_dimension_numbers<[1], [0], [0], [1], [0, 0, 1, 1], [], []>} : vector<5x64xf32>, vector<64x256xf32>, vector<5x256xf32> -> vector<5x256xf32>
    %394 = arith.addf %383, %393 : vector<5x256xf32>
    %c6_218 = arith.constant 6 : index
    %c0_219 = arith.constant 0 : index
    %c0_220 = arith.constant 0 : index
    %395 = vector.load %arg16[%c6_218, %c0_219, %c0_220] : memref<9x5x64xf32, #tpu.memory_space<vmem>>, vector<1x5x64xf32>
    %396 = vector.shape_cast %395 : vector<1x5x64xf32> to vector<5x64xf32>
    %c0_221 = arith.constant 0 : index
    %c32_222 = arith.constant 32 : index
    %397 = vector.load %arg23[%c0_221, %c32_222] : memref<64x290xf32, #tpu.memory_space<vmem>>, vector<64x256xf32>
    %c1_i32_223 = arith.constant 1 : i32
    %398 = vector.broadcast %c1_i32_223 : i32 to vector<1x256xi32>
    %399 = arith.cmpi sge, %16, %398 : vector<1x256xi32>
    %cst_224 = arith.constant 0.000000e+00 : f32
    %400 = vector.shape_cast %399 : vector<1x256xi1> to vector<1x256xi1>
    %401 = vector.broadcast %400 : vector<1x256xi1> to vector<64x256xi1>
    %402 = vector.broadcast %cst_224 : f32 to vector<64x256xf32>
    %403 = arith.select %401, %397, %402 : vector<64x256xi1>, vector<64x256xf32>
    %cst_225 = arith.constant dense<0.000000e+00> : vector<5x256xf32>
    %404 = tpu.matmul %396, %403, %cst_225 {dimension_numbers = #tpu.dot_dimension_numbers<[1], [0], [0], [1], [0, 0, 1, 1], [], []>} : vector<5x64xf32>, vector<64x256xf32>, vector<5x256xf32> -> vector<5x256xf32>
    %405 = arith.addf %394, %404 : vector<5x256xf32>
    %c7_226 = arith.constant 7 : index
    %c0_227 = arith.constant 0 : index
    %c0_228 = arith.constant 0 : index
    %406 = vector.load %arg16[%c7_226, %c0_227, %c0_228] : memref<9x5x64xf32, #tpu.memory_space<vmem>>, vector<1x5x64xf32>
    %407 = vector.shape_cast %406 : vector<1x5x64xf32> to vector<5x64xf32>
    %c0_229 = arith.constant 0 : index
    %c33_230 = arith.constant 33 : index
    %408 = vector.load %arg23[%c0_229, %c33_230] : memref<64x290xf32, #tpu.memory_space<vmem>>, vector<64x256xf32>
    %cst_231 = arith.constant dense<0.000000e+00> : vector<5x256xf32>
    %409 = tpu.matmul %407, %408, %cst_231 {dimension_numbers = #tpu.dot_dimension_numbers<[1], [0], [0], [1], [0, 0, 1, 1], [], []>} : vector<5x64xf32>, vector<64x256xf32>, vector<5x256xf32> -> vector<5x256xf32>
    %410 = arith.addf %405, %409 : vector<5x256xf32>
    %c8_232 = arith.constant 8 : index
    %c0_233 = arith.constant 0 : index
    %c0_234 = arith.constant 0 : index
    %411 = vector.load %arg16[%c8_232, %c0_233, %c0_234] : memref<9x5x64xf32, #tpu.memory_space<vmem>>, vector<1x5x64xf32>
    %412 = vector.shape_cast %411 : vector<1x5x64xf32> to vector<5x64xf32>
    %c0_235 = arith.constant 0 : index
    %c34_236 = arith.constant 34 : index
    %413 = vector.load %arg23[%c0_235, %c34_236] : memref<64x290xf32, #tpu.memory_space<vmem>>, vector<64x256xf32>
    %c15_i32_237 = arith.constant 15 : i32
    %414 = vector.broadcast %c15_i32_237 : i32 to vector<1x256xi32>
    %415 = arith.cmpi slt, %16, %414 : vector<1x256xi32>
    %cst_238 = arith.constant 0.000000e+00 : f32
    %416 = vector.shape_cast %415 : vector<1x256xi1> to vector<1x256xi1>
    %417 = vector.broadcast %416 : vector<1x256xi1> to vector<64x256xi1>
    %418 = vector.broadcast %cst_238 : f32 to vector<64x256xf32>
    %419 = arith.select %417, %413, %418 : vector<64x256xi1>, vector<64x256xf32>
    %cst_239 = arith.constant dense<0.000000e+00> : vector<5x256xf32>
    %420 = tpu.matmul %412, %419, %cst_239 {dimension_numbers = #tpu.dot_dimension_numbers<[1], [0], [0], [1], [0, 0, 1, 1], [], []>} : vector<5x64xf32>, vector<64x256xf32>, vector<5x256xf32> -> vector<5x256xf32>
    %421 = arith.addf %410, %420 : vector<5x256xf32>
    %c0_240 = arith.constant 0 : index
    %c0_241 = arith.constant 0 : index
    %422 = vector.load %arg17[%c0_240, %c0_241] : memref<5x1xf32, #tpu.memory_space<vmem>>, vector<5x1xf32>
    %423 = vector.broadcast %422 : vector<5x1xf32> to vector<5x256xf32>
    %424 = arith.addf %421, %423 : vector<5x256xf32>
    %c0_242 = arith.constant 0 : index
    %c0_243 = arith.constant 0 : index
    %c0_244 = arith.constant 0 : index
    %425 = vector.load %arg20[%c0_242, %c0_243, %c0_244] : memref<1x5x256xf32, #tpu.memory_space<vmem>>, vector<1x5x256xf32>
    %426 = vector.shape_cast %425 : vector<1x5x256xf32> to vector<5x256xf32>
    %427 = vector.shape_cast %424 : vector<5x256xf32> to vector<1x5x256xf32>
    tpu.vector_store %arg20[%c0_242, %c0_243, %c0_244], %427 {strides = array<i32>} : memref<1x5x256xf32, #tpu.memory_space<vmem>>, vector<1x5x256xf32>,
    return
  }
  func.func @transform_0(%arg0: i32) -> (i32, i32, i32) {
    %c0_i32 = arith.constant 0 : i32
    %c0_i32_0 = arith.constant 0 : i32
    %c0_i32_1 = arith.constant 0 : i32
    return %arg0, %c0_i32, %c0_i32_0 : i32, i32, i32
  }
  func.func @transform_1(%arg0: i32) -> (i32, i32, i32) {
    %c0_i32 = arith.constant 0 : i32
    %c0_i32_0 = arith.constant 0 : i32
    %c0_i32_1 = arith.constant 0 : i32
    %c0_i32_2 = arith.constant 0 : i32
    return %c0_i32, %c0_i32_0, %c0_i32_1 : i32, i32, i32
  }
  func.func @transform_2(%arg0: i32) -> (i32, i32) {
    %c0_i32 = arith.constant 0 : i32
    %c0_i32_0 = arith.constant 0 : i32
    %c0_i32_1 = arith.constant 0 : i32
    return %c0_i32, %c0_i32_0 : i32, i32
  }
  func.func @transform_3(%arg0: i32) -> (i32, i32) {
    %c0_i32 = arith.constant 0 : i32
    %c0_i32_0 = arith.constant 0 : i32
    %c0_i32_1 = arith.constant 0 : i32
    return %c0_i32, %c0_i32_0 : i32, i32
  }
  func.func @transform_4(%arg0: i32) -> (i32, i32) {
    %c0_i32 = arith.constant 0 : i32
    %c0_i32_0 = arith.constant 0 : i32
    %c0_i32_1 = arith.constant 0 : i32
    return %c0_i32, %c0_i32_0 : i32, i32
  }
  func.func @transform_5(%arg0: i32) -> (i32, i32) {
    %c0_i32 = arith.constant 0 : i32
    %c0_i32_0 = arith.constant 0 : i32
    %c0_i32_1 = arith.constant 0 : i32
    return %c0_i32, %c0_i32_0 : i32, i32
  }
  func.func @transform_6(%arg0: i32) -> (i32, i32) {
    %c0_i32 = arith.constant 0 : i32
    %c0_i32_0 = arith.constant 0 : i32
    %c0_i32_1 = arith.constant 0 : i32
    return %c0_i32, %c0_i32_0 : i32, i32
  }
  func.func @transform_7(%arg0: i32) -> (i32, i32) {
    %c0_i32 = arith.constant 0 : i32
    %c0_i32_0 = arith.constant 0 : i32
    %c0_i32_1 = arith.constant 0 : i32
    return %c0_i32, %c0_i32_0 : i32, i32
  }
  func.func @transform_8(%arg0: i32) -> (i32, i32) {
    %c0_i32 = arith.constant 0 : i32
    %c0_i32_0 = arith.constant 0 : i32
    %c0_i32_1 = arith.constant 0 : i32
    return %c0_i32, %c0_i32_0 : i32, i32
  }
  func.func @transform_9(%arg0: i32) -> (i32, i32) {
    %c0_i32 = arith.constant 0 : i32
    %c0_i32_0 = arith.constant 0 : i32
    %c0_i32_1 = arith.constant 0 : i32
    return %c0_i32, %c0_i32_0 : i32, i32
  }
  func.func @transform_10(%arg0: i32) -> (i32, i32) {
    %c0_i32 = arith.constant 0 : i32
    %c0_i32_0 = arith.constant 0 : i32
    %c0_i32_1 = arith.constant 0 : i32
    return %c0_i32, %c0_i32_0 : i32, i32
  }
  func.func @transform_11(%arg0: i32) -> (i32, i32) {
    %c0_i32 = arith.constant 0 : i32
    %c0_i32_0 = arith.constant 0 : i32
    %c0_i32_1 = arith.constant 0 : i32
    return %c0_i32, %c0_i32_0 : i32, i32
  }
  func.func @transform_12(%arg0: i32) -> (i32, i32) {
    %c0_i32 = arith.constant 0 : i32
    %c0_i32_0 = arith.constant 0 : i32
    %c0_i32_1 = arith.constant 0 : i32
    return %c0_i32, %c0_i32_0 : i32, i32
  }
  func.func @transform_13(%arg0: i32) -> (i32, i32) {
    %c0_i32 = arith.constant 0 : i32
    %c0_i32_0 = arith.constant 0 : i32
    %c0_i32_1 = arith.constant 0 : i32
    return %c0_i32, %c0_i32_0 : i32, i32
  }
  func.func @transform_14(%arg0: i32) -> (i32, i32) {
    %c0_i32 = arith.constant 0 : i32
    %c0_i32_0 = arith.constant 0 : i32
    %c0_i32_1 = arith.constant 0 : i32
    return %c0_i32, %c0_i32_0 : i32, i32
  }
  func.func @transform_15(%arg0: i32) -> (i32, i32, i32) {
    %c0_i32 = arith.constant 0 : i32
    %c0_i32_0 = arith.constant 0 : i32
    %c0_i32_1 = arith.constant 0 : i32
    %c0_i32_2 = arith.constant 0 : i32
    return %c0_i32, %c0_i32_0, %c0_i32_1 : i32, i32, i32
  }
  func.func @transform_16(%arg0: i32) -> (i32, i32) {
    %c0_i32 = arith.constant 0 : i32
    %c0_i32_0 = arith.constant 0 : i32
    %c0_i32_1 = arith.constant 0 : i32
    return %c0_i32, %c0_i32_0 : i32, i32
  }
  func.func @transform_17(%arg0: i32) -> (i32, i32) {
    %c0_i32 = arith.constant 0 : i32
    %c0_i32_0 = arith.constant 0 : i32
    %c0_i32_1 = arith.constant 0 : i32
    return %c0_i32, %c0_i32_0 : i32, i32
  }
  func.func @transform_18(%arg0: i32) -> (i32, i32) {
    %c0_i32 = arith.constant 0 : i32
    %c0_i32_0 = arith.constant 0 : i32
    %c0_i32_1 = arith.constant 0 : i32
    return %c0_i32, %c0_i32_0 : i32, i32
  }
  func.func @transform_19(%arg0: i32) -> (i32, i32, i32) {
    %c0_i32 = arith.constant 0 : i32
    %c0_i32_0 = arith.constant 0 : i32
    %c0_i32_1 = arith.constant 0 : i32
    return %arg0, %c0_i32, %c0_i32_0 : i32, i32, i32
  }
  func.func @transform_20(%arg0: i32) -> (i32, i32, i32) {
    %c0_i32 = arith.constant 0 : i32
    %c0_i32_0 = arith.constant 0 : i32
    %c0_i32_1 = arith.constant 0 : i32
    return %arg0, %c0_i32, %c0_i32_0 : i32, i32, i32
  }
}

</mosaic_0001>

<bundles_post_ra>
// kernel: total_model_forward.1
= control target key start
LH: loop header
LB: loop body
LE: loop exit
PB: predicated region body
PF: predicated region fallthrough
CT: control target
= control target key end

     0   :  { %s18021_s0 = inlined_call_operand.vmem [shape: f32[2,9,256], index: 0, kind: input, shape index: {}]   ;;  %s18022_s1 = inlined_call_operand.vmem [shape: f32[9,96,9], index: 1, kind: input, shape index: {}]   ;;  %s18023_s2 = inlined_call_operand.vmem [shape: f32[96,1], index: 2, kind: input, shape index: {}]   ;;  %s18024_s3 = inlined_call_operand.vmem [shape: f32[32,1], index: 3, kind: input, shape index: {}]   ;;  %s18025_s4 = inlined_call_operand.vmem [shape: f32[32,1], index: 4, kind: input, shape index: {}]   ;;  %s18026_s5 = inlined_call_operand.vmem [shape: f32[96,32], index: 5, kind: input, shape index: {}]   ;;  %s18027_s6 = inlined_call_operand.vmem [shape: f32[96,1], index: 6, kind: input, shape index: {}]   ;;  %s18028_s7 = inlined_call_operand.vmem [shape: f32[32,32], index: 7, kind: input, shape index: {}]   ;;  %s18029_s8 = inlined_call_operand.vmem [shape: f32[32,1], index: 8, kind: input, shape index: {}]   ;;  %s18030_s9 = inlined_call_operand.vmem [shape: f32[32,1], index: 9, kind: input, shape index: {}]   ;;  %s18031_s10 = inlined_call_operand.vmem [shape: f32[32,1], index: 10, kind: input, shape index: {}]   ;;  %s18032_s11 = inlined_call_operand.vmem [shape: f32[64,32], index: 11, kind: input, shape index: {}]   ;;  %s18033_s12 = inlined_call_operand.vmem [shape: f32[64,1], index: 12, kind: input, shape index: {}]   ;;  %s18034_s13 = inlined_call_operand.vmem [shape: f32[32,64], index: 13, kind: input, shape index: {}]   ;;  %s18035_s14 = inlined_call_operand.vmem [shape: f32[32,1], index: 14, kind: input, shape index: {}]   ;;  %s18036_s15 = inlined_call_operand.vmem [shape: f32[9,5,64], index: 15, kind: input, shape index: {}]   ;;  %s18037_s16 = inlined_call_operand.vmem [shape: f32[5,1], index: 16, kind: input, shape index: {}]   ;;  %s18038_s17 = inlined_call_operand.vmem [shape: f32[8,32], index: 17, kind: input, shape index: {}]   ;;  %s18039_s18 = inlined_call_operand.vmem [shape: f32[8,1], index: 18, kind: input, shape index: {}]   ;;  %s18040_s19 = inlined_call_operand.vmem [shape: f32[2,5,256], index: 19, kind: output, shape index: {0}]   ;;  %s18041_s20 = inlined_call_operand.vmem [shape: f32[2,8,1], index: 20, kind: output, shape index: {1}]  }
   0x1   :  { %18387 = sst [smem:[#allocation141_spill]] %s18021_s0 }
   0x2   :  { %18388 = sst [smem:[#allocation142_spill]] %s18022_s1  ;;  %s12786_s1 = smov 0  }
   0x3   :  { %18389 = sst [smem:[#allocation143_spill]] %s18023_s2 }
   0x4   :  { %18390 = sst [smem:[#allocation144_spill]] %s18024_s3 }
   0x5   :  { %18391 = sst [smem:[#allocation145_spill]] %s18025_s4 }
   0x6 LB: > { %s10161_s22 = sadd.s32 4294967295, %s12665_s1   ;;  %p10165_p0 = scmp.ge.s32.totalorder %s12665_s1, 1  ;;  %s12665_s1 = sphi %s12786_s1, %s31_s1  }
   0x7   : > { %p565_p1 = scmp.lt.s32.totalorder %s12665_s1, 3 }
   0x9   : > { %p566_p2 = pnand %p10165_p0, %p565_p1 }
   0xb   : > { %569 = sbr.rel (%p566_p2) target bundleno = 5701 (0x1645), region = 96 }
  0x12   : > { %p12794_p3 = scmp.lt.s32.totalorder %s10161_s22, 1  ;;  %vm675_vm0 = vcmask 270336   ;;  %v12667_v0 = vmov 0.0   ;;  %vm671_vm1 = vcmask 277504   ;;  %s18393_s3 = sld [smem:[#allocation141_spill]]  ;;  %v642_v5 = vlaneseq }
  0x13   : > { %673 = vst [vmem:[#allocation2 + $0x18] sm:$0x1] %v12667_v0  ;;  %669 = vst [vmem:[#allocation2] sm:$0xff] %v12667_v0  ;;  %883 = vmatprep.mubr.f32.mxu0 %v12667_v0  ;;  %3587 = vmatprep.mubr.f32.mxu1 %v12667_v0  ;;  %s18310_s27 = smov 17   ;;  %vm706_vm2 = vcmask 1040520   ;;  %vm702_vm3 = vcmask 1047688  }
  0x14   : > { %674 = vst [vmem:[#allocation2 + $0x20] sm:$0x1] %v12667_v0  ;;  %8421 = vst [vmem:[#allocation3] sm:$0xff] %v12667_v0  ;;  %s19217_s22 = smov (!%p12794_p3, %s10161_s22), 1  ;;  %v12833_v8 = vand.u32 127, %v642_v5  ;;  %vm693_vm4 = vcmask 138240  }
  0x15   : > { %8424 = vst [vmem:[#allocation3 + $0x18] sm:$0xff] %v12667_v0  ;;  %8427 = vst [vmem:[#allocation3 + $0x30] sm:$0xff] %v12667_v0  ;;  %s10688_s24 = sshll.u32 %s19217_s22, 5  ;;  %vm709_vm5 = vcmask 131072   ;;  %v18394_v16 = vmov 0  ;;  %v18397_v25 = vmov 0 }
  0x16   : > { %8430 = vst [vmem:[#allocation3 + $0x48] sm:$0xff] %v12667_v0  ;;  %8433 = vst [vmem:[#allocation3 + $0x60] sm:$0xff] %v12667_v0  ;;  %v649_v11 = vand.u32 15, %v12833_v8  ;;  %v12841_v14 = vadd.s32 128, %v12833_v8  ;;  %s18062_s28 = smov 127   ;;  %s18060_s4 = smov 126  }
  0x17   : > { %8436 = vst [vmem:[#allocation3 + $0x78] sm:$0xff] %v12667_v0  ;;  %8439 = vst [vmem:[#allocation3 + $0x90] sm:$0xff] %v12667_v0  ;;  %s18058_s29 = smov 112   ;;  %s18056_s30 = smov 111   ;;  %vm770_vm8 = vcmask 1039360   ;;  %vm814_vm9 = vcmask 1040384  }
  0x18   : > { %8442 = vst [vmem:[#allocation3 + $0xa8] sm:$0xff] %v12667_v0  ;;  %676 = vst.msk [vmem:[#allocation2 + $0x28] sm:$0x1] %vm675_vm0, %v12667_v0  ;;  %s631_s26 = scalar_lea.vmem %s18393_s3, %s10688_s24  ;;  %vm12845_vm6 = vcmp.ge.s32.totalorder %v649_v11, 1  ;;  %v656_v18 = vand.u32 15, %v12841_v14  ;;  %s18054_s0 = smov 110  }
  0x19   : > { %672 = vst.msk [vmem:[#allocation2 + $0x10] sm:$0xff] %vm671_vm1, %v12667_v0  ;;  %8423 = vst.msk [vmem:[#allocation3 + $0x10] sm:$0xff] %vm671_vm1, %v12667_v0  ;;  %v679_v1 = vld [vmem:[%s631_s26 + $0x10] sm:$0x1]  ;;  %v677_v2 = vld [vmem:[%s631_s26] sm:$0xff]  ;;  %v18395_v16 = vsel %vm12845_vm6, 4294967295, %v18394_v16 }
  0x1a   : > { %8426 = vst.msk [vmem:[#allocation3 + $0x28] sm:$0xff] %vm671_vm1, %v12667_v0  ;;  %8429 = vst.msk [vmem:[#allocation3 + $0x40] sm:$0xff] %vm671_vm1, %v12667_v0  ;;  %689 = vrot.lane.b32.xlu1 %v679_v1, %s18310_s27  ;;  %685 = vrot.lane.b32.xlu0 %v677_v2, %s18310_s27  ;;  %v680_v3 = vld [vmem:[%s631_s26 + $0x18] sm:$0x1]  ;;  %v678_v4 = vld [vmem:[%s631_s26 + $0x8] sm:$0xff]  ;;  %vm12856_vm7 = vcmp.ge.s32.totalorder %v656_v18, 1 }
  0x1b   : > { %8432 = vst.msk [vmem:[#allocation3 + $0x58] sm:$0xff] %vm671_vm1, %v12667_v0  ;;  %8435 = vst.msk [vmem:[#allocation3 + $0x70] sm:$0xff] %vm671_vm1, %v12667_v0  ;;  %v18398_v25 = vsel %vm12856_vm7, 4294967295, %v18397_v25  ;;  %s18050_s21 = smov 96   ;;  %s18048_s23 = smov 95   ;;  %vm12677_vm10 = vmmov 1  }
  0x1c   : > { %8438 = vst.msk [vmem:[#allocation3 + $0x88] sm:$0xff] %vm671_vm1, %v12667_v0  ;;  %8441 = vst.msk [vmem:[#allocation3 + $0xa0] sm:$0xff] %vm671_vm1, %v12667_v0  ;;  %s18046_s24 = smov 94   ;;  %vm1166_vm12 = vcmask 1031168   ;;  %vm12917_vm14 = vcmp.lt.s32.totalorder %v656_v18, 15  ;;  %v18404_v53 = vmov 0 }
  0x1d   : > { %8444 = vst.msk [vmem:[#allocation3 + $0xb8] sm:$0xff] %vm671_vm1, %v12667_v0  ;;  %18396 = vst [vmem:[#allocation5_spill] sm:$0xff] %v18395_v16  ;;  %v18405_v53 = vsel %vm12917_vm14, 4294967295, %v18404_v53  ;;  %s18407_s3 = sld [smem:[#allocation142_spill]]  ;;  %vm777_vm15 = vcmask 72704   ;;  %s19000_s26 = smov 126  }
  0x1e   : > { %691 = vrot.lane.b32.xlu1 %v680_v3, %s18310_s27  ;;  %687 = vrot.lane.b32.xlu0 %v678_v4, %s18310_s27  ;;  %18399 = vst [vmem:[#allocation6_spill] sm:$0xff] %v18398_v25  ;;  %vm12891_vm11 = vmpackc.low %vm814_vm9, %vm12677_vm10  ;;  %s19003_s2 = smov 112   ;;  %s19007_s27 = smov 110  }
  0x1f   : > { %vm12911_vm13 = vmpackc.low %vm814_vm9, %vm12856_vm7  ;;  %18406 = vst [vmem:[#allocation7_spill] sm:$0xff] %v18405_v53  ;;  %s19009_s25 = smov 95  }
  0x20   : > { %vm12935_vm0 = vmpackc.low %vm814_vm9, %vm12845_vm6 }
  0x21   : > { %vm12944_vm1 = vmpackc.low %vm814_vm9, %vm12917_vm14 }
  0x23   : > { %v10171_v56 = vld [vmem:[%s18407_s3 + $0x60] sm:$0xff]  ;;  %v10172_v62 = vld [vmem:[%s18407_s3 + $0x68] sm:$0xff]  ;;  %v10173_v63 = vld [vmem:[%s18407_s3 + $0x70] sm:$0xff] }
  0x24   : > { %v10174_v1 = vld [vmem:[%s18407_s3 + $0x78] sm:$0xff]  ;;  %v10175_v2 = vld [vmem:[%s18407_s3 + $0x80] sm:$0xff]  ;;  %v10176_v3 = vld [vmem:[%s18407_s3 + $0x88] sm:$0xff] }
  0x25   : > { %v10177_v4 = vld [vmem:[%s18407_s3 + $0x90] sm:$0xff]  ;;  %v10178_v5 = vld [vmem:[%s18407_s3 + $0x98] sm:$0xff]  ;;  %v10273_v52 = vld [vmem:[%s18407_s3 + $0x1a0] sm:$0xff] }
  0x26   : > { %v10298_v58 = vld [vmem:[%s18407_s3 + $0x1f8] sm:$0xff] }
  0x27   : > { %v10326_v40 = vld [vmem:[%s18407_s3 + $0x258] sm:$0xff] }
  0x8c   : > { %v690_v6 = vpop.permute.xlu1 %689  ;;  %v686_v7 = vpop.permute.xlu0 %685 }
  0x8d   : > { %707 = vst.msk [vmem:[#allocation2 + $0x18] sm:$0x1] %vm706_vm2, %v690_v6  ;;  %vm18052_vm2 = vcmask 916480  }
  0x8e   : > { %703 = vst.msk [vmem:[#allocation2] sm:$0xff] %vm702_vm3, %v686_v7 }
  0x90   : > { %v692_v9 = vpop.permute.xlu1 %691  ;;  %v688_v10 = vpop.permute.xlu0 %687 }
  0x91   : > { %v695_v12 = vsel %vm693_vm4, %v690_v6, %v692_v9  ;;  %710 = vst.msk [vmem:[#allocation2 + $0x28] sm:$0x1] %vm709_vm5, %v692_v9  ;;  %v694_v13 = vsel %vm693_vm4, %v686_v7, %v688_v10  ;;  %v10179_v6 = vld [vmem:[%s18407_s3 + $0xa0] sm:$0xff]  ;;  %v10180_v9 = vld [vmem:[%s18407_s3 + $0xa8] sm:$0xff]  ;;  %vm13012_vm5 = vcmp.lt.s32.totalorder %v649_v11, 15 }
  0x92   : > { %705 = vst.msk [vmem:[#allocation2 + $0x10] sm:$0xff] %vm693_vm4, %v688_v10  ;;  %708 = vst [vmem:[#allocation2 + $0x20] sm:$0x1] %v695_v12 }
  0x93   : > { %vm13040_vm10 = vmpackc.low %vm814_vm9, %vm13012_vm5  ;;  %vm18053_vm9 = vcmask 908288  }
  0x94   : > { %v725_v15 = vld [vmem:[#allocation2 + $0x18] sm:$0x1] }
  0x95   : > { %v723_v17 = vld [vmem:[#allocation2] sm:$0xff]  ;;  %v735_v19 = vsel %vm12845_vm6, %v725_v15, 0.0 }
  0x96   : > { %v12852_v22 = vpack.c.bf16 %v735_v19, %v723_v17  ;;  %v11254_v28 = vpack.i.bf16 %v725_v15, %v723_v17  ;;  %v11269_v30 = vpack.i.bf16 %v723_v17, %v725_v15  ;;  %v18412_v19 = vmov 0 }
  0x97   : > { %v18413_v19 = vsel %vm13012_vm5, 4294967295, %v18412_v19 }
  0x98   : > { %v751_v20 = vld [vmem:[#allocation2 + $0x28] sm:$0x1]  ;;  %18414 = vst [vmem:[#allocation8_spill] sm:$0xff] %v18413_v19 }
  0x99   : > { %v750_v21 = vld [vmem:[#allocation2 + $0x10] sm:$0xff]  ;;  %v726_v23 = vld [vmem:[#allocation2 + $0x20] sm:$0x1] }
  0x9a   : > { %v11244_v24 = vpack.i.bf16 %v750_v21, %v694_v13  ;;  %v11249_v26 = vpack.i.bf16 %v751_v20, %v726_v23  ;;  %v736_v27 = vsel %vm12856_vm7, %v726_v23, 0.0  ;;  %v10182_v23 = vld [vmem:[%s18407_s3 + $0xb8] sm:$0xff] }
  0x9b   : > { %v12864_v29 = vpack.c.bf16 %v736_v27, %v694_v13  ;;  %v10181_v13 = vld [vmem:[%s18407_s3 + $0xb0] sm:$0xff]  ;;  %v711_v27 = vld [vmem:[%s18407_s3] sm:$0xff] }
  0x9c   : > { %11245 = vrot.lane.b32.xlu0 %v11244_v24, %s18062_s28  ;;  %11250 = vrot.lane.b32.xlu1 %v11249_v26, %s18062_s28 }
  0xa0   : > { %11255 = vrot.lane.b32.xlu0 %v11254_v28, %s18062_s28  ;;  %11260 = vrot.lane.b32.xlu1 %v11249_v26, %s18060_s4  ;;  %s18419_s28 = sld [smem:[#allocation145_spill]] }
  0xa4   : > { %11265 = vrot.lane.b32.xlu0 %v11244_v24, %s18060_s4  ;;  %11270 = vrot.lane.b32.xlu1 %v11269_v30, %s18060_s4  ;;  %s18418_s4 = sld [smem:[#allocation144_spill]] }
  0xa8   : > { %11275 = vrot.lane.b32.xlu0 %v11249_v26, %s18058_s29  ;;  %11280 = vrot.lane.b32.xlu1 %v11244_v24, %s18058_s29 }
  0xac   : > { %11285 = vrot.lane.b32.xlu0 %v11269_v30, %s18058_s29  ;;  %11290 = vrot.lane.b32.xlu1 %v11244_v24, %s18056_s30  ;;  %s18981_s29 = smov 17  }
  0xb0   : > { %11295 = vrot.lane.b32.xlu0 %v11249_v26, %s18056_s30  ;;  %11300 = vrot.lane.b32.xlu1 %v11254_v28, %s18056_s30  ;;  %s18997_s30 = smov 127  }
  0xb4   : > { %11305 = vrot.lane.b32.xlu0 %v11249_v26, %s18054_s0  ;;  %11310 = vrot.lane.b32.xlu1 %v11244_v24, %s18054_s0 }
  0xb8   : > { %11315 = vrot.lane.b32.xlu0 %v11269_v30, %s18054_s0  ;;  %11320 = vrot.lane.b32.xlu1 %v11249_v26, %s18050_s21  ;;  %s18417_s0 = sld [smem:[#allocation143_spill]] }
  0xbc   : > { %11325 = vrot.lane.b32.xlu0 %v11244_v24, %s18050_s21  ;;  %11330 = vrot.lane.b32.xlu1 %v11269_v30, %s18050_s21 }
  0xbe   : > { %v2813_v61 = vld [vmem:[%s18417_s0 + $0x8] sm:$0xff] }
  0xc0   : > { %11335 = vrot.lane.b32.xlu0 %v11244_v24, %s18048_s23  ;;  %11340 = vrot.lane.b32.xlu1 %v11249_v26, %s18048_s23 }
  0xc4   : > { %11345 = vrot.lane.b32.xlu0 %v11254_v28, %s18048_s23  ;;  %11350 = vrot.lane.b32.xlu1 %v11249_v26, %s18046_s24 }
  0xc8   : > { %11355 = vrot.lane.b32.xlu0 %v11244_v24, %s18046_s24  ;;  %11360 = vrot.lane.b32.xlu1 %v11269_v30, %s18046_s24  ;;  %s19004_s24 = smov 111  }
 0x10e   : > { %v11246_v31 = vpop.permute.xlu0 %11245  ;;  %v11251_v32 = vpop.permute.xlu1 %11250 }
 0x10f   : > { %v11248_v33 = vunpack.i.h.bf16 %v11246_v31  ;;  %v11247_v34 = vunpack.i.l.bf16 %v11246_v31  ;;  %v11253_v35 = vunpack.i.h.bf16 %v11251_v32  ;;  %v11252_v36 = vunpack.i.l.bf16 %v11251_v32  ;;  %v712_v32 = vld [vmem:[%s18407_s3 + $0x8] sm:$0xff] }
 0x111   : > { %v772_v37 = vsel %vm770_vm8, %v11247_v34, %v11248_v33  ;;  %v774_v39 = vsel %vm770_vm8, %v11252_v36, %v11253_v35  ;;  %v713_v33 = vld [vmem:[%s18407_s3 + $0x10] sm:$0xff]  ;;  %v715_v35 = vld [vmem:[%s18407_s3 + $0x20] sm:$0xff] }
 0x112   : > { %v11256_v38 = vpop.permute.xlu0 %11255  ;;  %v12895_v41 = vpop.permute.xlu1 %11260  ;;  %v10706_v44 = vpack.c.bf16 %v774_v39, %v772_v37  ;;  %v717_v37 = vld [vmem:[%s18407_s3 + $0x30] sm:$0xff]  ;;  %v719_v39 = vld [vmem:[%s18407_s3 + $0x40] sm:$0xff] }
 0x113   : > { %v11258_v42 = vunpack.i.h.bf16 %v11256_v38  ;;  %v11257_v43 = vunpack.i.l.bf16 %v11256_v38  ;;  %v11263_v45 = vunpack.i.h.bf16 %v12895_v41  ;;  %v11262_v46 = vunpack.i.l.bf16 %v12895_v41  ;;  %v718_v38 = vld [vmem:[%s18407_s3 + $0x38] sm:$0xff] }
 0x114   : > { %10708 = vmatprep.subr.msk.bf16.mxu0 %vm12891_vm11, %v10706_v44  ;;  %v721_v44 = vld [vmem:[%s18407_s3 + $0x50] sm:$0xff] }
 0x115   : > { %v771_v47 = vsel %vm770_vm8, %v11257_v43, %v11247_v34  ;;  %v773_v48 = vsel %vm770_vm8, %v11258_v42, %v11252_v36  ;;  %v1170_v49 = vsel %vm1166_vm12, %v11262_v46, %v11263_v45  ;;  %v714_v34 = vld [vmem:[%s18407_s3 + $0x18] sm:$0xff]  ;;  %v716_v36 = vld [vmem:[%s18407_s3 + $0x28] sm:$0xff] }
 0x116   : > { %v12906_v50 = vpop.permute.xlu0 %11265  ;;  %v10709_v51 = vpack.c.bf16 %v773_v48, %v771_v47  ;;  %v1178_v59 = vsel %vm12917_vm14, %v1170_v49, 0.0  ;;  %v11271_v7 = vpop.permute.xlu1 %11270  ;;  %v720_v42 = vld [vmem:[%s18407_s3 + $0x48] sm:$0xff] }
 0x117   : > { %v11268_v54 = vunpack.i.h.bf16 %v12906_v50  ;;  %v11267_v55 = vunpack.i.l.bf16 %v12906_v50  ;;  %v11272_v12 = vunpack.i.l.bf16 %v11271_v7  ;;  %v11273_v18 = vunpack.i.h.bf16 %v11271_v7  ;;  %v10219_v7 = vld [vmem:[%s18407_s3 + $0xf0] sm:$0xff] }
 0x118   : > { %10711 = vmatpush1.bf16.msk.msra.mxu0 %vm12891_vm11, %v10709_v51  ;;  %v722_v51 = vld [vmem:[%s18407_s3 + $0x58] sm:$0xff] }
 0x119   : > { %v1168_v57 = vsel %vm1166_vm12, %v11267_v55, %v11268_v54  ;;  %10714 = vmatprep.subr.msk.bf16.mxu0 %vm12911_vm13, %v12864_v29  ;;  %v1169_v20 = vsel %vm1166_vm12, %v11272_v12, %v11262_v46  ;;  %v1167_v24 = vsel %vm1166_vm12, %v11273_v18, %v11267_v55  ;;  %v10353_v29 = vld [vmem:[%s18407_s3 + $0x2b0] sm:$0xff] }
 0x11a   : > { %v10718_v60 = vpack.c.bf16 %v1178_v59, %v1168_v57  ;;  %v12998_v10 = vpop.permute.xlu0 %11275  ;;  %v13005_v14 = vpop.permute.xlu1 %11280  ;;  %v1177_v11 = vsel %vm13012_vm5, %v1169_v20, 0.0 }
 0x11b   : > { %10185 = vmatmul.mubr.msk.f32.vlgmr.msra.gmra.mrb[0].mxu0 %vm777_vm15, %v10171_v56  ;;  %v11278_v15 = vunpack.i.h.bf16 %v12998_v10  ;;  %v11277_v17 = vunpack.i.l.bf16 %v12998_v10  ;;  %v11283_v21 = vunpack.i.h.bf16 %v13005_v14  ;;  %v10721_v30 = vpack.c.bf16 %v1177_v11, %v1167_v24  ;;  %v10221_v10 = vld [vmem:[%s18407_s3 + $0x100] sm:$0xff]  ;;  %v10224_v11 = vld [vmem:[%s18407_s3 + $0x118] sm:$0xff] }
 0x11c   : > { %10717 = vmatpush1.bf16.msk.msra.mxu0 %vm12935_vm0, %v12852_v22  ;;  %889 = vmatprep.mubr.f32.mxu0 %v12667_v0  ;;  %v11282_v22 = vunpack.i.l.bf16 %v13005_v14 }
 0x11d   : > { %10720 = vmatprep.subr.msk.bf16.mxu0 %vm12944_vm1, %v10718_v60  ;;  %v1411_v8 = vsel %vm18052_vm2, %v11277_v17, %v11278_v15  ;;  %v10213_v60 = vld [vmem:[%s18407_s3 + $0xc0] sm:$0xff]  ;;  %v10223_v15 = vld [vmem:[%s18407_s3 + $0x110] sm:$0xff] }
 0x11e   : > { %v1409_v26 = vsel %vm18052_vm2, %v11282_v22, %v11283_v21  ;;  %v1419_v28 = vsel %vm12856_vm7, %v1411_v8, 0.0  ;;  %v11286_v41 = vpop.permute.xlu0 %11285  ;;  %v13100_v46 = vpop.permute.xlu1 %11290 }
 0x11f   : > { %10186 = vmatmul.mubr.msk.f32.gmra.mrb[2].mxu0 %vm777_vm15, %v10172_v62  ;;  %v10724_v31 = vpack.c.bf16 %v1419_v28, %v1409_v26  ;;  %v11287_v43 = vunpack.i.l.bf16 %v11286_v41  ;;  %v11288_v47 = vunpack.i.h.bf16 %v11286_v41  ;;  %v11293_v54 = vunpack.i.h.bf16 %v13100_v46  ;;  %v10248_v41 = vld [vmem:[%s18407_s3 + $0x158] sm:$0xff] }
 0x120   : > { %895 = vmatprep.mubr.f32.mxu0 %v12667_v0  ;;  %v11292_v55 = vunpack.i.l.bf16 %v13100_v46 }
 0x121   : > { %v1410_v48 = vsel %vm18052_vm2, %v11287_v43, %v11277_v17  ;;  %v1408_v56 = vsel %vm18052_vm2, %v11288_v47, %v11282_v22  ;;  %vm1881_vm2 = vcmask 900096   ;;  %v10251_v47 = vld [vmem:[%s18407_s3 + $0x170] sm:$0xff] }
 0x122   : > { %v13098_v45 = vpop.permute.xlu0 %11295  ;;  %v1418_v57 = vsel %vm12845_vm6, %v1410_v48, 0.0  ;;  %v1650_v62 = vsel %vm18053_vm9, %v11292_v55, %v11293_v54  ;;  %v11301_v12 = vpop.permute.xlu1 %11300 }
 0x123   : > { %10187 = vmatmul.mubr.msk.f32.gmra.mrb[4].mxu0 %vm777_vm15, %v10173_v63  ;;  %v11298_v49 = vunpack.i.h.bf16 %v13098_v45  ;;  %v11297_v50 = vunpack.i.l.bf16 %v13098_v45  ;;  %v10727_v63 = vpack.c.bf16 %v1418_v57, %v1408_v56  ;;  %v11303_v21 = vunpack.i.h.bf16 %v11301_v12  ;;  %v10252_v57 = vld [vmem:[%s18407_s3 + $0x178] sm:$0xff] }
 0x124   : > { %901 = vmatprep.mubr.f32.mxu0 %v12667_v0  ;;  %v11302_v22 = vunpack.i.l.bf16 %v11301_v12  ;;  %v10276_v12 = vld [vmem:[%s18407_s3 + $0x1b8] sm:$0xff] }
 0x125   : > { %v1652_v59 = vsel %vm18053_vm9, %v11297_v50, %v11298_v49 }
 0x126   : > { %v13173_v14 = vpop.permute.xlu0 %11305  ;;  %v13180_v17 = vpop.permute.xlu1 %11310  ;;  %v1649_v26 = vsel %vm18053_vm9, %v11302_v22, %v11292_v55 }
 0x127   : > { %10188 = vmatmul.mubr.msk.f32.gmra.mrb[6].mxu0 %vm777_vm15, %v10174_v1  ;;  %v10730_v1 = vpack.c.bf16 %v1652_v59, %v1650_v62  ;;  %v11308_v18 = vunpack.i.h.bf16 %v13173_v14  ;;  %v11307_v20 = vunpack.i.l.bf16 %v13173_v14  ;;  %v11312_v8 = vunpack.i.l.bf16 %v13180_v17 }
 0x128   : > { %907 = vmatprep.mubr.f32.mxu0 %v12667_v0 }
 0x129   : > { %v1885_v24 = vsel %vm1881_vm2, %v11307_v20, %v11308_v18  ;;  %v10279_v18 = vld [vmem:[%s18407_s3 + $0x1d0] sm:$0xff] }
 0x12a   : > { %v11316_v43 = vpop.permute.xlu0 %11315  ;;  %v13254_v45 = vpop.permute.xlu1 %11320 }
 0x12b   : > { %10189 = vmatmul.mubr.msk.f32.gmra.mrb[8].mxu0 %vm777_vm15, %v10175_v2  ;;  %v10214_v2 = vld [vmem:[%s18407_s3 + $0xc8] sm:$0xff]  ;;  %v11317_v46 = vunpack.i.l.bf16 %v11316_v43  ;;  %v11323_v49 = vunpack.i.h.bf16 %v13254_v45 }
 0x12c   : > { %913 = vmatprep.mubr.f32.mxu0 %v12667_v0 }
 0x12d   : > { %v1884_v54 = vsel %vm1881_vm2, %v11317_v46, %v11307_v20 }
 0x12e   : > { %v13260_v48 = vpop.permute.xlu0 %11325  ;;  %v1892_v62 = vsel %vm13012_vm5, %v1884_v54, 0.0  ;;  %v11331_v14 = vpop.permute.xlu1 %11330 }
 0x12f   : > { %10190 = vmatmul.mubr.msk.f32.gmra.mrb[10].mxu0 %vm777_vm15, %v10176_v3  ;;  %v10215_v3 = vld [vmem:[%s18407_s3 + $0xd0] sm:$0xff]  ;;  %v11328_v55 = vunpack.i.h.bf16 %v13260_v48  ;;  %v11327_v56 = vunpack.i.l.bf16 %v13260_v48  ;;  %v11333_v22 = vunpack.i.h.bf16 %v11331_v14 }
 0x130   : > { %919 = vmatprep.mubr.f32.mxu0 %v12667_v0 }
 0x132   : > { %v13338_v20 = vpop.permute.xlu1 %11340 }
 0x133   : > { %10191 = vmatmul.mubr.msk.f32.gmra.mrb[12].mxu0 %vm777_vm15, %v10177_v4  ;;  %v10216_v4 = vld [vmem:[%s18407_s3 + $0xd8] sm:$0xff] }
 0x134   : > { %925 = vmatprep.mubr.f32.mxu0 %v12667_v0 }
 0x136   : > { %v13412_v46 = vpop.permute.xlu1 %11350 }
 0x137   : > { %10192 = vmatmul.mubr.msk.f32.gmra.mrb[14].mxu0 %vm777_vm15, %v10178_v5  ;;  %v10217_v5 = vld [vmem:[%s18407_s3 + $0xe0] sm:$0xff] }
 0x138   : > { %931 = vmatprep.mubr.f32.mxu0 %v12667_v0 }
 0x13b   : > { %10193 = vmatmul.mubr.msk.f32.gmra.mrb[16].mxu0 %vm777_vm15, %v10179_v6  ;;  %v10218_v6 = vld [vmem:[%s18407_s3 + $0xe8] sm:$0xff] }
 0x13c   : > { %937 = vmatprep.mubr.f32.mxu0 %v12667_v0 }
 0x13f   : > { %10194 = vmatmul.mubr.msk.f32.gmra.mrb[18].mxu0 %vm777_vm15, %v10180_v9  ;;  %v10220_v9 = vld [vmem:[%s18407_s3 + $0xf8] sm:$0xff] }
 0x140   : > { %943 = vmatprep.mubr.f32.mxu0 %v12667_v0 }
 0x143   : > { %10195 = vmatmul.mubr.msk.f32.gmra.mrb[20].mxu0 %vm777_vm15, %v10181_v13  ;;  %v10222_v13 = vld [vmem:[%s18407_s3 + $0x108] sm:$0xff] }
 0x144   : > { %949 = vmatprep.mubr.f32.mxu0 %v12667_v0 }
 0x147   : > { %10196 = vmatmul.mubr.msk.f32.gmra.mrb[22].mxu0 %vm777_vm15, %v10182_v23  ;;  %v11313_v23 = vunpack.i.h.bf16 %v13180_v17  ;;  %v11332_v17 = vunpack.i.l.bf16 %v11331_v14  ;;  %v2814_v14 = vld [vmem:[%s18417_s0 + $0x10] sm:$0xff] }
 0x148   : > { %1062 = vmatprep.mubr.f32.mxu0 %v12667_v0 }
 0x149   : > { %v1883_v28 = vsel %vm1881_vm2, %v11312_v8, %v11313_v23 }
 0x14b   : > { %10201 = vmatmul.mubr.msk.f32.vlgmr.msra.gmra.mrb[0].mxu0 %vm777_vm15, %v711_v27  ;;  %v1651_v27 = vsel %vm18053_vm9, %v11303_v21, %v11297_v50  ;;  %v11322_v50 = vunpack.i.l.bf16 %v13254_v45  ;;  %vm2122_vm9 = vcmask 785408   ;;  %v13340_v21 = vpop.permute.xlu0 %11335  ;;  %v10304_v45 = vld [vmem:[%s18407_s3 + $0x228] sm:$0xff] }
 0x14c   : > { %10723 = vmatpush1.bf16.msk.msra.mxu0 %vm13040_vm10, %v10721_v30  ;;  %1068 = vmatprep.mubr.f32.mxu0 %v12667_v0  ;;  %v10241_v30 = vld [vmem:[%s18407_s3 + $0x120] sm:$0xff] }
 0x14d   : > { %10726 = vmatprep.subr.msk.bf16.mxu0 %vm12911_vm13, %v10724_v31  ;;  %v1893_v31 = vsel %vm12917_vm14, %v1885_v24, 0.0  ;;  %v2126_v59 = vsel %vm2122_vm9, %v11322_v50, %v11323_v49  ;;  %v2125_v23 = vsel %vm2122_vm9, %v11332_v17, %v11322_v50  ;;  %v11338_v24 = vunpack.i.h.bf16 %v13340_v21  ;;  %v13494_v17 = vld [vmem:[#allocation3] sm:$0xff] }
 0x14e   : > { %v11353_v49 = vunpack.i.h.bf16 %v13412_v46  ;;  %v11352_v50 = vunpack.i.l.bf16 %v13412_v46  ;;  %v10352_v46 = vld [vmem:[%s18407_s3 + $0x2a8] sm:$0xff] }
 0x14f   : > { %10202 = vmatmul.mubr.msk.f32.gmra.mrb[2].mxu0 %vm777_vm15, %v712_v32  ;;  %v10733_v32 = vpack.c.bf16 %v1651_v27, %v1649_v26  ;;  %v11337_v26 = vunpack.i.l.bf16 %v13340_v21  ;;  %v10280_v27 = vld [vmem:[%s18407_s3 + $0x1d8] sm:$0xff] }
 0x150   : > { %1074 = vmatprep.mubr.f32.mxu0 %v12667_v0  ;;  %v10330_v21 = vld [vmem:[%s18407_s3 + $0x278] sm:$0xff] }
 0x153   : > { %10203 = vmatmul.mubr.msk.f32.gmra.mrb[4].mxu0 %vm777_vm15, %v713_v33  ;;  %v10736_v33 = vpack.c.bf16 %v1893_v31, %v1883_v28  ;;  %v2133_v28 = vsel %vm12845_vm6, %v2125_v23, 0.0  ;;  %v2819_v23 = vld [vmem:[%s18417_s0 + $0x38] sm:$0xff] }
 0x154   : > { %1080 = vmatprep.mubr.f32.mxu0 %v12667_v0 }
 0x157   : > { %10204 = vmatmul.mubr.msk.f32.gmra.mrb[6].mxu0 %vm777_vm15, %v714_v34  ;;  %v10242_v34 = vld [vmem:[%s18407_s3 + $0x128] sm:$0xff] }
 0x158   : > { %1086 = vmatprep.mubr.f32.mxu0 %v12667_v0 }
 0x15b   : > { %10205 = vmatmul.mubr.msk.f32.gmra.mrb[8].mxu0 %vm777_vm15, %v715_v35  ;;  %v10243_v35 = vld [vmem:[%s18407_s3 + $0x130] sm:$0xff] }
 0x15c   : > { %1092 = vmatprep.mubr.f32.mxu0 %v12667_v0 }
 0x15f   : > { %10206 = vmatmul.mubr.msk.f32.gmra.mrb[10].mxu0 %vm777_vm15, %v716_v36  ;;  %v10244_v36 = vld [vmem:[%s18407_s3 + $0x138] sm:$0xff] }
 0x160   : > { %1098 = vmatprep.mubr.f32.mxu0 %v12667_v0 }
 0x163   : > { %10207 = vmatmul.mubr.msk.f32.gmra.mrb[12].mxu0 %vm777_vm15, %v717_v37  ;;  %v10245_v37 = vld [vmem:[%s18407_s3 + $0x140] sm:$0xff] }
 0x164   : > { %1104 = vmatprep.mubr.f32.mxu0 %v12667_v0 }
 0x167   : > { %10208 = vmatmul.mubr.msk.f32.gmra.mrb[14].mxu0 %vm777_vm15, %v718_v38  ;;  %v10246_v38 = vld [vmem:[%s18407_s3 + $0x148] sm:$0xff] }
 0x168   : > { %1110 = vmatprep.mubr.f32.mxu0 %v12667_v0 }
 0x16b   : > { %10209 = vmatmul.mubr.msk.f32.gmra.mrb[16].mxu0 %vm777_vm15, %v719_v39  ;;  %v10247_v39 = vld [vmem:[%s18407_s3 + $0x150] sm:$0xff] }
 0x16c   : > { %1116 = vmatprep.mubr.f32.mxu0 %v12667_v0 }
 0x16f   : > { %10210 = vmatmul.mubr.msk.f32.gmra.mrb[18].mxu0 %vm777_vm15, %v720_v42  ;;  %v10249_v42 = vld [vmem:[%s18407_s3 + $0x160] sm:$0xff] }
 0x170   : > { %1122 = vmatprep.mubr.f32.mxu0 %v12667_v0 }
 0x173   : > { %10211 = vmatmul.mubr.msk.f32.gmra.mrb[20].mxu0 %vm777_vm15, %v721_v44  ;;  %v10250_v44 = vld [vmem:[%s18407_s3 + $0x168] sm:$0xff] }
 0x174   : > { %1128 = vmatprep.mubr.f32.mxu0 %v12667_v0 }
 0x177   : > { %10212 = vmatmul.mubr.msk.f32.gmra.mrb[22].mxu0 %vm777_vm15, %v722_v51  ;;  %v11318_v51 = vunpack.i.h.bf16 %v11316_v43  ;;  %v10303_v43 = vld [vmem:[%s18407_s3 + $0x220] sm:$0xff] }
 0x178   : > { %1285 = vmatprep.mubr.f32.mxu0 %v12667_v0 }
 0x17b   : > { %10229 = vmatmul.mubr.msk.f32.vlgmr.msra.gmra.mrb[0].mxu0 %vm777_vm15, %v10213_v60  ;;  %v1882_v60 = vsel %vm1881_vm2, %v11318_v51, %v11312_v8  ;;  %v11343_v8 = vunpack.i.h.bf16 %v13338_v20 }
 0x17c   : > { %10729 = vmatpush1.bf16.msk.msra.mxu0 %vm12935_vm0, %v10727_v63  ;;  %1291 = vmatprep.mubr.f32.mxu0 %v12667_v0  ;;  %v2124_v63 = vsel %vm2122_vm9, %v11327_v56, %v11328_v55 }
 0x17d   : > { %10732 = vmatprep.subr.msk.bf16.mxu0 %vm12891_vm11, %v10730_v1  ;;  %v10269_v1 = vld [vmem:[%s18407_s3 + $0x180] sm:$0xff] }
 0x17f   : > { %10230 = vmatmul.mubr.msk.f32.gmra.mrb[2].mxu0 %vm777_vm15, %v10214_v2  ;;  %v10739_v2 = vpack.c.bf16 %v1892_v62, %v1882_v60 }
 0x180   : > { %1297 = vmatprep.mubr.f32.mxu0 %v12667_v0 }
 0x183   : > { %10231 = vmatmul.mubr.msk.f32.gmra.mrb[4].mxu0 %vm777_vm15, %v10215_v3  ;;  %v2134_v3 = vsel %vm12856_vm7, %v2126_v59, 0.0 }
 0x184   : > { %1303 = vmatprep.mubr.f32.mxu0 %v12667_v0 }
 0x187   : > { %10232 = vmatmul.mubr.msk.f32.gmra.mrb[6].mxu0 %vm777_vm15, %v10216_v4  ;;  %v10742_v4 = vpack.c.bf16 %v2134_v3, %v2124_v63 }
 0x188   : > { %1309 = vmatprep.mubr.f32.mxu0 %v12667_v0 }
 0x18b   : > { %10233 = vmatmul.mubr.msk.f32.gmra.mrb[8].mxu0 %vm777_vm15, %v10217_v5  ;;  %v10270_v5 = vld [vmem:[%s18407_s3 + $0x188] sm:$0xff] }
 0x18c   : > { %1315 = vmatprep.mubr.f32.mxu0 %v12667_v0 }
 0x18f   : > { %10234 = vmatmul.mubr.msk.f32.gmra.mrb[10].mxu0 %vm777_vm15, %v10218_v6  ;;  %v10271_v6 = vld [vmem:[%s18407_s3 + $0x190] sm:$0xff] }
 0x190   : > { %1321 = vmatprep.mubr.f32.mxu0 %v12667_v0 }
 0x193   : > { %10235 = vmatmul.mubr.msk.f32.gmra.mrb[12].mxu0 %vm777_vm15, %v10219_v7  ;;  %v10272_v7 = vld [vmem:[%s18407_s3 + $0x198] sm:$0xff] }
 0x194   : > { %1327 = vmatprep.mubr.f32.mxu0 %v12667_v0 }
 0x197   : > { %10236 = vmatmul.mubr.msk.f32.gmra.mrb[14].mxu0 %vm777_vm15, %v10220_v9  ;;  %v10274_v9 = vld [vmem:[%s18407_s3 + $0x1a8] sm:$0xff] }
 0x198   : > { %1333 = vmatprep.mubr.f32.mxu0 %v12667_v0 }
 0x19b   : > { %10237 = vmatmul.mubr.msk.f32.gmra.mrb[16].mxu0 %vm777_vm15, %v10221_v10  ;;  %v10275_v10 = vld [vmem:[%s18407_s3 + $0x1b0] sm:$0xff] }
 0x19c   : > { %1339 = vmatprep.mubr.f32.mxu0 %v12667_v0 }
 0x19f   : > { %10238 = vmatmul.mubr.msk.f32.gmra.mrb[18].mxu0 %vm777_vm15, %v10222_v13  ;;  %v10277_v13 = vld [vmem:[%s18407_s3 + $0x1c0] sm:$0xff] }
 0x1a0   : > { %1345 = vmatprep.mubr.f32.mxu0 %v12667_v0 }
 0x1a3   : > { %10239 = vmatmul.mubr.msk.f32.gmra.mrb[20].mxu0 %vm777_vm15, %v10223_v15  ;;  %v10278_v15 = vld [vmem:[%s18407_s3 + $0x1c8] sm:$0xff] }
 0x1a4   : > { %1351 = vmatprep.mubr.f32.mxu0 %v12667_v0 }
 0x1a7   : > { %10240 = vmatmul.mubr.msk.f32.gmra.mrb[22].mxu0 %vm777_vm15, %v10224_v11  ;;  %v11342_v11 = vunpack.i.l.bf16 %v13338_v20  ;;  %v2821_v20 = vld [vmem:[%s18417_s0 + $0x48] sm:$0xff] }
 0x1a8   : > { %1526 = vmatprep.mubr.f32.mxu0 %v12667_v0 }
 0x1ab   : > { %10257 = vmatmul.mubr.msk.f32.vlgmr.msra.gmra.mrb[0].mxu0 %vm777_vm15, %v10241_v30  ;;  %v2123_v30 = vsel %vm2122_vm9, %v11333_v22, %v11327_v56  ;;  %v2815_v22 = vld [vmem:[%s18417_s0 + $0x18] sm:$0xff] }
 0x1ac   : > { %10735 = vmatpush1.bf16.msk.msra.mxu0 %vm12891_vm11, %v10733_v32  ;;  %1532 = vmatprep.mubr.f32.mxu0 %v12667_v0 }
 0x1ad   : > { %10738 = vmatprep.subr.msk.bf16.mxu0 %vm12944_vm1, %v10736_v33  ;;  %v10295_v33 = vld [vmem:[%s18407_s3 + $0x1e0] sm:$0xff] }
 0x1af   : > { %10258 = vmatmul.mubr.msk.f32.gmra.mrb[2].mxu0 %vm777_vm15, %v10242_v34  ;;  %v10745_v34 = vpack.c.bf16 %v2133_v28, %v2123_v30  ;;  %v2993_v28 = vld [vmem:[%s18418_s4] sm:$0xff]  ;;  %v2994_v30 = vld [vmem:[%s18418_s4 + $0x8] sm:$0xff] }
 0x1b0   : > { %1538 = vmatprep.mubr.f32.mxu0 %v12667_v0 }
 0x1b3   : > { %10259 = vmatmul.mubr.msk.f32.gmra.mrb[4].mxu0 %vm777_vm15, %v10243_v35 }
 0x1b4   : > { %1544 = vmatprep.mubr.f32.mxu0 %v12667_v0 }
 0x1b7   : > { %10260 = vmatmul.mubr.msk.f32.gmra.mrb[6].mxu0 %vm777_vm15, %v10244_v36  ;;  %v10296_v36 = vld [vmem:[%s18407_s3 + $0x1e8] sm:$0xff] }
 0x1b8   : > { %1550 = vmatprep.mubr.f32.mxu0 %v12667_v0 }
 0x1bb   : > { %10261 = vmatmul.mubr.msk.f32.gmra.mrb[8].mxu0 %vm777_vm15, %v10245_v37  ;;  %v10297_v37 = vld [vmem:[%s18407_s3 + $0x1f0] sm:$0xff] }
 0x1bc   : > { %1556 = vmatprep.mubr.f32.mxu0 %v12667_v0 }
 0x1bf   : > { %10262 = vmatmul.mubr.msk.f32.gmra.mrb[10].mxu0 %vm777_vm15, %v10246_v38  ;;  %v10299_v38 = vld [vmem:[%s18407_s3 + $0x200] sm:$0xff] }
 0x1c0   : > { %1562 = vmatprep.mubr.f32.mxu0 %v12667_v0 }
 0x1c3   : > { %10263 = vmatmul.mubr.msk.f32.gmra.mrb[12].mxu0 %vm777_vm15, %v10247_v39  ;;  %v10300_v39 = vld [vmem:[%s18407_s3 + $0x208] sm:$0xff] }
 0x1c4   : > { %1568 = vmatprep.mubr.f32.mxu0 %v12667_v0 }
 0x1c7   : > { %10264 = vmatmul.mubr.msk.f32.gmra.mrb[14].mxu0 %vm777_vm15, %v10248_v41  ;;  %v10301_v41 = vld [vmem:[%s18407_s3 + $0x210] sm:$0xff] }
 0x1c8   : > { %1574 = vmatprep.mubr.f32.mxu0 %v12667_v0 }
 0x1cb   : > { %10265 = vmatmul.mubr.msk.f32.gmra.mrb[16].mxu0 %vm777_vm15, %v10249_v42  ;;  %v10302_v42 = vld [vmem:[%s18407_s3 + $0x218] sm:$0xff] }
 0x1cc   : > { %1580 = vmatprep.mubr.f32.mxu0 %v12667_v0 }
 0x1cf   : > { %10266 = vmatmul.mubr.msk.f32.gmra.mrb[18].mxu0 %vm777_vm15, %v10250_v44  ;;  %v11346_v44 = vpop.permute.xlu0 %11345 }
 0x1d0   : > { %1586 = vmatprep.mubr.f32.mxu0 %v12667_v0  ;;  %v11348_v51 = vunpack.i.h.bf16 %v11346_v44  ;;  %v11347_v54 = vunpack.i.l.bf16 %v11346_v44  ;;  %v3027_v44 = vld [vmem:[%s18419_s28 + $0x10] sm:$0xff] }
 0x1d3   : > { %10267 = vmatmul.mubr.msk.f32.gmra.mrb[20].mxu0 %vm777_vm15, %v10251_v47  ;;  %v10305_v47 = vld [vmem:[%s18407_s3 + $0x230] sm:$0xff]  ;;  %v13418_v48 = vpop.permute.xlu0 %11355 }
 0x1d4   : > { %1592 = vmatprep.mubr.f32.mxu0 %v12667_v0  ;;  %v11358_v55 = vunpack.i.h.bf16 %v13418_v48  ;;  %v11357_v56 = vunpack.i.l.bf16 %v13418_v48  ;;  %v3073_v48 = vld [vmem:[%s18027_s6 + $0x20] sm:$0xff] }
 0x1d7   : > { %10268 = vmatmul.mubr.msk.f32.gmra.mrb[22].mxu0 %vm777_vm15, %v10252_v57  ;;  %v10306_v57 = vld [vmem:[%s18407_s3 + $0x238] sm:$0xff] }
 0x1d8   : > { %1759 = vmatprep.mubr.f32.mxu0 %v12667_v0 }
 0x1db   : > { %10283 = vmatmul.mubr.msk.f32.vlgmr.msra.gmra.mrb[0].mxu0 %vm777_vm15, %v10269_v1  ;;  %v10323_v1 = vld [vmem:[%s18407_s3 + $0x240] sm:$0xff] }
 0x1dc   : > { %10741 = vmatpush1.bf16.msk.msra.mxu0 %vm13040_vm10, %v10739_v2  ;;  %1765 = vmatprep.mubr.f32.mxu0 %v12667_v0 }
 0x1dd   : > { %10744 = vmatprep.subr.msk.bf16.mxu0 %vm12911_vm13, %v10742_v4  ;;  %vm2363_vm13 = vcmask 777216  }
 0x1de   : > { %v2367_v31 = vsel %vm2363_vm13, %v11342_v11, %v11343_v8  ;;  %v2365_v32 = vsel %vm2363_vm13, %v11337_v26, %v11338_v24  ;;  %v2366_v60 = vsel %vm2363_vm13, %v11348_v51, %v11342_v11  ;;  %v2364_v62 = vsel %vm2363_vm13, %v11347_v54, %v11337_v26  ;;  %v10331_v8 = vld [vmem:[%s18407_s3 + $0x280] sm:$0xff]  ;;  %v2822_v11 = vld [vmem:[%s18417_s0 + $0x50] sm:$0xff]  ;;  %v2823_v24 = vld [vmem:[%s18417_s0 + $0x58] sm:$0xff] }
 0x1df   : > { %10284 = vmatmul.mubr.msk.f32.gmra.mrb[2].mxu0 %vm777_vm15, %v10270_v5  ;;  %v10748_v35 = vpack.c.bf16 %v2367_v31, %v2365_v32  ;;  %v10751_v2 = vpack.c.bf16 %v2366_v60, %v2364_v62  ;;  %v10324_v5 = vld [vmem:[%s18407_s3 + $0x248] sm:$0xff]  ;;  %v10333_v32 = vld [vmem:[%s18407_s3 + $0x290] sm:$0xff]  ;;  %v10362_v60 = vld [vmem:[%s18407_s3 + $0x2f8] sm:$0xff] }
 0x1e0   : > { %1771 = vmatprep.mubr.f32.mxu0 %v12667_v0  ;;  %v10332_v26 = vld [vmem:[%s18407_s3 + $0x288] sm:$0xff]  ;;  %v10357_v54 = vld [vmem:[%s18407_s3 + $0x2d0] sm:$0xff]  ;;  %v10377_v62 = vld [vmem:[%s18407_s3 + $0x300] sm:$0xff] }
 0x1e1   : > { %v10356_v51 = vld [vmem:[%s18407_s3 + $0x2c8] sm:$0xff] }
 0x1e3   : > { %10285 = vmatmul.mubr.msk.f32.gmra.mrb[4].mxu0 %vm777_vm15, %v10271_v6  ;;  %v10325_v6 = vld [vmem:[%s18407_s3 + $0x250] sm:$0xff] }
 0x1e4   : > { %1777 = vmatprep.mubr.f32.mxu0 %v12667_v0 }
 0x1e7   : > { %10286 = vmatmul.mubr.msk.f32.gmra.mrb[6].mxu0 %vm777_vm15, %v10272_v7  ;;  %v2812_v7 = vld [vmem:[%s18417_s0] sm:$0xff] }
 0x1e8   : > { %1783 = vmatprep.mubr.f32.mxu0 %v12667_v0 }
 0x1eb   : > { %10287 = vmatmul.mubr.msk.f32.gmra.mrb[8].mxu0 %vm777_vm15, %v10273_v52  ;;  %v10327_v52 = vld [vmem:[%s18407_s3 + $0x260] sm:$0xff] }
 0x1ec   : > { %1789 = vmatprep.mubr.f32.mxu0 %v12667_v0 }
 0x1ef   : > { %10288 = vmatmul.mubr.msk.f32.gmra.mrb[10].mxu0 %vm777_vm15, %v10274_v9  ;;  %v18064_v9 = vmov 0  }
 0x1f0   : > { %1795 = vmatprep.mubr.f32.mxu0 %v12667_v0  ;;  %11365 = vset.pattern.permute.xlu1 %v18064_v9 }
 0x1f1   : > { %2831 = vperm.xlu1 %11365, %v2813_v61   ;;  %11364 = vset.pattern.permute.xlu0 %v18064_v9  ;;  %v10386_v61 = vld [vmem:[%s18407_s3 + $0x348] sm:$0xff] }
 0x1f2   : > { %2826 = vperm.xlu0 %11364, %v2812_v7   ;;  %v10387_v7 = vld [vmem:[%s18407_s3 + $0x350] sm:$0xff] }
 0x1f3   : > { %10289 = vmatmul.mubr.msk.f32.gmra.mrb[12].mxu0 %vm777_vm15, %v10275_v10  ;;  %v2816_v10 = vld [vmem:[%s18417_s0 + $0x20] sm:$0xff] }
 0x1f4   : > { %1801 = vmatprep.mubr.f32.mxu0 %v12667_v0 }
 0x1f5   : > { %2846 = vperm.xlu1 %11365, %v2816_v10  }
 0x1f7   : > { %10290 = vmatmul.mubr.msk.f32.gmra.mrb[14].mxu0 %vm777_vm15, %v10276_v12  ;;  %v2817_v12 = vld [vmem:[%s18417_s0 + $0x28] sm:$0xff] }
 0x1f8   : > { %1807 = vmatprep.mubr.f32.mxu0 %v12667_v0  ;;  %2851 = vperm.xlu0 %11364, %v2817_v12  }
 0x1f9   : > { %2836 = vperm.xlu1 %11365, %v2814_v14  }
 0x1fb   : > { %10291 = vmatmul.mubr.msk.f32.gmra.mrb[16].mxu0 %vm777_vm15, %v10277_v13  ;;  %v10328_v13 = vld [vmem:[%s18407_s3 + $0x268] sm:$0xff] }
 0x1fc   : > { %1813 = vmatprep.mubr.f32.mxu0 %v12667_v0 }
 0x1ff   : > { %10292 = vmatmul.mubr.msk.f32.gmra.mrb[18].mxu0 %vm777_vm15, %v10278_v15  ;;  %v2818_v15 = vld [vmem:[%s18417_s0 + $0x30] sm:$0xff] }
 0x200   : > { %1819 = vmatprep.mubr.f32.mxu0 %v12667_v0  ;;  %2856 = vperm.xlu0 %11364, %v2818_v15  }
 0x203   : > { %10293 = vmatmul.mubr.msk.f32.gmra.mrb[20].mxu0 %vm777_vm15, %v10279_v18  ;;  %v2820_v18 = vld [vmem:[%s18417_s0 + $0x40] sm:$0xff]  ;;  %s19008_s0 = smov 96  }
 0x204   : > { %1825 = vmatprep.mubr.f32.mxu0 %v12667_v0  ;;  %2866 = vperm.xlu1 %11365, %v2820_v18  }
 0x205   : > { %2871 = vperm.xlu0 %11364, %v2821_v20  }
 0x207   : > { %10294 = vmatmul.mubr.msk.f32.gmra.mrb[22].mxu0 %vm777_vm15, %v10280_v27  ;;  %v11361_v27 = vpop.permute.xlu1 %11360 }
 0x208   : > { %2000 = vmatprep.mubr.f32.mxu0 %v12667_v0  ;;  %2841 = vperm.xlu1 %11365, %v2815_v22   ;;  %v11362_v31 = vunpack.i.l.bf16 %v11361_v27 }
 0x209   : > { %2861 = vperm.xlu0 %11364, %v2819_v23  }
 0x20b   : > { %10311 = vmatmul.mubr.msk.f32.vlgmr.msra.gmra.mrb[0].mxu0 %vm777_vm15, %v10295_v33  ;;  %v3025_v33 = vld [vmem:[%s18419_s28] sm:$0xff] }
 0x20c   : > { %10747 = vmatpush1.bf16.msk.msra.mxu0 %vm12935_vm0, %v10745_v34  ;;  %2006 = vmatprep.mubr.f32.mxu0 %v12667_v0  ;;  %vm2596_vm0 = vcmask 769024   ;;  %v11363_v34 = vunpack.i.h.bf16 %v11361_v27 }
 0x20d   : > { %10750 = vmatprep.subr.msk.bf16.mxu0 %vm12891_vm11, %v10748_v35  ;;  %v2600_v59 = vsel %vm2596_vm0, %v11352_v50, %v11353_v49  ;;  %v2598_v63 = vsel %vm2596_vm0, %v11357_v56, %v11358_v55  ;;  %2876 = vperm.xlu1 %11365, %v2822_v11   ;;  %v3026_v35 = vld [vmem:[%s18419_s28 + $0x8] sm:$0xff]  ;;  %v10354_v49 = vld [vmem:[%s18407_s3 + $0x2b8] sm:$0xff] }
 0x20e   : > { %v2608_v3 = vsel %vm12917_vm14, %v2600_v59, 0.0  ;;  %2881 = vperm.xlu0 %11364, %v2823_v24   ;;  %v10358_v55 = vld [vmem:[%s18407_s3 + $0x2d8] sm:$0xff]  ;;  %v10361_v59 = vld [vmem:[%s18407_s3 + $0x2f0] sm:$0xff] }
 0x20f   : > { %10312 = vmatmul.mubr.msk.f32.gmra.mrb[2].mxu0 %vm777_vm15, %v10296_v36  ;;  %v10754_v4 = vpack.c.bf16 %v2608_v3, %v2598_v63  ;;  %v2599_v36 = vsel %vm2596_vm0, %v11362_v31, %v11352_v50  ;;  %v10355_v50 = vld [vmem:[%s18407_s3 + $0x2c0] sm:$0xff]  ;;  %v10378_v63 = vld [vmem:[%s18407_s3 + $0x308] sm:$0xff] }
 0x210   : > { %2012 = vmatprep.mubr.f32.mxu0 %v12667_v0  ;;  %v10381_v3 = vld [vmem:[%s18407_s3 + $0x320] sm:$0xff] }
 0x211   : > { %2999 = vperm.xlu1 %11365, %v2993_v28  }
 0x212   : > { %3004 = vperm.xlu0 %11364, %v2994_v30  }
 0x213   : > { %10313 = vmatmul.mubr.msk.f32.gmra.mrb[4].mxu0 %vm777_vm15, %v10297_v37  ;;  %v10334_v37 = vld [vmem:[%s18407_s3 + $0x298] sm:$0xff] }
 0x214   : > { %2018 = vmatprep.mubr.f32.mxu0 %v12667_v0 }
 0x215   : > { %3031 = vperm.xlu1 %11365, %v3025_v33  }
 0x216   : > { %3036 = vperm.xlu0 %11364, %v3026_v35  }
 0x217   : > { %10314 = vmatmul.mubr.msk.f32.gmra.mrb[6].mxu0 %vm777_vm15, %v10298_v58  ;;  %v2995_v58 = vld [vmem:[%s18418_s4 + $0x10] sm:$0xff] }
 0x218   : > { %2024 = vmatprep.mubr.f32.mxu0 %v12667_v0 }
 0x219   : > { %3009 = vperm.xlu1 %11365, %v2995_v58  }
 0x21b   : > { %10315 = vmatmul.mubr.msk.f32.gmra.mrb[8].mxu0 %vm777_vm15, %v10299_v38  ;;  %v2607_v38 = vsel %vm13012_vm5, %v2599_v36, 0.0 }
 0x21c   : > { %2030 = vmatprep.mubr.f32.mxu0 %v12667_v0 }
 0x21d   : > { %3041 = vperm.xlu1 %11365, %v3027_v44  }
 0x21f   : > { %10316 = vmatmul.mubr.msk.f32.gmra.mrb[10].mxu0 %vm777_vm15, %v10300_v39  ;;  %v2597_v39 = vsel %vm2596_vm0, %v11363_v34, %v11357_v56  ;;  %v10359_v56 = vld [vmem:[%s18407_s3 + $0x2e0] sm:$0xff] }
 0x220   : > { %2036 = vmatprep.mubr.f32.mxu0 %v12667_v0 }
 0x223   : > { %10317 = vmatmul.mubr.msk.f32.gmra.mrb[12].mxu0 %vm777_vm15, %v10301_v41  ;;  %v2996_v41 = vld [vmem:[%s18418_s4 + $0x18] sm:$0xff] }
 0x224   : > { %2042 = vmatprep.mubr.f32.mxu0 %v12667_v0  ;;  %3014 = vperm.xlu0 %11364, %v2996_v41  }
 0x227   : > { %10318 = vmatmul.mubr.msk.f32.gmra.mrb[14].mxu0 %vm777_vm15, %v10302_v42  ;;  %v10351_v42 = vld [vmem:[%s18407_s3 + $0x2a0] sm:$0xff] }
 0x228   : > { %2048 = vmatprep.mubr.f32.mxu0 %v12667_v0 }
 0x22b   : > { %10319 = vmatmul.mubr.msk.f32.gmra.mrb[16].mxu0 %vm777_vm15, %v10303_v43  ;;  %v10757_v43 = vpack.c.bf16 %v2607_v38, %v2597_v39 }
 0x22c   : > { %2054 = vmatprep.mubr.f32.mxu0 %v12667_v0 }
 0x22f   : > { %10320 = vmatmul.mubr.msk.f32.gmra.mrb[18].mxu0 %vm777_vm15, %v10304_v45  ;;  %v3028_v45 = vld [vmem:[%s18419_s28 + $0x18] sm:$0xff] }
 0x230   : > { %2060 = vmatprep.mubr.f32.mxu0 %v12667_v0  ;;  %3046 = vperm.xlu0 %11364, %v3028_v45  }
 0x233   : > { %10321 = vmatmul.mubr.msk.f32.gmra.mrb[20].mxu0 %vm777_vm15, %v10305_v47  ;;  %v3069_v47 = vld [vmem:[%s18027_s6] sm:$0xff] }
 0x234   : > { %2066 = vmatprep.mubr.f32.mxu0 %v12667_v0  ;;  %3083 = vperm.xlu1 %11365, %v3069_v47  }
 0x235   : > { %3103 = vperm.xlu0 %11364, %v3073_v48  }
 0x237   : > { %10322 = vmatmul.mubr.msk.f32.gmra.mrb[22].mxu0 %vm777_vm15, %v10306_v57  ;;  %v10360_v57 = vld [vmem:[%s18407_s3 + $0x2e8] sm:$0xff] }
 0x238   : > { %2241 = vmatprep.mubr.f32.mxu0 %v12667_v0 }
 0x23b   : > { %10339 = vmatmul.mubr.msk.f32.vlgmr.msra.gmra.mrb[0].mxu0 %vm777_vm15, %v10323_v1  ;;  %v10379_v1 = vld [vmem:[%s18407_s3 + $0x310] sm:$0xff] }
 0x23c   : > { %10753 = vmatpush1.bf16.msk.msra.mxu0 %vm12891_vm11, %v10751_v2  ;;  %2247 = vmatprep.mubr.f32.mxu0 %v12667_v0  ;;  %v10380_v2 = vld [vmem:[%s18407_s3 + $0x318] sm:$0xff]  ;;  %vm3141_vm11 = vcmask 261120  }
 0x23d   : > { %10756 = vmatprep.subr.msk.bf16.mxu0 %vm12944_vm1, %v10754_v4  ;;  %v10382_v4 = vld [vmem:[%s18407_s3 + $0x328] sm:$0xff]  ;;  %vm5361_vm1 = vcmask 1043456  }
 0x23f   : > { %10340 = vmatmul.mubr.msk.f32.gmra.mrb[2].mxu0 %vm777_vm15, %v10324_v5  ;;  %v10383_v5 = vld [vmem:[%s18407_s3 + $0x330] sm:$0xff] }
 0x240   : > { %2253 = vmatprep.mubr.f32.mxu0 %v12667_v0 }
 0x243   : > { %10341 = vmatmul.mubr.msk.f32.gmra.mrb[4].mxu0 %vm777_vm15, %v10325_v6  ;;  %v10384_v6 = vld [vmem:[%s18407_s3 + $0x338] sm:$0xff] }
 0x244   : > { %2259 = vmatprep.mubr.f32.mxu0 %v12667_v0 }
 0x247   : > { %10342 = vmatmul.mubr.msk.f32.gmra.mrb[6].mxu0 %vm777_vm15, %v10326_v40  ;;  %v10385_v40 = vld [vmem:[%s18407_s3 + $0x340] sm:$0xff] }
 0x248   : > { %2265 = vmatprep.mubr.f32.mxu0 %v12667_v0 }
 0x24b   : > { %10343 = vmatmul.mubr.msk.f32.gmra.mrb[8].mxu0 %vm777_vm15, %v10327_v52  ;;  %v10388_v52 = vld [vmem:[%s18407_s3 + $0x358] sm:$0xff] }
 0x24c   : > { %2271 = vmatprep.mubr.f32.mxu0 %v12667_v0  ;;  %v10329_v0 = vld [vmem:[%s18407_s3 + $0x270] sm:$0xff] }
 0x24f   : > { %10344 = vmatmul.mubr.msk.f32.gmra.mrb[10].mxu0 %vm777_vm15, %v10328_v13 }
 0x250   : > { %2277 = vmatprep.mubr.f32.mxu0 %v13494_v17 }
 0x253   : > { %10345 = vmatmul.mubr.msk.f32.gmra.mrb[12].mxu0 %vm777_vm15, %v10329_v0 }
 0x254   : > { %2283 = vmatprep.mubr.f32.mxu0 %v13494_v17 }
 0x257   : > { %10346 = vmatmul.mubr.msk.f32.gmra.mrb[14].mxu0 %vm777_vm15, %v10330_v21 }
 0x258   : > { %2289 = vmatprep.mubr.f32.mxu0 %v13494_v17 }
 0x25b   : > { %10347 = vmatmul.mubr.msk.f32.gmra.mrb[16].mxu0 %vm777_vm15, %v10331_v8 }
 0x25c   : > { %2295 = vmatprep.mubr.f32.mxu0 %v13494_v17 }
 0x25f   : > { %10348 = vmatmul.mubr.msk.f32.gmra.mrb[18].mxu0 %vm777_vm15, %v10332_v26 }
 0x260   : > { %2301 = vmatprep.mubr.f32.mxu0 %v13494_v17 }
 0x263   : > { %10349 = vmatmul.mubr.msk.f32.gmra.mrb[20].mxu0 %vm777_vm15, %v10333_v32 }
 0x264   : > { %2307 = vmatprep.mubr.f32.mxu0 %v13494_v17 }
 0x267   : > { %10350 = vmatmul.mubr.msk.f32.gmra.mrb[22].mxu0 %vm777_vm15, %v10334_v37 }
 0x268   : > { %2474 = vmatprep.mubr.f32.mxu0 %v13494_v17 }
 0x26b   : > { %10365 = vmatmul.mubr.msk.f32.vlgmr.msra.gmra.mrb[0].mxu0 %vm777_vm15, %v10351_v42 }
 0x26c   : > { %10759 = vmatpush1.bf16.msk.msra.mxu0 %vm13040_vm10, %v10757_v43  ;;  %2480 = vmatprep.mubr.f32.mxu0 %v13494_v17  ;;  %vm8217_vm10 = vcmask 523264  }
 0x26f   : > { %10366 = vmatmul.mubr.msk.f32.gmra.mrb[2].mxu0 %vm777_vm15, %v10352_v46 }
 0x270   : > { %2486 = vmatprep.mubr.f32.mxu0 %v13494_v17  ;;  %v2832_v18 = vpop.permute.xlu1 %2831 }
 0x271   : > { %v2827_v22 = vpop.permute.xlu0 %2826 }
 0x273   : > { %10367 = vmatmul.mubr.msk.f32.gmra.mrb[4].mxu0 %vm777_vm15, %v10353_v29 }
 0x274   : > { %2492 = vmatprep.mubr.f32.mxu0 %v13494_v17  ;;  %v2847_v23 = vpop.permute.xlu1 %2846 }
 0x277   : > { %10368 = vmatmul.mubr.msk.f32.gmra.mrb[6].mxu0 %vm777_vm15, %v10354_v49  ;;  %v2852_v24 = vpop.permute.xlu0 %2851 }
 0x278   : > { %2498 = vmatprep.mubr.f32.mxu0 %v13494_v17  ;;  %v2837_v28 = vpop.permute.xlu1 %2836 }
 0x27b   : > { %10369 = vmatmul.mubr.msk.f32.gmra.mrb[8].mxu0 %vm777_vm15, %v10355_v50 }
 0x27c   : > { %2504 = vmatprep.mubr.f32.mxu0 %v13494_v17 }
 0x27f   : > { %10370 = vmatmul.mubr.msk.f32.gmra.mrb[10].mxu0 %vm777_vm15, %v10356_v51  ;;  %v2857_v32 = vpop.permute.xlu0 %2856 }
 0x280   : > { %2510 = vmatprep.mubr.f32.mxu0 %v13494_v17 }
 0x283   : > { %10371 = vmatmul.mubr.msk.f32.gmra.mrb[12].mxu0 %vm777_vm15, %v10357_v54  ;;  %v2867_v33 = vpop.permute.xlu1 %2866 }
 0x284   : > { %2516 = vmatprep.mubr.f32.mxu0 %v13494_v17  ;;  %v2872_v36 = vpop.permute.xlu0 %2871 }
 0x287   : > { %10372 = vmatmul.mubr.msk.f32.gmra.mrb[14].mxu0 %vm777_vm15, %v10358_v55  ;;  %v2842_v38 = vpop.permute.xlu1 %2841 }
 0x288   : > { %2522 = vmatprep.mubr.f32.mxu0 %v13494_v17  ;;  %v2862_v49 = vpop.permute.xlu0 %2861 }
 0x28b   : > { %10373 = vmatmul.mubr.msk.f32.gmra.mrb[16].mxu0 %vm777_vm15, %v10359_v56 }
 0x28c   : > { %2528 = vmatprep.mubr.f32.mxu0 %v13494_v17 }
 0x28f   : > { %10374 = vmatmul.mubr.msk.f32.gmra.mrb[18].mxu0 %vm777_vm15, %v10360_v57 }
 0x290   : > { %2534 = vmatprep.mubr.f32.mxu0 %v13494_v17 }
 0x293   : > { %10375 = vmatmul.mubr.msk.f32.gmra.mrb[20].mxu0 %vm777_vm15, %v10361_v59 }
 0x294   : > { %2540 = vmatprep.mubr.f32.mxu0 %v13494_v17 }
 0x297   : > { %10376 = vmatmul.mubr.msk.f32.gmra.mrb[22].mxu0 %vm777_vm15, %v10362_v60 }
 0x298   : > { %2715 = vmatprep.mubr.f32.mxu0 %v13494_v17 }
 0x29b   : > { %10393 = vmatmul.mubr.msk.f32.vlgmr.msra.gmra.mrb[0].mxu0 %vm777_vm15, %v10377_v62  ;;  %v2877_v62 = vpop.permute.xlu1 %2876 }
 0x29c   : > { %2721 = vmatprep.mubr.f32.mxu0 %v13494_v17 }
 0x29f   : > { %10394 = vmatmul.mubr.msk.f32.gmra.mrb[2].mxu0 %vm777_vm15, %v10378_v63 }
 0x2a0   : > { %2727 = vmatprep.mubr.f32.mxu0 %v13494_v17 }
 0x2a3   : > { %10395 = vmatmul.mubr.msk.f32.gmra.mrb[4].mxu0 %vm777_vm15, %v10379_v1 }
 0x2a4   : > { %2733 = vmatprep.mubr.f32.mxu0 %v13494_v17 }
 0x2a7   : > { %10396 = vmatmul.mubr.msk.f32.gmra.mrb[6].mxu0 %vm777_vm15, %v10380_v2 }
 0x2a8   : > { %2739 = vmatprep.mubr.f32.mxu0 %v13494_v17 }
 0x2ab   : > { %10397 = vmatmul.mubr.msk.f32.gmra.mrb[8].mxu0 %vm777_vm15, %v10381_v3 }
 0x2ac   : > { %2745 = vmatprep.mubr.f32.mxu0 %v13494_v17 }
 0x2af   : > { %10398 = vmatmul.mubr.msk.f32.gmra.mrb[10].mxu0 %vm777_vm15, %v10382_v4 }
 0x2b0   : > { %2751 = vmatprep.mubr.f32.mxu0 %v13494_v17 }
 0x2b3   : > { %10399 = vmatmul.mubr.msk.f32.gmra.mrb[12].mxu0 %vm777_vm15, %v10383_v5 }
 0x2b4   : > { %2757 = vmatprep.mubr.f32.mxu0 %v13494_v17 }
 0x2b7   : > { %10400 = vmatmul.mubr.msk.f32.gmra.mrb[14].mxu0 %vm777_vm15, %v10384_v6 }
 0x2b8   : > { %2763 = vmatprep.mubr.f32.mxu0 %v13494_v17 }
 0x2bb   : > { %10401 = vmatmul.mubr.msk.f32.gmra.mrb[16].mxu0 %vm777_vm15, %v10385_v40 }
 0x2bc   : > { %2769 = vmatprep.mubr.f32.mxu0 %v13494_v17 }
 0x2bf   : > { %10402 = vmatmul.mubr.msk.f32.gmra.mrb[18].mxu0 %vm777_vm15, %v10386_v61 }
 0x2c0   : > { %2775 = vmatprep.mubr.f32.mxu0 %v13494_v17 }
 0x2c3   : > { %10403 = vmatmul.mubr.msk.f32.gmra.mrb[20].mxu0 %vm777_vm15, %v10387_v7 }
 0x2c4   : > { %2781 = vmatprep.mubr.f32.mxu0 %v13494_v17 }
 0x2c7   : > { %10404 = vmatmul.mubr.msk.f32.gmra.mrb[22].mxu0 %vm777_vm15, %v10388_v52  ;;  %vm3426_vm15 = vcmask 64512  }
 0x2c8   : > { %3242 = vmatprep.mubr.f32.mxu0 %v13494_v17 }
 0x36e   : > { %v2717_v10 = vpop.f32.mrb[0].mxu0 }
 0x36f   : > { %v2719_v12 = vpop.f32.mrb[1].mxu0  ;;  %v13705_v45 = vadd.f32 %v2827_v22, %v2717_v10 }
 0x370   : > { %v13711_v50 = vadd.f32 %v2827_v22, %v2719_v12 }
 0x371   : > { %18420 = vst [vmem:[#allocation9_spill] sm:$0xff] %v13705_v45 }
 0x372   : > { %v2723_v13 = vpop.f32.mrb[2].mxu0  ;;  %18423 = vst [vmem:[#allocation12_spill] sm:$0xff] %v13711_v50 }
 0x373   : > { %v2725_v14 = vpop.f32.mrb[3].mxu0  ;;  %v13707_v46 = vadd.f32 %v2832_v18, %v2723_v13 }
 0x374   : > { %v13713_v51 = vadd.f32 %v2832_v18, %v2725_v14  ;;  %v2882_v18 = vpop.permute.xlu0 %2881 }
 0x375   : > { %18421 = vst [vmem:[#allocation10_spill] sm:$0xff] %v13707_v46 }
 0x376   : > { %v2729_v15 = vpop.f32.mrb[4].mxu0  ;;  %18424 = vst [vmem:[#allocation13_spill] sm:$0xff] %v13713_v51 }
 0x377   : > { %v2731_v0 = vpop.f32.mrb[5].mxu0  ;;  %v13717_v56 = vadd.f32 %v2837_v28, %v2729_v15 }
 0x378   : > { %v13719_v57 = vadd.f32 %v2837_v28, %v2731_v0 }
 0x379   : > { %18426 = vst [vmem:[#allocation15_spill] sm:$0xff] %v13717_v56 }
 0x37a   : > { %v2735_v20 = vpop.f32.mrb[6].mxu0  ;;  %18427 = vst [vmem:[#allocation16_spill] sm:$0xff] %v13719_v57 }
 0x37b   : > { %v2737_v21 = vpop.f32.mrb[7].mxu0  ;;  %v13741_v14 = vadd.f32 %v2842_v38, %v2735_v20 }
 0x37c   : > { %v13749_v22 = vadd.f32 %v2842_v38, %v2737_v21 }
 0x37d   : > { %18434 = vst [vmem:[#allocation23_spill] sm:$0xff] %v13741_v14 }
 0x37e   : > { %v2741_v8 = vpop.f32.mrb[8].mxu0  ;;  %18437 = vst [vmem:[#allocation26_spill] sm:$0xff] %v13749_v22 }
 0x37f   : > { %v2743_v11 = vpop.f32.mrb[9].mxu0  ;;  %v2892_v41 = vadd.f32 %v2847_v23, %v2741_v8 }
 0x380   : > { %v2893_v42 = vadd.f32 %v2847_v23, %v2743_v11 }
 0x381   : > { %v2908_v63 = vadd.f32 %v2892_v41, %v13705_v45 }
 0x382   : > { %v2747_v26 = vpop.f32.mrb[10].mxu0  ;;  %v2909_v1 = vadd.f32 %v2893_v42, %v13711_v50 }
 0x383   : > { %v2749_v27 = vpop.f32.mrb[11].mxu0  ;;  %v2894_v39 = vadd.f32 %v2852_v24, %v2747_v26 }
 0x384   : > { %v2895_v43 = vadd.f32 %v2852_v24, %v2749_v27 }
 0x385   : > { %v2910_v59 = vadd.f32 %v2894_v39, %v13707_v46 }
 0x386   : > { %v2753_v30 = vpop.f32.mrb[12].mxu0  ;;  %v2911_v2 = vadd.f32 %v2895_v43, %v13713_v51 }
 0x387   : > { %v2755_v31 = vpop.f32.mrb[13].mxu0  ;;  %v2896_v47 = vadd.f32 %v2857_v32, %v2753_v30 }
 0x388   : > { %v2897_v54 = vadd.f32 %v2857_v32, %v2755_v31 }
 0x389   : > { %v2912_v5 = vadd.f32 %v2896_v47, %v13717_v56 }
 0x38a   : > { %v2759_v34 = vpop.f32.mrb[14].mxu0  ;;  %v2913_v52 = vadd.f32 %v2897_v54, %v13719_v57 }
 0x38b   : > { %v2761_v35 = vpop.f32.mrb[15].mxu0  ;;  %v2898_v6 = vadd.f32 %v2862_v49, %v2759_v34 }
 0x38c   : > { %v2899_v10 = vadd.f32 %v2862_v49, %v2761_v35 }
 0x38d   : > { %v2914_v24 = vadd.f32 %v2898_v6, %v13741_v14 }
 0x38e   : > { %v2765_v37 = vpop.f32.mrb[16].mxu0  ;;  %v2915_v28 = vadd.f32 %v2899_v10, %v13749_v22 }
 0x38f   : > { %v2767_v58 = vpop.f32.mrb[17].mxu0  ;;  %v13722_v60 = vadd.f32 %v2867_v33, %v2765_v37 }
 0x390   : > { %v13727_v3 = vadd.f32 %v2867_v33, %v2767_v58 }
 0x391   : > { %18428 = vst [vmem:[#allocation17_spill] sm:$0xff] %v13722_v60  ;;  %v13744_v15 = vadd.f32 %v2908_v63, %v13722_v60 }
 0x392   : > { %v2771_v44 = vpop.f32.mrb[18].mxu0  ;;  %18429 = vst [vmem:[#allocation18_spill] sm:$0xff] %v13727_v3  ;;  %v13752_v23 = vadd.f32 %v2909_v1, %v13727_v3 }
 0x393   : > { %v13709_v48 = vadd.f32 %v2872_v36, %v2771_v44  ;;  %v2773_v29 = vpop.f32.mrb[19].mxu0  ;;  %18435 = vst [vmem:[#allocation24_spill] sm:$0xff] %v13744_v15 }
 0x394   : > { %v13715_v55 = vadd.f32 %v2872_v36, %v2773_v29  ;;  %18438 = vst [vmem:[#allocation27_spill] sm:$0xff] %v13752_v23 }
 0x395   : > { %18422 = vst [vmem:[#allocation11_spill] sm:$0xff] %v13709_v48  ;;  %v13731_v40 = vadd.f32 %v2910_v59, %v13709_v48 }
 0x396   : > { %18425 = vst [vmem:[#allocation14_spill] sm:$0xff] %v13715_v55  ;;  %v2777_v4 = vpop.f32.mrb[20].mxu0  ;;  %v13737_v12 = vadd.f32 %v2911_v2, %v13715_v55 }
 0x397   : > { %18430 = vst [vmem:[#allocation19_spill] sm:$0xff] %v13731_v40  ;;  %v13733_v61 = vadd.f32 %v2877_v62, %v2777_v4  ;;  %v2779_v7 = vpop.f32.mrb[21].mxu0  ;;  %v2924_v20 = vadd.f32 %v13731_v40, %v13744_v15 }
 0x398   : > { %18432 = vst [vmem:[#allocation21_spill] sm:$0xff] %v13737_v12  ;;  %v13739_v13 = vadd.f32 %v2877_v62, %v2779_v7  ;;  %v2933_v21 = vadd.f32 %v13737_v12, %v13752_v23 }
 0x399   : > { %18431 = vst [vmem:[#allocation20_spill] sm:$0xff] %v13733_v61  ;;  %v13747_v0 = vadd.f32 %v2912_v5, %v13733_v61 }
 0x39a   : > { %18433 = vst [vmem:[#allocation22_spill] sm:$0xff] %v13739_v13  ;;  %v13755_v8 = vadd.f32 %v2913_v52, %v13739_v13  ;;  %v2783_v11 = vpop.f32.mrb[22].mxu0 }
 0x39b   : > { %18436 = vst [vmem:[#allocation25_spill] sm:$0xff] %v13747_v0  ;;  %v13760_v26 = vadd.f32 %v2882_v18, %v2783_v11  ;;  %v2785_v27 = vpop.f32.mrb[23].mxu0  ;;  %v2925_v31 = vadd.f32 %v2924_v20, %v13747_v0 }
 0x39c   : > { %18439 = vst [vmem:[#allocation28_spill] sm:$0xff] %v13755_v8  ;;  %v13765_v30 = vadd.f32 %v2882_v18, %v2785_v27  ;;  %v2934_v33 = vadd.f32 %v2933_v21, %v13755_v8 }
 0x39d   : > { %18440 = vst [vmem:[#allocation29_spill] sm:$0xff] %v13760_v26  ;;  %v13769_v32 = vadd.f32 %v2914_v24, %v13760_v26 }
 0x39e   : > { %18441 = vst [vmem:[#allocation30_spill] sm:$0xff] %v13765_v30  ;;  %v13773_v34 = vadd.f32 %v2915_v28, %v13765_v30 }
 0x39f   : > { %18442 = vst [vmem:[#allocation31_spill] sm:$0xff] %v13769_v32  ;;  %v2926_v35 = vadd.f32 %v2925_v31, %v13769_v32 }
 0x3a0   : > { %18443 = vst [vmem:[#allocation32_spill] sm:$0xff] %v13773_v34  ;;  %v2935_v36 = vadd.f32 %v2934_v33, %v13773_v34 }
 0x3a1   : > { %v2927_v37 = vrot.slane %v2926_v35, 4 }
 0x3a2   : > { %v2936_v58 = vrot.slane %v2935_v36, 4 }
 0x3a3   : > { %v2928_v38 = vadd.f32 %v2927_v37, %v2926_v35 }
 0x3a4   : > { %v2937_v39 = vadd.f32 %v2936_v58, %v2935_v36 }
 0x3a5   : > { %v2929_v41 = vrot.slane %v2928_v38, 2 }
 0x3a6   : > { %v2938_v42 = vrot.slane %v2937_v39, 2 }
 0x3a7   : > { %v2930_v43 = vadd.f32 %v2929_v41, %v2928_v38 }
 0x3a8   : > { %v2939_v44 = vadd.f32 %v2938_v42, %v2937_v39 }
 0x3a9   : > { %v2931_v47 = vrot.slane %v2930_v43, 1 }
 0x3aa   : > { %v2940_v29 = vrot.slane %v2939_v44, 1 }
 0x3ab   : > { %v2932_v49 = vadd.f32 %v2931_v47, %v2930_v43 }
 0x3ac   : > { %v2941_v54 = vadd.f32 %v2940_v29, %v2939_v44 }
 0x3ad   : > { %v2943_v59 = vmul.f32 0.03125, %v2932_v49 }
 0x3ae   : > { %v2944_v62 = vmul.f32 0.03125, %v2941_v54 }
 0x3af   : > { %v2945_v63 = vsub.f32 %v13744_v15, %v2943_v59  ;;  %v2947_v1 = vsub.f32 %v13731_v40, %v2943_v59  ;;  %v2949_v2 = vsub.f32 %v13747_v0, %v2943_v59  ;;  %v2951_v7 = vsub.f32 %v13769_v32, %v2943_v59 }
 0x3b0   : > { %v2946_v4 = vsub.f32 %v13752_v23, %v2944_v62  ;;  %v2948_v5 = vsub.f32 %v13737_v12, %v2944_v62  ;;  %v2950_v6 = vsub.f32 %v13755_v8, %v2944_v62  ;;  %v2952_v18 = vsub.f32 %v13773_v34, %v2944_v62 }
 0x3b1   : > { %v2953_v52 = vmul.f32 %v2945_v63, %v2945_v63  ;;  %v2955_v10 = vmul.f32 %v2947_v1, %v2947_v1  ;;  %v2957_v20 = vmul.f32 %v2949_v2, %v2949_v2  ;;  %v2959_v31 = vmul.f32 %v2951_v7, %v2951_v7 }
 0x3b2   : > { %v2954_v11 = vmul.f32 %v2946_v4, %v2946_v4  ;;  %v2956_v24 = vmul.f32 %v2948_v5, %v2948_v5  ;;  %v2958_v28 = vmul.f32 %v2950_v6, %v2950_v6  ;;  %v2960_v35 = vmul.f32 %v2952_v18, %v2952_v18 }
 0x3b3   : > { %v2961_v27 = vadd.f32 %v2955_v10, %v2953_v52  ;;  %v3000_v10 = vpop.permute.xlu1 %2999 }
 0x3b4   : > { %v2970_v21 = vadd.f32 %v2956_v24, %v2954_v11  ;;  %v3005_v11 = vpop.permute.xlu0 %3004 }
 0x3b5   : > { %v2962_v33 = vadd.f32 %v2961_v27, %v2957_v20 }
 0x3b6   : > { %v2971_v36 = vadd.f32 %v2970_v21, %v2958_v28 }
 0x3b7   : > { %v2963_v37 = vadd.f32 %v2962_v33, %v2959_v31  ;;  %v3032_v28 = vpop.permute.xlu1 %3031 }
 0x3b8   : > { %v2972_v58 = vadd.f32 %v2971_v36, %v2960_v35  ;;  %v3037_v21 = vpop.permute.xlu0 %3036 }
 0x3b9   : > { %v2964_v38 = vrot.slane %v2963_v37, 4 }
 0x3ba   : > { %v2973_v39 = vrot.slane %v2972_v58, 4 }
 0x3bb   : > { %v2965_v41 = vadd.f32 %v2964_v38, %v2963_v37  ;;  %v3010_v31 = vpop.permute.xlu1 %3009 }
 0x3bc   : > { %v2974_v42 = vadd.f32 %v2973_v39, %v2972_v58  ;;  %v3015_v33 = vpop.permute.xlu0 %3014 }
 0x3bd   : > { %v2966_v43 = vrot.slane %v2965_v41, 2 }
 0x3be   : > { %v2975_v44 = vrot.slane %v2974_v42, 2 }
 0x3bf   : > { %v2967_v47 = vadd.f32 %v2966_v43, %v2965_v41 }
 0x3c0   : > { %v2976_v29 = vadd.f32 %v2975_v44, %v2974_v42 }
 0x3c1   : > { %v2968_v49 = vrot.slane %v2967_v47, 1 }
 0x3c2   : > { %v2977_v54 = vrot.slane %v2976_v29, 1 }
 0x3c3   : > { %v2969_v59 = vadd.f32 %v2968_v49, %v2967_v47 }
 0x3c4   : > { %v2978_v62 = vadd.f32 %v2977_v54, %v2976_v29 }
 0x3c5   : > { %v2979_v52 = vmul.f32 0.03125, %v2969_v59 }
 0x3c6   : > { %v2980_v24 = vmul.f32 0.03125, %v2978_v62 }
 0x3c7   : > { %v2981_v20 = vadd.f32 1e-05, %v2979_v52  ;;  %v3042_v52 = vpop.permute.xlu1 %3041 }
 0x3c8   : > { %v2982_v27 = vadd.f32 1e-05, %v2980_v24  ;;  %v3047_v24 = vpop.permute.xlu0 %3046 }
 0x3c9   : > { %11846 = vrsqrt.f32 %v2981_v20 }
 0x3ca   : > { %11848 = vrsqrt.f32 %v2982_v27 }
 0x3d3   : > { %v11847_v35 = vpop.eup %11846 }
 0x3d4   : > { %v11849_v36 = vpop.eup %11848  ;;  %v2991_v37 = vmul.f32 %v11847_v35, %v2951_v7  ;;  %v2985_v58 = vmul.f32 %v11847_v35, %v2945_v63  ;;  %v2987_v38 = vmul.f32 %v11847_v35, %v2947_v1  ;;  %v2989_v39 = vmul.f32 %v11847_v35, %v2949_v2 }
 0x3d5   : > { %v2992_v41 = vmul.f32 %v11849_v36, %v2952_v18  ;;  %v2986_v42 = vmul.f32 %v11849_v36, %v2946_v4  ;;  %v2988_v43 = vmul.f32 %v11849_v36, %v2948_v5  ;;  %v2990_v44 = vmul.f32 %v11849_v36, %v2950_v6 }
 0x3d6   : > { %v3017_v47 = vmul.f32 %v3000_v10, %v2985_v58  ;;  %v3019_v29 = vmul.f32 %v3005_v11, %v2987_v38  ;;  %v3023_v20 = vmul.f32 %v3015_v33, %v2991_v37  ;;  %v3021_v19 = vmul.f32 %v3010_v31, %v2989_v39 }
 0x3d7   : > { %v3018_v49 = vmul.f32 %v3000_v10, %v2986_v42  ;;  %v3020_v54 = vmul.f32 %v3005_v11, %v2988_v43  ;;  %v3022_v59 = vmul.f32 %v3010_v31, %v2990_v44  ;;  %v3024_v62 = vmul.f32 %v3015_v33, %v2992_v41  ;;  %v3057_v11 = vld [vmem:[%s18026_s5] sm:$0xff]  ;;  %v3084_v31 = vpop.permute.xlu1 %3083 }
 0x3d8   : > { %v3049_v27 = vadd.f32 %v3032_v28, %v3017_v47  ;;  %v3051_v9 = vadd.f32 %v3037_v21, %v3019_v29  ;;  %v3053_v5 = vadd.f32 %v3042_v52, %v3021_v19  ;;  %v3055_v6 = vadd.f32 %v3047_v24, %v3023_v20  ;;  %v3058_v19 = vld [vmem:[%s18026_s5 + $0x8] sm:$0xff] }
 0x3d9   : > { %v3050_v7 = vadd.f32 %v3032_v28, %v3018_v49  ;;  %v3052_v63 = vadd.f32 %v3037_v21, %v3020_v54  ;;  %v3054_v1 = vadd.f32 %v3042_v52, %v3022_v59  ;;  %v3056_v2 = vadd.f32 %v3047_v24, %v3024_v62  ;;  %v3060_v28 = vld [vmem:[%s18026_s5 + $0x18] sm:$0xff]  ;;  %v3061_v21 = vld [vmem:[%s18026_s5 + $0x20] sm:$0xff]  ;;  %v3104_v54 = vpop.permute.xlu0 %3103 }
 0x3da   : > { %v10762_v4 = vpack.c.bf16 %v3051_v9, %v3049_v27  ;;  %v10766_v10 = vpack.c.bf16 %v3055_v6, %v3053_v5  ;;  %v3059_v9 = vld [vmem:[%s18026_s5 + $0x10] sm:$0xff] }
 0x3db   : > { %v10760_v18 = vpack.c.bf16 %v3052_v63, %v3050_v7  ;;  %v10764_v35 = vpack.c.bf16 %v3056_v2, %v3054_v1 }
 0x3dd   : > { %10761 = vmatprep.subr.bf16.mxu0 %v10760_v18 }
 0x3de   : > { %10763 = vmatpush1.bf16.msra.mxu0 %v10762_v4 }
 0x3df   : > { %10765 = vmatprep.subr.bf16.mxu0 %v10764_v35 }
 0x3e2   : > { %10767 = vmatpush1.bf16.msra.mxu0 %v10766_v10 }
 0x3e5   : > { %10405 = vmatmul.mubr.msk.f32.vlgmr.msra.gmra.mrb[24].mxu0 %vm3141_vm11, %v3057_v11 }
 0x3e6   : > { %3248 = vmatprep.mubr.f32.mxu0 %v13494_v17 }
 0x3e9   : > { %10406 = vmatmul.mubr.msk.f32.gmra.mrb[26].mxu0 %vm3141_vm11, %v3058_v19 }
 0x3ea   : > { %3254 = vmatprep.mubr.f32.mxu0 %v13494_v17 }
 0x3ed   : > { %10407 = vmatmul.mubr.msk.f32.gmra.mrb[28].mxu0 %vm3141_vm11, %v3059_v9 }
 0x3ee   : > { %3260 = vmatprep.mubr.f32.mxu0 %v13494_v17 }
 0x3f1   : > { %10408 = vmatmul.mubr.msk.f32.gmra.mrb[30].mxu0 %vm3141_vm11, %v3060_v28 }
 0x3f2   : > { %3266 = vmatprep.mubr.f32.mxu0 %v13494_v17 }
 0x3f5   : > { %10409 = vmatmul.mubr.msk.f32.gmra.mrb[32].mxu0 %vm3141_vm11, %v3061_v21 }
 0x3f6   : > { %3272 = vmatprep.mubr.f32.mxu0 %v13494_v17 }
 0x4b8   : > { %v3244_v33 = vpop.f32.mrb[24].mxu0 }
 0x4b9   : > { %v3245_v36 = vadd.f32 %v3244_v33, %v3084_v31  ;;  %v3246_v37 = vpop.f32.mrb[25].mxu0 }
 0x4ba   : > { %v3247_v58 = vadd.f32 %v3246_v37, %v3084_v31 }
 0x4bb   : > { %v3360_v38 = vmul.f32 0.35355338, %v3245_v36 }
 0x4bc   : > { %v3361_v39 = vmul.f32 0.35355338, %v3247_v58  ;;  %v13810_v41 = vpop.f32.mrb[26].mxu0 }
 0x4bd   : > { %18444 = vst [vmem:[#allocation33_spill] sm:$0xff] %v13810_v41  ;;  %3362 = vxpose.xlu1.b32.start.end [1/1] (short) %v3360_v38, 128  ;;  %v13812_v42 = vpop.f32.mrb[27].mxu0 }
 0x4be   : > { %18445 = vst [vmem:[#allocation34_spill] sm:$0xff] %v13812_v42  ;;  %3394 = vxpose.xlu0.b32.start.end [1/1] (short) %v3361_v39, 128 }
 0x4c0   : > { %v13814_v43 = vpop.f32.mrb[28].mxu0 }
 0x4c1   : > { %18446 = vst [vmem:[#allocation35_spill] sm:$0xff] %v13814_v43  ;;  %v13816_v44 = vpop.f32.mrb[29].mxu0 }
 0x4c2   : > { %18447 = vst [vmem:[#allocation36_spill] sm:$0xff] %v13816_v44 }
 0x4c4   : > { %v13818_v47 = vpop.f32.mrb[30].mxu0 }
 0x4c5   : > { %18448 = vst [vmem:[#allocation37_spill] sm:$0xff] %v13818_v47  ;;  %v13820_v29 = vpop.f32.mrb[31].mxu0 }
 0x4c6   : > { %18449 = vst [vmem:[#allocation38_spill] sm:$0xff] %v13820_v29 }
 0x4c8   : > { %v3268_v49 = vpop.f32.mrb[32].mxu0 }
 0x4c9   : > { %v3270_v59 = vpop.f32.mrb[33].mxu0  ;;  %v3269_v52 = vadd.f32 %v3268_v49, %v3104_v54 }
 0x4ca   : > { %v3271_v62 = vadd.f32 %v3270_v59, %v3104_v54 }
 0x4cc   : > { %3523 = vmatprep.subr.mxu1 %v3271_v62 }
 0x4cd   : > { %3524 = vmatpush1.msra.mxu1 %v3269_v52 }
 0x53d   : > { %v3378_v24 = vpop.trf.xlu1 }
 0x53e   : > { %10417 = vmatmul.mubr.msk.f32.vlgmr.msra.gmra.mrb[0].mxu1 %vm3426_vm15, %v3378_v24  ;;  %v3410_v5 = vpop.trf.xlu0 }
 0x53f   : > { %3593 = vmatprep.mubr.f32.mxu1 %v13494_v17 }
 0x541   : > { %v3379_v20 = vpop.trf.xlu1 }
 0x542   : > { %10418 = vmatmul.mubr.msk.f32.gmra.mrb[2].mxu1 %vm3426_vm15, %v3379_v20  ;;  %v3411_v10 = vpop.trf.xlu0 }
 0x543   : > { %3599 = vmatprep.mubr.f32.mxu1 %v13494_v17 }
 0x545   : > { %v3380_v27 = vpop.trf.xlu1 }
 0x546   : > { %10419 = vmatmul.mubr.msk.f32.gmra.mrb[4].mxu1 %vm3426_vm15, %v3380_v27  ;;  %v3412_v19 = vpop.trf.xlu0 }
 0x547   : > { %3605 = vmatprep.mubr.f32.mxu1 %v13494_v17 }
 0x549   : > { %v3381_v7 = vpop.trf.xlu1 }
 0x54a   : > { %10420 = vmatmul.mubr.msk.f32.gmra.mrb[6].mxu1 %vm3426_vm15, %v3381_v7  ;;  %v3413_v21 = vpop.trf.xlu0 }
 0x54b   : > { %3611 = vmatprep.mubr.f32.mxu1 %v13494_v17 }
 0x54d   : > { %v3382_v63 = vpop.trf.xlu1 }
 0x54e   : > { %10421 = vmatmul.mubr.msk.f32.gmra.mrb[8].mxu1 %vm3426_vm15, %v3382_v63  ;;  %v3414_v33 = vpop.trf.xlu0 }
 0x54f   : > { %3617 = vmatprep.mubr.f32.mxu1 %v13494_v17 }
 0x551   : > { %v3383_v1 = vpop.trf.xlu1 }
 0x552   : > { %10422 = vmatmul.mubr.msk.f32.gmra.mrb[10].mxu1 %vm3426_vm15, %v3383_v1  ;;  %v3415_v37 = vpop.trf.xlu0 }
 0x553   : > { %3623 = vmatprep.mubr.f32.mxu1 %v13494_v17 }
 0x555   : > { %v3384_v2 = vpop.trf.xlu1 }
 0x556   : > { %10423 = vmatmul.mubr.msk.f32.gmra.mrb[12].mxu1 %vm3426_vm15, %v3384_v2  ;;  %v3416_v58 = vpop.trf.xlu0 }
 0x557   : > { %3629 = vmatprep.mubr.f32.mxu1 %v13494_v17 }
 0x559   : > { %v3385_v18 = vpop.trf.xlu1 }
 0x55a   : > { %10424 = vmatmul.mubr.msk.f32.gmra.mrb[14].mxu1 %vm3426_vm15, %v3385_v18  ;;  %v3417_v38 = vpop.trf.xlu0 }
 0x55b   : > { %3635 = vmatprep.mubr.f32.mxu1 %v13494_v17 }
 0x55d   : > { %v3386_v4 = vpop.trf.xlu1 }
 0x55e   : > { %10425 = vmatmul.mubr.msk.f32.gmra.mrb[16].mxu1 %vm3426_vm15, %v3386_v4  ;;  %v3418_v39 = vpop.trf.xlu0 }
 0x55f   : > { %3641 = vmatprep.mubr.f32.mxu1 %v13494_v17 }
 0x561   : > { %v3387_v6 = vpop.trf.xlu1 }
 0x562   : > { %10426 = vmatmul.mubr.msk.f32.gmra.mrb[18].mxu1 %vm3426_vm15, %v3387_v6  ;;  %v3419_v49 = vpop.trf.xlu0 }
 0x563   : > { %3647 = vmatprep.mubr.f32.mxu1 %v13494_v17 }
 0x565   : > { %v3388_v35 = vpop.trf.xlu1 }
 0x566   : > { %10427 = vmatmul.mubr.msk.f32.gmra.mrb[20].mxu1 %vm3426_vm15, %v3388_v35  ;;  %v3420_v54 = vpop.trf.xlu0 }
 0x567   : > { %3653 = vmatprep.mubr.f32.mxu1 %v13494_v17 }
 0x569   : > { %v3389_v11 = vpop.trf.xlu1 }
 0x56a   : > { %10428 = vmatmul.mubr.msk.f32.gmra.mrb[22].mxu1 %vm3426_vm15, %v3389_v11  ;;  %v3421_v59 = vpop.trf.xlu0 }
 0x56b   : > { %3659 = vmatprep.mubr.f32.mxu1 %v13494_v17 }
 0x56d   : > { %v3390_v9 = vpop.trf.xlu1 }
 0x56e   : > { %10429 = vmatmul.mubr.msk.f32.gmra.mrb[24].mxu1 %vm3426_vm15, %v3390_v9  ;;  %v3422_v62 = vpop.trf.xlu0 }
 0x56f   : > { %3665 = vmatprep.mubr.f32.mxu1 %v13494_v17 }
 0x571   : > { %v3391_v28 = vpop.trf.xlu1 }
 0x572   : > { %10430 = vmatmul.mubr.msk.f32.gmra.mrb[26].mxu1 %vm3426_vm15, %v3391_v28  ;;  %v3423_v52 = vpop.trf.xlu0 }
 0x573   : > { %3671 = vmatprep.mubr.f32.mxu1 %v13494_v17 }
 0x575   : > { %v3392_v31 = vpop.trf.xlu1 }
 0x576   : > { %10431 = vmatmul.mubr.msk.f32.gmra.mrb[28].mxu1 %vm3426_vm15, %v3392_v31  ;;  %v3424_v24 = vpop.trf.xlu0 }
 0x577   : > { %3677 = vmatprep.mubr.f32.mxu1 %v13494_v17 }
 0x579   : > { %v3393_v36 = vpop.trf.xlu1 }
 0x57a   : > { %10432 = vmatmul.mubr.msk.f32.gmra.mrb[30].mxu1 %vm3426_vm15, %v3393_v36  ;;  %v3425_v20 = vpop.trf.xlu0 }
 0x57b   : > { %3683 = vmatprep.mubr.f32.mxu1 %v13494_v17 }
 0x57e   : > { %10433 = vmatmul.mubr.msk.f32.gmra.mrb[32].mxu1 %vm3426_vm15, %v3410_v5 }
 0x57f   : > { %3689 = vmatprep.mubr.f32.mxu1 %v13494_v17 }
 0x582   : > { %10434 = vmatmul.mubr.msk.f32.gmra.mrb[34].mxu1 %vm3426_vm15, %v3411_v10 }
 0x583   : > { %3695 = vmatprep.mubr.f32.mxu1 %v13494_v17 }
 0x586   : > { %10435 = vmatmul.mubr.msk.f32.gmra.mrb[36].mxu1 %vm3426_vm15, %v3412_v19 }
 0x587   : > { %3701 = vmatprep.mubr.f32.mxu1 %v13494_v17 }
 0x58a   : > { %10436 = vmatmul.mubr.msk.f32.gmra.mrb[38].mxu1 %vm3426_vm15, %v3413_v21 }
 0x58b   : > { %3707 = vmatprep.mubr.f32.mxu1 %v13494_v17 }
 0x58e   : > { %10437 = vmatmul.mubr.msk.f32.gmra.mrb[40].mxu1 %vm3426_vm15, %v3414_v33 }
 0x58f   : > { %3713 = vmatprep.mubr.f32.mxu1 %v13494_v17 }
 0x592   : > { %10438 = vmatmul.mubr.msk.f32.gmra.mrb[42].mxu1 %vm3426_vm15, %v3415_v37 }
 0x593   : > { %3719 = vmatprep.mubr.f32.mxu1 %v13494_v17 }
 0x596   : > { %10439 = vmatmul.mubr.msk.f32.gmra.mrb[44].mxu1 %vm3426_vm15, %v3416_v58 }
 0x597   : > { %3725 = vmatprep.mubr.f32.mxu1 %v13494_v17 }
 0x59a   : > { %10440 = vmatmul.mubr.msk.f32.gmra.mrb[46].mxu1 %vm3426_vm15, %v3417_v38 }
 0x59b   : > { %3731 = vmatprep.mubr.f32.mxu1 %v13494_v17 }
 0x59e   : > { %10441 = vmatmul.mubr.msk.f32.gmra.mrb[48].mxu1 %vm3426_vm15, %v3418_v39 }
 0x59f   : > { %3737 = vmatprep.mubr.f32.mxu1 %v13494_v17 }
 0x5a2   : > { %10442 = vmatmul.mubr.msk.f32.gmra.mrb[50].mxu1 %vm3426_vm15, %v3419_v49 }
 0x5a3   : > { %3743 = vmatprep.mubr.f32.mxu1 %v13494_v17 }
 0x5a6   : > { %10443 = vmatmul.mubr.msk.f32.gmra.mrb[52].mxu1 %vm3426_vm15, %v3420_v54 }
 0x5a7   : > { %3749 = vmatprep.mubr.f32.mxu1 %v13494_v17 }
 0x5aa   : > { %10444 = vmatmul.mubr.msk.f32.gmra.mrb[54].mxu1 %vm3426_vm15, %v3421_v59 }
 0x5ab   : > { %3755 = vmatprep.mubr.f32.mxu1 %v13494_v17 }
 0x5ae   : > { %10445 = vmatmul.mubr.msk.f32.gmra.mrb[56].mxu1 %vm3426_vm15, %v3422_v62 }
 0x5af   : > { %3761 = vmatprep.mubr.f32.mxu1 %v13494_v17 }
 0x5b2   : > { %10446 = vmatmul.mubr.msk.f32.gmra.mrb[58].mxu1 %vm3426_vm15, %v3423_v52 }
 0x5b3   : > { %3767 = vmatprep.mubr.f32.mxu1 %v13494_v17 }
 0x5b6   : > { %10447 = vmatmul.mubr.msk.f32.gmra.mrb[60].mxu1 %vm3426_vm15, %v3424_v24 }
 0x5b7   : > { %3773 = vmatprep.mubr.f32.mxu1 %v13494_v17 }
 0x5ba   : > { %10448 = vmatmul.mubr.msk.f32.gmra.mrb[62].mxu1 %vm3426_vm15, %v3425_v20 }
 0x611   : > { %v13885_v27 = vpop.f32.mrb[0].mxu1 }
 0x612   : > { %v13887_v7 = vpop.f32.mrb[1].mxu1 }
 0x613   : > { %v3780_v63 = vmax.f32 %v13885_v27, %v13887_v7 }
 0x615   : > { %3781 = vmax.xlane.f32.xlu0 %v3780_v63  ;;  %v13891_v1 = vpop.f32.mrb[2].mxu1 }
 0x616   : > { %v13893_v2 = vpop.f32.mrb[3].mxu1 }
 0x617   : > { %v3783_v18 = vmax.f32 %v13891_v1, %v13893_v2 }
 0x619   : > { %3784 = vmax.xlane.f32.xlu1 %v3783_v18  ;;  %v13897_v4 = vpop.f32.mrb[4].mxu1 }
 0x61a   : > { %v13899_v17 = vpop.f32.mrb[5].mxu1 }
 0x61b   : > { %v3786_v5 = vmax.f32 %v13897_v4, %v13899_v17 }
 0x61d   : > { %3787 = vmax.xlane.f32.xlu0 %v3786_v5  ;;  %v13903_v6 = vpop.f32.mrb[6].mxu1 }
 0x61e   : > { %v13905_v35 = vpop.f32.mrb[7].mxu1 }
 0x61f   : > { %v3789_v10 = vmax.f32 %v13903_v6, %v13905_v35 }
 0x621   : > { %3790 = vmax.xlane.f32.xlu1 %v3789_v10  ;;  %v13909_v11 = vpop.f32.mrb[8].mxu1 }
 0x622   : > { %v13911_v19 = vpop.f32.mrb[9].mxu1 }
 0x623   : > { %v3792_v9 = vmax.f32 %v13909_v11, %v13911_v19 }
 0x625   : > { %3793 = vmax.xlane.f32.xlu0 %v3792_v9  ;;  %v13915_v28 = vpop.f32.mrb[10].mxu1 }
 0x626   : > { %v13917_v21 = vpop.f32.mrb[11].mxu1 }
 0x627   : > { %v3795_v31 = vmax.f32 %v13915_v28, %v13917_v21 }
 0x629   : > { %3796 = vmax.xlane.f32.xlu1 %v3795_v31  ;;  %v13921_v33 = vpop.f32.mrb[12].mxu1 }
 0x62a   : > { %v13923_v36 = vpop.f32.mrb[13].mxu1 }
 0x62b   : > { %v3798_v37 = vmax.f32 %v13921_v33, %v13923_v36 }
 0x62d   : > { %3799 = vmax.xlane.f32.xlu0 %v3798_v37  ;;  %v13927_v58 = vpop.f32.mrb[14].mxu1 }
 0x62e   : > { %v13929_v38 = vpop.f32.mrb[15].mxu1 }
 0x62f   : > { %v3801_v39 = vmax.f32 %v13927_v58, %v13929_v38 }
 0x631   : > { %3802 = vmax.xlane.f32.xlu1 %v3801_v39  ;;  %v13933_v49 = vpop.f32.mrb[16].mxu1 }
 0x632   : > { %v13935_v54 = vpop.f32.mrb[17].mxu1 }
 0x633   : > { %v3804_v59 = vmax.f32 %v13933_v49, %v13935_v54 }
 0x635   : > { %3805 = vmax.xlane.f32.xlu0 %v3804_v59  ;;  %v13939_v62 = vpop.f32.mrb[18].mxu1 }
 0x636   : > { %v13941_v52 = vpop.f32.mrb[19].mxu1 }
 0x637   : > { %v3807_v24 = vmax.f32 %v13939_v62, %v13941_v52 }
 0x639   : > { %3808 = vmax.xlane.f32.xlu1 %v3807_v24  ;;  %v13945_v20 = vpop.f32.mrb[20].mxu1 }
 0x63a   : > { %v13947_v63 = vpop.f32.mrb[21].mxu1 }
 0x63b   : > { %v3810_v18 = vmax.f32 %v13945_v20, %v13947_v63 }
 0x63d   : > { %3811 = vmax.xlane.f32.xlu0 %v3810_v18  ;;  %v13951_v5 = vpop.f32.mrb[22].mxu1 }
 0x63e   : > { %v13953_v10 = vpop.f32.mrb[23].mxu1 }
 0x63f   : > { %v3813_v9 = vmax.f32 %v13951_v5, %v13953_v10 }
 0x641   : > { %3814 = vmax.xlane.f32.xlu1 %v3813_v9  ;;  %v13957_v31 = vpop.f32.mrb[24].mxu1 }
 0x642   : > { %v13959_v37 = vpop.f32.mrb[25].mxu1 }
 0x643   : > { %v3816_v39 = vmax.f32 %v13957_v31, %v13959_v37 }
 0x645   : > { %3817 = vmax.xlane.f32.xlu0 %v3816_v39  ;;  %v13963_v59 = vpop.f32.mrb[26].mxu1 }
 0x646   : > { %v13965_v24 = vpop.f32.mrb[27].mxu1 }
 0x647   : > { %v3819_v18 = vmax.f32 %v13963_v59, %v13965_v24 }
 0x649   : > { %3820 = vmax.xlane.f32.xlu1 %v3819_v18  ;;  %v13969_v53 = vpop.f32.mrb[28].mxu1 }
 0x64a   : > { %v13971_v16 = vpop.f32.mrb[29].mxu1 }
 0x64b   : > { %v3822_v9 = vmax.f32 %v13969_v53, %v13971_v16 }
 0x64d   : > { %3823 = vmax.xlane.f32.xlu0 %v3822_v9  ;;  %v13975_v25 = vpop.f32.mrb[30].mxu1 }
 0x64e   : > { %v13977_v30 = vpop.f32.mrb[31].mxu1 }
 0x64f   : > { %v3825_v39 = vmax.f32 %v13975_v25, %v13977_v30 }
 0x651   : > { %3826 = vmax.xlane.f32.xlu1 %v3825_v39  ;;  %v13981_v26 = vpop.f32.mrb[32].mxu1 }
 0x652   : > { %v13983_v22 = vpop.f32.mrb[33].mxu1 }
 0x653   : > { %v3828_v18 = vmax.f32 %v13981_v26, %v13983_v22 }
 0x655   : > { %3829 = vmax.xlane.f32.xlu0 %v3828_v18  ;;  %v13987_v14 = vpop.f32.mrb[34].mxu1 }
 0x656   : > { %v13989_v13 = vpop.f32.mrb[35].mxu1 }
 0x657   : > { %18450 = vst [vmem:[#allocation39_spill] sm:$0xff] %v13989_v13  ;;  %v3831_v9 = vmax.f32 %v13987_v14, %v13989_v13 }
 0x659   : > { %3832 = vmax.xlane.f32.xlu1 %v3831_v9  ;;  %v13993_v61 = vpop.f32.mrb[36].mxu1 }
 0x65a   : > { %18451 = vst [vmem:[#allocation40_spill] sm:$0xff] %v13993_v61  ;;  %v13995_v57 = vpop.f32.mrb[37].mxu1 }
 0x65b   : > { %18452 = vst [vmem:[#allocation41_spill] sm:$0xff] %v13995_v57  ;;  %v3834_v39 = vmax.f32 %v13993_v61, %v13995_v57 }
 0x65d   : > { %3835 = vmax.xlane.f32.xlu0 %v3834_v39  ;;  %v13999_v56 = vpop.f32.mrb[38].mxu1 }
 0x65e   : > { %18453 = vst [vmem:[#allocation42_spill] sm:$0xff] %v13999_v56  ;;  %v14001_v55 = vpop.f32.mrb[39].mxu1 }
 0x65f   : > { %18454 = vst [vmem:[#allocation43_spill] sm:$0xff] %v14001_v55  ;;  %v3837_v18 = vmax.f32 %v13999_v56, %v14001_v55 }
 0x661   : > { %3838 = vmax.xlane.f32.xlu1 %v3837_v18  ;;  %v14005_v48 = vpop.f32.mrb[40].mxu1 }
 0x662   : > { %18455 = vst [vmem:[#allocation44_spill] sm:$0xff] %v14005_v48  ;;  %v14007_v51 = vpop.f32.mrb[41].mxu1 }
 0x663   : > { %18456 = vst [vmem:[#allocation45_spill] sm:$0xff] %v14007_v51  ;;  %v3840_v9 = vmax.f32 %v14005_v48, %v14007_v51 }
 0x665   : > { %3841 = vmax.xlane.f32.xlu0 %v3840_v9  ;;  %v14011_v46 = vpop.f32.mrb[42].mxu1 }
 0x666   : > { %18457 = vst [vmem:[#allocation46_spill] sm:$0xff] %v14011_v46  ;;  %v14013_v3 = vpop.f32.mrb[43].mxu1 }
 0x667   : > { %18458 = vst [vmem:[#allocation47_spill] sm:$0xff] %v14013_v3  ;;  %v3843_v39 = vmax.f32 %v14011_v46, %v14013_v3  ;;  %v3063_v3 = vld [vmem:[%s18026_s5 + $0x30] sm:$0xff] }
 0x669   : > { %3844 = vmax.xlane.f32.xlu1 %v3843_v39  ;;  %v14017_v60 = vpop.f32.mrb[44].mxu1  ;;  %v3064_v39 = vld [vmem:[%s18026_s5 + $0x38] sm:$0xff] }
 0x66a   : > { %18459 = vst [vmem:[#allocation48_spill] sm:$0xff] %v14017_v60  ;;  %v14019_v50 = vpop.f32.mrb[45].mxu1 }
 0x66b   : > { %18460 = vst [vmem:[#allocation49_spill] sm:$0xff] %v14019_v50  ;;  %v3846_v18 = vmax.f32 %v14017_v60, %v14019_v50  ;;  %v3062_v60 = vld [vmem:[%s18026_s5 + $0x28] sm:$0xff] }
 0x66c   : > { %10410 = vmatmul.mubr.msk.f32.gmra.mrb[34].mxu0 %vm3141_vm11, %v3062_v60  ;;  %v3065_v60 = vld [vmem:[%s18026_s5 + $0x40] sm:$0xff] }
 0x66d   : > { %3847 = vmax.xlane.f32.xlu0 %v3846_v18  ;;  %v14023_v45 = vpop.f32.mrb[46].mxu1 }
 0x66e   : > { %18461 = vst [vmem:[#allocation50_spill] sm:$0xff] %v14023_v45  ;;  %v14025_v34 = vpop.f32.mrb[47].mxu1 }
 0x66f   : > { %18462 = vst [vmem:[#allocation51_spill] sm:$0xff] %v14025_v34  ;;  %v3849_v9 = vmax.f32 %v14023_v45, %v14025_v34 }
 0x671   : > { %3850 = vmax.xlane.f32.xlu1 %v3849_v9  ;;  %v14029_v32 = vpop.f32.mrb[48].mxu1  ;;  %v12655_v9 = vld [vmem:[#allocation3] sm:$0xff] }
 0x672   : > { %v14031_v8 = vpop.f32.mrb[49].mxu1  ;;  %3278 = vmatprep.mubr.f32.mxu0 %v12655_v9 }
 0x673   : > { %10411 = vmatmul.mubr.msk.f32.gmra.mrb[36].mxu0 %vm3141_vm11, %v3063_v3 }
 0x674   : > { %3284 = vmatprep.mubr.f32.mxu0 %v12655_v9 }
 0x675   : > { %v14035_v0 = vpop.f32.mrb[50].mxu1 }
 0x676   : > { %v14037_v23 = vpop.f32.mrb[51].mxu1 }
 0x677   : > { %10412 = vmatmul.mubr.msk.f32.gmra.mrb[38].mxu0 %vm3141_vm11, %v3064_v39 }
 0x678   : > { %3290 = vmatprep.mubr.f32.mxu0 %v12655_v9 }
 0x679   : > { %v14041_v15 = vpop.f32.mrb[52].mxu1 }
 0x67a   : > { %v14043_v12 = vpop.f32.mrb[53].mxu1 }
 0x67b   : > { %10413 = vmatmul.mubr.msk.f32.gmra.mrb[40].mxu0 %vm3141_vm11, %v3065_v60 }
 0x67c   : > { %3296 = vmatprep.mubr.f32.mxu0 %v12655_v9 }
 0x67d   : > { %v14047_v40 = vpop.f32.mrb[54].mxu1 }
 0x67e   : > { %v14049_v29 = vpop.f32.mrb[55].mxu1 }
 0x681   : > { %v14053_v47 = vpop.f32.mrb[56].mxu1 }
 0x682   : > { %v14055_v44 = vpop.f32.mrb[57].mxu1 }
 0x685   : > { %v14059_v43 = vpop.f32.mrb[58].mxu1 }
 0x686   : > { %v14061_v42 = vpop.f32.mrb[59].mxu1 }
 0x689   : > { %v14065_v41 = vpop.f32.mrb[60].mxu1 }
 0x68a   : > { %v14067_v34 = vpop.f32.mrb[61].mxu1 }
 0x68d   : > { %v14071_v45 = vpop.f32.mrb[62].mxu1 }
 0x68e   : > { %v14073_v50 = vpop.f32.mrb[63].mxu1 }
 0x6a2   : > { %v3782_v18 = vpop.xlane.xlu0 %3781 }
 0x6a3   : > { %v3876_v46 = vsub.f32 %v13885_v27, %v3782_v18  ;;  %v3877_v3 = vsub.f32 %v13887_v7, %v3782_v18 }
 0x6a5   : > { %v3940_v51 = vmul.f32 1.442695, %v3876_v46  ;;  %v3942_v48 = vmul.f32 1.442695, %v3877_v3 }
 0x6a6   : > { %v3785_v55 = vpop.xlane.xlu1 %3784 }
 0x6a7   : > { %11850 = vpow2.f32 %v3940_v51  ;;  %v3878_v56 = vsub.f32 %v13891_v1, %v3785_v55  ;;  %v3879_v39 = vsub.f32 %v13893_v2, %v3785_v55 }
 0x6a8   : > { %11852 = vpow2.f32 %v3942_v48 }
 0x6a9   : > { %v3944_v57 = vmul.f32 1.442695, %v3878_v56  ;;  %v3946_v61 = vmul.f32 1.442695, %v3879_v39 }
 0x6aa   : > { %v3788_v13 = vpop.xlane.xlu0 %3787 }
 0x6ab   : > { %11854 = vpow2.f32 %v3944_v57  ;;  %v3880_v9 = vsub.f32 %v13897_v4, %v3788_v13  ;;  %v3881_v60 = vsub.f32 %v13899_v17, %v3788_v13 }
 0x6ac   : > { %11856 = vpow2.f32 %v3946_v61 }
 0x6ad   : > { %v3948_v27 = vmul.f32 1.442695, %v3880_v9  ;;  %v3950_v7 = vmul.f32 1.442695, %v3881_v60 }
 0x6ae   : > { %v3791_v46 = vpop.xlane.xlu1 %3790 }
 0x6af   : > { %11858 = vpow2.f32 %v3948_v27  ;;  %v3882_v51 = vsub.f32 %v13903_v6, %v3791_v46  ;;  %v3883_v1 = vsub.f32 %v13905_v35, %v3791_v46 }
 0x6b0   : > { %11860 = vpow2.f32 %v3950_v7  ;;  %v18463_v7 = vmax.f32 %v14029_v32, %v14031_v8 }
 0x6b1   : > { %v14101_v55 = vpop.eup %11850  ;;  %v3952_v48 = vmul.f32 1.442695, %v3882_v51  ;;  %v3954_v56 = vmul.f32 1.442695, %v3883_v1 }
 0x6b2   : > { %v14103_v2 = vpop.eup %11852  ;;  %v3794_v57 = vpop.xlane.xlu0 %3793 }
 0x6b3   : > { %11862 = vpow2.f32 %v3952_v48  ;;  %v3884_v13 = vsub.f32 %v13909_v11, %v3794_v57  ;;  %v3885_v61 = vsub.f32 %v13911_v19, %v3794_v57  ;;  %v4068_v4 = vadd.f32 %v14103_v2, %v14101_v55 }
 0x6b4   : > { %11864 = vpow2.f32 %v3954_v56 }
 0x6b5   : > { %v14109_v17 = vpop.eup %11854  ;;  %v3956_v6 = vmul.f32 1.442695, %v3884_v13  ;;  %v3958_v35 = vmul.f32 1.442695, %v3885_v61  ;;  %4069 = vadd.xlane.f32.xlu0 %v4068_v4  ;;  %v18464_v13 = vmax.f32 %v14035_v0, %v14037_v23 }
 0x6b6   : > { %v14111_v18 = vpop.eup %11856  ;;  %v3797_v3 = vpop.xlane.xlu1 %3796 }
 0x6b7   : > { %11866 = vpow2.f32 %v3956_v6  ;;  %v3886_v39 = vsub.f32 %v13915_v28, %v3797_v3  ;;  %v3887_v9 = vsub.f32 %v13917_v21, %v3797_v3  ;;  %v4071_v11 = vadd.f32 %v14111_v18, %v14109_v17 }
 0x6b8   : > { %11868 = vpow2.f32 %v3958_v35 }
 0x6b9   : > { %v14117_v19 = vpop.eup %11858  ;;  %v3960_v60 = vmul.f32 1.442695, %v3886_v39  ;;  %v3962_v27 = vmul.f32 1.442695, %v3887_v9  ;;  %3853 = vmax.xlane.f32.xlu0 %v18463_v7  ;;  %4072 = vadd.xlane.f32.xlu1 %v4071_v11  ;;  %v18465_v9 = vmax.f32 %v14041_v15, %v14043_v12 }
 0x6ba   : > { %v14122_v46 = vpop.eup %11860  ;;  %v3800_v51 = vpop.xlane.xlu0 %3799 }
 0x6bb   : > { %11870 = vpow2.f32 %v3960_v60  ;;  %v3888_v28 = vsub.f32 %v13921_v33, %v3800_v51  ;;  %v3889_v21 = vsub.f32 %v13923_v36, %v3800_v51  ;;  %v4074_v1 = vadd.f32 %v14122_v46, %v14117_v19 }
 0x6bc   : > { %11872 = vpow2.f32 %v3962_v27 }
 0x6bd   : > { %v14128_v48 = vpop.eup %11862  ;;  %v3964_v56 = vmul.f32 1.442695, %v3888_v28  ;;  %v3966_v57 = vmul.f32 1.442695, %v3889_v21  ;;  %4075 = vadd.xlane.f32.xlu0 %v4074_v1  ;;  %3856 = vmax.xlane.f32.xlu1 %v18464_v13  ;;  %v18466_v21 = vmax.f32 %v14047_v40, %v14049_v29 }
 0x6be   : > { %v14133_v61 = vpop.eup %11864  ;;  %v3803_v4 = vpop.xlane.xlu1 %3802 }
 0x6bf   : > { %11874 = vpow2.f32 %v3964_v56  ;;  %v3890_v33 = vsub.f32 %v13927_v58, %v3803_v4  ;;  %v3891_v36 = vsub.f32 %v13929_v38, %v3803_v4  ;;  %v4077_v6 = vadd.f32 %v14133_v61, %v14128_v48 }
 0x6c0   : > { %11876 = vpow2.f32 %v3966_v57 }
 0x6c1   : > { %v14139_v35 = vpop.eup %11866  ;;  %v3968_v3 = vmul.f32 1.442695, %v3890_v33  ;;  %v3970_v39 = vmul.f32 1.442695, %v3891_v36  ;;  %3859 = vmax.xlane.f32.xlu0 %v18465_v9  ;;  %4078 = vadd.xlane.f32.xlu1 %v4077_v6  ;;  %v18467_v36 = vmax.f32 %v14053_v47, %v14055_v44 }
 0x6c2   : > { %v14144_v11 = vpop.eup %11868  ;;  %v3806_v60 = vpop.xlane.xlu0 %3805 }
 0x6c3   : > { %11878 = vpow2.f32 %v3968_v3  ;;  %v3892_v58 = vsub.f32 %v13933_v49, %v3806_v60  ;;  %v3893_v38 = vsub.f32 %v13935_v54, %v3806_v60  ;;  %v4080_v27 = vadd.f32 %v14144_v11, %v14139_v35 }
 0x6c4   : > { %11880 = vpow2.f32 %v3970_v39 }
 0x6c5   : > { %v14150_v7 = vpop.eup %11870  ;;  %v3972_v51 = vmul.f32 1.442695, %v3892_v58  ;;  %v3974_v28 = vmul.f32 1.442695, %v3893_v38  ;;  %4081 = vadd.xlane.f32.xlu0 %v4080_v27  ;;  %3862 = vmax.xlane.f32.xlu1 %v18466_v21  ;;  %v18468_v38 = vmax.f32 %v14059_v43, %v14061_v42 }
 0x6c6   : > { %v14155_v1 = vpop.eup %11872  ;;  %v3809_v56 = vpop.xlane.xlu1 %3808 }
 0x6c7   : > { %11882 = vpow2.f32 %v3972_v51  ;;  %v3894_v49 = vsub.f32 %v13939_v62, %v3809_v56  ;;  %v3895_v54 = vsub.f32 %v13941_v52, %v3809_v56  ;;  %v4083_v57 = vadd.f32 %v14155_v1, %v14150_v7 }
 0x6c8   : > { %11884 = vpow2.f32 %v3974_v28 }
 0x6c9   : > { %v14161_v13 = vpop.eup %11874  ;;  %v3976_v4 = vmul.f32 1.442695, %v3894_v49  ;;  %v3978_v33 = vmul.f32 1.442695, %v3895_v54  ;;  %3865 = vmax.xlane.f32.xlu0 %v18467_v36  ;;  %4084 = vadd.xlane.f32.xlu1 %v4083_v57  ;;  %v18469_v54 = vmax.f32 %v14065_v41, %v14067_v34 }
 0x6ca   : > { %v14166_v6 = vpop.eup %11876  ;;  %v3812_v3 = vpop.xlane.xlu0 %3811 }
 0x6cb   : > { %11886 = vpow2.f32 %v3976_v4  ;;  %v3896_v62 = vsub.f32 %v13945_v20, %v3812_v3  ;;  %v3897_v52 = vsub.f32 %v13947_v63, %v3812_v3  ;;  %v4086_v39 = vadd.f32 %v14166_v6, %v14161_v13 }
 0x6cc   : > { %11888 = vpow2.f32 %v3978_v33 }
 0x6cd   : > { %v14172_v9 = vpop.eup %11878  ;;  %v3980_v60 = vmul.f32 1.442695, %v3896_v62  ;;  %v3982_v58 = vmul.f32 1.442695, %v3897_v52  ;;  %4087 = vadd.xlane.f32.xlu0 %v4086_v39  ;;  %3868 = vmax.xlane.f32.xlu1 %v18468_v38  ;;  %v18470_v52 = vmax.f32 %v14071_v45, %v14073_v50 }
 0x6ce   : > { %v14177_v27 = vpop.eup %11880  ;;  %v3815_v51 = vpop.xlane.xlu1 %3814 }
 0x6cf   : > { %11890 = vpow2.f32 %v3980_v60  ;;  %v3898_v20 = vsub.f32 %v13951_v5, %v3815_v51  ;;  %v3899_v63 = vsub.f32 %v13953_v10, %v3815_v51  ;;  %v4089_v28 = vadd.f32 %v14177_v27, %v14172_v9 }
 0x6d0   : > { %11892 = vpow2.f32 %v3982_v58 }
 0x6d1   : > { %v14183_v21 = vpop.eup %11882  ;;  %v3984_v56 = vmul.f32 1.442695, %v3898_v20  ;;  %v3986_v49 = vmul.f32 1.442695, %v3899_v63  ;;  %3871 = vmax.xlane.f32.xlu0 %v18469_v54  ;;  %4090 = vadd.xlane.f32.xlu1 %v4089_v28 }
 0x6d2   : > { %v14188_v57 = vpop.eup %11884  ;;  %v3818_v4 = vpop.xlane.xlu0 %3817 }
 0x6d3   : > { %11894 = vpow2.f32 %v3984_v56  ;;  %v3900_v5 = vsub.f32 %v13957_v31, %v3818_v4  ;;  %v3901_v10 = vsub.f32 %v13959_v37, %v3818_v4  ;;  %v4092_v33 = vadd.f32 %v14188_v57, %v14183_v21 }
 0x6d4   : > { %11896 = vpow2.f32 %v3986_v49 }
 0x6d5   : > { %v14194_v36 = vpop.eup %11886  ;;  %v3988_v3 = vmul.f32 1.442695, %v3900_v5  ;;  %v3990_v62 = vmul.f32 1.442695, %v3901_v10  ;;  %4093 = vadd.xlane.f32.xlu0 %v4092_v33  ;;  %3874 = vmax.xlane.f32.xlu1 %v18470_v52 }
 0x6d6   : > { %v14199_v39 = vpop.eup %11888  ;;  %v3821_v60 = vpop.xlane.xlu1 %3820 }
 0x6d7   : > { %11898 = vpow2.f32 %v3988_v3  ;;  %v3902_v31 = vsub.f32 %v13963_v59, %v3821_v60  ;;  %v3903_v37 = vsub.f32 %v13965_v24, %v3821_v60  ;;  %v4095_v58 = vadd.f32 %v14199_v39, %v14194_v36 }
 0x6d8   : > { %11900 = vpow2.f32 %v3990_v62 }
 0x6d9   : > { %v14205_v38 = vpop.eup %11890  ;;  %v3992_v51 = vmul.f32 1.442695, %v3902_v31  ;;  %v3994_v20 = vmul.f32 1.442695, %v3903_v37  ;;  %4096 = vadd.xlane.f32.xlu1 %v4095_v58 }
 0x6da   : > { %v14207_v63 = vpop.eup %11892  ;;  %v3824_v28 = vpop.xlane.xlu0 %3823 }
 0x6db   : > { %11902 = vpow2.f32 %v3992_v51  ;;  %v3904_v56 = vsub.f32 %v13969_v53, %v3824_v28  ;;  %v3905_v49 = vsub.f32 %v13971_v16, %v3824_v28  ;;  %v4098_v59 = vadd.f32 %v14207_v63, %v14205_v38 }
 0x6dc   : > { %11904 = vpow2.f32 %v3994_v20 }
 0x6dd   : > { %v14213_v24 = vpop.eup %11894  ;;  %v3996_v54 = vmul.f32 1.442695, %v3904_v56  ;;  %v3998_v4 = vmul.f32 1.442695, %v3905_v49  ;;  %4099 = vadd.xlane.f32.xlu0 %v4098_v59  ;;  %v18471_v59 = vld [vmem:[#allocation39_spill] sm:$0xff] }
 0x6de   : > { %v14215_v5 = vpop.eup %11896  ;;  %v3827_v10 = vpop.xlane.xlu1 %3826 }
 0x6df   : > { %11906 = vpow2.f32 %v3996_v54  ;;  %v3906_v33 = vsub.f32 %v13975_v25, %v3827_v10  ;;  %v3907_v3 = vsub.f32 %v13977_v30, %v3827_v10  ;;  %v4101_v16 = vadd.f32 %v14215_v5, %v14213_v24 }
 0x6e0   : > { %11908 = vpow2.f32 %v3998_v4 }
 0x6e1   : > { %v14221_v53 = vpop.eup %11898  ;;  %v4000_v62 = vmul.f32 1.442695, %v3906_v33  ;;  %v4002_v52 = vmul.f32 1.442695, %v3907_v3  ;;  %4102 = vadd.xlane.f32.xlu1 %v4101_v16  ;;  %v18473_v16 = vld [vmem:[#allocation40_spill] sm:$0xff] }
 0x6e2   : > { %v14223_v60 = vpop.eup %11900  ;;  %v3830_v31 = vpop.xlane.xlu0 %3829 }
 0x6e3   : > { %11910 = vpow2.f32 %v4000_v62  ;;  %v3908_v37 = vsub.f32 %v13981_v26, %v3830_v31  ;;  %v3909_v58 = vsub.f32 %v13983_v22, %v3830_v31  ;;  %v4104_v25 = vadd.f32 %v14223_v60, %v14221_v53 }
 0x6e4   : > { %11912 = vpow2.f32 %v4002_v52  ;;  %v18474_v52 = vld [vmem:[#allocation41_spill] sm:$0xff] }
 0x6e5   : > { %v14229_v30 = vpop.eup %11902  ;;  %v4004_v51 = vmul.f32 1.442695, %v3908_v37  ;;  %v4006_v20 = vmul.f32 1.442695, %v3909_v58  ;;  %4105 = vadd.xlane.f32.xlu0 %v4104_v25 }
 0x6e6   : > { %v14231_v28 = vpop.eup %11904  ;;  %v3833_v56 = vpop.xlane.xlu1 %3832 }
 0x6e7   : > { %11914 = vpow2.f32 %v4004_v51  ;;  %v3910_v49 = vsub.f32 %v13987_v14, %v3833_v56  ;;  %v3911_v54 = vsub.f32 %v18471_v59, %v3833_v56  ;;  %v4107_v22 = vadd.f32 %v14231_v28, %v14229_v30  ;;  %v18476_v56 = vld [vmem:[#allocation42_spill] sm:$0xff]  ;;  %v18477_v59 = vld [vmem:[#allocation43_spill] sm:$0xff] }
 0x6e8   : > { %11916 = vpow2.f32 %v4006_v20 }
 0x6e9   : > { %v14237_v26 = vpop.eup %11906  ;;  %v4008_v4 = vmul.f32 1.442695, %v3910_v49  ;;  %v4010_v10 = vmul.f32 1.442695, %v3911_v54  ;;  %4108 = vadd.xlane.f32.xlu1 %v4107_v22 }
 0x6ea   : > { %18472 = vst [vmem:[#allocation39_spill] sm:$0xff] %v14237_v26  ;;  %v14239_v33 = vpop.eup %11908  ;;  %v3836_v3 = vpop.xlane.xlu0 %3835 }
 0x6eb   : > { %11918 = vpow2.f32 %v4008_v4  ;;  %v3912_v62 = vsub.f32 %v18473_v16, %v3836_v3  ;;  %v3913_v31 = vsub.f32 %v18474_v52, %v3836_v3  ;;  %v4110_v14 = vadd.f32 %v14239_v33, %v14237_v26  ;;  %v18480_v52 = vld [vmem:[#allocation44_spill] sm:$0xff] }
 0x6ec   : > { %11920 = vpow2.f32 %v4010_v10 }
 0x6ed   : > { %v14245_v37 = vpop.eup %11910  ;;  %v4012_v58 = vmul.f32 1.442695, %v3912_v62  ;;  %v4014_v25 = vmul.f32 1.442695, %v3913_v31  ;;  %4111 = vadd.xlane.f32.xlu0 %v4110_v14  ;;  %v18481_v14 = vld [vmem:[#allocation45_spill] sm:$0xff] }
 0x6ee   : > { %18475 = vst [vmem:[#allocation40_spill] sm:$0xff] %v14245_v37  ;;  %v14247_v51 = vpop.eup %11912  ;;  %v3839_v20 = vpop.xlane.xlu1 %3838 }
 0x6ef   : > { %11922 = vpow2.f32 %v4012_v58  ;;  %v3914_v49 = vsub.f32 %v18476_v56, %v3839_v20  ;;  %v3915_v54 = vsub.f32 %v18477_v59, %v3839_v20  ;;  %v4113_v22 = vadd.f32 %v14247_v51, %v14245_v37 }
 0x6f0   : > { %11924 = vpow2.f32 %v4014_v25 }
 0x6f1   : > { %v14253_v4 = vpop.eup %11914  ;;  %v4016_v10 = vmul.f32 1.442695, %v3914_v49  ;;  %v4018_v3 = vmul.f32 1.442695, %v3915_v54  ;;  %4114 = vadd.xlane.f32.xlu1 %v4113_v22  ;;  %v18484_v22 = vld [vmem:[#allocation46_spill] sm:$0xff] }
 0x6f2   : > { %18478 = vst [vmem:[#allocation41_spill] sm:$0xff] %v14253_v4  ;;  %v14255_v16 = vpop.eup %11916  ;;  %v3842_v62 = vpop.xlane.xlu0 %3841 }
 0x6f3   : > { %18479 = vst [vmem:[#allocation42_spill] sm:$0xff] %v14255_v16  ;;  %11926 = vpow2.f32 %v4016_v10  ;;  %v3916_v31 = vsub.f32 %v18480_v52, %v3842_v62  ;;  %v3917_v58 = vsub.f32 %v18481_v14, %v3842_v62  ;;  %v4116_v20 = vadd.f32 %v14255_v16, %v14253_v4  ;;  %v18485_v10 = vld [vmem:[#allocation47_spill] sm:$0xff] }
 0x6f4   : > { %11928 = vpow2.f32 %v4018_v3 }
 0x6f5   : > { %v14261_v56 = vpop.eup %11918  ;;  %v4020_v25 = vmul.f32 1.442695, %v3916_v31  ;;  %v4022_v59 = vmul.f32 1.442695, %v3917_v58  ;;  %4117 = vadd.xlane.f32.xlu0 %v4116_v20  ;;  %v18487_v20 = vld [vmem:[#allocation48_spill] sm:$0xff] }
 0x6f6   : > { %18482 = vst [vmem:[#allocation43_spill] sm:$0xff] %v14261_v56  ;;  %v14263_v49 = vpop.eup %11920  ;;  %v3845_v54 = vpop.xlane.xlu1 %3844 }
 0x6f7   : > { %18483 = vst [vmem:[#allocation44_spill] sm:$0xff] %v14263_v49  ;;  %11930 = vpow2.f32 %v4020_v25  ;;  %v3918_v26 = vsub.f32 %v18484_v22, %v3845_v54  ;;  %v3919_v37 = vsub.f32 %v18485_v10, %v3845_v54  ;;  %v4119_v62 = vadd.f32 %v14263_v49, %v14261_v56  ;;  %v18488_v25 = vld [vmem:[#allocation49_spill] sm:$0xff] }
 0x6f8   : > { %11932 = vpow2.f32 %v4022_v59 }
 0x6f9   : > { %v14269_v52 = vpop.eup %11922  ;;  %v4024_v3 = vmul.f32 1.442695, %v3918_v26  ;;  %v4026_v14 = vmul.f32 1.442695, %v3919_v37  ;;  %4120 = vadd.xlane.f32.xlu1 %v4119_v62  ;;  %v18489_v62 = vld [vmem:[#allocation50_spill] sm:$0xff] }
 0x6fa   : > { %18486 = vst [vmem:[#allocation45_spill] sm:$0xff] %v14269_v52  ;;  %v14271_v31 = vpop.eup %11924  ;;  %v3848_v58 = vpop.xlane.xlu0 %3847 }
 0x6fb   : > { %11934 = vpow2.f32 %v4024_v3  ;;  %v3920_v4 = vsub.f32 %v18487_v20, %v3848_v58  ;;  %v3921_v16 = vsub.f32 %v18488_v25, %v3848_v58  ;;  %v4122_v54 = vadd.f32 %v14271_v31, %v14269_v52  ;;  %v18490_v3 = vld [vmem:[#allocation51_spill] sm:$0xff] }
 0x6fc   : > { %11936 = vpow2.f32 %v4026_v14 }
 0x6fd   : > { %v14277_v22 = vpop.eup %11926  ;;  %v4028_v59 = vmul.f32 1.442695, %v3920_v4  ;;  %v4030_v10 = vmul.f32 1.442695, %v3921_v16  ;;  %4123 = vadd.xlane.f32.xlu0 %v4122_v54 }
 0x6fe   : > { %v14279_v26 = vpop.eup %11928  ;;  %v3851_v37 = vpop.xlane.xlu1 %3850 }
 0x6ff   : > { %11938 = vpow2.f32 %v4028_v59  ;;  %v3922_v56 = vsub.f32 %v18489_v62, %v3851_v37  ;;  %v3923_v49 = vsub.f32 %v18490_v3, %v3851_v37  ;;  %v4125_v58 = vadd.f32 %v14279_v26, %v14277_v22 }
 0x700   : > { %11940 = vpow2.f32 %v4030_v10 }
 0x701   : > { %v14285_v20 = vpop.eup %11930  ;;  %v4032_v14 = vmul.f32 1.442695, %v3922_v56  ;;  %v4034_v25 = vmul.f32 1.442695, %v3923_v49  ;;  %4126 = vadd.xlane.f32.xlu1 %v4125_v58 }
 0x702   : > { %18491 = vst [vmem:[#allocation46_spill] sm:$0xff] %v14285_v20  ;;  %v14287_v4 = vpop.eup %11932 }
 0x703   : > { %18492 = vst [vmem:[#allocation47_spill] sm:$0xff] %v14287_v4  ;;  %11942 = vpow2.f32 %v4032_v14  ;;  %v4128_v16 = vadd.f32 %v14287_v4, %v14285_v20 }
 0x704   : > { %11944 = vpow2.f32 %v4034_v25 }
 0x705   : > { %v14291_v54 = vpop.eup %11934  ;;  %4129 = vadd.xlane.f32.xlu0 %v4128_v16 }
 0x706   : > { %18493 = vst [vmem:[#allocation48_spill] sm:$0xff] %v14291_v54  ;;  %v14293_v59 = vpop.eup %11936 }
 0x707   : > { %18494 = vst [vmem:[#allocation49_spill] sm:$0xff] %v14293_v59  ;;  %v4131_v10 = vadd.f32 %v14293_v59, %v14291_v54 }
 0x709   : > { %v14297_v37 = vpop.eup %11938  ;;  %4132 = vadd.xlane.f32.xlu1 %v4131_v10 }
 0x70a   : > { %18495 = vst [vmem:[#allocation50_spill] sm:$0xff] %v14297_v37  ;;  %v14299_v56 = vpop.eup %11940 }
 0x70b   : > { %18496 = vst [vmem:[#allocation51_spill] sm:$0xff] %v14299_v56  ;;  %v4134_v49 = vadd.f32 %v14299_v56, %v14297_v37 }
 0x70d   : > { %v14303_v62 = vpop.eup %11942  ;;  %4135 = vadd.xlane.f32.xlu0 %v4134_v49 }
 0x70e   : > { %18497 = vst [vmem:[#allocation52_spill] sm:$0xff] %v14303_v62  ;;  %v14305_v3 = vpop.eup %11944 }
 0x70f   : > { %18498 = vst [vmem:[#allocation53_spill] sm:$0xff] %v14305_v3  ;;  %v4137_v58 = vadd.f32 %v14305_v3, %v14303_v62 }
 0x711   : > { %4138 = vadd.xlane.f32.xlu1 %v4137_v58 }
 0x742   : > { %v4070_v14 = vpop.xlane.xlu0 %4069 }
 0x743   : > { %11946 = vrcp.f32 %v4070_v14 }
 0x746   : > { %v3854_v25 = vpop.xlane.xlu0 %3853  ;;  %v4073_v16 = vpop.xlane.xlu1 %4072 }
 0x747   : > { %v3924_v10 = vsub.f32 %v14029_v32, %v3854_v25  ;;  %v3925_v20 = vsub.f32 %v14031_v8, %v3854_v25  ;;  %11948 = vrcp.f32 %v4073_v16 }
 0x749   : > { %v4036_v54 = vmul.f32 1.442695, %v3924_v10  ;;  %v4038_v37 = vmul.f32 1.442695, %v3925_v20 }
 0x74a   : > { %v4076_v56 = vpop.xlane.xlu0 %4075  ;;  %v3857_v59 = vpop.xlane.xlu1 %3856 }
 0x74b   : > { %11950 = vpow2.f32 %v4036_v54  ;;  %v3926_v49 = vsub.f32 %v14035_v0, %v3857_v59  ;;  %v3927_v4 = vsub.f32 %v14037_v23, %v3857_v59 }
 0x74c   : > { %11952 = vpow2.f32 %v4038_v37 }
 0x74d   : > { %11954 = vrcp.f32 %v4076_v56  ;;  %v4040_v58 = vmul.f32 1.442695, %v3926_v49  ;;  %v4042_v14 = vmul.f32 1.442695, %v3927_v4  ;;  %v11947_v52 = vpop.eup %11946 }
 0x74e   : > { %v3860_v62 = vpop.xlane.xlu0 %3859  ;;  %v4079_v3 = vpop.xlane.xlu1 %4078  ;;  %v4197_v23 = vmul.f32 %v11947_v52, %v14103_v2  ;;  %v4196_v4 = vmul.f32 %v11947_v52, %v14101_v55 }
 0x74f   : > { %11956 = vpow2.f32 %v4040_v58  ;;  %v3928_v8 = vsub.f32 %v14041_v15, %v3860_v62  ;;  %v3929_v32 = vsub.f32 %v14043_v12, %v3860_v62 }
 0x750   : > { %11958 = vpow2.f32 %v4042_v14 }
 0x751   : > { %v11949_v20 = vpop.eup %11948  ;;  %v4044_v25 = vmul.f32 1.442695, %v3928_v8  ;;  %v4046_v54 = vmul.f32 1.442695, %v3929_v32  ;;  %11960 = vrcp.f32 %v4079_v3 }
 0x752   : > { %v4082_v0 = vpop.xlane.xlu0 %4081  ;;  %v3863_v16 = vpop.xlane.xlu1 %3862  ;;  %v4199_v59 = vmul.f32 %v11949_v20, %v14111_v18  ;;  %v4198_v37 = vmul.f32 %v11949_v20, %v14109_v17 }
 0x753   : > { %11962 = vpow2.f32 %v4044_v25  ;;  %v3930_v15 = vsub.f32 %v14047_v40, %v3863_v16  ;;  %v3931_v12 = vsub.f32 %v14049_v29, %v3863_v16 }
 0x754   : > { %11964 = vpow2.f32 %v4046_v54  ;;  %v4261_v56 = vpack.c.bf16 %v4199_v59, %v4197_v23  ;;  %v4260_v62 = vpack.c.bf16 %v4198_v37, %v4196_v4 }
 0x755   : > { %v14321_v10 = vpop.eup %11950  ;;  %11966 = vrcp.f32 %v4082_v0  ;;  %v4048_v3 = vmul.f32 1.442695, %v3930_v15  ;;  %v4050_v49 = vmul.f32 1.442695, %v3931_v12 }
 0x756   : > { %v14323_v2 = vpop.eup %11952  ;;  %v3866_v18 = vpop.xlane.xlu0 %3865  ;;  %4294 = vmatprep.subr.bf16.mxu1 %v4261_v56 }
 0x757   : > { %v4085_v55 = vpop.xlane.xlu1 %4084  ;;  %v11955_v52 = vpop.eup %11954  ;;  %11968 = vpow2.f32 %v4048_v3  ;;  %v3932_v17 = vsub.f32 %v14053_v47, %v3866_v18  ;;  %v3933_v40 = vsub.f32 %v14055_v44, %v3866_v18  ;;  %4295 = vmatpush1.bf16.xpose.msra.mxu1 %v4260_v62  ;;  %v4140_v29 = vadd.f32 %v14323_v2, %v14321_v10 }
 0x758   : > { %11970 = vpow2.f32 %v4050_v49  ;;  %v4201_v54 = vmul.f32 %v11955_v52, %v14122_v46  ;;  %v4200_v59 = vmul.f32 %v11955_v52, %v14117_v19 }
 0x759   : > { %v14329_v58 = vpop.eup %11956  ;;  %v4052_v14 = vmul.f32 1.442695, %v3932_v17  ;;  %v4054_v8 = vmul.f32 1.442695, %v3933_v40  ;;  %11972 = vrcp.f32 %v4085_v55  ;;  %4141 = vadd.xlane.f32.xlu0 %v4140_v29 }
 0x75a   : > { %v14331_v32 = vpop.eup %11958  ;;  %v4088_v20 = vpop.xlane.xlu0 %4087 }
 0x75b   : > { %v3869_v25 = vpop.xlane.xlu1 %3868  ;;  %v11961_v47 = vpop.eup %11960  ;;  %11974 = vpow2.f32 %v4052_v14  ;;  %v4143_v16 = vadd.f32 %v14331_v32, %v14329_v58 }
 0x75c   : > { %v3934_v44 = vsub.f32 %v14059_v43, %v3869_v25  ;;  %v3935_v0 = vsub.f32 %v14061_v42, %v3869_v25  ;;  %11976 = vpow2.f32 %v4054_v8  ;;  %v4203_v23 = vmul.f32 %v11961_v47, %v14133_v61 }
 0x75d   : > { %v4202_v4 = vmul.f32 %v11961_v47, %v14128_v48  ;;  %v14341_v37 = vpop.eup %11962  ;;  %4144 = vadd.xlane.f32.xlu1 %v4143_v16  ;;  %11978 = vrcp.f32 %v4088_v20 }
 0x75e   : > { %v4056_v15 = vmul.f32 1.442695, %v3934_v44  ;;  %v4058_v46 = vmul.f32 1.442695, %v3935_v0  ;;  %v14343_v12 = vpop.eup %11964  ;;  %v3872_v43 = vpop.xlane.xlu0 %3871  ;;  %v4263_v42 = vpack.c.bf16 %v4203_v23, %v4201_v54 }
 0x75f   : > { %v4091_v56 = vpop.xlane.xlu1 %4090  ;;  %v4262_v62 = vpack.c.bf16 %v4202_v4, %v4200_v59  ;;  %v11967_v3 = vpop.eup %11966  ;;  %v3936_v61 = vsub.f32 %v14065_v41, %v3872_v43  ;;  %v3937_v19 = vsub.f32 %v14067_v34, %v3872_v43  ;;  %v4146_v48 = vadd.f32 %v14343_v12, %v14341_v37 }
 0x760   : > { %11980 = vpow2.f32 %v4056_v15  ;;  %4296 = vmatprep.subr.bf16.mxu1 %v4263_v42  ;;  %v4205_v40 = vmul.f32 %v11967_v3, %v14144_v11  ;;  %v4204_v25 = vmul.f32 %v11967_v3, %v14139_v35 }
 0x761   : > { %11982 = vpow2.f32 %v4058_v46  ;;  %v14349_v49 = vpop.eup %11968  ;;  %v4060_v18 = vmul.f32 1.442695, %v3936_v61  ;;  %v4062_v55 = vmul.f32 1.442695, %v3937_v19  ;;  %4297 = vmatpush1.bf16.xpose.msra.mxu1 %v4262_v62  ;;  %4147 = vadd.xlane.f32.xlu0 %v4146_v48 }
 0x762   : > { %11984 = vrcp.f32 %v4091_v56  ;;  %v14351_v52 = vpop.eup %11970  ;;  %v4094_v34 = vpop.xlane.xlu0 %4093 }
 0x763   : > { %v3875_v17 = vpop.xlane.xlu1 %3874  ;;  %v11973_v41 = vpop.eup %11972  ;;  %11986 = vpow2.f32 %v4060_v18  ;;  %v4149_v8 = vadd.f32 %v14351_v52, %v14349_v49 }
 0x764   : > { %v3938_v29 = vsub.f32 %v14071_v45, %v3875_v17  ;;  %v3939_v14 = vsub.f32 %v14073_v50, %v3875_v17  ;;  %11988 = vpow2.f32 %v4062_v55  ;;  %v4207_v20 = vmul.f32 %v11973_v41, %v14155_v1 }
 0x765   : > { %v4206_v54 = vmul.f32 %v11973_v41, %v14150_v7  ;;  %v14361_v47 = vpop.eup %11974  ;;  %4150 = vadd.xlane.f32.xlu1 %v4149_v8  ;;  %11990 = vrcp.f32 %v4094_v34 }
 0x766   : > { %v4064_v11 = vmul.f32 1.442695, %v3938_v29  ;;  %v4066_v44 = vmul.f32 1.442695, %v3939_v14  ;;  %v14363_v0 = vpop.eup %11976  ;;  %v4265_v45 = vpack.c.bf16 %v4207_v20, %v4205_v40 }
 0x767   : > { %v4097_v50 = vpop.xlane.xlu1 %4096  ;;  %v4264_v16 = vpack.c.bf16 %v4206_v54, %v4204_v25  ;;  %v4152_v23 = vadd.f32 %v14363_v0, %v14361_v47  ;;  %v11979_v1 = vpop.eup %11978 }
 0x768   : > { %11992 = vpow2.f32 %v4064_v11  ;;  %4298 = vmatprep.subr.bf16.mxu1 %v4265_v45  ;;  %v4209_v46 = vmul.f32 %v11979_v1, %v14166_v6  ;;  %v4208_v42 = vmul.f32 %v11979_v1, %v14161_v13 }
 0x769   : > { %11994 = vpow2.f32 %v4066_v44  ;;  %4299 = vmatpush1.bf16.xpose.msra.mxu1 %v4264_v16  ;;  %4153 = vadd.xlane.f32.xlu0 %v4152_v23 }
 0x76a   : > { %v14367_v35 = vpop.eup %11980  ;;  %11996 = vrcp.f32 %v4097_v50  ;;  %v4100_v59 = vpop.xlane.xlu0 %4099 }
 0x76b   : > { %v14369_v7 = vpop.eup %11982  ;;  %11998 = vrcp.f32 %v4100_v59 }
 0x76c   : > { %v11985_v4 = vpop.eup %11984  ;;  %v4155_v15 = vadd.f32 %v14369_v7, %v14367_v35 }
 0x76d   : > { %v4211_v43 = vmul.f32 %v11985_v4, %v14177_v27  ;;  %v4210_v56 = vmul.f32 %v11985_v4, %v14172_v9  ;;  %v14377_v62 = vpop.eup %11986 }
 0x76e   : > { %4156 = vadd.xlane.f32.xlu1 %v4155_v15  ;;  %v14379_v3 = vpop.eup %11988  ;;  %v4103_v19 = vpop.xlane.xlu1 %4102 }
 0x76f   : > { %v4267_v61 = vpack.c.bf16 %v4211_v43, %v4209_v46  ;;  %v4266_v48 = vpack.c.bf16 %v4210_v56, %v4208_v42  ;;  %12000 = vrcp.f32 %v4103_v19  ;;  %v4158_v18 = vadd.f32 %v14379_v3, %v14377_v62  ;;  %v11991_v6 = vpop.eup %11990  ;;  %v3077_v43 = vld [vmem:[%s18027_s6 + $0x40] sm:$0xff] }
 0x770   : > { %v4213_v40 = vmul.f32 %v11991_v6, %v14188_v57  ;;  %v4212_v34 = vmul.f32 %v11991_v6, %v14183_v21 }
 0x771   : > { %4300 = vmatprep.subr.bf16.mxu1 %v4267_v61 }
 0x772   : > { %v14383_v27 = vpop.eup %11992  ;;  %4301 = vmatpush1.bf16.xpose.msra.mxu1 %v4266_v48  ;;  %4159 = vadd.xlane.f32.xlu1 %v4158_v18  ;;  %v4106_v9 = vpop.xlane.xlu0 %4105 }
 0x773   : > { %v14385_v13 = vpop.eup %11994  ;;  %12002 = vrcp.f32 %v4106_v9 }
 0x774   : > { %v11997_v55 = vpop.eup %11996  ;;  %v4161_v17 = vadd.f32 %v14385_v13, %v14383_v27 }
 0x775   : > { %v4215_v41 = vmul.f32 %v11997_v55, %v14199_v39  ;;  %v4214_v29 = vmul.f32 %v11997_v55, %v14194_v36  ;;  %v11999_v25 = vpop.eup %11998  ;;  %v3070_v36 = vld [vmem:[%s18027_s6 + $0x8] sm:$0xff] }
 0x776   : > { %4162 = vadd.xlane.f32.xlu1 %v4161_v17  ;;  %v4109_v8 = vpop.xlane.xlu1 %4108  ;;  %v4217_v44 = vmul.f32 %v11999_v25, %v14207_v63  ;;  %v4216_v21 = vmul.f32 %v11999_v25, %v14205_v38  ;;  %v3074_v63 = vld [vmem:[%s18027_s6 + $0x28] sm:$0xff] }
 0x777   : > { %v4269_v14 = vpack.c.bf16 %v4215_v41, %v4213_v40  ;;  %v4268_v20 = vpack.c.bf16 %v4214_v29, %v4212_v34  ;;  %12004 = vrcp.f32 %v4109_v8  ;;  %v18503_v40 = vld [vmem:[#allocation40_spill] sm:$0xff]  ;;  %v18504_v34 = vld [vmem:[#allocation39_spill] sm:$0xff] }
 0x779   : > { %4302 = vmatprep.subr.bf16.mxu1 %v4269_v14  ;;  %v12001_v54 = vpop.eup %12000 }
 0x77a   : > { %4303 = vmatpush1.bf16.xpose.msra.mxu1 %v4268_v20  ;;  %v4112_v11 = vpop.xlane.xlu0 %4111  ;;  %v4219_v57 = vmul.f32 %v12001_v54, %v14215_v5  ;;  %v4218_v39 = vmul.f32 %v12001_v54, %v14213_v24  ;;  %v14403_v5 = vpop.f32.mrb[34].mxu0 }
 0x77b   : > { %12006 = vrcp.f32 %v4112_v11  ;;  %v14405_v38 = vpop.f32.mrb[35].mxu0 }
 0x77c   : > { %v4271_v45 = vpack.c.bf16 %v4219_v57, %v4217_v44  ;;  %v4270_v50 = vpack.c.bf16 %v4218_v39, %v4216_v21  ;;  %v14410_v46 = vpop.f32.mrb[36].mxu0  ;;  %v18505_v44 = vld [vmem:[#allocation42_spill] sm:$0xff]  ;;  %v18506_v39 = vld [vmem:[#allocation44_spill] sm:$0xff]  ;;  %v18507_v21 = vld [vmem:[#allocation43_spill] sm:$0xff] }
 0x77d   : > { %v12003_v23 = vpop.eup %12002  ;;  %18499 = vst [vmem:[#allocation54_spill] sm:$0xff] %v14410_v46  ;;  %v14416_v56 = vpop.f32.mrb[37].mxu0 }
 0x77e   : > { %4304 = vmatprep.subr.bf16.mxu1 %v4271_v45  ;;  %v4115_v16 = vpop.xlane.xlu1 %4114  ;;  %v4221_v59 = vmul.f32 %v12003_v23, %v14223_v60  ;;  %v4220_v42 = vmul.f32 %v12003_v23, %v14221_v53  ;;  %18500 = vst [vmem:[#allocation55_spill] sm:$0xff] %v14416_v56  ;;  %v14418_v19 = vpop.f32.mrb[38].mxu0 }
 0x77f   : > { %3088 = vperm.xlu0 %11364, %v3070_v36   ;;  %12008 = vrcp.f32 %v4115_v16  ;;  %18501 = vst [vmem:[#allocation56_spill] sm:$0xff] %v14418_v19  ;;  %v14420_v48 = vpop.f32.mrb[39].mxu0  ;;  %v18508_v36 = vld [vmem:[#allocation41_spill] sm:$0xff] }
 0x780   : > { %18502 = vst [vmem:[#allocation57_spill] sm:$0xff] %v14420_v48 }
 0x781   : > { %v12005_v24 = vpop.eup %12004 }
 0x782   : > { %4305 = vmatpush1.bf16.xpose.msra.mxu1 %v4270_v50  ;;  %v4118_v1 = vpop.xlane.xlu0 %4117  ;;  %v4223_v4 = vmul.f32 %v12005_v24, %v14231_v28  ;;  %v4222_v15 = vmul.f32 %v12005_v24, %v14229_v30  ;;  %v14422_v28 = vpop.f32.mrb[40].mxu0 }
 0x783   : > { %3108 = vperm.xlu0 %11364, %v3074_v63   ;;  %12010 = vrcp.f32 %v4118_v1  ;;  %v14424_v6 = vpop.f32.mrb[41].mxu0 }
 0x784   : > { %v4273_v61 = vpack.c.bf16 %v4223_v4, %v4221_v59  ;;  %v4272_v60 = vpack.c.bf16 %v4222_v15, %v4220_v42 }
 0x785   : > { %v12007_v18 = vpop.eup %12006 }
 0x786   : > { %4306 = vmatprep.subr.bf16.mxu1 %v4273_v61  ;;  %v4121_v30 = vpop.xlane.xlu1 %4120  ;;  %v4225_v55 = vmul.f32 %v12007_v18, %v14239_v33  ;;  %v4224_v29 = vmul.f32 %v12007_v18, %v18504_v34 }
 0x787   : > { %3123 = vperm.xlu1 %11365, %v3077_v43   ;;  %12012 = vrcp.f32 %v4121_v30  ;;  %v18509_v43 = vld [vmem:[#allocation45_spill] sm:$0xff] }
 0x789   : > { %v12009_v9 = vpop.eup %12008 }
 0x78a   : > { %4307 = vmatpush1.bf16.xpose.msra.mxu1 %v4272_v60  ;;  %v4124_v53 = vpop.xlane.xlu0 %4123  ;;  %v4227_v17 = vmul.f32 %v12009_v9, %v14247_v51  ;;  %v4226_v41 = vmul.f32 %v12009_v9, %v18503_v40 }
 0x78b   : > { %12014 = vrcp.f32 %v4124_v53  ;;  %v18510_v53 = vld [vmem:[#allocation47_spill] sm:$0xff] }
 0x78c   : > { %v4275_v14 = vpack.c.bf16 %v4227_v17, %v4225_v55  ;;  %v4274_v8 = vpack.c.bf16 %v4226_v41, %v4224_v29  ;;  %v18511_v17 = vld [vmem:[#allocation49_spill] sm:$0xff] }
 0x78d   : > { %v12011_v25 = vpop.eup %12010 }
 0x78e   : > { %4308 = vmatprep.subr.bf16.mxu1 %v4275_v14  ;;  %v4127_v20 = vpop.xlane.xlu1 %4126  ;;  %v4229_v57 = vmul.f32 %v12011_v25, %v18505_v44  ;;  %v4228_v45 = vmul.f32 %v12011_v25, %v18508_v36  ;;  %v18516_v44 = vld [vmem:[#allocation52_spill] sm:$0xff] }
 0x78f   : > { %12016 = vrcp.f32 %v4127_v20  ;;  %v18514_v20 = vld [vmem:[#allocation51_spill] sm:$0xff] }
 0x791   : > { %v12013_v54 = vpop.eup %12012 }
 0x792   : > { %4309 = vmatpush1.bf16.xpose.msra.mxu1 %v4274_v8  ;;  %v4130_v11 = vpop.xlane.xlu0 %4129  ;;  %v4231_v33 = vmul.f32 %v12013_v54, %v18506_v39  ;;  %v4230_v51 = vmul.f32 %v12013_v54, %v18507_v21  ;;  %v18515_v54 = vld [vmem:[#allocation53_spill] sm:$0xff]  ;;  %v18517_v39 = vld [vmem:[#allocation50_spill] sm:$0xff] }
 0x793   : > { %12018 = vrcp.f32 %v4130_v11 }
 0x794   : > { %v4277_v50 = vpack.c.bf16 %v4231_v33, %v4229_v57  ;;  %v4276_v16 = vpack.c.bf16 %v4230_v51, %v4228_v45 }
 0x795   : > { %v12015_v63 = vpop.eup %12014 }
 0x796   : > { %4310 = vmatprep.subr.bf16.mxu1 %v4277_v50  ;;  %v4133_v23 = vpop.xlane.xlu1 %4132  ;;  %v4233_v59 = vmul.f32 %v12015_v63, %v14271_v31  ;;  %v4232_v42 = vmul.f32 %v12015_v63, %v18509_v43  ;;  %v18512_v31 = vld [vmem:[#allocation48_spill] sm:$0xff] }
 0x797   : > { %12020 = vrcp.f32 %v4133_v23 }
 0x799   : > { %v12017_v24 = vpop.eup %12016 }
 0x79a   : > { %4311 = vmatpush1.bf16.xpose.msra.mxu1 %v4276_v16  ;;  %v4136_v1 = vpop.xlane.xlu0 %4135  ;;  %v4235_v4 = vmul.f32 %v12017_v24, %v14279_v26  ;;  %v4234_v15 = vmul.f32 %v12017_v24, %v14277_v22  ;;  %v18513_v26 = vld [vmem:[#allocation46_spill] sm:$0xff] }
 0x79b   : > { %12022 = vrcp.f32 %v4136_v1 }
 0x79c   : > { %v4279_v61 = vpack.c.bf16 %v4235_v4, %v4233_v59  ;;  %v4278_v60 = vpack.c.bf16 %v4234_v15, %v4232_v42 }
 0x79d   : > { %v12019_v18 = vpop.eup %12018 }
 0x79e   : > { %4312 = vmatprep.subr.bf16.mxu1 %v4279_v61  ;;  %v4139_v30 = vpop.xlane.xlu1 %4138  ;;  %v4237_v55 = vmul.f32 %v12019_v18, %v18510_v53  ;;  %v4236_v34 = vmul.f32 %v12019_v18, %v18513_v26 }
 0x79f   : > { %12024 = vrcp.f32 %v4139_v30 }
 0x7a1   : > { %v12021_v9 = vpop.eup %12020 }
 0x7a2   : > { %4313 = vmatpush1.bf16.xpose.msra.mxu1 %v4278_v60  ;;  %v4239_v40 = vmul.f32 %v12021_v9, %v18511_v17  ;;  %v4238_v41 = vmul.f32 %v12021_v9, %v18512_v31  ;;  %v18519_v17 = vld [vmem:[#allocation34_spill] sm:$0xff] }
 0x7a4   : > { %v4281_v22 = vpack.c.bf16 %v4239_v40, %v4237_v55  ;;  %v4280_v29 = vpack.c.bf16 %v4238_v41, %v4236_v34 }
 0x7a5   : > { %v12023_v14 = vpop.eup %12022 }
 0x7a6   : > { %4314 = vmatprep.subr.bf16.mxu1 %v4281_v22  ;;  %v4241_v25 = vmul.f32 %v12023_v14, %v18514_v20  ;;  %v4240_v33 = vmul.f32 %v12023_v14, %v18517_v39 }
 0x7a9   : > { %v12025_v8 = vpop.eup %12024 }
 0x7aa   : > { %4315 = vmatpush1.bf16.xpose.msra.mxu1 %v4280_v29  ;;  %v4243_v11 = vmul.f32 %v12025_v8, %v18515_v54  ;;  %v4242_v57 = vmul.f32 %v12025_v8, %v18516_v44 }
 0x7ac   : > { %v4283_v21 = vpack.c.bf16 %v4243_v11, %v4241_v25  ;;  %v4282_v51 = vpack.c.bf16 %v4242_v57, %v4240_v33 }
 0x7ae   : > { %4316 = vmatprep.subr.bf16.mxu1 %v4283_v21 }
 0x7b2   : > { %4317 = vmatpush1.bf16.xpose.msra.mxu1 %v4282_v51 }
 0x7e6   : > { %v4142_v36 = vpop.xlane.xlu0 %4141 }
 0x7e7   : > { %12026 = vrcp.f32 %v4142_v36 }
 0x7ea   : > { %v4145_v45 = vpop.xlane.xlu1 %4144 }
 0x7eb   : > { %12028 = vrcp.f32 %v4145_v45 }
 0x7ee   : > { %v4148_v50 = vpop.xlane.xlu0 %4147 }
 0x7ef   : > { %12030 = vrcp.f32 %v4148_v50 }
 0x7f1   : > { %v12027_v23 = vpop.eup %12026 }
 0x7f2   : > { %v4151_v16 = vpop.xlane.xlu1 %4150  ;;  %v4245_v1 = vmul.f32 %v12027_v23, %v14323_v2  ;;  %v4244_v4 = vmul.f32 %v12027_v23, %v14321_v10 }
 0x7f3   : > { %12032 = vrcp.f32 %v4151_v16 }
 0x7f5   : > { %v12029_v63 = vpop.eup %12028 }
 0x7f6   : > { %v4154_v24 = vpop.xlane.xlu0 %4153  ;;  %v4247_v59 = vmul.f32 %v12029_v63, %v14331_v32  ;;  %v4246_v15 = vmul.f32 %v12029_v63, %v14329_v58  ;;  %v18518_v58 = vld [vmem:[#allocation33_spill] sm:$0xff] }
 0x7f7   : > { %12034 = vrcp.f32 %v4154_v24 }
 0x7f8   : > { %v4285_v43 = vpack.c.bf16 %v4247_v59, %v4245_v1  ;;  %v4284_v42 = vpack.c.bf16 %v4246_v15, %v4244_v4 }
 0x7f9   : > { %v12031_v60 = vpop.eup %12030 }
 0x7fa   : > { %4318 = vmatprep.subr.bf16.mxu1 %v4285_v43  ;;  %v4249_v53 = vmul.f32 %v12031_v60, %v14343_v12  ;;  %v4248_v32 = vmul.f32 %v12031_v60, %v14341_v37 }
 0x7fb   : > { %v4157_v61 = vpop.xlane.xlu1 %4156  ;;  %4319 = vmatpush1.bf16.xpose.msra.mxu1 %v4284_v42 }
 0x7fc   : > { %12036 = vrcp.f32 %v4157_v61 }
 0x7fd   : > { %v12033_v30 = vpop.eup %12032 }
 0x7fe   : > { %v3089_v18 = vpop.permute.xlu0 %3088  ;;  %v4251_v2 = vmul.f32 %v12033_v30, %v14351_v52  ;;  %v4250_v10 = vmul.f32 %v12033_v30, %v14349_v49 }
 0x7ff   : > { %v4160_v9 = vpop.xlane.xlu1 %4159  ;;  %v3251_v55 = vadd.f32 %v18518_v58, %v3089_v18  ;;  %v3253_v40 = vadd.f32 %v18519_v17, %v3089_v18 }
 0x800   : > { %v4287_v31 = vpack.c.bf16 %v4251_v2, %v4249_v53  ;;  %v4286_v41 = vpack.c.bf16 %v4250_v10, %v4248_v32  ;;  %12038 = vrcp.f32 %v4160_v9 }
 0x801   : > { %v4360_v26 = vmul.f32 0.35355338, %v3251_v55  ;;  %v4361_v34 = vmul.f32 0.35355338, %v3253_v40  ;;  %v12035_v29 = vpop.eup %12034 }
 0x802   : > { %4320 = vmatprep.subr.bf16.mxu1 %v4287_v31  ;;  %v4253_v49 = vmul.f32 %v12035_v29, %v14363_v0  ;;  %v4252_v14 = vmul.f32 %v12035_v29, %v14361_v47  ;;  %v3109_v33 = vpop.permute.xlu0 %3108 }
 0x803   : > { %v4163_v22 = vpop.xlane.xlu1 %4162  ;;  %4362 = vxpose.xlu0.b32.start.end [1/1] (short) %v4360_v26, 128  ;;  %4394 = vxpose.xlu1.b32.start.end [1/1] (short) %v4361_v34, 128  ;;  %v3275_v45 = vadd.f32 %v14403_v5, %v3109_v33 }
 0x804   : > { %12040 = vrcp.f32 %v4163_v22  ;;  %4321 = vmatpush1.bf16.xpose.msra.mxu1 %v4286_v41 }
 0x806   : > { %v12037_v12 = vpop.eup %12036 }
 0x807   : > { %v3124_v37 = vpop.permute.xlu1 %3123  ;;  %v4255_v52 = vmul.f32 %v12037_v12, %v14369_v7  ;;  %v4254_v8 = vmul.f32 %v12037_v12, %v14367_v35 }
 0x808   : > { %v3295_v20 = vadd.f32 %v14424_v6, %v3124_v37  ;;  %v3277_v6 = vadd.f32 %v14405_v38, %v3109_v33  ;;  %v3293_v51 = vadd.f32 %v14422_v28, %v3124_v37 }
 0x809   : > { %v4289_v25 = vpack.c.bf16 %v4255_v52, %v4253_v49  ;;  %v4288_v54 = vpack.c.bf16 %v4254_v8, %v4252_v14 }
 0x80a   : > { %v4293_v11 = vpack.c.bf16 %v3295_v20, %v3295_v20  ;;  %v12039_v44 = vpop.eup %12038  ;;  %v4292_v36 = vpack.c.bf16 %v3293_v51, %v3293_v51 }
 0x80b   : > { %4322 = vmatprep.subr.bf16.mxu1 %v4289_v25  ;;  %v4257_v39 = vmul.f32 %v12039_v44, %v14379_v3  ;;  %v4256_v7 = vmul.f32 %v12039_v44, %v14377_v62  ;;  %v14468_v3 = vld [vmem:[#allocation3] sm:$0xff] }
 0x80c   : > { %4326 = vmatprep.mubr.bf16.mxu1 %v4293_v11  ;;  %4323 = vmatpush1.bf16.xpose.msra.mxu1 %v4288_v54 }
 0x80e   : > { %v12041_v57 = vpop.eup %12040 }
 0x80f   : > { %v4259_v0 = vmul.f32 %v12041_v57, %v14385_v13  ;;  %v4258_v47 = vmul.f32 %v12041_v57, %v14383_v27 }
 0x811   : > { %v4291_v35 = vpack.c.bf16 %v4259_v0, %v4257_v39  ;;  %v4290_v21 = vpack.c.bf16 %v4258_v47, %v4256_v7 }
 0x813   : > { %4324 = vmatprep.subr.bf16.mxu1 %v4291_v35 }
 0x814   : > { %4325 = vmatpush1.bf16.xpose.msra.mxu1 %v4290_v21 }
 0x815   : > { %4522 = vmatprep.subr.mxu1 %v3277_v6 }
 0x81b   : > { %4327 = vmatmul.mubr.bf16.vlgmr.msra.gmra.mrb[64].mxu1 %v4292_v36 }
 0x81c   : > { %4523 = vmatpush1.msra.mxu1 %v3275_v45  ;;  %4586 = vmatprep.mubr.f32.mxu1 %v14468_v3 }
 0x883   : > { %v4378_v62 = vpop.trf.xlu0  ;;  %v4410_v63 = vpop.trf.xlu1 }
 0x884   : > { %10449 = vmatmul.mubr.msk.f32.vlgmr.msra.gmra.mrb[68].mxu1 %vm3426_vm15, %v4378_v62 }
 0x885   : > { %4592 = vmatprep.mubr.f32.mxu1 %v14468_v3 }
 0x887   : > { %v4379_v27 = vpop.trf.xlu0  ;;  %v4411_v59 = vpop.trf.xlu1 }
 0x888   : > { %10450 = vmatmul.mubr.msk.f32.gmra.mrb[70].mxu1 %vm3426_vm15, %v4379_v27 }
 0x889   : > { %4598 = vmatprep.mubr.f32.mxu1 %v14468_v3 }
 0x88b   : > { %v4380_v13 = vpop.trf.xlu0  ;;  %v4412_v15 = vpop.trf.xlu1 }
 0x88c   : > { %10451 = vmatmul.mubr.msk.f32.gmra.mrb[72].mxu1 %vm3426_vm15, %v4380_v13 }
 0x88d   : > { %4604 = vmatprep.mubr.f32.mxu1 %v14468_v3 }
 0x88f   : > { %v4381_v5 = vpop.trf.xlu0  ;;  %v4413_v61 = vpop.trf.xlu1 }
 0x890   : > { %10452 = vmatmul.mubr.msk.f32.gmra.mrb[74].mxu1 %vm3426_vm15, %v4381_v5 }
 0x891   : > { %4610 = vmatprep.mubr.f32.mxu1 %v14468_v3 }
 0x893   : > { %v4382_v38 = vpop.trf.xlu0  ;;  %v4414_v30 = vpop.trf.xlu1 }
 0x894   : > { %10453 = vmatmul.mubr.msk.f32.gmra.mrb[76].mxu1 %vm3426_vm15, %v4382_v38 }
 0x895   : > { %4616 = vmatprep.mubr.f32.mxu1 %v14468_v3 }
 0x897   : > { %v4383_v28 = vpop.trf.xlu0  ;;  %v4415_v9 = vpop.trf.xlu1 }
 0x898   : > { %10454 = vmatmul.mubr.msk.f32.gmra.mrb[78].mxu1 %vm3426_vm15, %v4383_v28 }
 0x899   : > { %4622 = vmatprep.mubr.f32.mxu1 %v14468_v3 }
 0x89b   : > { %v4384_v50 = vpop.trf.xlu0  ;;  %v4416_v53 = vpop.trf.xlu1 }
 0x89c   : > { %10455 = vmatmul.mubr.msk.f32.gmra.mrb[80].mxu1 %vm3426_vm15, %v4384_v50 }
 0x89d   : > { %4628 = vmatprep.mubr.f32.mxu1 %v14468_v3 }
 0x89f   : > { %v4385_v16 = vpop.trf.xlu0  ;;  %v4417_v2 = vpop.trf.xlu1 }
 0x8a0   : > { %10456 = vmatmul.mubr.msk.f32.gmra.mrb[82].mxu1 %vm3426_vm15, %v4385_v16 }
 0x8a1   : > { %4634 = vmatprep.mubr.f32.mxu1 %v14468_v3 }
 0x8a3   : > { %v4386_v23 = vpop.trf.xlu0  ;;  %v4418_v32 = vpop.trf.xlu1 }
 0x8a4   : > { %10457 = vmatmul.mubr.msk.f32.gmra.mrb[84].mxu1 %vm3426_vm15, %v4386_v23 }
 0x8a5   : > { %4640 = vmatprep.mubr.f32.mxu1 %v14468_v3 }
 0x8a7   : > { %v4387_v24 = vpop.trf.xlu0  ;;  %v4419_v10 = vpop.trf.xlu1 }
 0x8a8   : > { %10458 = vmatmul.mubr.msk.f32.gmra.mrb[86].mxu1 %vm3426_vm15, %v4387_v24 }
 0x8a9   : > { %4646 = vmatprep.mubr.f32.mxu1 %v14468_v3 }
 0x8ab   : > { %v4388_v1 = vpop.trf.xlu0  ;;  %v4420_v58 = vpop.trf.xlu1 }
 0x8ac   : > { %10459 = vmatmul.mubr.msk.f32.gmra.mrb[88].mxu1 %vm3426_vm15, %v4388_v1 }
 0x8ad   : > { %4652 = vmatprep.mubr.f32.mxu1 %v14468_v3 }
 0x8af   : > { %v4389_v4 = vpop.trf.xlu0  ;;  %v4421_v55 = vpop.trf.xlu1 }
 0x8b0   : > { %10460 = vmatmul.mubr.msk.f32.gmra.mrb[90].mxu1 %vm3426_vm15, %v4389_v4 }
 0x8b1   : > { %4658 = vmatprep.mubr.f32.mxu1 %v14468_v3 }
 0x8b3   : > { %v4390_v43 = vpop.trf.xlu0  ;;  %v4422_v17 = vpop.trf.xlu1 }
 0x8b4   : > { %10461 = vmatmul.mubr.msk.f32.gmra.mrb[92].mxu1 %vm3426_vm15, %v4390_v43 }
 0x8b5   : > { %4664 = vmatprep.mubr.f32.mxu1 %v14468_v3 }
 0x8b7   : > { %v4391_v42 = vpop.trf.xlu0  ;;  %v4423_v34 = vpop.trf.xlu1 }
 0x8b8   : > { %10462 = vmatmul.mubr.msk.f32.gmra.mrb[94].mxu1 %vm3426_vm15, %v4391_v42 }
 0x8b9   : > { %4670 = vmatprep.mubr.f32.mxu1 %v14468_v3 }
 0x8bb   : > { %v4392_v60 = vpop.trf.xlu0  ;;  %v4424_v22 = vpop.trf.xlu1 }
 0x8bc   : > { %10463 = vmatmul.mubr.msk.f32.gmra.mrb[96].mxu1 %vm3426_vm15, %v4392_v60 }
 0x8bd   : > { %4676 = vmatprep.mubr.f32.mxu1 %v14468_v3 }
 0x8bf   : > { %v4393_v18 = vpop.trf.xlu0  ;;  %v4425_v29 = vpop.trf.xlu1 }
 0x8c0   : > { %10464 = vmatmul.mubr.msk.f32.gmra.mrb[98].mxu1 %vm3426_vm15, %v4393_v18 }
 0x8c1   : > { %4682 = vmatprep.mubr.f32.mxu1 %v14468_v3 }
 0x8c4   : > { %10465 = vmatmul.mubr.msk.f32.gmra.mrb[100].mxu1 %vm3426_vm15, %v4410_v63 }
 0x8c5   : > { %4688 = vmatprep.mubr.f32.mxu1 %v14468_v3 }
 0x8c8   : > { %10466 = vmatmul.mubr.msk.f32.gmra.mrb[102].mxu1 %vm3426_vm15, %v4411_v59 }
 0x8c9   : > { %4694 = vmatprep.mubr.f32.mxu1 %v14468_v3 }
 0x8cc   : > { %10467 = vmatmul.mubr.msk.f32.gmra.mrb[104].mxu1 %vm3426_vm15, %v4412_v15 }
 0x8cd   : > { %4700 = vmatprep.mubr.f32.mxu1 %v14468_v3 }
 0x8d0   : > { %10468 = vmatmul.mubr.msk.f32.gmra.mrb[106].mxu1 %vm3426_vm15, %v4413_v61 }
 0x8d1   : > { %4706 = vmatprep.mubr.f32.mxu1 %v14468_v3 }
 0x8d4   : > { %10469 = vmatmul.mubr.msk.f32.gmra.mrb[108].mxu1 %vm3426_vm15, %v4414_v30 }
 0x8d5   : > { %4712 = vmatprep.mubr.f32.mxu1 %v14468_v3 }
 0x8d8   : > { %10470 = vmatmul.mubr.msk.f32.gmra.mrb[110].mxu1 %vm3426_vm15, %v4415_v9 }
 0x8d9   : > { %4718 = vmatprep.mubr.f32.mxu1 %v14468_v3 }
 0x8dc   : > { %10471 = vmatmul.mubr.msk.f32.gmra.mrb[112].mxu1 %vm3426_vm15, %v4416_v53 }
 0x8dd   : > { %4724 = vmatprep.mubr.f32.mxu1 %v14468_v3 }
 0x8e0   : > { %10472 = vmatmul.mubr.msk.f32.gmra.mrb[114].mxu1 %vm3426_vm15, %v4417_v2 }
 0x8e1   : > { %4730 = vmatprep.mubr.f32.mxu1 %v14468_v3 }
 0x8e4   : > { %10473 = vmatmul.mubr.msk.f32.gmra.mrb[116].mxu1 %vm3426_vm15, %v4418_v32 }
 0x8e5   : > { %4736 = vmatprep.mubr.f32.mxu1 %v14468_v3 }
 0x8e8   : > { %10474 = vmatmul.mubr.msk.f32.gmra.mrb[118].mxu1 %vm3426_vm15, %v4419_v10 }
 0x8e9   : > { %4742 = vmatprep.mubr.f32.mxu1 %v14468_v3 }
 0x8ec   : > { %10475 = vmatmul.mubr.msk.f32.gmra.mrb[120].mxu1 %vm3426_vm15, %v4420_v58 }
 0x8ed   : > { %4748 = vmatprep.mubr.f32.mxu1 %v14468_v3 }
 0x8ee   : > { %v14525_v40 = vpop.f32.mrb[64].mxu1 }
 0x8ef   : > { %18520 = vst [vmem:[#allocation40_spill] sm:$0xff] %v14525_v40  ;;  %v14527_v31 = vpop.f32.mrb[65].mxu1 }
 0x8f0   : > { %18521 = vst [vmem:[#allocation39_spill] sm:$0xff] %v14527_v31  ;;  %v4332_v41 = vpop.f32.mrb[66].mxu1  ;;  %10476 = vmatmul.mubr.msk.f32.gmra.mrb[122].mxu1 %vm3426_vm15, %v4421_v55 }
 0x8f1   : > { %v4333_v26 = vpop.f32.mrb[67].mxu1  ;;  %4754 = vmatprep.mubr.f32.mxu1 %v14468_v3 }
 0x8f4   : > { %10477 = vmatmul.mubr.msk.f32.gmra.mrb[124].mxu1 %vm3426_vm15, %v4422_v17 }
 0x8f5   : > { %4760 = vmatprep.mubr.f32.mxu1 %v14468_v3 }
 0x8f8   : > { %10478 = vmatmul.mubr.msk.f32.gmra.mrb[126].mxu1 %vm3426_vm15, %v4423_v34 }
 0x8f9   : > { %4766 = vmatprep.mubr.f32.mxu1 %v14468_v3 }
 0x8fc   : > { %10479 = vmatmul.mubr.msk.f32.gmra.mrb[128].mxu1 %vm3426_vm15, %v4424_v22 }
 0x8fd   : > { %4772 = vmatprep.mubr.f32.mxu1 %v14468_v3 }
 0x900   : > { %10480 = vmatmul.mubr.msk.f32.gmra.mrb[130].mxu1 %vm3426_vm15, %v4425_v29 }
 0x957   : > { %v14538_v12 = vpop.f32.mrb[68].mxu1 }
 0x958   : > { %v14540_v37 = vpop.f32.mrb[69].mxu1 }
 0x959   : > { %v4779_v49 = vmax.f32 %v14538_v12, %v14540_v37 }
 0x95b   : > { %4780 = vmax.xlane.f32.xlu0 %v4779_v49  ;;  %v14544_v52 = vpop.f32.mrb[70].mxu1 }
 0x95c   : > { %v14546_v14 = vpop.f32.mrb[71].mxu1 }
 0x95d   : > { %v4782_v8 = vmax.f32 %v14544_v52, %v14546_v14 }
 0x95f   : > { %4783 = vmax.xlane.f32.xlu1 %v4782_v8  ;;  %v14550_v20 = vpop.f32.mrb[72].mxu1 }
 0x960   : > { %v14552_v25 = vpop.f32.mrb[73].mxu1 }
 0x961   : > { %v4785_v54 = vmax.f32 %v14550_v20, %v14552_v25 }
 0x963   : > { %4786 = vmax.xlane.f32.xlu0 %v4785_v54  ;;  %v14556_v11 = vpop.f32.mrb[74].mxu1 }
 0x964   : > { %v14558_v44 = vpop.f32.mrb[75].mxu1 }
 0x965   : > { %v4788_v57 = vmax.f32 %v14556_v11, %v14558_v44 }
 0x967   : > { %4789 = vmax.xlane.f32.xlu0 %v4788_v57  ;;  %v14562_v39 = vpop.f32.mrb[76].mxu1 }
 0x968   : > { %v14564_v0 = vpop.f32.mrb[77].mxu1 }
 0x969   : > { %v4791_v7 = vmax.f32 %v14562_v39, %v14564_v0 }
 0x96b   : > { %4792 = vmax.xlane.f32.xlu1 %v4791_v7  ;;  %v14568_v47 = vpop.f32.mrb[78].mxu1 }
 0x96c   : > { %v14570_v33 = vpop.f32.mrb[79].mxu1 }
 0x96d   : > { %v4794_v35 = vmax.f32 %v14568_v47, %v14570_v33 }
 0x96f   : > { %4795 = vmax.xlane.f32.xlu0 %v4794_v35  ;;  %v14574_v21 = vpop.f32.mrb[80].mxu1 }
 0x970   : > { %v14576_v6 = vpop.f32.mrb[81].mxu1 }
 0x971   : > { %v4797_v51 = vmax.f32 %v14574_v21, %v14576_v6 }
 0x973   : > { %4798 = vmax.xlane.f32.xlu1 %v4797_v51  ;;  %v14580_v36 = vpop.f32.mrb[82].mxu1 }
 0x974   : > { %v14582_v45 = vpop.f32.mrb[83].mxu1 }
 0x975   : > { %v4800_v62 = vmax.f32 %v14580_v36, %v14582_v45 }
 0x977   : > { %4801 = vmax.xlane.f32.xlu0 %v4800_v62  ;;  %v14586_v27 = vpop.f32.mrb[84].mxu1 }
 0x978   : > { %v14588_v13 = vpop.f32.mrb[85].mxu1 }
 0x979   : > { %v4803_v5 = vmax.f32 %v14586_v27, %v14588_v13 }
 0x97b   : > { %4804 = vmax.xlane.f32.xlu1 %v4803_v5  ;;  %v14592_v38 = vpop.f32.mrb[86].mxu1 }
 0x97c   : > { %v14594_v28 = vpop.f32.mrb[87].mxu1 }
 0x97d   : > { %v4806_v50 = vmax.f32 %v14592_v38, %v14594_v28 }
 0x97f   : > { %4807 = vmax.xlane.f32.xlu0 %v4806_v50  ;;  %v14598_v16 = vpop.f32.mrb[88].mxu1 }
 0x980   : > { %v14600_v23 = vpop.f32.mrb[89].mxu1 }
 0x981   : > { %v4809_v63 = vmax.f32 %v14598_v16, %v14600_v23 }
 0x983   : > { %4810 = vmax.xlane.f32.xlu1 %v4809_v63  ;;  %v14604_v24 = vpop.f32.mrb[90].mxu1 }
 0x984   : > { %v14606_v1 = vpop.f32.mrb[91].mxu1 }
 0x985   : > { %v4812_v59 = vmax.f32 %v14604_v24, %v14606_v1 }
 0x987   : > { %4813 = vmax.xlane.f32.xlu0 %v4812_v59  ;;  %v14610_v4 = vpop.f32.mrb[92].mxu1 }
 0x988   : > { %v14612_v15 = vpop.f32.mrb[93].mxu1 }
 0x989   : > { %v4815_v43 = vmax.f32 %v14610_v4, %v14612_v15 }
 0x98b   : > { %4816 = vmax.xlane.f32.xlu1 %v4815_v43  ;;  %v14616_v42 = vpop.f32.mrb[94].mxu1 }
 0x98c   : > { %v14618_v61 = vpop.f32.mrb[95].mxu1 }
 0x98d   : > { %v4818_v60 = vmax.f32 %v14616_v42, %v14618_v61 }
 0x98f   : > { %4819 = vmax.xlane.f32.xlu0 %v4818_v60  ;;  %v14622_v30 = vpop.f32.mrb[96].mxu1 }
 0x990   : > { %v14624_v18 = vpop.f32.mrb[97].mxu1 }
 0x991   : > { %v4821_v9 = vmax.f32 %v14622_v30, %v14624_v18 }
 0x993   : > { %4822 = vmax.xlane.f32.xlu1 %v4821_v9  ;;  %v14628_v53 = vpop.f32.mrb[98].mxu1 }
 0x994   : > { %v14630_v2 = vpop.f32.mrb[99].mxu1 }
 0x995   : > { %v4824_v32 = vmax.f32 %v14628_v53, %v14630_v2 }
 0x997   : > { %4825 = vmax.xlane.f32.xlu0 %v4824_v32  ;;  %v14634_v10 = vpop.f32.mrb[100].mxu1 }
 0x998   : > { %v14636_v58 = vpop.f32.mrb[101].mxu1 }
 0x999   : > { %v4827_v55 = vmax.f32 %v14634_v10, %v14636_v58 }
 0x99b   : > { %4828 = vmax.xlane.f32.xlu1 %v4827_v55  ;;  %v14640_v17 = vpop.f32.mrb[102].mxu1 }
 0x99c   : > { %v14642_v41 = vpop.f32.mrb[103].mxu1 }
 0x99d   : > { %18522 = vst [vmem:[#allocation42_spill] sm:$0xff] %v14642_v41  ;;  %v4830_v26 = vmax.f32 %v14640_v17, %v14642_v41 }
 0x99f   : > { %4831 = vmax.xlane.f32.xlu0 %v4830_v26  ;;  %v14646_v34 = vpop.f32.mrb[104].mxu1 }
 0x9a0   : > { %18523 = vst [vmem:[#allocation44_spill] sm:$0xff] %v14646_v34  ;;  %v14648_v22 = vpop.f32.mrb[105].mxu1 }
 0x9a1   : > { %18524 = vst [vmem:[#allocation43_spill] sm:$0xff] %v14648_v22  ;;  %v4833_v29 = vmax.f32 %v14646_v34, %v14648_v22 }
 0x9a3   : > { %4834 = vmax.xlane.f32.xlu1 %v4833_v29  ;;  %v14652_v49 = vpop.f32.mrb[106].mxu1 }
 0x9a4   : > { %18525 = vst [vmem:[#allocation41_spill] sm:$0xff] %v14652_v49  ;;  %v14654_v8 = vpop.f32.mrb[107].mxu1 }
 0x9a5   : > { %18526 = vst [vmem:[#allocation45_spill] sm:$0xff] %v14654_v8  ;;  %v4836_v54 = vmax.f32 %v14652_v49, %v14654_v8 }
 0x9a7   : > { %4837 = vmax.xlane.f32.xlu0 %v4836_v54  ;;  %v14658_v57 = vpop.f32.mrb[108].mxu1 }
 0x9a8   : > { %18527 = vst [vmem:[#allocation47_spill] sm:$0xff] %v14658_v57  ;;  %v14660_v7 = vpop.f32.mrb[109].mxu1 }
 0x9a9   : > { %18528 = vst [vmem:[#allocation49_spill] sm:$0xff] %v14660_v7  ;;  %v4839_v35 = vmax.f32 %v14658_v57, %v14660_v7 }
 0x9ab   : > { %4840 = vmax.xlane.f32.xlu1 %v4839_v35  ;;  %v14664_v51 = vpop.f32.mrb[110].mxu1 }
 0x9ac   : > { %18529 = vst [vmem:[#allocation48_spill] sm:$0xff] %v14664_v51  ;;  %v14666_v62 = vpop.f32.mrb[111].mxu1 }
 0x9ad   : > { %18530 = vst [vmem:[#allocation46_spill] sm:$0xff] %v14666_v62  ;;  %v4842_v5 = vmax.f32 %v14664_v51, %v14666_v62  ;;  %v3066_v62 = vld [vmem:[%s18026_s5 + $0x48] sm:$0xff] }
 0x9ae   : > { %10414 = vmatmul.mubr.msk.f32.gmra.mrb[42].mxu0 %vm3141_vm11, %v3066_v62 }
 0x9af   : > { %4843 = vmax.xlane.f32.xlu0 %v4842_v5  ;;  %v14670_v50 = vpop.f32.mrb[112].mxu1  ;;  %3302 = vmatprep.mubr.f32.mxu0 %v14468_v3 }
 0x9b0   : > { %18531 = vst [vmem:[#allocation51_spill] sm:$0xff] %v14670_v50  ;;  %v14672_v63 = vpop.f32.mrb[113].mxu1 }
 0x9b1   : > { %18532 = vst [vmem:[#allocation53_spill] sm:$0xff] %v14672_v63  ;;  %v4845_v59 = vmax.f32 %v14670_v50, %v14672_v63 }
 0x9b3   : > { %4846 = vmax.xlane.f32.xlu1 %v4845_v59  ;;  %v14676_v43 = vpop.f32.mrb[114].mxu1 }
 0x9b4   : > { %18533 = vst [vmem:[#allocation52_spill] sm:$0xff] %v14676_v43  ;;  %v14678_v60 = vpop.f32.mrb[115].mxu1 }
 0x9b5   : > { %18534 = vst [vmem:[#allocation50_spill] sm:$0xff] %v14678_v60  ;;  %v4848_v9 = vmax.f32 %v14676_v43, %v14678_v60 }
 0x9b7   : > { %4849 = vmax.xlane.f32.xlu0 %v4848_v9  ;;  %v14682_v32 = vpop.f32.mrb[116].mxu1 }
 0x9b8   : > { %v14684_v55 = vpop.f32.mrb[117].mxu1 }
 0x9bb   : > { %v14688_v29 = vpop.f32.mrb[118].mxu1 }
 0x9bc   : > { %v14690_v54 = vpop.f32.mrb[119].mxu1 }
 0x9bf   : > { %v14694_v5 = vpop.f32.mrb[120].mxu1 }
 0x9c0   : > { %v14696_v59 = vpop.f32.mrb[121].mxu1 }
 0x9c3   : > { %v14700_v19 = vpop.f32.mrb[122].mxu1 }
 0x9c4   : > { %v14702_v48 = vpop.f32.mrb[123].mxu1 }
 0x9c7   : > { %v14706_v46 = vpop.f32.mrb[124].mxu1 }
 0x9c8   : > { %v14708_v56 = vpop.f32.mrb[125].mxu1 }
 0x9cb   : > { %v14712_v40 = vpop.f32.mrb[126].mxu1 }
 0x9cc   : > { %v14714_v31 = vpop.f32.mrb[127].mxu1 }
 0x9cf   : > { %v14718_v60 = vpop.f32.mrb[128].mxu1 }
 0x9d0   : > { %v14720_v43 = vpop.f32.mrb[129].mxu1 }
 0x9d3   : > { %v14724_v63 = vpop.f32.mrb[130].mxu1 }
 0x9d4   : > { %v14726_v50 = vpop.f32.mrb[131].mxu1 }
 0x9e8   : > { %v4781_v9 = vpop.xlane.xlu0 %4780 }
 0x9e9   : > { %v4875_v51 = vsub.f32 %v14538_v12, %v4781_v9  ;;  %v4876_v26 = vsub.f32 %v14540_v37, %v4781_v9 }
 0x9eb   : > { %v4939_v7 = vmul.f32 1.442695, %v4875_v51  ;;  %v4941_v57 = vmul.f32 1.442695, %v4876_v26 }
 0x9ec   : > { %v4784_v8 = vpop.xlane.xlu1 %4783 }
 0x9ed   : > { %12042 = vpow2.f32 %v4939_v7  ;;  %v4877_v49 = vsub.f32 %v14544_v52, %v4784_v8  ;;  %v4878_v35 = vsub.f32 %v14546_v14, %v4784_v8 }
 0x9ee   : > { %12044 = vpow2.f32 %v4941_v57 }
 0x9ef   : > { %v4943_v22 = vmul.f32 1.442695, %v4877_v49  ;;  %v4945_v34 = vmul.f32 1.442695, %v4878_v35 }
 0x9f0   : > { %v4787_v41 = vpop.xlane.xlu0 %4786 }
 0x9f1   : > { %12046 = vpow2.f32 %v4943_v22  ;;  %v4879_v3 = vsub.f32 %v14550_v20, %v4787_v41  ;;  %v4880_v62 = vsub.f32 %v14552_v25, %v4787_v41 }
 0x9f2   : > { %12048 = vpow2.f32 %v4945_v34 }
 0x9f3   : > { %v4947_v12 = vmul.f32 1.442695, %v4879_v3  ;;  %v4949_v37 = vmul.f32 1.442695, %v4880_v62 }
 0x9f4   : > { %v4790_v51 = vpop.xlane.xlu0 %4789 }
 0x9f5   : > { %12050 = vpow2.f32 %v4947_v12  ;;  %v4881_v7 = vsub.f32 %v14556_v11, %v4790_v51  ;;  %v4882_v52 = vsub.f32 %v14558_v44, %v4790_v51 }
 0x9f6   : > { %12052 = vpow2.f32 %v4949_v37  ;;  %v18535_v37 = vmax.f32 %v14682_v32, %v14684_v55 }
 0x9f7   : > { %v14743_v14 = vpop.eup %12042  ;;  %v4951_v49 = vmul.f32 1.442695, %v4881_v7  ;;  %v4953_v8 = vmul.f32 1.442695, %v4882_v52 }
 0x9f8   : > { %v14745_v57 = vpop.eup %12044  ;;  %v4793_v22 = vpop.xlane.xlu1 %4792 }
 0x9f9   : > { %12054 = vpow2.f32 %v4951_v49  ;;  %v4883_v20 = vsub.f32 %v14562_v39, %v4793_v22  ;;  %v4884_v25 = vsub.f32 %v14564_v0, %v4793_v22  ;;  %v5067_v41 = vadd.f32 %v14745_v57, %v14743_v14 }
 0x9fa   : > { %12056 = vpow2.f32 %v4953_v8 }
 0x9fb   : > { %v14751_v11 = vpop.eup %12046  ;;  %v4955_v44 = vmul.f32 1.442695, %v4883_v20  ;;  %v4957_v34 = vmul.f32 1.442695, %v4884_v25  ;;  %5068 = vadd.xlane.f32.xlu1 %v5067_v41  ;;  %v18536_v20 = vmax.f32 %v14688_v29, %v14690_v54 }
 0x9fc   : > { %v14753_v26 = vpop.eup %12048  ;;  %v4796_v35 = vpop.xlane.xlu0 %4795 }
 0x9fd   : > { %12058 = vpow2.f32 %v4955_v44  ;;  %v4885_v9 = vsub.f32 %v14568_v47, %v4796_v35  ;;  %v4886_v3 = vsub.f32 %v14570_v33, %v4796_v35  ;;  %v5070_v39 = vadd.f32 %v14753_v26, %v14751_v11 }
 0x9fe   : > { %12060 = vpow2.f32 %v4957_v34 }
 0x9ff   : > { %v14759_v0 = vpop.eup %12050  ;;  %v4959_v62 = vmul.f32 1.442695, %v4885_v9  ;;  %v4961_v12 = vmul.f32 1.442695, %v4886_v3  ;;  %4852 = vmax.xlane.f32.xlu1 %v18535_v37  ;;  %5071 = vadd.xlane.f32.xlu0 %v5070_v39  ;;  %v18537_v3 = vmax.f32 %v14694_v5, %v14696_v59 }
 0xa00   : > { %v14764_v51 = vpop.eup %12052  ;;  %v4799_v7 = vpop.xlane.xlu1 %4798 }
 0xa01   : > { %12062 = vpow2.f32 %v4959_v62  ;;  %v4887_v47 = vsub.f32 %v14574_v21, %v4799_v7  ;;  %v4888_v33 = vsub.f32 %v14576_v6, %v4799_v7  ;;  %v5073_v52 = vadd.f32 %v14764_v51, %v14759_v0 }
 0xa02   : > { %12064 = vpow2.f32 %v4961_v12 }
 0xa03   : > { %v14770_v49 = vpop.eup %12054  ;;  %v4963_v8 = vmul.f32 1.442695, %v4887_v47  ;;  %v4965_v22 = vmul.f32 1.442695, %v4888_v33  ;;  %5074 = vadd.xlane.f32.xlu1 %v5073_v52  ;;  %4855 = vmax.xlane.f32.xlu0 %v18536_v20  ;;  %v18538_v33 = vmax.f32 %v14700_v19, %v14702_v48 }
 0xa04   : > { %v14775_v25 = vpop.eup %12056  ;;  %v4802_v41 = vpop.xlane.xlu0 %4801 }
 0xa05   : > { %12066 = vpow2.f32 %v4963_v8  ;;  %v4889_v21 = vsub.f32 %v14580_v36, %v4802_v41  ;;  %v4890_v6 = vsub.f32 %v14582_v45, %v4802_v41  ;;  %v5076_v44 = vadd.f32 %v14775_v25, %v14770_v49 }
 0xa06   : > { %12068 = vpow2.f32 %v4965_v22 }
 0xa07   : > { %v14781_v34 = vpop.eup %12058  ;;  %v4967_v35 = vmul.f32 1.442695, %v4889_v21  ;;  %v4969_v9 = vmul.f32 1.442695, %v4890_v6  ;;  %4858 = vmax.xlane.f32.xlu1 %v18537_v3  ;;  %5077 = vadd.xlane.f32.xlu0 %v5076_v44  ;;  %v18539_v6 = vmax.f32 %v14706_v46, %v14708_v56 }
 0xa08   : > { %v14786_v39 = vpop.eup %12060  ;;  %v4805_v62 = vpop.xlane.xlu1 %4804 }
 0xa09   : > { %12070 = vpow2.f32 %v4967_v35  ;;  %v4891_v36 = vsub.f32 %v14586_v27, %v4805_v62  ;;  %v4892_v45 = vsub.f32 %v14588_v13, %v4805_v62  ;;  %v5079_v12 = vadd.f32 %v14786_v39, %v14781_v34 }
 0xa0a   : > { %12072 = vpow2.f32 %v4969_v9 }
 0xa0b   : > { %v14792_v37 = vpop.eup %12062  ;;  %v4971_v7 = vmul.f32 1.442695, %v4891_v36  ;;  %v4973_v47 = vmul.f32 1.442695, %v4892_v45  ;;  %4861 = vmax.xlane.f32.xlu0 %v18538_v33  ;;  %5080 = vadd.xlane.f32.xlu1 %v5079_v12  ;;  %v18540_v45 = vmax.f32 %v14712_v40, %v14714_v31 }
 0xa0c   : > { %v14797_v52 = vpop.eup %12064  ;;  %v4808_v8 = vpop.xlane.xlu0 %4807 }
 0xa0d   : > { %12074 = vpow2.f32 %v4971_v7  ;;  %v4893_v27 = vsub.f32 %v14592_v38, %v4808_v8  ;;  %v4894_v13 = vsub.f32 %v14594_v28, %v4808_v8  ;;  %v5082_v22 = vadd.f32 %v14797_v52, %v14792_v37 }
 0xa0e   : > { %12076 = vpow2.f32 %v4973_v47 }
 0xa0f   : > { %v14803_v20 = vpop.eup %12066  ;;  %v4975_v41 = vmul.f32 1.442695, %v4893_v27  ;;  %v4977_v21 = vmul.f32 1.442695, %v4894_v13  ;;  %5083 = vadd.xlane.f32.xlu0 %v5082_v22  ;;  %4864 = vmax.xlane.f32.xlu1 %v18539_v6  ;;  %v18541_v13 = vmax.f32 %v14718_v60, %v14720_v43 }
 0xa10   : > { %v14808_v44 = vpop.eup %12068  ;;  %v4811_v35 = vpop.xlane.xlu1 %4810 }
 0xa11   : > { %12078 = vpow2.f32 %v4975_v41  ;;  %v4895_v38 = vsub.f32 %v14598_v16, %v4811_v35  ;;  %v4896_v28 = vsub.f32 %v14600_v23, %v4811_v35  ;;  %v5085_v9 = vadd.f32 %v14808_v44, %v14803_v20 }
 0xa12   : > { %12080 = vpow2.f32 %v4977_v21 }
 0xa13   : > { %v14814_v3 = vpop.eup %12070  ;;  %v4979_v62 = vmul.f32 1.442695, %v4895_v38  ;;  %v4981_v36 = vmul.f32 1.442695, %v4896_v28  ;;  %4867 = vmax.xlane.f32.xlu0 %v18540_v45  ;;  %5086 = vadd.xlane.f32.xlu1 %v5085_v9  ;;  %v18542_v28 = vmax.f32 %v14724_v63, %v14726_v50 }
 0xa14   : > { %v14819_v12 = vpop.eup %12072  ;;  %v4814_v7 = vpop.xlane.xlu0 %4813 }
 0xa15   : > { %12082 = vpow2.f32 %v4979_v62  ;;  %v4897_v16 = vsub.f32 %v14604_v24, %v4814_v7  ;;  %v4898_v23 = vsub.f32 %v14606_v1, %v4814_v7  ;;  %v5088_v47 = vadd.f32 %v14819_v12, %v14814_v3 }
 0xa16   : > { %12084 = vpow2.f32 %v4981_v36 }
 0xa17   : > { %v14825_v33 = vpop.eup %12074  ;;  %v4983_v8 = vmul.f32 1.442695, %v4897_v16  ;;  %v4985_v27 = vmul.f32 1.442695, %v4898_v23  ;;  %5089 = vadd.xlane.f32.xlu0 %v5088_v47  ;;  %4870 = vmax.xlane.f32.xlu1 %v18541_v13 }
 0xa18   : > { %v14830_v22 = vpop.eup %12076  ;;  %v4817_v41 = vpop.xlane.xlu1 %4816 }
 0xa19   : > { %12086 = vpow2.f32 %v4983_v8  ;;  %v4899_v24 = vsub.f32 %v14610_v4, %v4817_v41  ;;  %v4900_v1 = vsub.f32 %v14612_v15, %v4817_v41  ;;  %v5091_v21 = vadd.f32 %v14830_v22, %v14825_v33 }
 0xa1a   : > { %12088 = vpow2.f32 %v4985_v27 }
 0xa1b   : > { %v14836_v6 = vpop.eup %12078  ;;  %v4987_v35 = vmul.f32 1.442695, %v4899_v24  ;;  %v4989_v38 = vmul.f32 1.442695, %v4900_v1  ;;  %4873 = vmax.xlane.f32.xlu0 %v18542_v28  ;;  %5092 = vadd.xlane.f32.xlu1 %v5091_v21 }
 0xa1c   : > { %v14841_v9 = vpop.eup %12080  ;;  %v4820_v62 = vpop.xlane.xlu0 %4819 }
 0xa1d   : > { %12090 = vpow2.f32 %v4987_v35  ;;  %v4901_v4 = vsub.f32 %v14616_v42, %v4820_v62  ;;  %v4902_v15 = vsub.f32 %v14618_v61, %v4820_v62  ;;  %v5094_v36 = vadd.f32 %v14841_v9, %v14836_v6 }
 0xa1e   : > { %12092 = vpow2.f32 %v4989_v38 }
 0xa1f   : > { %v14847_v45 = vpop.eup %12082  ;;  %v4991_v7 = vmul.f32 1.442695, %v4901_v4  ;;  %v4993_v16 = vmul.f32 1.442695, %v4902_v15  ;;  %5095 = vadd.xlane.f32.xlu0 %v5094_v36 }
 0xa20   : > { %v14849_v23 = vpop.eup %12084  ;;  %v4823_v47 = vpop.xlane.xlu1 %4822 }
 0xa21   : > { %12094 = vpow2.f32 %v4991_v7  ;;  %v4903_v8 = vsub.f32 %v14622_v30, %v4823_v47  ;;  %v4904_v27 = vsub.f32 %v14624_v18, %v4823_v47  ;;  %v5097_v42 = vadd.f32 %v14849_v23, %v14847_v45 }
 0xa22   : > { %12096 = vpow2.f32 %v4993_v16 }
 0xa23   : > { %v14855_v61 = vpop.eup %12086  ;;  %v4995_v13 = vmul.f32 1.442695, %v4903_v8  ;;  %v4997_v41 = vmul.f32 1.442695, %v4904_v27  ;;  %5098 = vadd.xlane.f32.xlu1 %v5097_v42  ;;  %v18543_v42 = vld [vmem:[#allocation42_spill] sm:$0xff] }
 0xa24   : > { %v14857_v24 = vpop.eup %12088  ;;  %v4826_v1 = vpop.xlane.xlu0 %4825 }
 0xa25   : > { %12098 = vpow2.f32 %v4995_v13  ;;  %v4905_v21 = vsub.f32 %v14628_v53, %v4826_v1  ;;  %v4906_v35 = vsub.f32 %v14630_v2, %v4826_v1  ;;  %v5100_v30 = vadd.f32 %v14857_v24, %v14855_v61 }
 0xa26   : > { %12100 = vpow2.f32 %v4997_v41 }
 0xa27   : > { %v14863_v18 = vpop.eup %12090  ;;  %v4999_v38 = vmul.f32 1.442695, %v4905_v21  ;;  %v5001_v28 = vmul.f32 1.442695, %v4906_v35  ;;  %5101 = vadd.xlane.f32.xlu0 %v5100_v30  ;;  %v18545_v30 = vld [vmem:[#allocation44_spill] sm:$0xff] }
 0xa28   : > { %v14865_v62 = vpop.eup %12092  ;;  %v4829_v4 = vpop.xlane.xlu1 %4828 }
 0xa29   : > { %12102 = vpow2.f32 %v4999_v38  ;;  %v4907_v15 = vsub.f32 %v14634_v10, %v4829_v4  ;;  %v4908_v36 = vsub.f32 %v14636_v58, %v4829_v4  ;;  %v5103_v53 = vadd.f32 %v14865_v62, %v14863_v18 }
 0xa2a   : > { %12104 = vpow2.f32 %v5001_v28  ;;  %v18546_v28 = vld [vmem:[#allocation43_spill] sm:$0xff] }
 0xa2b   : > { %v14871_v2 = vpop.eup %12094  ;;  %v5003_v7 = vmul.f32 1.442695, %v4907_v15  ;;  %v5005_v16 = vmul.f32 1.442695, %v4908_v36  ;;  %5104 = vadd.xlane.f32.xlu1 %v5103_v53 }
 0xa2c   : > { %v14873_v47 = vpop.eup %12096  ;;  %v4832_v8 = vpop.xlane.xlu0 %4831 }
 0xa2d   : > { %12106 = vpow2.f32 %v5003_v7  ;;  %v4909_v27 = vsub.f32 %v14640_v17, %v4832_v8  ;;  %v4910_v13 = vsub.f32 %v18543_v42, %v4832_v8  ;;  %v5106_v10 = vadd.f32 %v14873_v47, %v14871_v2  ;;  %v18548_v8 = vld [vmem:[#allocation41_spill] sm:$0xff] }
 0xa2e   : > { %12108 = vpow2.f32 %v5005_v16  ;;  %v18549_v42 = vld [vmem:[#allocation45_spill] sm:$0xff] }
 0xa2f   : > { %v14879_v58 = vpop.eup %12098  ;;  %v5007_v41 = vmul.f32 1.442695, %v4909_v27  ;;  %v5009_v1 = vmul.f32 1.442695, %v4910_v13  ;;  %5107 = vadd.xlane.f32.xlu0 %v5106_v10 }
 0xa30   : > { %18544 = vst [vmem:[#allocation33_spill] sm:$0xff] %v14879_v58  ;;  %v14881_v21 = vpop.eup %12100  ;;  %v4835_v35 = vpop.xlane.xlu1 %4834 }
 0xa31   : > { %12110 = vpow2.f32 %v5007_v41  ;;  %v4911_v38 = vsub.f32 %v18545_v30, %v4835_v35  ;;  %v4912_v4 = vsub.f32 %v18546_v28, %v4835_v35  ;;  %v5109_v17 = vadd.f32 %v14881_v21, %v14879_v58  ;;  %v18552_v28 = vld [vmem:[#allocation47_spill] sm:$0xff] }
 0xa32   : > { %12112 = vpow2.f32 %v5009_v1 }
 0xa33   : > { %v14887_v15 = vpop.eup %12102  ;;  %v5011_v36 = vmul.f32 1.442695, %v4911_v38  ;;  %v5013_v53 = vmul.f32 1.442695, %v4912_v4  ;;  %5110 = vadd.xlane.f32.xlu1 %v5109_v17  ;;  %v18553_v17 = vld [vmem:[#allocation49_spill] sm:$0xff] }
 0xa34   : > { %18547 = vst [vmem:[#allocation34_spill] sm:$0xff] %v14887_v15  ;;  %v14889_v7 = vpop.eup %12104  ;;  %v4838_v16 = vpop.xlane.xlu0 %4837 }
 0xa35   : > { %12114 = vpow2.f32 %v5011_v36  ;;  %v4913_v27 = vsub.f32 %v18548_v8, %v4838_v16  ;;  %v4914_v13 = vsub.f32 %v18549_v42, %v4838_v16  ;;  %v5112_v10 = vadd.f32 %v14889_v7, %v14887_v15 }
 0xa36   : > { %12116 = vpow2.f32 %v5013_v53 }
 0xa37   : > { %v14895_v41 = vpop.eup %12106  ;;  %v5015_v1 = vmul.f32 1.442695, %v4913_v27  ;;  %v5017_v35 = vmul.f32 1.442695, %v4914_v13  ;;  %5113 = vadd.xlane.f32.xlu0 %v5112_v10  ;;  %v18556_v10 = vld [vmem:[#allocation48_spill] sm:$0xff] }
 0xa38   : > { %18550 = vst [vmem:[#allocation42_spill] sm:$0xff] %v14895_v41  ;;  %v14897_v30 = vpop.eup %12108  ;;  %v4841_v38 = vpop.xlane.xlu1 %4840 }
 0xa39   : > { %18551 = vst [vmem:[#allocation44_spill] sm:$0xff] %v14897_v30  ;;  %12118 = vpow2.f32 %v5015_v1  ;;  %v4915_v4 = vsub.f32 %v18552_v28, %v4841_v38  ;;  %v4916_v36 = vsub.f32 %v18553_v17, %v4841_v38  ;;  %v5115_v16 = vadd.f32 %v14897_v30, %v14895_v41  ;;  %v18557_v1 = vld [vmem:[#allocation46_spill] sm:$0xff] }
 0xa3a   : > { %12120 = vpow2.f32 %v5017_v35 }
 0xa3b   : > { %v14903_v8 = vpop.eup %12110  ;;  %v5019_v53 = vmul.f32 1.442695, %v4915_v4  ;;  %v5021_v42 = vmul.f32 1.442695, %v4916_v36  ;;  %5116 = vadd.xlane.f32.xlu1 %v5115_v16  ;;  %v18558_v16 = vld [vmem:[#allocation51_spill] sm:$0xff] }
 0xa3c   : > { %18554 = vst [vmem:[#allocation43_spill] sm:$0xff] %v14903_v8  ;;  %v14905_v27 = vpop.eup %12112  ;;  %v4844_v13 = vpop.xlane.xlu0 %4843 }
 0xa3d   : > { %18555 = vst [vmem:[#allocation41_spill] sm:$0xff] %v14905_v27  ;;  %12122 = vpow2.f32 %v5019_v53  ;;  %v4917_v58 = vsub.f32 %v18556_v10, %v4844_v13  ;;  %v4918_v15 = vsub.f32 %v18557_v1, %v4844_v13  ;;  %v5118_v38 = vadd.f32 %v14905_v27, %v14903_v8  ;;  %v18559_v53 = vld [vmem:[#allocation53_spill] sm:$0xff] }
 0xa3e   : > { %12124 = vpow2.f32 %v5021_v42 }
 0xa3f   : > { %v14911_v28 = vpop.eup %12114  ;;  %v5023_v35 = vmul.f32 1.442695, %v4917_v58  ;;  %v5025_v17 = vmul.f32 1.442695, %v4918_v15  ;;  %5119 = vadd.xlane.f32.xlu0 %v5118_v38  ;;  %v18560_v38 = vld [vmem:[#allocation52_spill] sm:$0xff] }
 0xa40   : > { %v14913_v4 = vpop.eup %12116  ;;  %v4847_v36 = vpop.xlane.xlu1 %4846 }
 0xa41   : > { %12126 = vpow2.f32 %v5023_v35  ;;  %v4919_v41 = vsub.f32 %v18558_v16, %v4847_v36  ;;  %v4920_v30 = vsub.f32 %v18559_v53, %v4847_v36  ;;  %v5121_v13 = vadd.f32 %v14913_v4, %v14911_v28  ;;  %v18561_v35 = vld [vmem:[#allocation50_spill] sm:$0xff] }
 0xa42   : > { %12128 = vpow2.f32 %v5025_v17 }
 0xa43   : > { %v14919_v10 = vpop.eup %12118  ;;  %v5027_v42 = vmul.f32 1.442695, %v4919_v41  ;;  %v5029_v1 = vmul.f32 1.442695, %v4920_v30  ;;  %5122 = vadd.xlane.f32.xlu1 %v5121_v13 }
 0xa44   : > { %v14921_v58 = vpop.eup %12120  ;;  %v4850_v15 = vpop.xlane.xlu0 %4849 }
 0xa45   : > { %12130 = vpow2.f32 %v5027_v42  ;;  %v4921_v8 = vsub.f32 %v18560_v38, %v4850_v15  ;;  %v4922_v27 = vsub.f32 %v18561_v35, %v4850_v15  ;;  %v5124_v36 = vadd.f32 %v14921_v58, %v14919_v10 }
 0xa46   : > { %12132 = vpow2.f32 %v5029_v1 }
 0xa47   : > { %v14927_v16 = vpop.eup %12122  ;;  %v5031_v17 = vmul.f32 1.442695, %v4921_v8  ;;  %v5033_v53 = vmul.f32 1.442695, %v4922_v27  ;;  %5125 = vadd.xlane.f32.xlu0 %v5124_v36 }
 0xa48   : > { %18562 = vst [vmem:[#allocation45_spill] sm:$0xff] %v14927_v16  ;;  %v14929_v41 = vpop.eup %12124 }
 0xa49   : > { %18563 = vst [vmem:[#allocation47_spill] sm:$0xff] %v14929_v41  ;;  %12134 = vpow2.f32 %v5031_v17  ;;  %v5127_v30 = vadd.f32 %v14929_v41, %v14927_v16 }
 0xa4a   : > { %12136 = vpow2.f32 %v5033_v53 }
 0xa4b   : > { %v14933_v13 = vpop.eup %12126  ;;  %5128 = vadd.xlane.f32.xlu1 %v5127_v30 }
 0xa4c   : > { %18564 = vst [vmem:[#allocation49_spill] sm:$0xff] %v14933_v13  ;;  %v14935_v42 = vpop.eup %12128 }
 0xa4d   : > { %18565 = vst [vmem:[#allocation48_spill] sm:$0xff] %v14935_v42  ;;  %v5130_v1 = vadd.f32 %v14935_v42, %v14933_v13 }
 0xa4f   : > { %v14939_v15 = vpop.eup %12130  ;;  %5131 = vadd.xlane.f32.xlu0 %v5130_v1 }
 0xa50   : > { %18566 = vst [vmem:[#allocation46_spill] sm:$0xff] %v14939_v15  ;;  %v14941_v8 = vpop.eup %12132 }
 0xa51   : > { %18567 = vst [vmem:[#allocation51_spill] sm:$0xff] %v14941_v8  ;;  %v5133_v27 = vadd.f32 %v14941_v8, %v14939_v15 }
 0xa53   : > { %v14945_v38 = vpop.eup %12134  ;;  %5134 = vadd.xlane.f32.xlu1 %v5133_v27 }
 0xa54   : > { %18568 = vst [vmem:[#allocation53_spill] sm:$0xff] %v14945_v38  ;;  %v14947_v35 = vpop.eup %12136 }
 0xa55   : > { %18569 = vst [vmem:[#allocation52_spill] sm:$0xff] %v14947_v35  ;;  %v5136_v36 = vadd.f32 %v14947_v35, %v14945_v38 }
 0xa57   : > { %5137 = vadd.xlane.f32.xlu0 %v5136_v36 }
 0xa88   : > { %v5069_v17 = vpop.xlane.xlu1 %5068 }
 0xa89   : > { %12138 = vrcp.f32 %v5069_v17 }
 0xa8c   : > { %v5072_v53 = vpop.xlane.xlu0 %5071  ;;  %v4853_v30 = vpop.xlane.xlu1 %4852 }
 0xa8d   : > { %12140 = vrcp.f32 %v5072_v53  ;;  %v4923_v1 = vsub.f32 %v14682_v32, %v4853_v30  ;;  %v4924_v16 = vsub.f32 %v14684_v55, %v4853_v30 }
 0xa8f   : > { %v5035_v13 = vmul.f32 1.442695, %v4923_v1  ;;  %v5037_v15 = vmul.f32 1.442695, %v4924_v16 }
 0xa90   : > { %v4856_v8 = vpop.xlane.xlu0 %4855  ;;  %v5075_v42 = vpop.xlane.xlu1 %5074 }
 0xa91   : > { %12142 = vpow2.f32 %v5035_v13  ;;  %v4925_v27 = vsub.f32 %v14688_v29, %v4856_v8  ;;  %v4926_v41 = vsub.f32 %v14690_v54, %v4856_v8 }
 0xa92   : > { %12144 = vpow2.f32 %v5037_v15 }
 0xa93   : > { %v5039_v36 = vmul.f32 1.442695, %v4925_v27  ;;  %v5041_v38 = vmul.f32 1.442695, %v4926_v41  ;;  %12146 = vrcp.f32 %v5075_v42  ;;  %v12139_v53 = vpop.eup %12138 }
 0xa94   : > { %v5078_v17 = vpop.xlane.xlu0 %5077  ;;  %v4859_v35 = vpop.xlane.xlu1 %4858  ;;  %v5196_v54 = vmul.f32 %v12139_v53, %v14745_v57  ;;  %v5195_v42 = vmul.f32 %v12139_v53, %v14743_v14 }
 0xa95   : > { %12148 = vpow2.f32 %v5039_v36  ;;  %v4927_v32 = vsub.f32 %v14694_v5, %v4859_v35  ;;  %v4928_v55 = vsub.f32 %v14696_v59, %v4859_v35 }
 0xa96   : > { %12150 = vpow2.f32 %v5041_v38 }
 0xa97   : > { %v12141_v16 = vpop.eup %12140  ;;  %12152 = vrcp.f32 %v5078_v17  ;;  %v5043_v13 = vmul.f32 1.442695, %v4927_v32  ;;  %v5045_v30 = vmul.f32 1.442695, %v4928_v55 }
 0xa98   : > { %v4862_v29 = vpop.xlane.xlu0 %4861  ;;  %v5081_v1 = vpop.xlane.xlu1 %5080  ;;  %v5198_v41 = vmul.f32 %v12141_v16, %v14753_v26  ;;  %v5197_v15 = vmul.f32 %v12141_v16, %v14751_v11 }
 0xa99   : > { %12154 = vpow2.f32 %v5043_v13  ;;  %v4929_v5 = vsub.f32 %v14700_v19, %v4862_v29  ;;  %v4930_v59 = vsub.f32 %v14702_v48, %v4862_v29 }
 0xa9a   : > { %12156 = vpow2.f32 %v5045_v30  ;;  %v5260_v8 = vpack.c.bf16 %v5198_v41, %v5196_v54  ;;  %v5259_v38 = vpack.c.bf16 %v5197_v15, %v5195_v42 }
 0xa9b   : > { %v14963_v35 = vpop.eup %12142  ;;  %v5047_v27 = vmul.f32 1.442695, %v4929_v5  ;;  %v5049_v36 = vmul.f32 1.442695, %v4930_v59  ;;  %12158 = vrcp.f32 %v5081_v1 }
 0xa9c   : > { %v14965_v57 = vpop.eup %12144  ;;  %v5084_v26 = vpop.xlane.xlu0 %5083  ;;  %5293 = vmatprep.subr.bf16.mxu1 %v5260_v8 }
 0xa9d   : > { %v4865_v14 = vpop.xlane.xlu1 %4864  ;;  %v12147_v17 = vpop.eup %12146  ;;  %12160 = vpow2.f32 %v5047_v27  ;;  %5294 = vmatpush1.bf16.xpose.msra.mxu1 %v5259_v38  ;;  %v5139_v48 = vadd.f32 %v14965_v57, %v14963_v35 }
 0xa9e   : > { %v4931_v11 = vsub.f32 %v14706_v46, %v4865_v14  ;;  %v4932_v19 = vsub.f32 %v14708_v56, %v4865_v14  ;;  %12162 = vpow2.f32 %v5049_v36  ;;  %v5200_v29 = vmul.f32 %v12147_v17, %v14764_v51 }
 0xa9f   : > { %v14971_v53 = vpop.eup %12148  ;;  %12164 = vrcp.f32 %v5084_v26  ;;  %5140 = vadd.xlane.f32.xlu1 %v5139_v48  ;;  %v5199_v42 = vmul.f32 %v12147_v17, %v14759_v0 }
 0xaa0   : > { %v5051_v32 = vmul.f32 1.442695, %v4931_v11  ;;  %v5053_v55 = vmul.f32 1.442695, %v4932_v19  ;;  %v14973_v16 = vpop.eup %12150  ;;  %v4868_v13 = vpop.xlane.xlu0 %4867 }
 0xaa1   : > { %v5087_v30 = vpop.xlane.xlu1 %5086  ;;  %v12153_v46 = vpop.eup %12152  ;;  %v4933_v56 = vsub.f32 %v14712_v40, %v4868_v13  ;;  %v4934_v1 = vsub.f32 %v14714_v31, %v4868_v13  ;;  %v5142_v54 = vadd.f32 %v14973_v16, %v14971_v53 }
 0xaa2   : > { %12166 = vpow2.f32 %v5051_v32  ;;  %v5202_v41 = vmul.f32 %v12153_v46, %v14775_v25  ;;  %v5201_v15 = vmul.f32 %v12153_v46, %v14770_v49 }
 0xaa3   : > { %12168 = vpow2.f32 %v5053_v55  ;;  %v14983_v5 = vpop.eup %12154  ;;  %v5055_v59 = vmul.f32 1.442695, %v4933_v56  ;;  %v5057_v51 = vmul.f32 1.442695, %v4934_v1  ;;  %5143 = vadd.xlane.f32.xlu0 %v5142_v54 }
 0xaa4   : > { %v14985_v8 = vpop.eup %12156  ;;  %12170 = vrcp.f32 %v5087_v30  ;;  %v5090_v40 = vpop.xlane.xlu0 %5089  ;;  %v5262_v31 = vpack.c.bf16 %v5202_v41, %v5200_v29  ;;  %v5261_v27 = vpack.c.bf16 %v5201_v15, %v5199_v42 }
 0xaa5   : > { %v4871_v38 = vpop.xlane.xlu1 %4870  ;;  %v12159_v36 = vpop.eup %12158  ;;  %12172 = vpow2.f32 %v5055_v59  ;;  %v5145_v49 = vadd.f32 %v14985_v8, %v14983_v5 }
 0xaa6   : > { %v4935_v25 = vsub.f32 %v14718_v60, %v4871_v38  ;;  %v4936_v0 = vsub.f32 %v14720_v43, %v4871_v38  ;;  %12174 = vpow2.f32 %v5057_v51  ;;  %5295 = vmatprep.subr.bf16.mxu1 %v5262_v31  ;;  %v5204_v48 = vmul.f32 %v12159_v36, %v14786_v39 }
 0xaa7   : > { %v14991_v26 = vpop.eup %12160  ;;  %12176 = vrcp.f32 %v5090_v40  ;;  %5296 = vmatpush1.bf16.xpose.msra.mxu1 %v5261_v27  ;;  %5146 = vadd.xlane.f32.xlu1 %v5145_v49  ;;  %v5203_v29 = vmul.f32 %v12159_v36, %v14781_v34 }
 0xaa8   : > { %v5059_v14 = vmul.f32 1.442695, %v4935_v25  ;;  %v5061_v17 = vmul.f32 1.442695, %v4936_v0  ;;  %v14993_v11 = vpop.eup %12162  ;;  %v4874_v19 = vpop.xlane.xlu0 %4873 }
 0xaa9   : > { %v12165_v60 = vpop.eup %12164  ;;  %v4937_v43 = vsub.f32 %v14724_v63, %v4874_v19  ;;  %v4938_v32 = vsub.f32 %v14726_v50, %v4874_v19  ;;  %v5093_v55 = vpop.xlane.xlu1 %5092  ;;  %v5148_v13 = vadd.f32 %v14993_v11, %v14991_v26 }
 0xaaa   : > { %12178 = vpow2.f32 %v5059_v14  ;;  %v5206_v30 = vmul.f32 %v12165_v60, %v14797_v52  ;;  %v5205_v46 = vmul.f32 %v12165_v60, %v14792_v37 }
 0xaab   : > { %12180 = vpow2.f32 %v5061_v17  ;;  %v5063_v39 = vmul.f32 1.442695, %v4937_v43  ;;  %v5065_v1 = vmul.f32 1.442695, %v4938_v32  ;;  %5149 = vadd.xlane.f32.xlu0 %v5148_v13 }
 0xaac   : > { %v15003_v56 = vpop.eup %12166  ;;  %12182 = vrcp.f32 %v5093_v55  ;;  %v5096_v50 = vpop.xlane.xlu0 %5095  ;;  %v5264_v63 = vpack.c.bf16 %v5206_v30, %v5204_v48  ;;  %v5263_v41 = vpack.c.bf16 %v5205_v46, %v5203_v29 }
 0xaad   : > { %v15005_v54 = vpop.eup %12168  ;;  %12184 = vpow2.f32 %v5063_v39 }
 0xaae   : > { %v5151_v42 = vadd.f32 %v15005_v54, %v15003_v56  ;;  %v12171_v52 = vpop.eup %12170  ;;  %12186 = vpow2.f32 %v5065_v1  ;;  %5297 = vmatprep.subr.bf16.mxu1 %v5264_v63 }
 0xaaf   : > { %v15009_v34 = vpop.eup %12172  ;;  %12188 = vrcp.f32 %v5096_v50  ;;  %5298 = vmatpush1.bf16.xpose.msra.mxu1 %v5263_v41  ;;  %v5208_v40 = vmul.f32 %v12171_v52, %v14808_v44  ;;  %v5207_v38 = vmul.f32 %v12171_v52, %v14803_v20  ;;  %v3078_v52 = vld [vmem:[%s18027_s6 + $0x48] sm:$0xff] }
 0xab0   : > { %5152 = vadd.xlane.f32.xlu1 %v5151_v42  ;;  %v15011_v37 = vpop.eup %12174  ;;  %v5099_v15 = vpop.xlane.xlu1 %5098 }
 0xab1   : > { %v12177_v59 = vpop.eup %12176  ;;  %v5154_v51 = vadd.f32 %v15011_v37, %v15009_v34  ;;  %12190 = vrcp.f32 %v5099_v15  ;;  %v15042_v15 = vpop.f32.mrb[42].mxu0 }
 0xab2   : > { %v5210_v31 = vmul.f32 %v12177_v59, %v14819_v12  ;;  %v5209_v27 = vmul.f32 %v12177_v59, %v14814_v3 }
 0xab3   : > { %5155 = vadd.xlane.f32.xlu0 %v5154_v51 }
 0xab4   : > { %v15019_v36 = vpop.eup %12178  ;;  %v5102_v0 = vpop.xlane.xlu0 %5101  ;;  %v5266_v49 = vpack.c.bf16 %v5210_v31, %v5208_v40  ;;  %v5265_v14 = vpack.c.bf16 %v5209_v27, %v5207_v38  ;;  %v3072_v40 = vld [vmem:[%s18027_s6 + $0x18] sm:$0xff] }
 0xab5   : > { %v15021_v25 = vpop.eup %12180  ;;  %12192 = vrcp.f32 %v5102_v0 }
 0xab6   : > { %v5157_v17 = vadd.f32 %v15021_v25, %v15019_v36  ;;  %v12183_v44 = vpop.eup %12182  ;;  %5299 = vmatprep.subr.bf16.mxu1 %v5266_v49 }
 0xab7   : > { %v15025_v12 = vpop.eup %12184  ;;  %5300 = vmatpush1.bf16.xpose.msra.mxu1 %v5265_v14  ;;  %v5212_v60 = vmul.f32 %v12183_v44, %v14830_v22  ;;  %v5211_v32 = vmul.f32 %v12183_v44, %v14825_v33  ;;  %v18570_v44 = vld [vmem:[#allocation34_spill] sm:$0xff] }
 0xab8   : > { %5158 = vadd.xlane.f32.xlu1 %v5157_v17  ;;  %v15027_v20 = vpop.eup %12186  ;;  %v5105_v3 = vpop.xlane.xlu1 %5104 }
 0xab9   : > { %v12189_v19 = vpop.eup %12188  ;;  %v5160_v48 = vadd.f32 %v15027_v20, %v15025_v12  ;;  %12194 = vrcp.f32 %v5105_v3 }
 0xaba   : > { %v5214_v43 = vmul.f32 %v12189_v19, %v14841_v9  ;;  %v5213_v55 = vmul.f32 %v12189_v19, %v14836_v6  ;;  %v3076_v19 = vld [vmem:[%s18027_s6 + $0x38] sm:$0xff] }
 0xabb   : > { %5161 = vadd.xlane.f32.xlu0 %v5160_v48  ;;  %v12191_v46 = vpop.eup %12190  ;;  %v18571_v48 = vld [vmem:[#allocation33_spill] sm:$0xff] }
 0xabc   : > { %v5108_v13 = vpop.xlane.xlu0 %5107  ;;  %v5268_v30 = vpack.c.bf16 %v5214_v43, %v5212_v60  ;;  %v5267_v29 = vpack.c.bf16 %v5213_v55, %v5211_v32  ;;  %v5216_v50 = vmul.f32 %v12191_v46, %v14849_v23  ;;  %v5215_v33 = vmul.f32 %v12191_v46, %v14847_v45  ;;  %v15044_v23 = vpop.f32.mrb[43].mxu0  ;;  %v18573_v46 = vld [vmem:[#allocation41_spill] sm:$0xff] }
 0xabd   : > { %12196 = vrcp.f32 %v5108_v13 }
 0xabe   : > { %5301 = vmatprep.subr.bf16.mxu1 %v5268_v30  ;;  %v18572_v30 = vld [vmem:[#allocation44_spill] sm:$0xff] }
 0xabf   : > { %v12193_v39 = vpop.eup %12192  ;;  %5302 = vmatpush1.bf16.xpose.msra.mxu1 %v5267_v29 }
 0xac0   : > { %v5111_v1 = vpop.xlane.xlu1 %5110  ;;  %v5218_v22 = vmul.f32 %v12193_v39, %v14857_v24  ;;  %v5217_v9 = vmul.f32 %v12193_v39, %v14855_v61 }
 0xac1   : > { %12198 = vrcp.f32 %v5111_v1  ;;  %v18574_v1 = vld [vmem:[#allocation43_spill] sm:$0xff] }
 0xac2   : > { %v5270_v6 = vpack.c.bf16 %v5218_v22, %v5216_v50  ;;  %v5269_v63 = vpack.c.bf16 %v5217_v9, %v5215_v33  ;;  %v18575_v22 = vld [vmem:[#allocation42_spill] sm:$0xff] }
 0xac3   : > { %v12195_v42 = vpop.eup %12194 }
 0xac4   : > { %v5114_v41 = vpop.xlane.xlu0 %5113  ;;  %5303 = vmatprep.subr.bf16.mxu1 %v5270_v6  ;;  %v5220_v45 = vmul.f32 %v12195_v42, %v14865_v62  ;;  %v5219_v31 = vmul.f32 %v12195_v42, %v14863_v18  ;;  %v3075_v62 = vld [vmem:[%s18027_s6 + $0x30] sm:$0xff] }
 0xac5   : > { %12200 = vrcp.f32 %v5114_v41 }
 0xac7   : > { %v12197_v24 = vpop.eup %12196  ;;  %5304 = vmatpush1.bf16.xpose.msra.mxu1 %v5269_v63 }
 0xac8   : > { %v5117_v61 = vpop.xlane.xlu1 %5116  ;;  %v5222_v59 = vmul.f32 %v12197_v24, %v14873_v47  ;;  %v5221_v51 = vmul.f32 %v12197_v24, %v14871_v2  ;;  %v3071_v2 = vld [vmem:[%s18027_s6 + $0x10] sm:$0xff] }
 0xac9   : > { %3128 = vperm.xlu1 %11365, %v3078_v52   ;;  %12202 = vrcp.f32 %v5117_v61 }
 0xaca   : > { %v5272_v38 = vpack.c.bf16 %v5222_v59, %v5220_v45  ;;  %v5271_v27 = vpack.c.bf16 %v5221_v51, %v5219_v31 }
 0xacb   : > { %v12199_v49 = vpop.eup %12198 }
 0xacc   : > { %v5120_v0 = vpop.xlane.xlu0 %5119  ;;  %5305 = vmatprep.subr.bf16.mxu1 %v5272_v38  ;;  %v5224_v14 = vmul.f32 %v12199_v49, %v14881_v21  ;;  %v5223_v60 = vmul.f32 %v12199_v49, %v18571_v48 }
 0xacd   : > { %3098 = vperm.xlu1 %11365, %v3072_v40   ;;  %12204 = vrcp.f32 %v5120_v0  ;;  %v18576_v0 = vld [vmem:[#allocation47_spill] sm:$0xff] }
 0xacf   : > { %v12201_v47 = vpop.eup %12200  ;;  %5306 = vmatpush1.bf16.xpose.msra.mxu1 %v5271_v27 }
 0xad0   : > { %v5123_v18 = vpop.xlane.xlu1 %5122  ;;  %v5226_v17 = vmul.f32 %v12201_v47, %v14889_v7  ;;  %v5225_v3 = vmul.f32 %v12201_v47, %v18570_v44 }
 0xad1   : > { %3113 = vperm.xlu1 %11365, %v3075_v62   ;;  %3093 = vperm.xlu0 %11364, %v3071_v2   ;;  %12206 = vrcp.f32 %v5123_v18  ;;  %v18577_v62 = vld [vmem:[#allocation48_spill] sm:$0xff] }
 0xad2   : > { %v5274_v43 = vpack.c.bf16 %v5226_v17, %v5224_v14  ;;  %v5273_v32 = vpack.c.bf16 %v5225_v3, %v5223_v60  ;;  %v18581_v60 = vld [vmem:[#allocation52_spill] sm:$0xff] }
 0xad3   : > { %v12203_v13 = vpop.eup %12202 }
 0xad4   : > { %v5126_v55 = vpop.xlane.xlu0 %5125  ;;  %5307 = vmatprep.subr.bf16.mxu1 %v5274_v43  ;;  %v5228_v29 = vmul.f32 %v12203_v13, %v18572_v30  ;;  %v5227_v9 = vmul.f32 %v12203_v13, %v18575_v22  ;;  %v10481_v13 = vld [vmem:[%s18028_s7 + $0x8] sm:$0xff] }
 0xad5   : > { %3118 = vperm.xlu1 %11365, %v3076_v19   ;;  %12208 = vrcp.f32 %v5126_v55  ;;  %v18580_v19 = vld [vmem:[#allocation51_spill] sm:$0xff] }
 0xad7   : > { %v12205_v21 = vpop.eup %12204  ;;  %5308 = vmatpush1.bf16.xpose.msra.mxu1 %v5273_v32  ;;  %v18582_v32 = vld [vmem:[#allocation53_spill] sm:$0xff] }
 0xad8   : > { %v5129_v7 = vpop.xlane.xlu1 %5128  ;;  %v5230_v39 = vmul.f32 %v12205_v21, %v18573_v46  ;;  %v5229_v50 = vmul.f32 %v12205_v21, %v18574_v1  ;;  %v18583_v21 = vld [vmem:[#allocation46_spill] sm:$0xff]  ;;  %v5336_v46 = vpack.c.bf16 %v10481_v13, %v10481_v13 }
 0xad9   : > { %12210 = vrcp.f32 %v5129_v7 }
 0xada   : > { %v5276_v33 = vpack.c.bf16 %v5230_v39, %v5228_v29  ;;  %v5275_v6 = vpack.c.bf16 %v5229_v50, %v5227_v9 }
 0xadb   : > { %v12207_v41 = vpop.eup %12206 }
 0xadc   : > { %v5132_v63 = vpop.xlane.xlu0 %5131  ;;  %5309 = vmatprep.subr.bf16.mxu1 %v5276_v33  ;;  %v5232_v24 = vmul.f32 %v12207_v41, %v14913_v4  ;;  %v5231_v59 = vmul.f32 %v12207_v41, %v14911_v28  ;;  %v18578_v4 = vld [vmem:[#allocation49_spill] sm:$0xff] }
 0xadd   : > { %12212 = vrcp.f32 %v5132_v63  ;;  %v18579_v28 = vld [vmem:[#allocation45_spill] sm:$0xff] }
 0xadf   : > { %v12209_v42 = vpop.eup %12208  ;;  %5310 = vmatpush1.bf16.xpose.msra.mxu1 %v5275_v6 }
 0xae0   : > { %v5135_v52 = vpop.xlane.xlu1 %5134  ;;  %v5234_v61 = vmul.f32 %v12209_v42, %v14921_v58  ;;  %v5233_v45 = vmul.f32 %v12209_v42, %v14919_v10  ;;  %v4335_v10 = vld [vmem:[%s18028_s7] sm:$0xff] }
 0xae1   : > { %12214 = vrcp.f32 %v5135_v52  ;;  %v4336_v17 = vpack.c.bf16 %v4335_v10, %v4335_v10 }
 0xae2   : > { %v5278_v51 = vpack.c.bf16 %v5234_v61, %v5232_v24  ;;  %v5277_v40 = vpack.c.bf16 %v5233_v45, %v5231_v59 }
 0xae3   : > { %v12211_v38 = vpop.eup %12210 }
 0xae4   : > { %v5138_v31 = vpop.xlane.xlu0 %5137  ;;  %5311 = vmatprep.subr.bf16.mxu1 %v5278_v51  ;;  %v5236_v49 = vmul.f32 %v12211_v38, %v18576_v0  ;;  %v5235_v58 = vmul.f32 %v12211_v38, %v18579_v28 }
 0xae5   : > { %12216 = vrcp.f32 %v5138_v31 }
 0xae7   : > { %v12213_v27 = vpop.eup %12212  ;;  %5312 = vmatpush1.bf16.xpose.msra.mxu1 %v5277_v40 }
 0xae8   : > { %v5238_v2 = vmul.f32 %v12213_v27, %v18577_v62  ;;  %v5237_v47 = vmul.f32 %v12213_v27, %v18578_v4 }
 0xaea   : > { %v5280_v18 = vpack.c.bf16 %v5238_v2, %v5236_v49  ;;  %v5279_v14 = vpack.c.bf16 %v5237_v47, %v5235_v58 }
 0xaeb   : > { %v12215_v44 = vpop.eup %12214 }
 0xaec   : > { %5313 = vmatprep.subr.bf16.mxu1 %v5280_v18  ;;  %v5240_v48 = vmul.f32 %v12215_v44, %v18580_v19  ;;  %v5239_v7 = vmul.f32 %v12215_v44, %v18583_v21  ;;  %v18584_v18 = vld [vmem:[#allocation35_spill] sm:$0xff] }
 0xaef   : > { %v12217_v3 = vpop.eup %12216  ;;  %5314 = vmatpush1.bf16.xpose.msra.mxu1 %v5279_v14  ;;  %5421 = vxpose.xlu0.c.b16.start.end [1/1] (short) (narrow) %v4336_v17, 32 }
 0xaf0   : > { %v5242_v43 = vmul.f32 %v12217_v3, %v18581_v60  ;;  %v5241_v55 = vmul.f32 %v12217_v3, %v18582_v32  ;;  %v18586_v32 = vld [vmem:[#allocation39_spill] sm:$0xff] }
 0xaf2   : > { %v5282_v30 = vpack.c.bf16 %v5242_v43, %v5240_v48  ;;  %v5281_v29 = vpack.c.bf16 %v5241_v55, %v5239_v7  ;;  %v4338_v55 = vpack.c.bf16 %v18586_v32, %v18586_v32  ;;  %v18588_v7 = vld [vmem:[#allocation55_spill] sm:$0xff]  ;;  %v18593_v32 = vld [vmem:[#allocation57_spill] sm:$0xff] }
 0xaf4   : > { %5315 = vmatprep.subr.bf16.mxu1 %v5282_v30 }
 0xaf7   : > { %5316 = vmatpush1.bf16.xpose.msra.mxu1 %v5281_v29  ;;  %v18589_v29 = vmov 0  }
 0xaf8   : > { %5339 = vxpose.xlu1.c.b16.start.end [1/1] (short) (narrow) %v5336_v46, 32 }
 0xb2c   : > { %v5141_v39 = vpop.xlane.xlu1 %5140 }
 0xb2d   : > { %12218 = vrcp.f32 %v5141_v39  ;;  %v18590_v39 = vld [vmem:[#allocation54_spill] sm:$0xff] }
 0xb30   : > { %v5144_v1 = vpop.xlane.xlu0 %5143 }
 0xb31   : > { %12220 = vrcp.f32 %v5144_v1 }
 0xb34   : > { %v5147_v50 = vpop.xlane.xlu1 %5146 }
 0xb35   : > { %12222 = vrcp.f32 %v5147_v50  ;;  %v15120_v50 = vld [vmem:[#allocation3] sm:$0xff] }
 0xb37   : > { %v12219_v9 = vpop.eup %12218 }
 0xb38   : > { %v5150_v22 = vpop.xlane.xlu0 %5149  ;;  %v5244_v63 = vmul.f32 %v12219_v9, %v14965_v57  ;;  %v5243_v42 = vmul.f32 %v12219_v9, %v14963_v35 }
 0xb39   : > { %12224 = vrcp.f32 %v5150_v22  ;;  %v18591_v22 = vld [vmem:[#allocation37_spill] sm:$0xff] }
 0xb3b   : > { %v12221_v33 = vpop.eup %12220 }
 0xb3c   : > { %v5246_v41 = vmul.f32 %v12221_v33, %v14973_v16  ;;  %v5245_v52 = vmul.f32 %v12221_v33, %v14971_v53  ;;  %v18592_v33 = vld [vmem:[#allocation38_spill] sm:$0xff] }
 0xb3d   : > { %v5153_v6 = vpop.xlane.xlu1 %5152 }
 0xb3e   : > { %v5284_v24 = vpack.c.bf16 %v5246_v41, %v5244_v63  ;;  %v5283_v61 = vpack.c.bf16 %v5245_v52, %v5243_v42  ;;  %12226 = vrcp.f32 %v5153_v6  ;;  %v3067_v42 = vld [vmem:[%s18026_s5 + $0x50] sm:$0xff]  ;;  %v3068_v52 = vld [vmem:[%s18026_s5 + $0x58] sm:$0xff] }
 0xb3f   : > { %v12223_v59 = vpop.eup %12222  ;;  %10415 = vmatmul.mubr.msk.f32.gmra.mrb[44].mxu0 %vm3141_vm11, %v3067_v42 }
 0xb40   : > { %v5156_v45 = vpop.xlane.xlu0 %5155  ;;  %5317 = vmatprep.subr.bf16.mxu1 %v5284_v24  ;;  %v5248_v31 = vmul.f32 %v12223_v59, %v14985_v8  ;;  %v5247_v16 = vmul.f32 %v12223_v59, %v14983_v5  ;;  %3308 = vmatprep.mubr.f32.mxu0 %v15120_v50 }
 0xb41   : > { %12228 = vrcp.f32 %v5156_v45  ;;  %5318 = vmatpush1.bf16.xpose.msra.mxu1 %v5283_v61 }
 0xb43   : > { %v12225_v51 = vpop.eup %12224  ;;  %10416 = vmatmul.mubr.msk.f32.gmra.mrb[46].mxu0 %vm3141_vm11, %v3068_v52 }
 0xb44   : > { %v5250_v57 = vmul.f32 %v12225_v51, %v14993_v11  ;;  %v5249_v35 = vmul.f32 %v12225_v51, %v14991_v26  ;;  %5400 = vmatprep.mubr.bf16.mxu0 %v18589_v29 }
 0xb45   : > { %v5159_v40 = vpop.xlane.xlu1 %5158 }
 0xb46   : > { %v5286_v38 = vpack.c.bf16 %v5250_v57, %v5248_v31  ;;  %v5285_v53 = vpack.c.bf16 %v5249_v35, %v5247_v16  ;;  %12230 = vrcp.f32 %v5159_v40 }
 0xb48   : > { %v5162_v27 = vpop.xlane.xlu0 %5161  ;;  %5319 = vmatprep.subr.bf16.mxu1 %v5286_v38  ;;  %v12227_v49 = vpop.eup %12226 }
 0xb49   : > { %v3129_v0 = vpop.permute.xlu1 %3128  ;;  %12232 = vrcp.f32 %v5162_v27  ;;  %5320 = vmatpush1.bf16.xpose.msra.mxu1 %v5285_v53  ;;  %v5252_v8 = vmul.f32 %v12227_v49, %v15005_v54  ;;  %v5251_v5 = vmul.f32 %v12227_v49, %v15003_v56 }
 0xb4a   : > { %v3301_v62 = vadd.f32 %v15044_v23, %v3129_v0  ;;  %v18585_v23 = vld [vmem:[#allocation36_spill] sm:$0xff]  ;;  %v3299_v13 = vadd.f32 %v15042_v15, %v3129_v0 }
 0xb4b   : > { %v12229_v2 = vpop.eup %12228 }
 0xb4c   : > { %v5292_v4 = vpack.c.bf16 %v3301_v62, %v3301_v62  ;;  %v5254_v11 = vmul.f32 %v12229_v2, %v15011_v37  ;;  %v5253_v26 = vmul.f32 %v12229_v2, %v15009_v34 }
 0xb4d   : > { %v3099_v43 = vpop.permute.xlu1 %3098 }
 0xb4e   : > { %5325 = vmatprep.mubr.bf16.mxu1 %v5292_v4  ;;  %v5288_v47 = vpack.c.bf16 %v5254_v11, %v5252_v8  ;;  %v5287_v10 = vpack.c.bf16 %v5253_v26, %v5251_v5  ;;  %v3263_v9 = vadd.f32 %v18591_v22, %v3099_v43  ;;  %v3265_v6 = vadd.f32 %v18592_v33, %v3099_v43 }
 0xb50   : > { %v3094_v28 = vpop.permute.xlu0 %3093  ;;  %5321 = vmatprep.subr.bf16.mxu1 %v5288_v47  ;;  %v12231_v58 = vpop.eup %12230  ;;  %v6612_v63 = vmul.f32 0.35355338, %v3263_v9  ;;  %v6613_v41 = vmul.f32 0.35355338, %v3265_v6 }
 0xb51   : > { %v3257_v14 = vadd.f32 %v18584_v18, %v3094_v28  ;;  %v3259_v17 = vadd.f32 %v18585_v23, %v3094_v28  ;;  %5322 = vmatpush1.bf16.xpose.msra.mxu1 %v5287_v10  ;;  %v5256_v37 = vmul.f32 %v12231_v58, %v15021_v25  ;;  %v5255_v34 = vmul.f32 %v12231_v58, %v15019_v36  ;;  %v18587_v25 = vld [vmem:[#allocation40_spill] sm:$0xff] }
 0xb52   : > { %v4337_v36 = vpack.c.bf16 %v18587_v25, %v18587_v25  ;;  %v18594_v25 = vld [vmem:[#allocation56_spill] sm:$0xff] }
 0xb53   : > { %v12233_v44 = vpop.eup %12232  ;;  %v5523_v3 = vmul.f32 0.35355338, %v3257_v14  ;;  %v5524_v54 = vmul.f32 0.35355338, %v3259_v17 }
 0xb54   : > { %v5258_v56 = vmul.f32 %v12233_v44, %v15027_v20  ;;  %v5257_v19 = vmul.f32 %v12233_v44, %v15025_v12  ;;  %v3114_v20 = vpop.permute.xlu1 %3113  ;;  %v5291_v12 = vpack.c.bf16 %v3299_v13, %v3299_v13  ;;  %v5444_v21 = vsel %vm5361_vm1, %v4337_v36, 0 }
 0xb55   : > { %5525 = vxpose.xlu0.b32.start.end [1/1] (short) %v5523_v3, 128  ;;  %5557 = vxpose.xlu1.b32.start.end [1/1] (short) %v5524_v54, 128  ;;  %v3283_v30 = vadd.f32 %v18588_v7, %v3114_v20  ;;  %v5429_v46 = vpop.trf.xlu0  ;;  %v3281_v1 = vadd.f32 %v18590_v39, %v3114_v20 }
 0xb56   : > { %v5290_v48 = vpack.c.bf16 %v5258_v56, %v5256_v37  ;;  %v5289_v60 = vpack.c.bf16 %v5257_v19, %v5255_v34 }
 0xb58   : > { %5323 = vmatprep.subr.bf16.mxu1 %v5290_v48  ;;  %v15145_v40 = vpop.permute.xlu1 %3118 }
 0xb59   : > { %5324 = vmatpush1.bf16.xpose.msra.mxu1 %v5289_v60  ;;  %v5430_v15 = vpop.trf.xlu0  ;;  %v3287_v36 = vadd.f32 %v18594_v25, %v15145_v40 }
 0xb5a   : > { %10485 = vmatprep.subr.msk.bf16.mxu1 %vm5361_vm1, %v4338_v55  ;;  %v3289_v55 = vadd.f32 %v18593_v32, %v15145_v40 }
 0xb5e   : > { %v15149_v16 = vpop.trf.xlu1 }
 0xb60   : > { %5326 = vmatmul.mubr.bf16.vlgmr.msra.gmra.mrb[132].mxu1 %v5291_v12 }
 0xb61   : > { %5450 = vmatpush1.bf16.msra.mxu1 %v5444_v21  ;;  %5481 = vmatprep.mubr.bf16.mxu1 %v18589_v29 }
 0xb62   : > { %5685 = vmatprep.subr.mxu1 %v3283_v30  ;;  %v15155_v38 = vpop.trf.xlu1 }
 0xb68   : > { %10486 = vmatmul.mubr.msk.bf16.vlgmr.msra.gmra.mrb[136].mxu1 %vm3426_vm15, %v5429_v46 }
 0xb69   : > { %5686 = vmatpush1.msra.mxu1 %v3281_v1  ;;  %5491 = vmatprep.mubr.bf16.mxu1 %v18589_v29 }
 0xb70   : > { %10487 = vmatmul.mubr.msk.bf16.gmra.mrb[140].mxu1 %vm3426_vm15, %v5430_v15 }
 0xb71   : > { %5749 = vmatprep.mubr.f32.mxu1 %v15120_v50 }
 0xb92   : > { %6646 = vxpose.xlu1.b32.start.end [1/1] (short) %v6613_v41, 128  ;;  %6614 = vxpose.xlu0.b32.start.end [1/1] (short) %v6612_v63, 128 }
 0xbd5   : > { %v5541_v24 = vpop.trf.xlu0  ;;  %v5573_v0 = vpop.trf.xlu1 }
 0xbd6   : > { %10488 = vmatmul.mubr.msk.f32.vlgmr.msra.gmra.mrb[144].mxu1 %vm3426_vm15, %v5541_v24 }
 0xbd7   : > { %5755 = vmatprep.mubr.f32.mxu1 %v15120_v50 }
 0xbd9   : > { %v5542_v61 = vpop.trf.xlu0  ;;  %v5574_v62 = vpop.trf.xlu1 }
 0xbda   : > { %10489 = vmatmul.mubr.msk.f32.gmra.mrb[146].mxu1 %vm3426_vm15, %v5542_v61 }
 0xbdb   : > { %5761 = vmatprep.mubr.f32.mxu1 %v15120_v50 }
 0xbdd   : > { %v5543_v45 = vpop.trf.xlu0  ;;  %v5575_v8 = vpop.trf.xlu1 }
 0xbde   : > { %10490 = vmatmul.mubr.msk.f32.gmra.mrb[148].mxu1 %vm3426_vm15, %v5543_v45 }
 0xbdf   : > { %5767 = vmatprep.mubr.f32.mxu1 %v15120_v50 }
 0xbe1   : > { %v5544_v59 = vpop.trf.xlu0  ;;  %v5576_v5 = vpop.trf.xlu1 }
 0xbe2   : > { %10491 = vmatmul.mubr.msk.f32.gmra.mrb[150].mxu1 %vm3426_vm15, %v5544_v59 }
 0xbe3   : > { %5773 = vmatprep.mubr.f32.mxu1 %v15120_v50 }
 0xbe5   : > { %v5545_v51 = vpop.trf.xlu0  ;;  %v5577_v10 = vpop.trf.xlu1 }
 0xbe6   : > { %10492 = vmatmul.mubr.msk.f32.gmra.mrb[152].mxu1 %vm3426_vm15, %v5545_v51 }
 0xbe7   : > { %5779 = vmatprep.mubr.f32.mxu1 %v15120_v50 }
 0xbe9   : > { %v5546_v31 = vpop.trf.xlu0  ;;  %v5578_v28 = vpop.trf.xlu1 }
 0xbea   : > { %10493 = vmatmul.mubr.msk.f32.gmra.mrb[154].mxu1 %vm3426_vm15, %v5546_v31 }
 0xbeb   : > { %5785 = vmatprep.mubr.f32.mxu1 %v15120_v50 }
 0xbed   : > { %v5547_v57 = vpop.trf.xlu0  ;;  %v5579_v58 = vpop.trf.xlu1 }
 0xbee   : > { %10494 = vmatmul.mubr.msk.f32.gmra.mrb[156].mxu1 %vm3426_vm15, %v5547_v57 }
 0xbef   : > { %5791 = vmatprep.mubr.f32.mxu1 %v15120_v50 }
 0xbf1   : > { %v5548_v35 = vpop.trf.xlu0  ;;  %v5580_v18 = vpop.trf.xlu1 }
 0xbf2   : > { %10495 = vmatmul.mubr.msk.f32.gmra.mrb[158].mxu1 %vm3426_vm15, %v5548_v35 }
 0xbf3   : > { %5797 = vmatprep.mubr.f32.mxu1 %v15120_v50 }
 0xbf5   : > { %v5549_v53 = vpop.trf.xlu0  ;;  %v5581_v14 = vpop.trf.xlu1 }
 0xbf6   : > { %10496 = vmatmul.mubr.msk.f32.gmra.mrb[160].mxu1 %vm3426_vm15, %v5549_v53 }
 0xbf7   : > { %5803 = vmatprep.mubr.f32.mxu1 %v15120_v50 }
 0xbf9   : > { %v5550_v27 = vpop.trf.xlu0  ;;  %v5582_v17 = vpop.trf.xlu1 }
 0xbfa   : > { %10497 = vmatmul.mubr.msk.f32.gmra.mrb[162].mxu1 %vm3426_vm15, %v5550_v27 }
 0xbfb   : > { %5809 = vmatprep.mubr.f32.mxu1 %v15120_v50 }
 0xbfd   : > { %v5551_v49 = vpop.trf.xlu0  ;;  %v5583_v54 = vpop.trf.xlu1 }
 0xbfe   : > { %10498 = vmatmul.mubr.msk.f32.gmra.mrb[164].mxu1 %vm3426_vm15, %v5551_v49 }
 0xbff   : > { %5815 = vmatprep.mubr.f32.mxu1 %v15120_v50 }
 0xc01   : > { %v5552_v2 = vpop.trf.xlu0  ;;  %v5584_v13 = vpop.trf.xlu1 }
 0xc02   : > { %10499 = vmatmul.mubr.msk.f32.gmra.mrb[166].mxu1 %vm3426_vm15, %v5552_v2 }
 0xc03   : > { %5821 = vmatprep.mubr.f32.mxu1 %v15120_v50 }
 0xc05   : > { %v5553_v4 = vpop.trf.xlu0  ;;  %v5585_v12 = vpop.trf.xlu1 }
 0xc06   : > { %10500 = vmatmul.mubr.msk.f32.gmra.mrb[168].mxu1 %vm3426_vm15, %v5553_v4 }
 0xc07   : > { %5827 = vmatprep.mubr.f32.mxu1 %v15120_v50 }
 0xc09   : > { %v5554_v11 = vpop.trf.xlu0  ;;  %v5586_v7 = vpop.trf.xlu1 }
 0xc0a   : > { %10501 = vmatmul.mubr.msk.f32.gmra.mrb[170].mxu1 %vm3426_vm15, %v5554_v11 }
 0xc0b   : > { %5833 = vmatprep.mubr.f32.mxu1 %v15120_v50 }
 0xc0d   : > { %v5555_v26 = vpop.trf.xlu0  ;;  %v5587_v46 = vpop.trf.xlu1 }
 0xc0e   : > { %10502 = vmatmul.mubr.msk.f32.gmra.mrb[172].mxu1 %vm3426_vm15, %v5555_v26 }
 0xc0f   : > { %5839 = vmatprep.mubr.f32.mxu1 %v15120_v50 }
 0xc11   : > { %v5556_v47 = vpop.trf.xlu0  ;;  %v5588_v1 = vpop.trf.xlu1 }
 0xc12   : > { %10503 = vmatmul.mubr.msk.f32.gmra.mrb[174].mxu1 %vm3426_vm15, %v5556_v47  ;;  %v15250_v31 = vpop.f32.mrb[44].mxu0 }
 0xc13   : > { %5845 = vmatprep.mubr.f32.mxu1 %v15120_v50  ;;  %18595 = vst [vmem:[#allocation50_spill] sm:$0xff] %v15250_v31  ;;  %v15252_v57 = vpop.f32.mrb[45].mxu0 }
 0xc14   : > { %18596 = vst [vmem:[#allocation34_spill] sm:$0xff] %v15252_v57 }
 0xc15   : > { %v6630_v23 = vpop.trf.xlu0  ;;  %v6662_v63 = vpop.trf.xlu1 }
 0xc16   : > { %10504 = vmatmul.mubr.msk.f32.gmra.mrb[176].mxu1 %vm3426_vm15, %v5573_v0  ;;  %v15262_v53 = vpop.f32.mrb[46].mxu0 }
 0xc17   : > { %5851 = vmatprep.mubr.f32.mxu1 %v15120_v50  ;;  %18597 = vst [vmem:[#allocation33_spill] sm:$0xff] %v15262_v53  ;;  %v15265_v27 = vpop.f32.mrb[47].mxu0 }
 0xc18   : > { %18598 = vst [vmem:[#allocation44_spill] sm:$0xff] %v15265_v27 }
 0xc19   : > { %v6631_v44 = vpop.trf.xlu0  ;;  %v6663_v42 = vpop.trf.xlu1 }
 0xc1a   : > { %10505 = vmatmul.mubr.msk.f32.gmra.mrb[178].mxu1 %vm3426_vm15, %v5574_v62 }
 0xc1b   : > { %5857 = vmatprep.mubr.f32.mxu1 %v15120_v50 }
 0xc1d   : > { %v6632_v43 = vpop.trf.xlu0  ;;  %v6664_v24 = vpop.trf.xlu1 }
 0xc1e   : > { %10506 = vmatmul.mubr.msk.f32.gmra.mrb[180].mxu1 %vm3426_vm15, %v5575_v8 }
 0xc1f   : > { %5863 = vmatprep.mubr.f32.mxu1 %v15120_v50 }
 0xc21   : > { %v6633_v20 = vpop.trf.xlu0  ;;  %v6665_v45 = vpop.trf.xlu1 }
 0xc22   : > { %10507 = vmatmul.mubr.msk.f32.gmra.mrb[182].mxu1 %vm3426_vm15, %v5576_v5 }
 0xc23   : > { %5869 = vmatprep.mubr.f32.mxu1 %v15120_v50 }
 0xc25   : > { %v6634_v21 = vpop.trf.xlu0  ;;  %v6666_v51 = vpop.trf.xlu1 }
 0xc26   : > { %10508 = vmatmul.mubr.msk.f32.gmra.mrb[184].mxu1 %vm3426_vm15, %v5577_v10 }
 0xc27   : > { %5875 = vmatprep.mubr.f32.mxu1 %v15120_v50 }
 0xc29   : > { %v6635_v30 = vpop.trf.xlu0  ;;  %v6667_v40 = vpop.trf.xlu1 }
 0xc2a   : > { %10509 = vmatmul.mubr.msk.f32.gmra.mrb[186].mxu1 %vm3426_vm15, %v5578_v28 }
 0xc2b   : > { %5881 = vmatprep.mubr.f32.mxu1 %v15120_v50 }
 0xc2d   : > { %v6636_v39 = vpop.trf.xlu0 }
 0xc2e   : > { %10510 = vmatmul.mubr.msk.f32.gmra.mrb[188].mxu1 %vm3426_vm15, %v5579_v58 }
 0xc2f   : > { %5887 = vmatprep.mubr.f32.mxu1 %v15120_v50 }
 0xc31   : > { %v6637_v15 = vpop.trf.xlu0 }
 0xc32   : > { %10511 = vmatmul.mubr.msk.f32.gmra.mrb[190].mxu1 %vm3426_vm15, %v5580_v18 }
 0xc33   : > { %v5327_v3 = vpop.f32.mrb[132].mxu1  ;;  %5893 = vmatprep.mubr.f32.mxu1 %v15120_v50 }
 0xc34   : > { %v5337_v37 = vpack.c.bf16 %v5327_v3, %v5327_v3  ;;  %v5329_v56 = vpop.f32.mrb[133].mxu1 }
 0xc35   : > { %v5338_v34 = vpack.c.bf16 %v5329_v56, %v5329_v56  ;;  %v5331_v19 = vpop.f32.mrb[134].mxu1  ;;  %v6638_v22 = vpop.trf.xlu0 }
 0xc36   : > { %v5363_v48 = vsel %vm5361_vm1, %v5337_v37, 0  ;;  %v5332_v60 = vpop.f32.mrb[135].mxu1  ;;  %10512 = vmatmul.mubr.msk.f32.gmra.mrb[192].mxu1 %vm3426_vm15, %v5581_v14 }
 0xc37   : > { %10482 = vmatprep.subr.msk.bf16.mxu0 %vm5361_vm1, %v5338_v34  ;;  %5899 = vmatprep.mubr.f32.mxu1 %v15120_v50 }
 0xc38   : > { %5369 = vmatpush1.bf16.msra.mxu0 %v5363_v48 }
 0xc39   : > { %6774 = vmatprep.subr.mxu0 %v3289_v55  ;;  %v6639_v9 = vpop.trf.xlu0 }
 0xc3a   : > { %10513 = vmatmul.mubr.msk.f32.gmra.mrb[194].mxu1 %vm3426_vm15, %v5582_v17 }
 0xc3b   : > { %10483 = vmatmul.mubr.msk.bf16.vlgmr.msra.gmra.mrb[48].mxu0 %vm3426_vm15, %v15149_v16  ;;  %5905 = vmatprep.mubr.f32.mxu1 %v15120_v50  ;;  %v6668_v16 = vpop.trf.xlu1 }
 0xc3c   : > { %6775 = vmatpush1.msra.mxu0 %v3287_v36  ;;  %5410 = vmatprep.mubr.bf16.mxu0 %v18589_v29 }
 0xc3d   : > { %v6640_v33 = vpop.trf.xlu0 }
 0xc3e   : > { %10514 = vmatmul.mubr.msk.f32.gmra.mrb[196].mxu1 %vm3426_vm15, %v5583_v54 }
 0xc3f   : > { %5911 = vmatprep.mubr.f32.mxu1 %v15120_v50  ;;  %v6669_v35 = vpop.trf.xlu1 }
 0xc41   : > { %v6641_v6 = vpop.trf.xlu0 }
 0xc42   : > { %10515 = vmatmul.mubr.msk.f32.gmra.mrb[198].mxu1 %vm3426_vm15, %v5584_v13 }
 0xc43   : > { %10484 = vmatmul.mubr.msk.bf16.gmra.mrb[52].mxu0 %vm3426_vm15, %v15155_v38  ;;  %5917 = vmatprep.mubr.f32.mxu1 %v15120_v50  ;;  %v6670_v38 = vpop.trf.xlu1 }
 0xc44   : > { %6838 = vmatprep.mubr.f32.mxu0 %v15120_v50 }
 0xc45   : > { %v6642_v41 = vpop.trf.xlu0 }
 0xc46   : > { %10516 = vmatmul.mubr.msk.f32.gmra.mrb[200].mxu1 %vm3426_vm15, %v5585_v12 }
 0xc47   : > { %5923 = vmatprep.mubr.f32.mxu1 %v15120_v50  ;;  %v6671_v0 = vpop.trf.xlu1 }
 0xc49   : > { %v6643_v52 = vpop.trf.xlu0 }
 0xc4a   : > { %10517 = vmatmul.mubr.msk.f32.gmra.mrb[202].mxu1 %vm3426_vm15, %v5586_v7 }
 0xc4b   : > { %10524 = vmatmul.mubr.msk.f32.vlgmr.msra.gmra.mrb[56].mxu0 %vm3426_vm15, %v6630_v23  ;;  %5929 = vmatprep.mubr.f32.mxu1 %v15120_v50  ;;  %v6672_v2 = vpop.trf.xlu1 }
 0xc4c   : > { %6844 = vmatprep.mubr.f32.mxu0 %v15120_v50 }
 0xc4d   : > { %v6644_v61 = vpop.trf.xlu0 }
 0xc4e   : > { %10518 = vmatmul.mubr.msk.f32.gmra.mrb[204].mxu1 %vm3426_vm15, %v5587_v46 }
 0xc4f   : > { %10525 = vmatmul.mubr.msk.f32.gmra.mrb[58].mxu0 %vm3426_vm15, %v6631_v44  ;;  %5935 = vmatprep.mubr.f32.mxu1 %v15120_v50  ;;  %v6673_v26 = vpop.trf.xlu1 }
 0xc50   : > { %6850 = vmatprep.mubr.f32.mxu0 %v15120_v50 }
 0xc51   : > { %v6645_v59 = vpop.trf.xlu0 }
 0xc52   : > { %10519 = vmatmul.mubr.msk.f32.gmra.mrb[206].mxu1 %vm3426_vm15, %v5588_v1 }
 0xc53   : > { %10526 = vmatmul.mubr.msk.f32.gmra.mrb[60].mxu0 %vm3426_vm15, %v6632_v43  ;;  %v6674_v14 = vpop.trf.xlu1 }
 0xc54   : > { %6856 = vmatprep.mubr.f32.mxu0 %v15120_v50 }
 0xc57   : > { %10527 = vmatmul.mubr.msk.f32.gmra.mrb[62].mxu0 %vm3426_vm15, %v6633_v20  ;;  %v6675_v3 = vpop.trf.xlu1 }
 0xc58   : > { %6862 = vmatprep.mubr.f32.mxu0 %v15120_v50 }
 0xc5b   : > { %10528 = vmatmul.mubr.msk.f32.gmra.mrb[64].mxu0 %vm3426_vm15, %v6634_v21  ;;  %v6676_v19 = vpop.trf.xlu1 }
 0xc5c   : > { %6868 = vmatprep.mubr.f32.mxu0 %v15120_v50 }
 0xc5f   : > { %10529 = vmatmul.mubr.msk.f32.gmra.mrb[66].mxu0 %vm3426_vm15, %v6635_v30  ;;  %v6677_v32 = vpop.trf.xlu1 }
 0xc60   : > { %6874 = vmatprep.mubr.f32.mxu0 %v15120_v50 }
 0xc63   : > { %10530 = vmatmul.mubr.msk.f32.gmra.mrb[68].mxu0 %vm3426_vm15, %v6636_v39 }
 0xc64   : > { %6880 = vmatprep.mubr.f32.mxu0 %v15120_v50 }
 0xc67   : > { %10531 = vmatmul.mubr.msk.f32.gmra.mrb[70].mxu0 %vm3426_vm15, %v6637_v15 }
 0xc68   : > { %6886 = vmatprep.mubr.f32.mxu0 %v15120_v50 }
 0xc6b   : > { %10532 = vmatmul.mubr.msk.f32.gmra.mrb[72].mxu0 %vm3426_vm15, %v6638_v22 }
 0xc6c   : > { %6892 = vmatprep.mubr.f32.mxu0 %v15120_v50 }
 0xc6f   : > { %10533 = vmatmul.mubr.msk.f32.gmra.mrb[74].mxu0 %vm3426_vm15, %v6639_v9 }
 0xc70   : > { %6898 = vmatprep.mubr.f32.mxu0 %v15120_v50 }
 0xc73   : > { %10534 = vmatmul.mubr.msk.f32.gmra.mrb[76].mxu0 %vm3426_vm15, %v6640_v33 }
 0xc74   : > { %6904 = vmatprep.mubr.f32.mxu0 %v15120_v50 }
 0xc77   : > { %10535 = vmatmul.mubr.msk.f32.gmra.mrb[78].mxu0 %vm3426_vm15, %v6641_v6 }
 0xc78   : > { %6910 = vmatprep.mubr.f32.mxu0 %v15120_v50 }
 0xc7b   : > { %10536 = vmatmul.mubr.msk.f32.gmra.mrb[80].mxu0 %vm3426_vm15, %v6642_v41 }
 0xc7c   : > { %6916 = vmatprep.mubr.f32.mxu0 %v15120_v50 }
 0xc7f   : > { %10537 = vmatmul.mubr.msk.f32.gmra.mrb[82].mxu0 %vm3426_vm15, %v6643_v52 }
 0xc80   : > { %6922 = vmatprep.mubr.f32.mxu0 %v15120_v50 }
 0xc83   : > { %10538 = vmatmul.mubr.msk.f32.gmra.mrb[84].mxu0 %vm3426_vm15, %v6644_v61 }
 0xc84   : > { %6928 = vmatprep.mubr.f32.mxu0 %v15120_v50 }
 0xc87   : > { %10539 = vmatmul.mubr.msk.f32.gmra.mrb[86].mxu0 %vm3426_vm15, %v6645_v59 }
 0xc88   : > { %6934 = vmatprep.mubr.f32.mxu0 %v15120_v50 }
 0xc8b   : > { %10540 = vmatmul.mubr.msk.f32.gmra.mrb[88].mxu0 %vm3426_vm15, %v6662_v63 }
 0xc8c   : > { %6940 = vmatprep.mubr.f32.mxu0 %v15120_v50 }
 0xc8f   : > { %10541 = vmatmul.mubr.msk.f32.gmra.mrb[90].mxu0 %vm3426_vm15, %v6663_v42 }
 0xc90   : > { %6946 = vmatprep.mubr.f32.mxu0 %v15120_v50 }
 0xc93   : > { %10542 = vmatmul.mubr.msk.f32.gmra.mrb[92].mxu0 %vm3426_vm15, %v6664_v24 }
 0xc94   : > { %6952 = vmatprep.mubr.f32.mxu0 %v15120_v50 }
 0xc97   : > { %10543 = vmatmul.mubr.msk.f32.gmra.mrb[94].mxu0 %vm3426_vm15, %v6665_v45 }
 0xc98   : > { %6958 = vmatprep.mubr.f32.mxu0 %v15120_v50 }
 0xc9b   : > { %10544 = vmatmul.mubr.msk.f32.gmra.mrb[96].mxu0 %vm3426_vm15, %v6666_v51 }
 0xc9c   : > { %6964 = vmatprep.mubr.f32.mxu0 %v15120_v50 }
 0xc9f   : > { %10545 = vmatmul.mubr.msk.f32.gmra.mrb[98].mxu0 %vm3426_vm15, %v6667_v40 }
 0xca0   : > { %6970 = vmatprep.mubr.f32.mxu0 %v15120_v50 }
 0xca3   : > { %10546 = vmatmul.mubr.msk.f32.gmra.mrb[100].mxu0 %vm3426_vm15, %v6668_v16 }
 0xca4   : > { %6976 = vmatprep.mubr.f32.mxu0 %v15120_v50 }
 0xca7   : > { %10547 = vmatmul.mubr.msk.f32.gmra.mrb[102].mxu0 %vm3426_vm15, %v6669_v35 }
 0xca8   : > { %6982 = vmatprep.mubr.f32.mxu0 %v15120_v50 }
 0xca9   : > { %v15272_v49 = vpop.f32.mrb[144].mxu1 }
 0xcaa   : > { %v15274_v62 = vpop.f32.mrb[145].mxu1 }
 0xcab   : > { %v5942_v4 = vmax.f32 %v15272_v49, %v15274_v62  ;;  %10548 = vmatmul.mubr.msk.f32.gmra.mrb[104].mxu0 %vm3426_vm15, %v6670_v38 }
 0xcac   : > { %6988 = vmatprep.mubr.f32.mxu0 %v15120_v50 }
 0xcad   : > { %5943 = vmax.xlane.f32.xlu0 %v5942_v4  ;;  %v15280_v8 = vpop.f32.mrb[146].mxu1 }
 0xcae   : > { %v15282_v11 = vpop.f32.mrb[147].mxu1 }
 0xcaf   : > { %v5945_v5 = vmax.f32 %v15280_v8, %v15282_v11  ;;  %10549 = vmatmul.mubr.msk.f32.gmra.mrb[106].mxu0 %vm3426_vm15, %v6671_v0 }
 0xcb0   : > { %6994 = vmatprep.mubr.f32.mxu0 %v15120_v50 }
 0xcb1   : > { %5946 = vmax.xlane.f32.xlu1 %v5945_v5  ;;  %v15288_v47 = vpop.f32.mrb[148].mxu1 }
 0xcb2   : > { %v15290_v10 = vpop.f32.mrb[149].mxu1 }
 0xcb3   : > { %v5948_v28 = vmax.f32 %v15288_v47, %v15290_v10  ;;  %10550 = vmatmul.mubr.msk.f32.gmra.mrb[108].mxu0 %vm3426_vm15, %v6672_v2 }
 0xcb4   : > { %7000 = vmatprep.mubr.f32.mxu0 %v15120_v50 }
 0xcb5   : > { %5949 = vmax.xlane.f32.xlu0 %v5948_v28  ;;  %v15296_v58 = vpop.f32.mrb[150].mxu1 }
 0xcb6   : > { %v15298_v18 = vpop.f32.mrb[151].mxu1 }
 0xcb7   : > { %v5951_v23 = vmax.f32 %v15296_v58, %v15298_v18  ;;  %10551 = vmatmul.mubr.msk.f32.gmra.mrb[110].mxu0 %vm3426_vm15, %v6673_v26 }
 0xcb8   : > { %7006 = vmatprep.mubr.f32.mxu0 %v15120_v50 }
 0xcb9   : > { %5952 = vmax.xlane.f32.xlu0 %v5951_v23  ;;  %v15304_v17 = vpop.f32.mrb[152].mxu1 }
 0xcba   : > { %v15306_v44 = vpop.f32.mrb[153].mxu1 }
 0xcbb   : > { %v5954_v54 = vmax.f32 %v15304_v17, %v15306_v44  ;;  %10552 = vmatmul.mubr.msk.f32.gmra.mrb[112].mxu0 %vm3426_vm15, %v6674_v14 }
 0xcbc   : > { %7012 = vmatprep.mubr.f32.mxu0 %v15120_v50 }
 0xcbd   : > { %5955 = vmax.xlane.f32.xlu0 %v5954_v54  ;;  %v15312_v37 = vpop.f32.mrb[154].mxu1 }
 0xcbe   : > { %v15314_v56 = vpop.f32.mrb[155].mxu1 }
 0xcbf   : > { %v5957_v34 = vmax.f32 %v15312_v37, %v15314_v56  ;;  %10553 = vmatmul.mubr.msk.f32.gmra.mrb[114].mxu0 %vm3426_vm15, %v6675_v3 }
 0xcc0   : > { %7018 = vmatprep.mubr.f32.mxu0 %v15120_v50 }
 0xcc1   : > { %5958 = vmax.xlane.f32.xlu1 %v5957_v34  ;;  %v15320_v48 = vpop.f32.mrb[156].mxu1 }
 0xcc2   : > { %v15322_v60 = vpop.f32.mrb[157].mxu1 }
 0xcc3   : > { %v5960_v43 = vmax.f32 %v15320_v48, %v15322_v60  ;;  %10554 = vmatmul.mubr.msk.f32.gmra.mrb[116].mxu0 %vm3426_vm15, %v6676_v19 }
 0xcc4   : > { %7024 = vmatprep.mubr.f32.mxu0 %v15120_v50 }
 0xcc5   : > { %5961 = vmax.xlane.f32.xlu0 %v5960_v43  ;;  %v15328_v55 = vpop.f32.mrb[158].mxu1 }
 0xcc6   : > { %v15330_v13 = vpop.f32.mrb[159].mxu1 }
 0xcc7   : > { %v5963_v25 = vmax.f32 %v15328_v55, %v15330_v13  ;;  %10555 = vmatmul.mubr.msk.f32.gmra.mrb[118].mxu0 %vm3426_vm15, %v6677_v32 }
 0xcc9   : > { %5964 = vmax.xlane.f32.xlu1 %v5963_v25  ;;  %v15335_v36 = vpop.f32.mrb[160].mxu1 }
 0xcca   : > { %v15337_v20 = vpop.f32.mrb[161].mxu1 }
 0xccb   : > { %v5966_v12 = vmax.f32 %v15335_v36, %v15337_v20 }
 0xccd   : > { %5967 = vmax.xlane.f32.xlu0 %v5966_v12  ;;  %v15341_v50 = vpop.f32.mrb[162].mxu1 }
 0xcce   : > { %v15343_v21 = vpop.f32.mrb[163].mxu1 }
 0xccf   : > { %v5969_v7 = vmax.f32 %v15341_v50, %v15343_v21 }
 0xcd1   : > { %5970 = vmax.xlane.f32.xlu1 %v5969_v7  ;;  %v15347_v30 = vpop.f32.mrb[164].mxu1 }
 0xcd2   : > { %18599 = vst [vmem:[#allocation41_spill] sm:$0xff] %v15347_v30  ;;  %v15349_v46 = vpop.f32.mrb[165].mxu1 }
 0xcd3   : > { %18600 = vst [vmem:[#allocation43_spill] sm:$0xff] %v15349_v46  ;;  %v5972_v39 = vmax.f32 %v15347_v30, %v15349_v46 }
 0xcd5   : > { %5973 = vmax.xlane.f32.xlu0 %v5972_v39  ;;  %v15353_v1 = vpop.f32.mrb[166].mxu1 }
 0xcd6   : > { %18601 = vst [vmem:[#allocation42_spill] sm:$0xff] %v15353_v1  ;;  %v15355_v15 = vpop.f32.mrb[167].mxu1 }
 0xcd7   : > { %18602 = vst [vmem:[#allocation47_spill] sm:$0xff] %v15355_v15  ;;  %v5975_v22 = vmax.f32 %v15353_v1, %v15355_v15 }
 0xcd9   : > { %5976 = vmax.xlane.f32.xlu1 %v5975_v22  ;;  %v15359_v9 = vpop.f32.mrb[168].mxu1 }
 0xcda   : > { %18603 = vst [vmem:[#allocation48_spill] sm:$0xff] %v15359_v9  ;;  %v15361_v33 = vpop.f32.mrb[169].mxu1 }
 0xcdb   : > { %18604 = vst [vmem:[#allocation49_spill] sm:$0xff] %v15361_v33  ;;  %v5978_v6 = vmax.f32 %v15359_v9, %v15361_v33 }
 0xcdd   : > { %5979 = vmax.xlane.f32.xlu0 %v5978_v6  ;;  %v15365_v63 = vpop.f32.mrb[170].mxu1 }
 0xcde   : > { %18605 = vst [vmem:[#allocation45_spill] sm:$0xff] %v15365_v63  ;;  %v15367_v41 = vpop.f32.mrb[171].mxu1 }
 0xcdf   : > { %18606 = vst [vmem:[#allocation51_spill] sm:$0xff] %v15367_v41  ;;  %v5981_v42 = vmax.f32 %v15365_v63, %v15367_v41 }
 0xce1   : > { %5982 = vmax.xlane.f32.xlu1 %v5981_v42  ;;  %v15371_v52 = vpop.f32.mrb[172].mxu1 }
 0xce2   : > { %18607 = vst [vmem:[#allocation52_spill] sm:$0xff] %v15371_v52  ;;  %v15373_v24 = vpop.f32.mrb[173].mxu1 }
 0xce3   : > { %18608 = vst [vmem:[#allocation53_spill] sm:$0xff] %v15373_v24  ;;  %v5984_v61 = vmax.f32 %v15371_v52, %v15373_v24 }
 0xce5   : > { %5985 = vmax.xlane.f32.xlu0 %v5984_v61  ;;  %v15377_v45 = vpop.f32.mrb[174].mxu1 }
 0xce6   : > { %18609 = vst [vmem:[#allocation46_spill] sm:$0xff] %v15377_v45  ;;  %v15379_v59 = vpop.f32.mrb[175].mxu1 }
 0xce7   : > { %18610 = vst [vmem:[#allocation35_spill] sm:$0xff] %v15379_v59  ;;  %v5987_v51 = vmax.f32 %v15377_v45, %v15379_v59 }
 0xce9   : > { %5988 = vmax.xlane.f32.xlu1 %v5987_v51  ;;  %v15383_v40 = vpop.f32.mrb[176].mxu1 }
 0xcea   : > { %18611 = vst [vmem:[#allocation36_spill] sm:$0xff] %v15383_v40  ;;  %v15385_v16 = vpop.f32.mrb[177].mxu1 }
 0xceb   : > { %18612 = vst [vmem:[#allocation39_spill] sm:$0xff] %v15385_v16  ;;  %v5990_v35 = vmax.f32 %v15383_v40, %v15385_v16 }
 0xced   : > { %5991 = vmax.xlane.f32.xlu0 %v5990_v35  ;;  %v15389_v38 = vpop.f32.mrb[178].mxu1 }
 0xcee   : > { %18613 = vst [vmem:[#allocation40_spill] sm:$0xff] %v15389_v38  ;;  %v15391_v0 = vpop.f32.mrb[179].mxu1 }
 0xcef   : > { %18614 = vst [vmem:[#allocation55_spill] sm:$0xff] %v15391_v0  ;;  %v5993_v2 = vmax.f32 %v15389_v38, %v15391_v0 }
 0xcf1   : > { %5994 = vmax.xlane.f32.xlu1 %v5993_v2  ;;  %v15395_v4 = vpop.f32.mrb[180].mxu1 }
 0xcf2   : > { %18615 = vst [vmem:[#allocation54_spill] sm:$0xff] %v15395_v4  ;;  %v15397_v5 = vpop.f32.mrb[181].mxu1 }
 0xcf3   : > { %18616 = vst [vmem:[#allocation37_spill] sm:$0xff] %v15397_v5  ;;  %v5996_v26 = vmax.f32 %v15395_v4, %v15397_v5 }
 0xcf5   : > { %5997 = vmax.xlane.f32.xlu0 %v5996_v26  ;;  %v15401_v28 = vpop.f32.mrb[182].mxu1 }
 0xcf6   : > { %18617 = vst [vmem:[#allocation38_spill] sm:$0xff] %v15401_v28  ;;  %v15403_v14 = vpop.f32.mrb[183].mxu1 }
 0xcf7   : > { %18618 = vst [vmem:[#allocation57_spill] sm:$0xff] %v15403_v14  ;;  %v5999_v23 = vmax.f32 %v15401_v28, %v15403_v14 }
 0xcf9   : > { %6000 = vmax.xlane.f32.xlu1 %v5999_v23  ;;  %v15407_v3 = vpop.f32.mrb[184].mxu1 }
 0xcfa   : > { %18619 = vst [vmem:[#allocation56_spill] sm:$0xff] %v15407_v3  ;;  %v15409_v54 = vpop.f32.mrb[185].mxu1 }
 0xcfb   : > { %18620 = vst [vmem:[#allocation58_spill] sm:$0xff] %v15409_v54  ;;  %v6002_v34 = vmax.f32 %v15407_v3, %v15409_v54 }
 0xcfd   : > { %6003 = vmax.xlane.f32.xlu0 %v6002_v34  ;;  %v15413_v19 = vpop.f32.mrb[186].mxu1 }
 0xcfe   : > { %18621 = vst [vmem:[#allocation59_spill] sm:$0xff] %v15413_v19  ;;  %v15415_v43 = vpop.f32.mrb[187].mxu1 }
 0xcff   : > { %18622 = vst [vmem:[#allocation60_spill] sm:$0xff] %v15415_v43  ;;  %v6005_v32 = vmax.f32 %v15413_v19, %v15415_v43 }
 0xd01   : > { %6006 = vmax.xlane.f32.xlu1 %v6005_v32  ;;  %v15419_v25 = vpop.f32.mrb[188].mxu1 }
 0xd02   : > { %18623 = vst [vmem:[#allocation61_spill] sm:$0xff] %v15419_v25  ;;  %v15421_v12 = vpop.f32.mrb[189].mxu1 }
 0xd03   : > { %18624 = vst [vmem:[#allocation62_spill] sm:$0xff] %v15421_v12  ;;  %v6008_v7 = vmax.f32 %v15419_v25, %v15421_v12 }
 0xd05   : > { %6009 = vmax.xlane.f32.xlu0 %v6008_v7  ;;  %v15425_v39 = vpop.f32.mrb[190].mxu1 }
 0xd06   : > { %18625 = vst [vmem:[#allocation63_spill] sm:$0xff] %v15425_v39  ;;  %v15427_v22 = vpop.f32.mrb[191].mxu1 }
 0xd07   : > { %18626 = vst [vmem:[#allocation64_spill] sm:$0xff] %v15427_v22  ;;  %v6011_v6 = vmax.f32 %v15425_v39, %v15427_v22 }
 0xd09   : > { %6012 = vmax.xlane.f32.xlu1 %v6011_v6  ;;  %v15431_v42 = vpop.f32.mrb[192].mxu1 }
 0xd0a   : > { %18627 = vst [vmem:[#allocation65_spill] sm:$0xff] %v15431_v42  ;;  %v15433_v61 = vpop.f32.mrb[193].mxu1 }
 0xd0b   : > { %18628 = vst [vmem:[#allocation66_spill] sm:$0xff] %v15433_v61  ;;  %v6014_v51 = vmax.f32 %v15431_v42, %v15433_v61 }
 0xd0d   : > { %6015 = vmax.xlane.f32.xlu0 %v6014_v51  ;;  %v15437_v35 = vpop.f32.mrb[194].mxu1 }
 0xd0e   : > { %18629 = vst [vmem:[#allocation67_spill] sm:$0xff] %v15437_v35  ;;  %v15439_v2 = vpop.f32.mrb[48].mxu0  ;;  %v15441_v26 = vpop.f32.mrb[195].mxu1 }
 0xd0f   : > { %18630 = vst [vmem:[#allocation68_spill] sm:$0xff] %v15439_v2  ;;  %18631 = vst [vmem:[#allocation69_spill] sm:$0xff] %v15441_v26  ;;  %v15443_v23 = vpop.f32.mrb[49].mxu0 }
 0xd10   : > { %18632 = vst [vmem:[#allocation70_spill] sm:$0xff] %v15443_v23  ;;  %v15447_v32 = vpop.f32.mrb[50].mxu0 }
 0xd11   : > { %18633 = vst [vmem:[#allocation71_spill] sm:$0xff] %v15447_v32  ;;  %v15449_v7 = vpop.f32.mrb[51].mxu0  ;;  %v15451_v6 = vpop.f32.mrb[196].mxu1 }
 0xd12   : > { %18634 = vst [vmem:[#allocation72_spill] sm:$0xff] %v15449_v7  ;;  %18635 = vst [vmem:[#allocation73_spill] sm:$0xff] %v15451_v6  ;;  %v15453_v53 = vpop.f32.mrb[197].mxu1 }
 0xd13   : > { %18636 = vst [vmem:[#allocation74_spill] sm:$0xff] %v15453_v53 }
 0xd15   : > { %v15457_v27 = vpop.f32.mrb[198].mxu1 }
 0xd16   : > { %18637 = vst [vmem:[#allocation75_spill] sm:$0xff] %v15457_v27  ;;  %v15459_v2 = vpop.f32.mrb[52].mxu0  ;;  %v15461_v29 = vpop.f32.mrb[199].mxu1 }
 0xd17   : > { %18638 = vst [vmem:[#allocation76_spill] sm:$0xff] %v15459_v2  ;;  %18639 = vst [vmem:[#allocation77_spill] sm:$0xff] %v15461_v29  ;;  %v15463_v23 = vpop.f32.mrb[53].mxu0 }
 0xd18   : > { %18640 = vst [vmem:[#allocation78_spill] sm:$0xff] %v15463_v23  ;;  %v15467_v32 = vpop.f32.mrb[54].mxu0 }
 0xd19   : > { %18641 = vst [vmem:[#allocation79_spill] sm:$0xff] %v15467_v32  ;;  %v15469_v7 = vpop.f32.mrb[55].mxu0  ;;  %v15471_v57 = vpop.f32.mrb[200].mxu1 }
 0xd1a   : > { %18642 = vst [vmem:[#allocation80_spill] sm:$0xff] %v15469_v7  ;;  %18643 = vst [vmem:[#allocation81_spill] sm:$0xff] %v15471_v57  ;;  %v15473_v31 = vpop.f32.mrb[201].mxu1 }
 0xd1b   : > { %18644 = vst [vmem:[#allocation82_spill] sm:$0xff] %v15473_v31 }
 0xd1d   : > { %v15477_v61 = vpop.f32.mrb[202].mxu1 }
 0xd1e   : > { %18645 = vst [vmem:[#allocation83_spill] sm:$0xff] %v15477_v61  ;;  %v15479_v2 = vpop.f32.mrb[56].mxu0  ;;  %v15481_v42 = vpop.f32.mrb[203].mxu1 }
 0xd1f   : > { %18646 = vst [vmem:[#allocation84_spill] sm:$0xff] %v15481_v42  ;;  %v15483_v23 = vpop.f32.mrb[57].mxu0 }
 0xd21   : > { %v15489_v32 = vpop.f32.mrb[204].mxu1 }
 0xd22   : > { %18647 = vst [vmem:[#allocation85_spill] sm:$0xff] %v15489_v32  ;;  %v15491_v22 = vpop.f32.mrb[58].mxu0  ;;  %v15493_v39 = vpop.f32.mrb[205].mxu1 }
 0xd23   : > { %18648 = vst [vmem:[#allocation86_spill] sm:$0xff] %v15493_v39  ;;  %v15495_v51 = vpop.f32.mrb[59].mxu0 }
 0xd25   : > { %v15501_v43 = vpop.f32.mrb[206].mxu1 }
 0xd26   : > { %18649 = vst [vmem:[#allocation87_spill] sm:$0xff] %v15501_v43  ;;  %v15503_v34 = vpop.f32.mrb[60].mxu0  ;;  %v15505_v19 = vpop.f32.mrb[207].mxu1 }
 0xd27   : > { %18650 = vst [vmem:[#allocation88_spill] sm:$0xff] %v15505_v19  ;;  %v15507_v7 = vpop.f32.mrb[61].mxu0 }
 0xd28   : > { %18651 = vst [vmem:[#allocation89_spill] sm:$0xff] %v15507_v7 }
 0xd2a   : > { %v15513_v14 = vpop.f32.mrb[62].mxu0 }
 0xd2b   : > { %v15515_v12 = vpop.f32.mrb[63].mxu0 }
 0xd2e   : > { %v15519_v28 = vpop.f32.mrb[64].mxu0 }
 0xd2f   : > { %v15521_v5 = vpop.f32.mrb[65].mxu0 }
 0xd32   : > { %v15525_v0 = vpop.f32.mrb[66].mxu0 }
 0xd33   : > { %v15527_v54 = vpop.f32.mrb[67].mxu0 }
 0xd36   : > { %v15531_v38 = vpop.f32.mrb[68].mxu0 }
 0xd37   : > { %v15533_v16 = vpop.f32.mrb[69].mxu0 }
 0xd3a   : > { %v5944_v40 = vpop.xlane.xlu0 %5943  ;;  %v15537_v59 = vpop.f32.mrb[70].mxu0 }
 0xd3b   : > { %v6038_v45 = vsub.f32 %v15272_v49, %v5944_v40  ;;  %v6039_v4 = vsub.f32 %v15274_v62, %v5944_v40  ;;  %v15541_v24 = vpop.f32.mrb[71].mxu0 }
 0xd3d   : > { %v6102_v3 = vmul.f32 1.442695, %v6038_v45  ;;  %v6104_v41 = vmul.f32 1.442695, %v6039_v4 }
 0xd3e   : > { %v5947_v63 = vpop.xlane.xlu1 %5946  ;;  %v15545_v33 = vpop.f32.mrb[72].mxu0 }
 0xd3f   : > { %12234 = vpow2.f32 %v6102_v3  ;;  %v6040_v25 = vsub.f32 %v15280_v8, %v5947_v63  ;;  %v6041_v9 = vsub.f32 %v15282_v11, %v5947_v63  ;;  %v15549_v15 = vpop.f32.mrb[73].mxu0 }
 0xd40   : > { %12236 = vpow2.f32 %v6104_v41 }
 0xd41   : > { %v6106_v62 = vmul.f32 1.442695, %v6040_v25  ;;  %v6108_v40 = vmul.f32 1.442695, %v6041_v9 }
 0xd42   : > { %v5950_v1 = vpop.xlane.xlu0 %5949  ;;  %v15553_v52 = vpop.f32.mrb[74].mxu0 }
 0xd43   : > { %12238 = vpow2.f32 %v6106_v62  ;;  %v6042_v45 = vsub.f32 %v15288_v47, %v5950_v1  ;;  %v6043_v4 = vsub.f32 %v15290_v10, %v5950_v1  ;;  %v15557_v3 = vpop.f32.mrb[75].mxu0 }
 0xd44   : > { %12240 = vpow2.f32 %v6108_v40 }
 0xd45   : > { %v6110_v11 = vmul.f32 1.442695, %v6042_v45  ;;  %v6112_v63 = vmul.f32 1.442695, %v6043_v4 }
 0xd46   : > { %v5953_v41 = vpop.xlane.xlu0 %5952  ;;  %v15561_v49 = vpop.f32.mrb[76].mxu0 }
 0xd47   : > { %12242 = vpow2.f32 %v6110_v11  ;;  %v15563_v9 = vpop.f32.mrb[77].mxu0  ;;  %v6044_v10 = vsub.f32 %v15296_v58, %v5953_v41  ;;  %v6045_v62 = vsub.f32 %v15298_v18, %v5953_v41 }
 0xd48   : > { %12244 = vpow2.f32 %v6112_v63 }
 0xd49   : > { %v15567_v25 = vpop.eup %12234  ;;  %v6114_v8 = vmul.f32 1.442695, %v6044_v10  ;;  %v6116_v18 = vmul.f32 1.442695, %v6045_v62  ;;  %v18657_v10 = vmax.f32 %v15479_v2, %v15483_v23 }
 0xd4a   : > { %18652 = vst [vmem:[#allocation90_spill] sm:$0xff] %v15567_v25  ;;  %v15570_v1 = vpop.eup %12236  ;;  %v5956_v40 = vpop.xlane.xlu0 %5955 }
 0xd4b   : > { %18653 = vst [vmem:[#allocation91_spill] sm:$0xff] %v15570_v1  ;;  %v15573_v45 = vpop.f32.mrb[78].mxu0  ;;  %v6230_v4 = vadd.f32 %v15570_v1, %v15567_v25  ;;  %v6046_v58 = vsub.f32 %v15304_v17, %v5956_v40  ;;  %v6047_v41 = vsub.f32 %v15306_v44, %v5956_v40  ;;  %12246 = vpow2.f32 %v6114_v8 }
 0xd4c   : > { %v15577_v11 = vpop.f32.mrb[79].mxu0  ;;  %12248 = vpow2.f32 %v6116_v18  ;;  %v18664_v8 = vmax.f32 %v15503_v34, %v15507_v7 }
 0xd4d   : > { %v15581_v47 = vpop.eup %12238  ;;  %6231 = vadd.xlane.f32.xlu0 %v6230_v4  ;;  %v6118_v17 = vmul.f32 1.442695, %v6046_v58  ;;  %v6120_v62 = vmul.f32 1.442695, %v6047_v41  ;;  %v18661_v58 = vmax.f32 %v15491_v22, %v15495_v51 }
 0xd4e   : > { %18654 = vst [vmem:[#allocation92_spill] sm:$0xff] %v15581_v47  ;;  %v15584_v46 = vpop.eup %12240  ;;  %v15587_v30 = vpop.f32.mrb[80].mxu0 }
 0xd4f   : > { %18655 = vst [vmem:[#allocation93_spill] sm:$0xff] %v15584_v46  ;;  %v6233_v25 = vadd.f32 %v15584_v46, %v15581_v47  ;;  %v15591_v1 = vpop.f32.mrb[81].mxu0  ;;  %12250 = vpow2.f32 %v6118_v17  ;;  %v18665_v17 = vmax.f32 %v15437_v35, %v15441_v26 }
 0xd50   : > { %12252 = vpow2.f32 %v6120_v62 }
 0xd51   : > { %v15595_v19 = vpop.eup %12242  ;;  %7032 = vmax.xlane.f32.xlu0 %v18657_v10  ;;  %6234 = vadd.xlane.f32.xlu1 %v6233_v25  ;;  %v5959_v25 = vpop.xlane.xlu1 %5958 }
 0xd52   : > { %18656 = vst [vmem:[#allocation94_spill] sm:$0xff] %v15595_v19  ;;  %v15600_v44 = vpop.eup %12244  ;;  %v15602_v40 = vpop.f32.mrb[82].mxu0  ;;  %v6048_v63 = vsub.f32 %v15312_v37, %v5959_v25  ;;  %v6049_v62 = vsub.f32 %v15314_v56, %v5959_v25  ;;  %v18671_v56 = vmax.f32 %v15513_v14, %v15515_v12 }
 0xd53   : > { %18658 = vst [vmem:[#allocation95_spill] sm:$0xff] %v15600_v44  ;;  %18659 = vst [vmem:[#allocation96_spill] sm:$0xff] %v15602_v40  ;;  %v6236_v4 = vadd.f32 %v15600_v44, %v15595_v19  ;;  %v15606_v47 = vpop.f32.mrb[83].mxu0 }
 0xd54   : > { %18660 = vst [vmem:[#allocation97_spill] sm:$0xff] %v15606_v47  ;;  %v6122_v46 = vmul.f32 1.442695, %v6048_v63  ;;  %v6124_v25 = vmul.f32 1.442695, %v6049_v62  ;;  %v18676_v62 = vmax.f32 %v15519_v28, %v15521_v5 }
 0xd55   : > { %6237 = vadd.xlane.f32.xlu0 %v6236_v4  ;;  %7035 = vmax.xlane.f32.xlu1 %v18661_v58  ;;  %v5962_v4 = vpop.xlane.xlu0 %5961  ;;  %v15629_v19 = vpop.eup %12246 }
 0xd56   : > { %v15613_v18 = vpop.f32.mrb[84].mxu0  ;;  %18667 = vst [vmem:[#allocation101_spill] sm:$0xff] %v15629_v19  ;;  %v15633_v10 = vpop.eup %12248  ;;  %v6051_v26 = vsub.f32 %v15322_v60, %v5962_v4  ;;  %12254 = vpow2.f32 %v6122_v46  ;;  %v18679_v46 = vmax.f32 %v15525_v0, %v15527_v54 }
 0xd57   : > { %18662 = vst [vmem:[#allocation98_spill] sm:$0xff] %v15613_v18  ;;  %v15615_v41 = vpop.f32.mrb[85].mxu0  ;;  %18669 = vst [vmem:[#allocation103_spill] sm:$0xff] %v15633_v10  ;;  %v6239_v63 = vadd.f32 %v15633_v10, %v15629_v19  ;;  %12256 = vpow2.f32 %v6124_v25  ;;  %v18682_v19 = vmax.f32 %v15531_v38, %v15533_v16 }
 0xd58   : > { %18663 = vst [vmem:[#allocation99_spill] sm:$0xff] %v15615_v41  ;;  %v6128_v60 = vmul.f32 1.442695, %v6051_v26 }
 0xd59   : > { %7038 = vmax.xlane.f32.xlu0 %v18664_v8  ;;  %6018 = vmax.xlane.f32.xlu1 %v18665_v17  ;;  %v6050_v8 = vsub.f32 %v15320_v48, %v5962_v4  ;;  %v18670_v17 = vmax.f32 %v15451_v6, %v15453_v53  ;;  %v15647_v7 = vpop.eup %12250 }
 0xd5a   : > { %v15627_v58 = vpop.f32.mrb[86].mxu0  ;;  %18673 = vst [vmem:[#allocation105_spill] sm:$0xff] %v15647_v7  ;;  %v15653_v48 = vpop.eup %12252 }
 0xd5b   : > { %18666 = vst [vmem:[#allocation100_spill] sm:$0xff] %v15627_v58  ;;  %v15631_v44 = vpop.f32.mrb[87].mxu0  ;;  %18675 = vst [vmem:[#allocation107_spill] sm:$0xff] %v15653_v48  ;;  %v6126_v53 = vmul.f32 1.442695, %v6050_v8  ;;  %v5965_v8 = vpop.xlane.xlu1 %5964 }
 0xd5c   : > { %18668 = vst [vmem:[#allocation102_spill] sm:$0xff] %v15631_v44 }
 0xd5d   : > { %6021 = vmax.xlane.f32.xlu0 %v18670_v17  ;;  %7041 = vmax.xlane.f32.xlu1 %v18671_v56  ;;  %v6242_v56 = vadd.f32 %v15653_v48, %v15647_v7  ;;  %12258 = vpow2.f32 %v6126_v53  ;;  %v18683_v53 = vmax.f32 %v15457_v27, %v15461_v29 }
 0xd5e   : > { %v15645_v35 = vpop.f32.mrb[88].mxu0  ;;  %12260 = vpow2.f32 %v6128_v60  ;;  %v6053_v60 = vsub.f32 %v15330_v13, %v5965_v8  ;;  %v18688_v13 = vmax.f32 %v15537_v59, %v15541_v24 }
 0xd5f   : > { %18672 = vst [vmem:[#allocation104_spill] sm:$0xff] %v15645_v35  ;;  %v15651_v37 = vpop.f32.mrb[89].mxu0 }
 0xd60   : > { %18674 = vst [vmem:[#allocation106_spill] sm:$0xff] %v15651_v37  ;;  %v15687_v17 = vpop.eup %12254 }
 0xd61   : > { %7044 = vmax.xlane.f32.xlu0 %v18676_v62  ;;  %6240 = vadd.xlane.f32.xlu1 %v6239_v63  ;;  %v6052_v62 = vsub.f32 %v15328_v55, %v5965_v8  ;;  %18685 = vst [vmem:[#allocation113_spill] sm:$0xff] %v15687_v17  ;;  %v15691_v63 = vpop.eup %12256  ;;  %v6132_v8 = vmul.f32 1.442695, %v6053_v60  ;;  %v18693_v60 = vmax.f32 %v15545_v33, %v15549_v15 }
 0xd62   : > { %v15660_v4 = vpop.f32.mrb[90].mxu0 }
 0xd63   : > { %18677 = vst [vmem:[#allocation108_spill] sm:$0xff] %v15660_v4  ;;  %v15664_v6 = vpop.f32.mrb[91].mxu0  ;;  %v6130_v48 = vmul.f32 1.442695, %v6052_v62  ;;  %v6245_v62 = vadd.f32 %v15691_v63, %v15687_v17  ;;  %v18699_v17 = vmax.f32 %v15561_v49, %v15563_v9 }
 0xd64   : > { %18678 = vst [vmem:[#allocation109_spill] sm:$0xff] %v15664_v6 }
 0xd65   : > { %6243 = vadd.xlane.f32.xlu0 %v6242_v56  ;;  %7047 = vmax.xlane.f32.xlu1 %v18679_v46  ;;  %v5968_v56 = vpop.xlane.xlu0 %5967  ;;  %12262 = vpow2.f32 %v6130_v48  ;;  %v18696_v48 = vmax.f32 %v15553_v52, %v15557_v3 }
 0xd66   : > { %v15671_v25 = vpop.f32.mrb[92].mxu0  ;;  %v6055_v29 = vsub.f32 %v15337_v20, %v5968_v56  ;;  %12264 = vpow2.f32 %v6132_v8 }
 0xd67   : > { %18680 = vst [vmem:[#allocation110_spill] sm:$0xff] %v15671_v25  ;;  %v15673_v26 = vpop.f32.mrb[93].mxu0  ;;  %v15705_v10 = vpop.eup %12258 }
 0xd68   : > { %18681 = vst [vmem:[#allocation111_spill] sm:$0xff] %v15673_v26  ;;  %18690 = vst [vmem:[#allocation116_spill] sm:$0xff] %v15705_v10  ;;  %v6136_v20 = vmul.f32 1.442695, %v6055_v29 }
 0xd69   : > { %7050 = vmax.xlane.f32.xlu0 %v18682_v19  ;;  %6024 = vmax.xlane.f32.xlu1 %v18683_v53  ;;  %v6054_v19 = vsub.f32 %v15335_v36, %v5968_v56  ;;  %v18687_v53 = vmax.f32 %v15471_v57, %v15473_v31  ;;  %v15711_v36 = vpop.eup %12260 }
 0xd6a   : > { %v15685_v46 = vpop.f32.mrb[94].mxu0  ;;  %18692 = vst [vmem:[#allocation118_spill] sm:$0xff] %v15711_v36 }
 0xd6b   : > { %18684 = vst [vmem:[#allocation112_spill] sm:$0xff] %v15685_v46  ;;  %v15689_v7 = vpop.f32.mrb[95].mxu0  ;;  %v6134_v31 = vmul.f32 1.442695, %v6054_v19  ;;  %v5971_v19 = vpop.xlane.xlu1 %5970 }
 0xd6c   : > { %18686 = vst [vmem:[#allocation114_spill] sm:$0xff] %v15689_v7 }
 0xd6d   : > { %6027 = vmax.xlane.f32.xlu0 %v18687_v53  ;;  %7053 = vmax.xlane.f32.xlu1 %v18688_v13  ;;  %v6248_v13 = vadd.f32 %v15711_v36, %v15705_v10  ;;  %12266 = vpow2.f32 %v6134_v31  ;;  %v18700_v31 = vmax.f32 %v15477_v61, %v15481_v42 }
 0xd6e   : > { %v15703_v27 = vpop.f32.mrb[96].mxu0  ;;  %12268 = vpow2.f32 %v6136_v20  ;;  %v6057_v20 = vsub.f32 %v15343_v21, %v5971_v19 }
 0xd6f   : > { %18689 = vst [vmem:[#allocation115_spill] sm:$0xff] %v15703_v27  ;;  %v15709_v55 = vpop.f32.mrb[97].mxu0 }
 0xd70   : > { %18691 = vst [vmem:[#allocation117_spill] sm:$0xff] %v15709_v55  ;;  %v6140_v21 = vmul.f32 1.442695, %v6057_v20 }
 0xd71   : > { %7056 = vmax.xlane.f32.xlu0 %v18693_v60  ;;  %6246 = vadd.xlane.f32.xlu1 %v6245_v62  ;;  %v6056_v60 = vsub.f32 %v15341_v50, %v5971_v19 }
 0xd72   : > { %v15718_v56 = vpop.f32.mrb[98].mxu0 }
 0xd73   : > { %18694 = vst [vmem:[#allocation119_spill] sm:$0xff] %v15718_v56  ;;  %v15722_v57 = vpop.f32.mrb[99].mxu0 }
 0xd74   : > { %18695 = vst [vmem:[#allocation120_spill] sm:$0xff] %v15722_v57 }
 0xd75   : > { %6249 = vadd.xlane.f32.xlu0 %v6248_v13  ;;  %7059 = vmax.xlane.f32.xlu1 %v18696_v48  ;;  %v15745_v48 = vpop.eup %12262 }
 0xd76   : > { %v15729_v8 = vpop.f32.mrb[100].mxu0  ;;  %18702 = vst [vmem:[#allocation124_spill] sm:$0xff] %v15745_v48  ;;  %v15749_v10 = vpop.eup %12264 }
 0xd77   : > { %18697 = vst [vmem:[#allocation121_spill] sm:$0xff] %v15729_v8  ;;  %v15731_v29 = vpop.f32.mrb[101].mxu0  ;;  %18704 = vst [vmem:[#allocation126_spill] sm:$0xff] %v15749_v10  ;;  %v15761_v42 = vpop.eup %12266  ;;  %v6251_v61 = vadd.f32 %v15749_v10, %v15745_v48 }
 0xd78   : > { %18698 = vst [vmem:[#allocation122_spill] sm:$0xff] %v15731_v29  ;;  %v7097_v62 = vmax.f32 %v15729_v8, %v15731_v29  ;;  %v6138_v29 = vmul.f32 1.442695, %v6056_v60  ;;  %18708 = vst [vmem:[#allocation128_spill] sm:$0xff] %v15761_v42 }
 0xd79   : > { %7062 = vmax.xlane.f32.xlu0 %v18699_v17  ;;  %6030 = vmax.xlane.f32.xlu1 %v18700_v31  ;;  %v18705_v17 = vmax.f32 %v15489_v32, %v15493_v39  ;;  %v18706_v31 = vmax.f32 %v15573_v45, %v15577_v11 }
 0xd7a   : > { %v15743_v13 = vpop.f32.mrb[102].mxu0  ;;  %12270 = vpow2.f32 %v6138_v29  ;;  %v18714_v29 = vmax.f32 %v15602_v40, %v15606_v47 }
 0xd7b   : > { %18701 = vst [vmem:[#allocation123_spill] sm:$0xff] %v15743_v13  ;;  %v15747_v53 = vpop.f32.mrb[103].mxu0  ;;  %12272 = vpow2.f32 %v6140_v21  ;;  %v18717_v21 = vmax.f32 %v15613_v18, %v15615_v41 }
 0xd7c   : > { %18703 = vst [vmem:[#allocation125_spill] sm:$0xff] %v15747_v53  ;;  %v7100_v50 = vmax.f32 %v15743_v13, %v15747_v53  ;;  %v15767_v53 = vpop.eup %12268 }
 0xd7d   : > { %6033 = vmax.xlane.f32.xlu0 %v18705_v17  ;;  %7065 = vmax.xlane.f32.xlu1 %v18706_v31  ;;  %18710 = vst [vmem:[#allocation130_spill] sm:$0xff] %v15767_v53  ;;  %v18711_v17 = vmax.f32 %v15587_v30, %v15591_v1  ;;  %v6254_v31 = vadd.f32 %v15767_v53, %v15761_v42 }
 0xd7e   : > { %v15759_v19 = vpop.f32.mrb[104].mxu0 }
 0xd7f   : > { %18707 = vst [vmem:[#allocation127_spill] sm:$0xff] %v15759_v19  ;;  %v15765_v8 = vpop.f32.mrb[105].mxu0 }
 0xd80   : > { %18709 = vst [vmem:[#allocation129_spill] sm:$0xff] %v15765_v8  ;;  %v7103_v60 = vmax.f32 %v15759_v19, %v15765_v8  ;;  %v18718_v19 = vld [vmem:[#allocation88_spill] sm:$0xff] }
 0xd81   : > { %7068 = vmax.xlane.f32.xlu0 %v18711_v17  ;;  %6252 = vadd.xlane.f32.xlu1 %v6251_v61  ;;  %v18719_v32 = vmax.f32 %v15501_v43, %v18718_v19 }
 0xd82   : > { %v15774_v20 = vpop.f32.mrb[106].mxu0 }
 0xd83   : > { %18712 = vst [vmem:[#allocation131_spill] sm:$0xff] %v15774_v20  ;;  %v15778_v13 = vpop.f32.mrb[107].mxu0 }
 0xd84   : > { %18713 = vst [vmem:[#allocation132_spill] sm:$0xff] %v15778_v13  ;;  %v7106_v39 = vmax.f32 %v15774_v20, %v15778_v13  ;;  %v15799_v13 = vpop.eup %12270 }
 0xd85   : > { %6255 = vadd.xlane.f32.xlu0 %v6254_v31  ;;  %7071 = vmax.xlane.f32.xlu1 %v18714_v29  ;;  %18721 = vst [vmem:[#allocation136_spill] sm:$0xff] %v15799_v13  ;;  %v15803_v20 = vpop.eup %12272 }
 0xd86   : > { %v15785_v8 = vpop.f32.mrb[108].mxu0  ;;  %18723 = vst [vmem:[#allocation138_spill] sm:$0xff] %v15803_v20  ;;  %v6257_v19 = vadd.f32 %v15803_v20, %v15799_v13  ;;  %v18729_v13 = vmax.f32 %v15703_v27, %v15709_v55  ;;  %v18730_v20 = vmax.f32 %v15660_v4, %v15664_v6  ;;  %v18736_v4 = vld [vmem:[#allocation47_spill] sm:$0xff] }
 0xd87   : > { %18715 = vst [vmem:[#allocation133_spill] sm:$0xff] %v15785_v8  ;;  %v15787_v17 = vpop.f32.mrb[109].mxu0 }
 0xd88   : > { %18716 = vst [vmem:[#allocation134_spill] sm:$0xff] %v15787_v17  ;;  %v7109_v61 = vmax.f32 %v15785_v8, %v15787_v17  ;;  %v18724_v17 = vmax.f32 %v15645_v35, %v15651_v37  ;;  %v18739_v35 = vld [vmem:[#allocation49_spill] sm:$0xff] }
 0xd89   : > { %7074 = vmax.xlane.f32.xlu0 %v18717_v21  ;;  %6036 = vmax.xlane.f32.xlu1 %v18719_v32  ;;  %v18725_v21 = vmax.f32 %v15627_v58, %v15631_v44 }
 0xd8a   : > { %v15797_v31 = vpop.f32.mrb[110].mxu0 }
 0xd8b   : > { %18720 = vst [vmem:[#allocation135_spill] sm:$0xff] %v15797_v31  ;;  %v15801_v29 = vpop.f32.mrb[111].mxu0 }
 0xd8c   : > { %18722 = vst [vmem:[#allocation137_spill] sm:$0xff] %v15801_v29  ;;  %v7112_v42 = vmax.f32 %v15797_v31, %v15801_v29  ;;  %v18728_v29 = vmax.f32 %v15671_v25, %v15673_v26  ;;  %v18737_v25 = vld [vmem:[#allocation48_spill] sm:$0xff] }
 0xd8d   : > { %7080 = vmax.xlane.f32.xlu0 %v18724_v17  ;;  %7077 = vmax.xlane.f32.xlu1 %v18725_v21 }
 0xd8e   : > { %v15813_v32 = vpop.f32.mrb[112].mxu0 }
 0xd8f   : > { %18726 = vst [vmem:[#allocation139_spill] sm:$0xff] %v15813_v32  ;;  %v15817_v43 = vpop.f32.mrb[113].mxu0 }
 0xd90   : > { %18727 = vst [vmem:[#allocation140_spill] sm:$0xff] %v15817_v43  ;;  %v7115_v8 = vmax.f32 %v15813_v32, %v15817_v43 }
 0xd91   : > { %7086 = vmax.xlane.f32.xlu0 %v18728_v29  ;;  %6258 = vadd.xlane.f32.xlu1 %v6257_v19  ;;  %v18731_v29 = vmax.f32 %v15685_v46, %v15689_v7 }
 0xd92   : > { %v15824_v17 = vpop.f32.mrb[114].mxu0 }
 0xd93   : > { %v15826_v31 = vpop.f32.mrb[115].mxu0 }
 0xd95   : > { %7092 = vmax.xlane.f32.xlu0 %v18729_v13  ;;  %7083 = vmax.xlane.f32.xlu1 %v18730_v20  ;;  %v18732_v20 = vmax.f32 %v15718_v56, %v15722_v57  ;;  %v18735_v56 = vld [vmem:[#allocation42_spill] sm:$0xff] }
 0xd96   : > { %v15836_v43 = vpop.f32.mrb[116].mxu0 }
 0xd97   : > { %v15838_v32 = vpop.f32.mrb[117].mxu0 }
 0xd99   : > { %7098 = vmax.xlane.f32.xlu0 %v7097_v62  ;;  %7089 = vmax.xlane.f32.xlu1 %v18731_v29  ;;  %v5974_v62 = vpop.xlane.xlu0 %5973  ;;  %v5977_v29 = vpop.xlane.xlu1 %5976 }
 0xd9a   : > { %v15845_v21 = vpop.f32.mrb[118].mxu0  ;;  %v6060_v6 = vsub.f32 %v18735_v56, %v5977_v29  ;;  %v6061_v26 = vsub.f32 %v18736_v4, %v5977_v29  ;;  %v18741_v56 = vld [vmem:[#allocation51_spill] sm:$0xff] }
 0xd9b   : > { %v15847_v53 = vpop.f32.mrb[119].mxu0 }
 0xd9c   : > { %v6146_v37 = vmul.f32 1.442695, %v6060_v6 }
 0xd9d   : > { %7104 = vmax.xlane.f32.xlu0 %v7103_v60  ;;  %7095 = vmax.xlane.f32.xlu1 %v18732_v20  ;;  %v5980_v19 = vpop.xlane.xlu0 %5979  ;;  %v5983_v27 = vpop.xlane.xlu1 %5982 }
 0xd9e   : > { %v6062_v36 = vsub.f32 %v18737_v25, %v5980_v19  ;;  %v6065_v47 = vsub.f32 %v18741_v56, %v5983_v27  ;;  %v18747_v56 = vld [vmem:[#allocation46_spill] sm:$0xff] }
 0xda0   : > { %v6150_v18 = vmul.f32 1.442695, %v6062_v36  ;;  %v6156_v6 = vmul.f32 1.442695, %v6065_v47 }
 0xda1   : > { %7110 = vmax.xlane.f32.xlu0 %v7109_v61  ;;  %7101 = vmax.xlane.f32.xlu1 %v7100_v50  ;;  %v5986_v55 = vpop.xlane.xlu0 %5985  ;;  %v15856_v46 = vpop.xlane.xlu1 %5988  ;;  %v18733_v61 = vld [vmem:[#allocation41_spill] sm:$0xff] }
 0xda2   : > { %v6058_v50 = vsub.f32 %v18733_v61, %v5974_v62  ;;  %v6148_v61 = vmul.f32 1.442695, %v6061_v26  ;;  %v18743_v26 = vld [vmem:[#allocation52_spill] sm:$0xff] }
 0xda4   : > { %v6142_v48 = vmul.f32 1.442695, %v6058_v50 }
 0xda5   : > { %7116 = vmax.xlane.f32.xlu0 %v7115_v8  ;;  %7107 = vmax.xlane.f32.xlu1 %v7106_v39  ;;  %v15854_v7 = vpop.xlane.xlu0 %5991  ;;  %v15860_v60 = vpop.xlane.xlu1 %5994  ;;  %v18734_v8 = vld [vmem:[#allocation43_spill] sm:$0xff] }
 0xda6   : > { %v6059_v39 = vsub.f32 %v18734_v8, %v5974_v62  ;;  %v6063_v62 = vsub.f32 %v18739_v35, %v5980_v19  ;;  %12274 = vpow2.f32 %v6142_v48  ;;  %v18740_v8 = vld [vmem:[#allocation45_spill] sm:$0xff] }
 0xda7   : > { %v6064_v41 = vsub.f32 %v18740_v8, %v5983_v27  ;;  %v18744_v27 = vld [vmem:[#allocation53_spill] sm:$0xff] }
 0xda8   : > { %v6144_v10 = vmul.f32 1.442695, %v6059_v39  ;;  %v6152_v25 = vmul.f32 1.442695, %v6063_v62  ;;  %v6066_v39 = vsub.f32 %v18743_v26, %v5986_v55  ;;  %v6067_v36 = vsub.f32 %v18744_v27, %v5986_v55 }
 0xda9   : > { %7113 = vmax.xlane.f32.xlu1 %v7112_v42  ;;  %v15858_v13 = vpop.xlane.xlu0 %5997  ;;  %v15866_v42 = vpop.xlane.xlu1 %6000  ;;  %v6154_v50 = vmul.f32 1.442695, %v6064_v41 }
 0xdaa   : > { %12276 = vpow2.f32 %v6144_v10  ;;  %v6158_v41 = vmul.f32 1.442695, %v6066_v39 }
 0xdab   : > { %12278 = vpow2.f32 %v6146_v37 }
 0xdac   : > { %12280 = vpow2.f32 %v6148_v61 }
 0xdad   : > { %v15862_v57 = vpop.xlane.xlu0 %6003  ;;  %v15873_v44 = vpop.xlane.xlu1 %6006 }
 0xdb1   : > { %v15868_v20 = vpop.xlane.xlu0 %6009  ;;  %v15880_v4 = vpop.xlane.xlu1 %6012 }
 0xdb2   : > { %18742 = vst [vmem:[#allocation43_spill] sm:$0xff] %v15880_v4  ;;  %v18757_v4 = vld [vmem:[#allocation90_spill] sm:$0xff] }
 0xdb5   : > { %v15875_v58 = vpop.xlane.xlu0 %6015 }
 0xdb6   : > { %18738 = vst [vmem:[#allocation41_spill] sm:$0xff] %v15875_v58  ;;  %v18756_v58 = vld [vmem:[#allocation93_spill] sm:$0xff] }
 0xdda   : > { %v6232_v29 = vpop.xlane.xlu0 %6231 }
 0xddb   : > { %12282 = vrcp.f32 %v6232_v29  ;;  %v6068_v29 = vsub.f32 %v18747_v56, %v15856_v46 }
 0xddc   : > { %12284 = vpow2.f32 %v6150_v18  ;;  %v15888_v18 = vpop.eup %12274 }
 0xddd   : > { %18745 = vst [vmem:[#allocation42_spill] sm:$0xff] %v15888_v18 }
 0xdde   : > { %v7033_v35 = vpop.xlane.xlu0 %7032  ;;  %v6235_v48 = vpop.xlane.xlu1 %6234 }
 0xddf   : > { %v7127_v19 = vsub.f32 %v15479_v2, %v7033_v35  ;;  %v7128_v10 = vsub.f32 %v15483_v23, %v7033_v35  ;;  %12286 = vrcp.f32 %v6235_v48  ;;  %v15892_v23 = vpop.eup %12276 }
 0xde0   : > { %12288 = vpow2.f32 %v6152_v25  ;;  %18746 = vst [vmem:[#allocation47_spill] sm:$0xff] %v15892_v23  ;;  %v15896_v55 = vpop.eup %12278  ;;  %v6160_v25 = vmul.f32 1.442695, %v6067_v36 }
 0xde1   : > { %12290 = vpow2.f32 %v6154_v50  ;;  %v7191_v37 = vmul.f32 1.442695, %v7127_v19  ;;  %v7193_v61 = vmul.f32 1.442695, %v7128_v10  ;;  %18748 = vst [vmem:[#allocation48_spill] sm:$0xff] %v15896_v55  ;;  %v18749_v50 = vld [vmem:[#allocation35_spill] sm:$0xff]  ;;  %v15900_v35 = vpop.eup %12280 }
 0xde2   : > { %12292 = vpow2.f32 %v6156_v6  ;;  %v15886_v62 = vpop.xlane.xlu0 %6237  ;;  %v7036_v47 = vpop.xlane.xlu1 %7035  ;;  %v6069_v6 = vsub.f32 %v18749_v50, %v15856_v46  ;;  %18750 = vst [vmem:[#allocation49_spill] sm:$0xff] %v15900_v35  ;;  %v18752_v19 = vld [vmem:[#allocation36_spill] sm:$0xff]  ;;  %v6162_v46 = vmul.f32 1.442695, %v6068_v29 }
 0xde3   : > { %12294 = vpow2.f32 %v7191_v37  ;;  %v7129_v8 = vsub.f32 %v15491_v22, %v7036_v47  ;;  %v7130_v2 = vsub.f32 %v15495_v51, %v7036_v47  ;;  %v6070_v10 = vsub.f32 %v18752_v19, %v15854_v7  ;;  %v18753_v37 = vld [vmem:[#allocation89_spill] sm:$0xff]  ;;  %v18755_v19 = vld [vmem:[#allocation91_spill] sm:$0xff] }
 0xde4   : > { %12296 = vpow2.f32 %v7193_v61 }
 0xde5   : > { %v7195_v26 = vmul.f32 1.442695, %v7129_v8  ;;  %v7197_v39 = vmul.f32 1.442695, %v7130_v2  ;;  %12298 = vpow2.f32 %v6158_v41  ;;  %v12283_v51 = vpop.eup %12282  ;;  %v6164_v8 = vmul.f32 1.442695, %v6069_v6 }
 0xde6   : > { %v7039_v22 = vpop.xlane.xlu0 %7038  ;;  %v15902_v48 = vpop.xlane.xlu1 %6018 }
 0xde7   : > { %18751 = vst [vmem:[#allocation45_spill] sm:$0xff] %v15902_v48  ;;  %12300 = vpow2.f32 %v7195_v26  ;;  %v7131_v27 = vsub.f32 %v15503_v34, %v7039_v22  ;;  %v7132_v36 = vsub.f32 %v18753_v37, %v7039_v22  ;;  %v15908_v61 = vpop.eup %12284  ;;  %v6359_v26 = vmul.f32 %v12283_v51, %v18755_v19  ;;  %v18758_v37 = vld [vmem:[#allocation92_spill] sm:$0xff] }
 0xde8   : > { %12302 = vpow2.f32 %v7197_v39  ;;  %v6358_v22 = vmul.f32 %v12283_v51, %v18757_v4  ;;  %v6166_v39 = vmul.f32 1.442695, %v6070_v10  ;;  %v18759_v51 = vld [vmem:[#allocation39_spill] sm:$0xff] }
 0xde9   : > { %v12287_v47 = vpop.eup %12286  ;;  %12304 = vpow2.f32 %v6160_v25  ;;  %v7199_v41 = vmul.f32 1.442695, %v7131_v27  ;;  %v7201_v2 = vmul.f32 1.442695, %v7132_v36  ;;  %v6071_v10 = vsub.f32 %v18759_v51, %v15854_v7 }
 0xdea   : > { %v15910_v56 = vpop.eup %12288  ;;  %v15912_v50 = vpop.xlane.xlu0 %6021  ;;  %v6361_v34 = vmul.f32 %v12287_v47, %v18756_v58  ;;  %v6360_v40 = vmul.f32 %v12287_v47, %v18758_v37 }
 0xdeb   : > { %18754 = vst [vmem:[#allocation51_spill] sm:$0xff] %v15912_v50  ;;  %v7042_v48 = vpop.xlane.xlu1 %7041  ;;  %v15918_v29 = vpop.eup %12290  ;;  %12306 = vpow2.f32 %v7199_v41 }
 0xdec   : > { %v7133_v25 = vsub.f32 %v15513_v14, %v7042_v48  ;;  %v15921_v6 = vpop.eup %12292  ;;  %12308 = vpow2.f32 %v7201_v2  ;;  %v7134_v27 = vsub.f32 %v15515_v12, %v7042_v48  ;;  %v6423_v36 = vpack.c.bf16 %v6361_v34, %v6359_v26 }
 0xded   : > { %v6422_v50 = vpack.c.bf16 %v6360_v40, %v6358_v22  ;;  %v15924_v19 = vpop.eup %12294  ;;  %12310 = vpow2.f32 %v6162_v46  ;;  %v18761_v46 = vld [vmem:[#allocation40_spill] sm:$0xff] }
 0xdee   : > { %v7203_v58 = vmul.f32 1.442695, %v7133_v25  ;;  %v15926_v4 = vpop.eup %12296  ;;  %12312 = vpow2.f32 %v6164_v8  ;;  %v7205_v47 = vmul.f32 1.442695, %v7134_v27  ;;  %v7045_v41 = vpop.xlane.xlu0 %7044  ;;  %6456 = vmatprep.subr.bf16.mxu1 %v6423_v36  ;;  %v6072_v8 = vsub.f32 %v18761_v46, %v15860_v60 }
 0xdef   : > { %v6241_v14 = vpop.xlane.xlu1 %6240  ;;  %12314 = vpow2.f32 %v6166_v39  ;;  %v7135_v2 = vsub.f32 %v15519_v28, %v7045_v41  ;;  %v7136_v12 = vsub.f32 %v15521_v5, %v7045_v41  ;;  %6457 = vmatpush1.bf16.xpose.msra.mxu1 %v6422_v50  ;;  %v7319_v40 = vadd.f32 %v15926_v4, %v15924_v19  ;;  %v15934_v48 = vpop.eup %12298  ;;  %v18762_v50 = vld [vmem:[#allocation55_spill] sm:$0xff] }
 0xdf0   : > { %18760 = vst [vmem:[#allocation52_spill] sm:$0xff] %v15934_v48  ;;  %12316 = vrcp.f32 %v15886_v62  ;;  %v6168_v5 = vmul.f32 1.442695, %v6071_v10  ;;  %v6073_v22 = vsub.f32 %v18762_v50, %v15860_v60  ;;  %v6260_v25 = vadd.f32 %v15892_v23, %v15888_v18  ;;  %v18764_v10 = vld [vmem:[#allocation54_spill] sm:$0xff] }
 0xdf1   : > { %v15939_v7 = vpop.eup %12300  ;;  %12318 = vpow2.f32 %v7203_v58  ;;  %v7207_v26 = vmul.f32 1.442695, %v7135_v2  ;;  %v7209_v34 = vmul.f32 1.442695, %v7136_v12  ;;  %7320 = vadd.xlane.f32.xlu0 %v7319_v40  ;;  %v6170_v51 = vmul.f32 1.442695, %v6072_v8 }
 0xdf2   : > { %v15941_v28 = vpop.eup %12302  ;;  %12320 = vpow2.f32 %v7205_v47  ;;  %v15945_v37 = vpop.xlane.xlu0 %6243  ;;  %v6074_v47 = vsub.f32 %v18764_v10, %v15858_v13 }
 0xdf3   : > { %v7048_v39 = vpop.xlane.xlu1 %7047  ;;  %v15949_v62 = vpop.eup %12304  ;;  %12322 = vpow2.f32 %v7207_v26  ;;  %v7322_v58 = vadd.f32 %v15941_v28, %v15939_v7 }
 0xdf4   : > { %18763 = vst [vmem:[#allocation53_spill] sm:$0xff] %v15949_v62  ;;  %v7137_v27 = vsub.f32 %v15525_v0, %v7048_v39  ;;  %v7138_v36 = vsub.f32 %v15527_v54, %v7048_v39  ;;  %12324 = vpow2.f32 %v7209_v34  ;;  %v6172_v0 = vmul.f32 1.442695, %v6073_v22  ;;  %v18765_v54 = vld [vmem:[#allocation37_spill] sm:$0xff] }
 0xdf5   : > { %v15955_v60 = vpop.eup %12306  ;;  %12326 = vrcp.f32 %v6241_v14  ;;  %6261 = vadd.xlane.f32.xlu0 %v6260_v25  ;;  %7323 = vadd.xlane.f32.xlu1 %v7322_v58  ;;  %v6075_v40 = vsub.f32 %v18765_v54, %v15858_v13  ;;  %v6174_v13 = vmul.f32 1.442695, %v6074_v47 }
 0xdf6   : > { %v7211_v41 = vmul.f32 1.442695, %v7137_v27  ;;  %v7213_v2 = vmul.f32 1.442695, %v7138_v36  ;;  %v15959_v12 = vpop.eup %12308  ;;  %12328 = vpow2.f32 %v6168_v5  ;;  %v7051_v46 = vpop.xlane.xlu0 %7050  ;;  %v18769_v27 = vmax.f32 %v15824_v17, %v15826_v31 }
 0xdf7   : > { %v15963_v8 = vpop.xlane.xlu1 %6024  ;;  %v15965_v26 = vpop.eup %12310  ;;  %v7139_v34 = vsub.f32 %v15531_v38, %v7051_v46  ;;  %v7140_v14 = vsub.f32 %v15533_v16, %v7051_v46  ;;  %v7325_v5 = vadd.f32 %v15959_v12, %v15955_v60  ;;  %v6176_v38 = vmul.f32 1.442695, %v6075_v40 }
 0xdf8   : > { %18766 = vst [vmem:[#allocation46_spill] sm:$0xff] %v15965_v26  ;;  %12330 = vpow2.f32 %v7211_v41  ;;  %v15969_v50 = vpop.eup %12312  ;;  %v6263_v46 = vadd.f32 %v15900_v35, %v15896_v55  ;;  %v18779_v55 = vld [vmem:[#allocation94_spill] sm:$0xff]  ;;  %v18780_v35 = vld [vmem:[#allocation101_spill] sm:$0xff] }
 0xdf9   : > { %18767 = vst [vmem:[#allocation35_spill] sm:$0xff] %v15969_v50  ;;  %12332 = vpow2.f32 %v7213_v2  ;;  %v15973_v22 = vpop.eup %12314  ;;  %v7215_v39 = vmul.f32 1.442695, %v7139_v34  ;;  %v7217_v25 = vmul.f32 1.442695, %v7140_v14  ;;  %7119 = vmax.xlane.f32.xlu1 %v18769_v27  ;;  %7326 = vadd.xlane.f32.xlu0 %v7325_v5 }
 0xdfa   : > { %18768 = vst [vmem:[#allocation36_spill] sm:$0xff] %v15973_v22  ;;  %12334 = vpow2.f32 %v6170_v51  ;;  %v12317_v36 = vpop.eup %12316  ;;  %v15978_v16 = vpop.xlane.xlu0 %6027 }
 0xdfb   : > { %12336 = vpow2.f32 %v6172_v0  ;;  %v7054_v58 = vpop.xlane.xlu1 %7053  ;;  %v15980_v10 = vpop.eup %12318  ;;  %v18772_v0 = vld [vmem:[#allocation38_spill] sm:$0xff]  ;;  %v6362_v18 = vmul.f32 %v12317_v36, %v18779_v55 }
 0xdfc   : > { %18770 = vst [vmem:[#allocation89_spill] sm:$0xff] %v15980_v10  ;;  %12338 = vpow2.f32 %v7215_v39  ;;  %v7141_v41 = vsub.f32 %v15537_v59, %v7054_v58  ;;  %v15983_v51 = vpop.eup %12320  ;;  %v7142_v47 = vsub.f32 %v15541_v24, %v7054_v58  ;;  %v6076_v54 = vsub.f32 %v18772_v0, %v15866_v42  ;;  %v18774_v59 = vld [vmem:[#allocation57_spill] sm:$0xff]  ;;  %v18776_v0 = vld [vmem:[#allocation95_spill] sm:$0xff] }
 0xdfd   : > { %12340 = vpow2.f32 %v7217_v25  ;;  %v15986_v2 = vpop.eup %12322  ;;  %v6077_v14 = vsub.f32 %v18774_v59, %v15866_v42  ;;  %v18775_v24 = vmax.f32 %v15836_v43, %v15838_v32  ;;  %v18778_v59 = vld [vmem:[#allocation103_spill] sm:$0xff] }
 0xdfe   : > { %18771 = vst [vmem:[#allocation91_spill] sm:$0xff] %v15986_v2  ;;  %12342 = vpow2.f32 %v6174_v13  ;;  %v7219_v40 = vmul.f32 1.442695, %v7141_v41  ;;  %v15992_v34 = vpop.eup %12324  ;;  %v7221_v5 = vmul.f32 1.442695, %v7142_v47  ;;  %v7328_v13 = vadd.f32 %v15983_v51, %v15980_v10  ;;  %v7057_v39 = vpop.xlane.xlu0 %7056 }
 0xdff   : > { %18773 = vst [vmem:[#allocation93_spill] sm:$0xff] %v15992_v34  ;;  %12344 = vpow2.f32 %v6176_v38  ;;  %7122 = vmax.xlane.f32.xlu0 %v18775_v24  ;;  %v6247_v25 = vpop.xlane.xlu1 %6246  ;;  %v12327_v27 = vpop.eup %12326  ;;  %v7143_v58 = vsub.f32 %v15545_v33, %v7057_v39  ;;  %v7144_v41 = vsub.f32 %v15549_v15, %v7057_v39  ;;  %v6363_v38 = vmul.f32 %v12317_v36, %v18776_v0 }
 0xe00   : > { %v7331_v42 = vadd.f32 %v15992_v34, %v15986_v2  ;;  %v16006_v47 = vpop.eup %12328  ;;  %12346 = vrcp.f32 %v15945_v37  ;;  %7329 = vadd.xlane.f32.xlu1 %v7328_v13  ;;  %v6365_v24 = vmul.f32 %v12327_v27, %v18778_v59  ;;  %v6364_v23 = vmul.f32 %v12327_v27, %v18780_v35  ;;  %v18781_v2 = vld [vmem:[#allocation56_spill] sm:$0xff] }
 0xe01   : > { %18777 = vst [vmem:[#allocation90_spill] sm:$0xff] %v16006_v47  ;;  %v6178_v33 = vmul.f32 1.442695, %v6076_v54  ;;  %12348 = vpow2.f32 %v7219_v40  ;;  %v7223_v15 = vmul.f32 1.442695, %v7143_v58  ;;  %v6078_v34 = vsub.f32 %v18781_v2, %v15862_v57 }
 0xe02   : > { %v16012_v10 = vpop.eup %12330  ;;  %v7225_v39 = vmul.f32 1.442695, %v7144_v41  ;;  %12350 = vpow2.f32 %v7221_v5  ;;  %v6425_v37 = vpack.c.bf16 %v6365_v24, %v6363_v38  ;;  %v6424_v13 = vpack.c.bf16 %v6364_v23, %v6362_v18  ;;  %v16018_v59 = vpop.xlane.xlu0 %6249  ;;  %v18783_v5 = vld [vmem:[#allocation58_spill] sm:$0xff] }
 0xe03   : > { %v16014_v0 = vpop.eup %12332  ;;  %7332 = vadd.xlane.f32.xlu0 %v7331_v42  ;;  %v7060_v55 = vpop.xlane.xlu1 %7059  ;;  %12352 = vpow2.f32 %v7223_v15  ;;  %v6180_v27 = vmul.f32 1.442695, %v6077_v14  ;;  %v6266_v18 = vadd.f32 %v15910_v56, %v15908_v61  ;;  %v6079_v58 = vsub.f32 %v18783_v5, %v15862_v57 }
 0xe04   : > { %v16020_v36 = vpop.eup %12334  ;;  %v7145_v35 = vsub.f32 %v15553_v52, %v7060_v55  ;;  %v7146_v54 = vsub.f32 %v15557_v3, %v7060_v55  ;;  %12354 = vpow2.f32 %v7225_v39  ;;  %6458 = vmatprep.subr.bf16.mxu1 %v6425_v37  ;;  %6264 = vadd.xlane.f32.xlu1 %v6263_v46  ;;  %v7334_v23 = vadd.f32 %v16014_v0, %v16012_v10  ;;  %v18784_v46 = vld [vmem:[#allocation59_spill] sm:$0xff] }
 0xe05   : > { %18782 = vst [vmem:[#allocation92_spill] sm:$0xff] %v16020_v36  ;;  %v16024_v40 = vpop.eup %12336  ;;  %12356 = vrcp.f32 %v6247_v25  ;;  %6459 = vmatpush1.bf16.xpose.msra.mxu1 %v6424_v13  ;;  %v6182_v14 = vmul.f32 1.442695, %v6078_v34  ;;  %v6080_v38 = vsub.f32 %v18784_v46, %v15873_v44 }
 0xe06   : > { %v16030_v2 = vpop.eup %12338  ;;  %v7227_v52 = vmul.f32 1.442695, %v7145_v35  ;;  %v7229_v3 = vmul.f32 1.442695, %v7146_v54  ;;  %12358 = vpow2.f32 %v6178_v33  ;;  %v7063_v42 = vpop.xlane.xlu0 %7062  ;;  %v6184_v33 = vmul.f32 1.442695, %v6079_v58 }
 0xe07   : > { %v16034_v41 = vpop.eup %12340  ;;  %6267 = vadd.xlane.f32.xlu0 %v6266_v18  ;;  %v16038_v24 = vpop.xlane.xlu1 %6030  ;;  %v7147_v57 = vsub.f32 %v15561_v49, %v7063_v42  ;;  %v7148_v25 = vsub.f32 %v15563_v9, %v7063_v42  ;;  %v6186_v35 = vmul.f32 1.442695, %v6080_v38  ;;  %v6272_v58 = vadd.f32 %v15949_v62, %v15934_v48  ;;  %v18791_v42 = vld [vmem:[#allocation61_spill] sm:$0xff] }
 0xe08   : > { %v16040_v15 = vpop.eup %12342  ;;  %12360 = vpow2.f32 %v7227_v52  ;;  %7335 = vadd.xlane.f32.xlu1 %v7334_v23  ;;  %v7337_v34 = vadd.f32 %v16034_v41, %v16030_v2 }
 0xe09   : > { %18785 = vst [vmem:[#allocation39_spill] sm:$0xff] %v16040_v15  ;;  %v16044_v39 = vpop.eup %12344  ;;  %12362 = vpow2.f32 %v7229_v3  ;;  %v7231_v37 = vmul.f32 1.442695, %v7147_v57  ;;  %v7233_v13 = vmul.f32 1.442695, %v7148_v25  ;;  %v18789_v3 = vld [vmem:[#allocation60_spill] sm:$0xff]  ;;  %v6082_v57 = vsub.f32 %v18791_v42, %v15868_v20 }
 0xe0a   : > { %18786 = vst [vmem:[#allocation40_spill] sm:$0xff] %v16044_v39  ;;  %12364 = vpow2.f32 %v6180_v27  ;;  %v12347_v55 = vpop.eup %12346  ;;  %v16048_v54 = vpop.xlane.xlu0 %6033  ;;  %v18787_v27 = vmax.f32 %v15845_v21, %v15847_v53  ;;  %v18795_v42 = vld [vmem:[#allocation113_spill] sm:$0xff] }
 0xe0b   : > { %12366 = vpow2.f32 %v6182_v14  ;;  %7338 = vadd.xlane.f32.xlu0 %v7337_v34  ;;  %v7066_v49 = vpop.xlane.xlu1 %7065  ;;  %v16050_v18 = vpop.eup %12348  ;;  %v6081_v14 = vsub.f32 %v18789_v3, %v15873_v44 }
 0xe0c   : > { %12368 = vpow2.f32 %v7231_v37  ;;  %v7149_v9 = vsub.f32 %v15573_v45, %v7066_v49  ;;  %v16053_v23 = vpop.eup %12350  ;;  %7125 = vmax.xlane.f32.xlu1 %v18787_v27  ;;  %v7150_v5 = vsub.f32 %v15577_v11, %v7066_v49  ;;  %v6269_v45 = vadd.f32 %v15921_v6, %v15918_v29  ;;  %v18792_v49 = vld [vmem:[#allocation107_spill] sm:$0xff] }
 0xe0d   : > { %12370 = vpow2.f32 %v7233_v13  ;;  %v16061_v52 = vpop.eup %12352  ;;  %v7340_v25 = vadd.f32 %v16053_v23, %v16050_v18 }
 0xe0e   : > { %18788 = vst [vmem:[#allocation55_spill] sm:$0xff] %v16061_v52  ;;  %12372 = vpow2.f32 %v6184_v33  ;;  %v7235_v46 = vmul.f32 1.442695, %v7149_v9  ;;  %v16067_v38 = vpop.eup %12354  ;;  %v7237_v11 = vmul.f32 1.442695, %v7150_v5  ;;  %v7069_v34 = vpop.xlane.xlu0 %7068  ;;  %v6367_v9 = vmul.f32 %v12347_v55, %v18792_v49 }
 0xe0f   : > { %18790 = vst [vmem:[#allocation54_spill] sm:$0xff] %v16067_v38  ;;  %12374 = vpow2.f32 %v6186_v35  ;;  %6273 = vadd.xlane.f32.xlu0 %v6272_v58  ;;  %v6253_v33 = vpop.xlane.xlu1 %6252  ;;  %v12357_v37 = vpop.eup %12356  ;;  %v7151_v44 = vsub.f32 %v15587_v30, %v7069_v34  ;;  %v7152_v13 = vsub.f32 %v15591_v1, %v7069_v34  ;;  %v7343_v35 = vadd.f32 %v16067_v38, %v16061_v52  ;;  %v18794_v58 = vld [vmem:[#allocation105_spill] sm:$0xff]  ;;  %v18797_v52 = vld [vmem:[#allocation62_spill] sm:$0xff] }
 0xe10   : > { %v16078_v27 = vpop.eup %12358  ;;  %12376 = vrcp.f32 %v16018_v59  ;;  %7341 = vadd.xlane.f32.xlu1 %v7340_v25  ;;  %v6369_v5 = vmul.f32 %v12357_v37, %v15691_v63  ;;  %v6366_v3 = vmul.f32 %v12347_v55, %v18794_v58  ;;  %v6368_v48 = vmul.f32 %v12357_v37, %v18795_v42  ;;  %v18799_v37 = vld [vmem:[#allocation96_spill] sm:$0xff] }
 0xe11   : > { %18793 = vst [vmem:[#allocation37_spill] sm:$0xff] %v16078_v27  ;;  %v6188_v30 = vmul.f32 1.442695, %v6081_v14  ;;  %12378 = vpow2.f32 %v7235_v46  ;;  %v7239_v1 = vmul.f32 1.442695, %v7151_v44  ;;  %v6083_v38 = vsub.f32 %v18797_v52, %v15868_v20  ;;  %v18800_v46 = vld [vmem:[#allocation97_spill] sm:$0xff] }
 0xe12   : > { %v16084_v62 = vpop.eup %12360  ;;  %v7241_v34 = vmul.f32 1.442695, %v7152_v13  ;;  %12380 = vpow2.f32 %v7237_v11  ;;  %v6427_v59 = vpack.c.bf16 %v6369_v5, %v6367_v9  ;;  %v6426_v25 = vpack.c.bf16 %v6368_v48, %v6366_v3  ;;  %v16090_v63 = vpop.xlane.xlu0 %6255  ;;  %v18803_v11 = vld [vmem:[#allocation43_spill] sm:$0xff] }
 0xe13   : > { %18796 = vst [vmem:[#allocation38_spill] sm:$0xff] %v16084_v62  ;;  %v16086_v49 = vpop.eup %12362  ;;  %7344 = vadd.xlane.f32.xlu0 %v7343_v35  ;;  %v7072_v55 = vpop.xlane.xlu1 %7071  ;;  %12382 = vpow2.f32 %v7239_v1  ;;  %v6190_v42 = vmul.f32 1.442695, %v6082_v57  ;;  %v6278_v20 = vadd.f32 %v16006_v47, %v15973_v22  ;;  %v18804_v9 = vld [vmem:[#allocation63_spill] sm:$0xff]  ;;  %v6192_v57 = vmul.f32 1.442695, %v6083_v38 }
 0xe14   : > { %v16092_v58 = vpop.eup %12364  ;;  %v7153_v14 = vsub.f32 %v18799_v37, %v7072_v55  ;;  %v7154_v44 = vsub.f32 %v18800_v46, %v7072_v55  ;;  %12384 = vpow2.f32 %v7241_v34  ;;  %6460 = vmatprep.subr.bf16.mxu1 %v6427_v59  ;;  %6270 = vadd.xlane.f32.xlu1 %v6269_v45  ;;  %v7346_v48 = vadd.f32 %v16086_v49, %v16084_v62  ;;  %v18807_v55 = vld [vmem:[#allocation98_spill] sm:$0xff]  ;;  %v18808_v46 = vld [vmem:[#allocation99_spill] sm:$0xff]  ;;  %v18814_v47 = vld [vmem:[#allocation100_spill] sm:$0xff] }
 0xe15   : > { %18798 = vst [vmem:[#allocation57_spill] sm:$0xff] %v16092_v58  ;;  %v16096_v13 = vpop.eup %12366  ;;  %v6084_v35 = vsub.f32 %v18804_v9, %v18803_v11  ;;  %12386 = vrcp.f32 %v6253_v33  ;;  %6461 = vmatpush1.bf16.xpose.msra.mxu1 %v6426_v25  ;;  %v18810_v33 = vld [vmem:[#allocation64_spill] sm:$0xff] }
 0xe16   : > { %18801 = vst [vmem:[#allocation95_spill] sm:$0xff] %v16096_v13  ;;  %v16102_v52 = vpop.eup %12368  ;;  %v7243_v5 = vmul.f32 1.442695, %v7153_v14  ;;  %v7245_v3 = vmul.f32 1.442695, %v7154_v44  ;;  %12388 = vpow2.f32 %v6188_v30  ;;  %v7075_v45 = vpop.xlane.xlu0 %7074  ;;  %v6085_v25 = vsub.f32 %v18810_v33, %v18803_v11  ;;  %v18812_v11 = vld [vmem:[#allocation104_spill] sm:$0xff] }
 0xe17   : > { %18802 = vst [vmem:[#allocation103_spill] sm:$0xff] %v16102_v52  ;;  %v16106_v1 = vpop.eup %12370  ;;  %6279 = vadd.xlane.f32.xlu0 %v6278_v20  ;;  %v16108_v34 = vpop.xlane.xlu1 %6036  ;;  %v7155_v37 = vsub.f32 %v18807_v55, %v7075_v45  ;;  %v7156_v22 = vsub.f32 %v18808_v46, %v7075_v45  ;;  %v6194_v30 = vmul.f32 1.442695, %v6084_v35 }
 0xe18   : > { %18805 = vst [vmem:[#allocation94_spill] sm:$0xff] %v16106_v1  ;;  %v16110_v59 = vpop.eup %12372  ;;  %12390 = vpow2.f32 %v7243_v5  ;;  %7347 = vadd.xlane.f32.xlu1 %v7346_v48  ;;  %v7349_v38 = vadd.f32 %v16106_v1, %v16102_v52  ;;  %v6275_v5 = vadd.f32 %v15969_v50, %v15965_v26  ;;  %v18819_v1 = vld [vmem:[#allocation65_spill] sm:$0xff] }
 0xe19   : > { %18806 = vst [vmem:[#allocation101_spill] sm:$0xff] %v16110_v59  ;;  %v16114_v9 = vpop.eup %12374  ;;  %12392 = vpow2.f32 %v7245_v3  ;;  %v7247_v14 = vmul.f32 1.442695, %v7155_v37  ;;  %v7249_v44 = vmul.f32 1.442695, %v7156_v22  ;;  %v18813_v3 = vld [vmem:[#allocation106_spill] sm:$0xff] }
 0xe1a   : > { %18809 = vst [vmem:[#allocation56_spill] sm:$0xff] %v16114_v9  ;;  %12394 = vpow2.f32 %v6190_v42  ;;  %v12377_v20 = vpop.eup %12376  ;;  %v7081_v45 = vpop.xlane.xlu0 %7080  ;;  %v6196_v22 = vmul.f32 1.442695, %v6085_v25 }
 0xe1b   : > { %12396 = vpow2.f32 %v6192_v57  ;;  %7350 = vadd.xlane.f32.xlu0 %v7349_v38  ;;  %v7078_v55 = vpop.xlane.xlu1 %7077  ;;  %v16122_v46 = vpop.eup %12378  ;;  %v7159_v48 = vsub.f32 %v18812_v11, %v7081_v45  ;;  %v7160_v33 = vsub.f32 %v18813_v3, %v7081_v45  ;;  %v18816_v57 = vld [vmem:[#allocation102_spill] sm:$0xff]  ;;  %v6284_v38 = vadd.f32 %v16044_v39, %v16040_v15 }
 0xe1c   : > { %18811 = vst [vmem:[#allocation58_spill] sm:$0xff] %v16122_v46  ;;  %12398 = vpow2.f32 %v7247_v14  ;;  %v7157_v42 = vsub.f32 %v18814_v47, %v7078_v55  ;;  %v16127_v35 = vpop.eup %12380  ;;  %6276 = vadd.xlane.f32.xlu1 %v6275_v5  ;;  %v7158_v37 = vsub.f32 %v18816_v57, %v7078_v55  ;;  %v18818_v14 = vld [vmem:[#allocation41_spill] sm:$0xff]  ;;  %v18821_v47 = vld [vmem:[#allocation66_spill] sm:$0xff] }
 0xe1d   : > { %18815 = vst [vmem:[#allocation59_spill] sm:$0xff] %v16127_v35  ;;  %12400 = vpow2.f32 %v7249_v44  ;;  %v16132_v52 = vpop.eup %12382  ;;  %v6086_v11 = vsub.f32 %v18819_v1, %v18818_v14  ;;  %v7255_v26 = vmul.f32 1.442695, %v7159_v48  ;;  %v6087_v25 = vsub.f32 %v18821_v47, %v18818_v14  ;;  %v18822_v57 = vld [vmem:[#allocation118_spill] sm:$0xff]  ;;  %v18823_v48 = vld [vmem:[#allocation116_spill] sm:$0xff] }
 0xe1e   : > { %18817 = vst [vmem:[#allocation60_spill] sm:$0xff] %v16132_v52  ;;  %12402 = vpow2.f32 %v6194_v30  ;;  %v7251_v45 = vmul.f32 1.442695, %v7157_v42  ;;  %v16136_v3 = vpop.eup %12384  ;;  %v7253_v44 = vmul.f32 1.442695, %v7158_v37  ;;  %v7352_v5 = vadd.f32 %v16127_v35, %v16122_v46  ;;  %v7087_v55 = vpop.xlane.xlu0 %7086  ;;  %v18825_v37 = vld [vmem:[#allocation110_spill] sm:$0xff] }
 0xe1f   : > { %18820 = vst [vmem:[#allocation61_spill] sm:$0xff] %v16136_v3  ;;  %6285 = vadd.xlane.f32.xlu0 %v6284_v38  ;;  %v6371_v15 = vmul.f32 %v12377_v20, %v18822_v57  ;;  %v6259_v39 = vpop.xlane.xlu1 %6258  ;;  %v12387_v30 = vpop.eup %12386  ;;  %12404 = vrcp.f32 %v16090_v63  ;;  %v7257_v1 = vmul.f32 1.442695, %v7160_v33  ;;  %v6370_v42 = vmul.f32 %v12377_v20, %v18823_v48  ;;  %v18826_v14 = vld [vmem:[#allocation126_spill] sm:$0xff]  ;;  %v18827_v46 = vld [vmem:[#allocation124_spill] sm:$0xff] }
 0xe20   : > { %v7355_v50 = vadd.f32 %v16136_v3, %v16132_v52  ;;  %v16147_v62 = vpop.eup %12388  ;;  %12406 = vpow2.f32 %v7255_v26  ;;  %7353 = vadd.xlane.f32.xlu1 %v7352_v5  ;;  %v7163_v38 = vsub.f32 %v18825_v37, %v7087_v55  ;;  %v6373_v47 = vmul.f32 %v12387_v30, %v18826_v14  ;;  %v18831_v52 = vld [vmem:[#allocation108_spill] sm:$0xff] }
 0xe21   : > { %18824 = vst [vmem:[#allocation107_spill] sm:$0xff] %v16147_v62  ;;  %v6372_v57 = vmul.f32 %v12387_v30, %v18827_v46  ;;  %12408 = vpow2.f32 %v7251_v45  ;;  %v6281_v63 = vadd.f32 %v16024_v40, %v16020_v36  ;;  %v6290_v20 = vadd.f32 %v16110_v59, %v16096_v13  ;;  %v18830_v30 = vld [vmem:[#allocation111_spill] sm:$0xff] }
 0xe22   : > { %v16152_v35 = vpop.eup %12390  ;;  %v6198_v48 = vmul.f32 1.442695, %v6086_v11  ;;  %12410 = vpow2.f32 %v7253_v44  ;;  %v6429_v26 = vpack.c.bf16 %v6373_v47, %v6371_v15  ;;  %v6200_v46 = vmul.f32 1.442695, %v6087_v25  ;;  %v18833_v11 = vld [vmem:[#allocation109_spill] sm:$0xff] }
 0xe23   : > { %18828 = vst [vmem:[#allocation105_spill] sm:$0xff] %v16152_v35  ;;  %v16158_v33 = vpop.eup %12392  ;;  %v6428_v5 = vpack.c.bf16 %v6372_v57, %v6370_v42  ;;  %7356 = vadd.xlane.f32.xlu0 %v7355_v50  ;;  %v7084_v37 = vpop.xlane.xlu1 %7083  ;;  %12412 = vpow2.f32 %v7257_v1  ;;  %v7164_v45 = vsub.f32 %v18830_v30, %v7087_v55  ;;  %v7263_v13 = vmul.f32 1.442695, %v7163_v38  ;;  %v18835_v42 = vld [vmem:[#allocation51_spill] sm:$0xff]  ;;  %v18836_v25 = vld [vmem:[#allocation73_spill] sm:$0xff]  ;;  %v18839_v30 = vld [vmem:[#allocation112_spill] sm:$0xff] }
 0xe24   : > { %v16160_v14 = vpop.eup %12394  ;;  %v7161_v3 = vsub.f32 %v18831_v52, %v7084_v37  ;;  %12414 = vpow2.f32 %v6196_v22  ;;  %6462 = vmatprep.subr.bf16.mxu1 %v6429_v26  ;;  %6282 = vadd.xlane.f32.xlu1 %v6281_v63  ;;  %v7162_v44 = vsub.f32 %v18833_v11, %v7084_v37  ;;  %v7358_v50 = vadd.f32 %v16158_v33, %v16152_v35  ;;  %v18838_v22 = vld [vmem:[#allocation74_spill] sm:$0xff]  ;;  %v7093_v37 = vpop.xlane.xlu0 %7092  ;;  %v18841_v11 = vld [vmem:[#allocation67_spill] sm:$0xff] }
 0xe25   : > { %18829 = vst [vmem:[#allocation113_spill] sm:$0xff] %v16160_v14  ;;  %v16164_v36 = vpop.eup %12396  ;;  %v6090_v1 = vsub.f32 %v18836_v25, %v18835_v42  ;;  %12416 = vrcp.f32 %v6259_v39  ;;  %6463 = vmatpush1.bf16.xpose.msra.mxu1 %v6428_v5  ;;  %v6091_v38 = vsub.f32 %v18838_v22, %v18835_v42  ;;  %v7265_v26 = vmul.f32 1.442695, %v7164_v45  ;;  %v18844_v45 = vld [vmem:[#allocation115_spill] sm:$0xff] }
 0xe26   : > { %18832 = vst [vmem:[#allocation62_spill] sm:$0xff] %v16164_v36  ;;  %v16169_v15 = vpop.eup %12398  ;;  %v7259_v55 = vmul.f32 1.442695, %v7161_v3  ;;  %12418 = vpow2.f32 %v6198_v48  ;;  %v7261_v47 = vmul.f32 1.442695, %v7162_v44  ;;  %v18840_v48 = vld [vmem:[#allocation45_spill] sm:$0xff]  ;;  %v7167_v59 = vsub.f32 %v18844_v45, %v7093_v37 }
 0xe27   : > { %18834 = vst [vmem:[#allocation96_spill] sm:$0xff] %v16169_v15  ;;  %v16173_v52 = vpop.eup %12400  ;;  %6291 = vadd.xlane.f32.xlu0 %v6290_v20  ;;  %v7090_v57 = vpop.xlane.xlu1 %7089  ;;  %12420 = vpow2.f32 %v6200_v46  ;;  %v6088_v25 = vsub.f32 %v18841_v11, %v18840_v48  ;;  %v6206_v42 = vmul.f32 1.442695, %v6090_v1  ;;  %v18842_v20 = vld [vmem:[#allocation114_spill] sm:$0xff]  ;;  %v6208_v46 = vmul.f32 1.442695, %v6091_v38 }
 0xe28   : > { %18837 = vst [vmem:[#allocation97_spill] sm:$0xff] %v16173_v52  ;;  %v16177_v63 = vpop.eup %12402  ;;  %12422 = vpow2.f32 %v7263_v13  ;;  %7359 = vadd.xlane.f32.xlu1 %v7358_v50  ;;  %v7165_v39 = vsub.f32 %v18839_v30, %v7090_v57  ;;  %v7361_v3 = vadd.f32 %v16173_v52, %v16169_v15  ;;  %v7166_v44 = vsub.f32 %v18842_v20, %v7090_v57  ;;  %v18846_v30 = vld [vmem:[#allocation117_spill] sm:$0xff] }
 0xe29   : > { %v12405_v5 = vpop.eup %12404  ;;  %12424 = vpow2.f32 %v7259_v55  ;;  %v6287_v13 = vadd.f32 %v16092_v58, %v16078_v27  ;;  %v7168_v15 = vsub.f32 %v18846_v30, %v7093_v37  ;;  %v18848_v1 = vld [vmem:[#allocation69_spill] sm:$0xff]  ;;  %v6202_v45 = vmul.f32 1.442695, %v6088_v25  ;;  %v7099_v30 = vpop.xlane.xlu0 %7098  ;;  %v18852_v25 = vld [vmem:[#allocation119_spill] sm:$0xff] }
 0xe2a   : > { %v16185_v22 = vpop.eup %12406  ;;  %12426 = vpow2.f32 %v7261_v47  ;;  %v6089_v55 = vsub.f32 %v18848_v1, %v18840_v48  ;;  %v7267_v57 = vmul.f32 1.442695, %v7165_v39  ;;  %v6296_v47 = vadd.f32 %v16164_v36, %v16160_v14  ;;  %v18851_v39 = vld [vmem:[#allocation82_spill] sm:$0xff] }
 0xe2b   : > { %18843 = vst [vmem:[#allocation43_spill] sm:$0xff] %v16185_v22  ;;  %7362 = vadd.xlane.f32.xlu0 %v7361_v3  ;;  %v16190_v50 = vpop.eup %12408  ;;  %12428 = vpow2.f32 %v7265_v26  ;;  %v7096_v38 = vpop.xlane.xlu1 %7095  ;;  %v6293_v3 = vadd.f32 %v16147_v62, %v16114_v9  ;;  %v18850_v26 = vld [vmem:[#allocation81_spill] sm:$0xff]  ;;  %v7269_v52 = vmul.f32 1.442695, %v7166_v44  ;;  %v6095_v48 = vsub.f32 %v18851_v39, %v15978_v16  ;;  %v18853_v9 = vld [vmem:[#allocation130_spill] sm:$0xff] }
 0xe2c   : > { %18845 = vst [vmem:[#allocation63_spill] sm:$0xff] %v16190_v50  ;;  %v16193_v11 = vpop.eup %12410  ;;  %6288 = vadd.xlane.f32.xlu1 %v6287_v13  ;;  %12430 = vpow2.f32 %v6206_v42  ;;  %v6094_v37 = vsub.f32 %v18850_v26, %v15978_v16  ;;  %v7271_v13 = vmul.f32 1.442695, %v7167_v59  ;;  %v7273_v36 = vmul.f32 1.442695, %v7168_v15  ;;  %v18854_v26 = vld [vmem:[#allocation128_spill] sm:$0xff] }
 0xe2d   : > { %18847 = vst [vmem:[#allocation98_spill] sm:$0xff] %v16193_v11  ;;  %v16201_v20 = vpop.eup %12412  ;;  %12432 = vpow2.f32 %v6208_v46  ;;  %v7364_v1 = vadd.f32 %v16193_v11, %v16190_v50  ;;  %v7169_v42 = vsub.f32 %v18852_v25, %v7096_v38  ;;  %v6375_v62 = vmul.f32 %v12405_v5, %v18853_v9  ;;  %v18856_v46 = vld [vmem:[#allocation138_spill] sm:$0xff]  ;;  %v18857_v16 = vld [vmem:[#allocation136_spill] sm:$0xff] }
 0xe2e   : > { %18849 = vst [vmem:[#allocation99_spill] sm:$0xff] %v16201_v20  ;;  %v16205_v27 = vpop.eup %12414  ;;  %v6374_v58 = vmul.f32 %v12405_v5, %v18854_v26  ;;  %12434 = vpow2.f32 %v7267_v57  ;;  %v6204_v15 = vmul.f32 1.442695, %v6089_v55  ;;  %v6214_v50 = vmul.f32 1.442695, %v6094_v37  ;;  %v18858_v25 = vld [vmem:[#allocation120_spill] sm:$0xff] }
 0xe2f   : > { %6297 = vadd.xlane.f32.xlu0 %v6296_v47  ;;  %v12417_v14 = vpop.eup %12416  ;;  %v7367_v47 = vadd.f32 %v16201_v20, %v16185_v22  ;;  %12436 = vpow2.f32 %v7269_v52  ;;  %v7170_v9 = vsub.f32 %v18858_v25, %v7096_v38  ;;  %v18859_v5 = vld [vmem:[#allocation121_spill] sm:$0xff]  ;;  %v7105_v20 = vpop.xlane.xlu0 %7104  ;;  %v18861_v52 = vld [vmem:[#allocation75_spill] sm:$0xff]  ;;  %v7275_v37 = vmul.f32 1.442695, %v7169_v42 }
 0xe30   : > { %v16214_v44 = vpop.eup %12418  ;;  %7365 = vadd.xlane.f32.xlu1 %v7364_v1  ;;  %v6377_v35 = vmul.f32 %v12417_v14, %v18856_v46  ;;  %v6376_v59 = vmul.f32 %v12417_v14, %v18857_v16  ;;  %12438 = vpow2.f32 %v7271_v13  ;;  %v7171_v57 = vsub.f32 %v18859_v5, %v7099_v30  ;;  %v18860_v16 = vld [vmem:[#allocation122_spill] sm:$0xff] }
 0xe31   : > { %18855 = vst [vmem:[#allocation64_spill] sm:$0xff] %v16214_v44  ;;  %v16220_v39 = vpop.eup %12420  ;;  %v6216_v14 = vmul.f32 1.442695, %v6095_v48  ;;  %12440 = vpow2.f32 %v7273_v36  ;;  %v7172_v22 = vsub.f32 %v18860_v16, %v7099_v30  ;;  %v6092_v38 = vsub.f32 %v18861_v52, %v15963_v8  ;;  %v18862_v36 = vld [vmem:[#allocation77_spill] sm:$0xff]  ;;  %v7102_v48 = vpop.xlane.xlu1 %7101 }
 0xe32   : > { %v16223_v11 = vpop.eup %12422  ;;  %v6431_v1 = vpack.c.bf16 %v6377_v35, %v6375_v62  ;;  %v6430_v26 = vpack.c.bf16 %v6376_v59, %v6374_v58  ;;  %12442 = vpow2.f32 %v6202_v45  ;;  %v6302_v62 = vadd.f32 %v16220_v39, %v16214_v44  ;;  %v18863_v45 = vld [vmem:[#allocation85_spill] sm:$0xff] }
 0xe33   : > { %7368 = vadd.xlane.f32.xlu0 %v7367_v47  ;;  %v16226_v46 = vpop.eup %12424  ;;  %12444 = vpow2.f32 %v6204_v15  ;;  %v6093_v35 = vsub.f32 %v18862_v36, %v15963_v8  ;;  %v7277_v30 = vmul.f32 1.442695, %v7170_v9  ;;  %v6098_v13 = vsub.f32 %v18863_v45, %v16048_v54  ;;  %v18865_v47 = vld [vmem:[#allocation86_spill] sm:$0xff]  ;;  %v18868_v16 = vld [vmem:[#allocation125_spill] sm:$0xff] }
 0xe34   : > { %v16229_v55 = vpop.eup %12426  ;;  %6464 = vmatprep.subr.bf16.mxu1 %v6431_v1  ;;  %6294 = vadd.xlane.f32.xlu1 %v6293_v3  ;;  %12446 = vpow2.f32 %v6214_v50  ;;  %v7279_v59 = vmul.f32 1.442695, %v7171_v57  ;;  %v6099_v15 = vsub.f32 %v18865_v47, %v16048_v54  ;;  %v7281_v25 = vmul.f32 1.442695, %v7172_v22  ;;  %v18867_v50 = vld [vmem:[#allocation123_spill] sm:$0xff]  ;;  %v18870_v45 = vld [vmem:[#allocation129_spill] sm:$0xff] }
 0xe35   : > { %v16235_v58 = vpop.eup %12428  ;;  %6465 = vmatpush1.bf16.xpose.msra.mxu1 %v6430_v26  ;;  %v7370_v3 = vadd.f32 %v16229_v55, %v16226_v46  ;;  %12448 = vpow2.f32 %v6216_v14  ;;  %v6210_v9 = vmul.f32 1.442695, %v6092_v38  ;;  %v7173_v5 = vsub.f32 %v18867_v50, %v7102_v48  ;;  %v7111_v26 = vpop.xlane.xlu0 %7110  ;;  %v18869_v54 = vld [vmem:[#allocation127_spill] sm:$0xff]  ;;  %v18873_v50 = vld [vmem:[#allocation84_spill] sm:$0xff] }
 0xe36   : > { %v16243_v42 = vpop.eup %12430  ;;  %12450 = vpow2.f32 %v7275_v37  ;;  %v7373_v57 = vadd.f32 %v16235_v58, %v16223_v11  ;;  %v6212_v1 = vmul.f32 1.442695, %v6093_v35  ;;  %v7174_v52 = vsub.f32 %v18868_v16, %v7102_v48  ;;  %v18872_v48 = vld [vmem:[#allocation83_spill] sm:$0xff]  ;;  %v18874_v16 = vld [vmem:[#allocation133_spill] sm:$0xff] }
 0xe37   : > { %6303 = vadd.xlane.f32.xlu0 %v6302_v62  ;;  %18864 = vst [vmem:[#allocation104_spill] sm:$0xff] %v16243_v42  ;;  %v16247_v8 = vpop.eup %12432  ;;  %12452 = vpow2.f32 %v7277_v30  ;;  %v6222_v62 = vmul.f32 1.442695, %v6098_v13  ;;  %v7175_v22 = vsub.f32 %v18869_v54, %v7105_v20  ;;  %v6299_v38 = vadd.f32 %v16205_v27, %v16177_v63 }
 0xe38   : > { %18866 = vst [vmem:[#allocation106_spill] sm:$0xff] %v16247_v8  ;;  %7371 = vadd.xlane.f32.xlu1 %v7370_v3  ;;  %v16253_v14 = vpop.eup %12434  ;;  %12454 = vpow2.f32 %v7279_v59  ;;  %v6224_v36 = vmul.f32 1.442695, %v6099_v15  ;;  %v7176_v35 = vsub.f32 %v18870_v45, %v7105_v20  ;;  %v6096_v3 = vsub.f32 %v18872_v48, %v16038_v24 }
 0xe39   : > { %v16258_v37 = vpop.eup %12436  ;;  %12456 = vpow2.f32 %v7281_v25  ;;  %v7283_v13 = vmul.f32 1.442695, %v7173_v5  ;;  %v6308_v59 = vadd.f32 %v16247_v8, %v16243_v42  ;;  %v6097_v15 = vsub.f32 %v18873_v50, %v16038_v24  ;;  %v7117_v42 = vpop.xlane.xlu0 %7116  ;;  %v18877_v50 = vld [vmem:[#allocation131_spill] sm:$0xff]  ;;  %v18879_v8 = vld [vmem:[#allocation132_spill] sm:$0xff] }
 0xe3a   : > { %v16261_v30 = vpop.eup %12438  ;;  %12458 = vpow2.f32 %v6210_v9  ;;  %v7285_v25 = vmul.f32 1.442695, %v7174_v52  ;;  %v7287_v9 = vmul.f32 1.442695, %v7175_v22  ;;  %v7179_v54 = vsub.f32 %v18874_v16, %v7111_v26 }
 0xe3b   : > { %7374 = vadd.xlane.f32.xlu0 %v7373_v57  ;;  %18871 = vst [vmem:[#allocation100_spill] sm:$0xff] %v16261_v30  ;;  %v16267_v47 = vpop.eup %12440  ;;  %12460 = vpow2.f32 %v6212_v1  ;;  %v7108_v57 = vpop.xlane.xlu1 %7107  ;;  %v7376_v5 = vadd.f32 %v16258_v37, %v16253_v14  ;;  %v7289_v45 = vmul.f32 1.442695, %v7176_v35  ;;  %v18875_v1 = vld [vmem:[#allocation134_spill] sm:$0xff]  ;;  %v6218_v52 = vmul.f32 1.442695, %v6096_v3 }
 0xe3c   : > { %6300 = vadd.xlane.f32.xlu1 %v6299_v38  ;;  %v16271_v20 = vpop.eup %12442  ;;  %12462 = vpow2.f32 %v6222_v62  ;;  %v7180_v48 = vsub.f32 %v18875_v1, %v7111_v26  ;;  %v7177_v62 = vsub.f32 %v18877_v50, %v7108_v57  ;;  %v7379_v22 = vadd.f32 %v16267_v47, %v16261_v30  ;;  %v18880_v1 = vld [vmem:[#allocation139_spill] sm:$0xff]  ;;  %v18881_v50 = vld [vmem:[#allocation140_spill] sm:$0xff] }
 0xe3d   : > { %v16276_v38 = vpop.eup %12444  ;;  %12464 = vpow2.f32 %v6224_v36  ;;  %v6220_v16 = vmul.f32 1.442695, %v6097_v15  ;;  %v7178_v36 = vsub.f32 %v18879_v8, %v7108_v57  ;;  %v7295_v26 = vmul.f32 1.442695, %v7179_v54  ;;  %v18882_v8 = vld [vmem:[#allocation87_spill] sm:$0xff] }
 0xe3e   : > { %v16279_v24 = vpop.eup %12446  ;;  %12466 = vpow2.f32 %v7283_v13  ;;  %v7183_v44 = vsub.f32 %v18880_v1, %v7117_v42  ;;  %v6305_v3 = vadd.f32 %v16276_v38, %v16271_v20  ;;  %v7184_v30 = vsub.f32 %v18881_v50, %v7117_v42 }
 0xe3f   : > { %6309 = vadd.xlane.f32.xlu0 %v6308_v59  ;;  %18876 = vst [vmem:[#allocation102_spill] sm:$0xff] %v16279_v24  ;;  %v16284_v59 = vpop.eup %12448  ;;  %12468 = vpow2.f32 %v7285_v25  ;;  %v6100_v25 = vsub.f32 %v18882_v8, %v16108_v34  ;;  %v7291_v57 = vmul.f32 1.442695, %v7177_v62  ;;  %v7114_v1 = vpop.xlane.xlu1 %7113 }
 0xe40   : > { %7377 = vadd.xlane.f32.xlu1 %v7376_v5  ;;  %18878 = vst [vmem:[#allocation41_spill] sm:$0xff] %v16284_v59  ;;  %v16287_v35 = vpop.eup %12450  ;;  %12470 = vpow2.f32 %v7287_v9  ;;  %v7297_v5 = vmul.f32 1.442695, %v7180_v48  ;;  %v6314_v9 = vadd.f32 %v16284_v59, %v16279_v24  ;;  %v7293_v48 = vmul.f32 1.442695, %v7178_v36  ;;  %v18885_v24 = vld [vmem:[#allocation135_spill] sm:$0xff] }
 0xe41   : > { %v16292_v13 = vpop.eup %12452  ;;  %12472 = vpow2.f32 %v7289_v45  ;;  %v7305_v50 = vmul.f32 1.442695, %v7184_v30 }
 0xe42   : > { %v16295_v15 = vpop.eup %12454  ;;  %12474 = vpow2.f32 %v6218_v52  ;;  %v7303_v52 = vmul.f32 1.442695, %v7183_v44  ;;  %v7382_v62 = vadd.f32 %v16292_v13, %v16287_v35 }
 0xe43   : > { %7380 = vadd.xlane.f32.xlu0 %v7379_v22  ;;  %v16301_v54 = vpop.eup %12456  ;;  %12476 = vpow2.f32 %v6220_v16  ;;  %v18883_v22 = vld [vmem:[#allocation88_spill] sm:$0xff]  ;;  %v6226_v16 = vmul.f32 1.442695, %v6100_v25 }
 0xe44   : > { %6306 = vadd.xlane.f32.xlu1 %v6305_v3  ;;  %v6101_v45 = vsub.f32 %v18883_v22, %v16108_v34  ;;  %v16305_v42 = vpop.eup %12458  ;;  %12478 = vpow2.f32 %v7295_v26  ;;  %v7181_v34 = vsub.f32 %v18885_v24, %v7114_v1  ;;  %v7385_v36 = vadd.f32 %v16301_v54, %v16295_v15 }
 0xe45   : > { %v16309_v3 = vpop.eup %12460  ;;  %12480 = vpow2.f32 %v7297_v5 }
 0xe46   : > { %v16311_v8 = vpop.eup %12462  ;;  %12482 = vpow2.f32 %v7291_v57  ;;  %v6228_v44 = vmul.f32 1.442695, %v6101_v45  ;;  %v6311_v30 = vadd.f32 %v16309_v3, %v16305_v42  ;;  %v7299_v25 = vmul.f32 1.442695, %v7181_v34 }
 0xe47   : > { %6315 = vadd.xlane.f32.xlu0 %v6314_v9  ;;  %18884 = vst [vmem:[#allocation65_spill] sm:$0xff] %v16311_v8  ;;  %v16316_v26 = vpop.eup %12464  ;;  %12484 = vpow2.f32 %v7293_v48  ;;  %v18887_v9 = vld [vmem:[#allocation137_spill] sm:$0xff] }
 0xe48   : > { %7383 = vadd.xlane.f32.xlu1 %v7382_v62  ;;  %18886 = vst [vmem:[#allocation66_spill] sm:$0xff] %v16316_v26  ;;  %v7182_v22 = vsub.f32 %v18887_v9, %v7114_v1  ;;  %v16319_v59 = vpop.eup %12466  ;;  %12486 = vpow2.f32 %v7303_v52  ;;  %v6320_v57 = vadd.f32 %v16316_v26, %v16311_v8 }
 0xe49   : > { %v16323_v5 = vpop.eup %12468  ;;  %12488 = vpow2.f32 %v7305_v50 }
 0xe4a   : > { %v16325_v24 = vpop.eup %12470  ;;  %12490 = vpow2.f32 %v6226_v16  ;;  %v7301_v48 = vmul.f32 1.442695, %v7182_v22  ;;  %v7388_v52 = vadd.f32 %v16323_v5, %v16319_v59 }
 0xe4b   : > { %7386 = vadd.xlane.f32.xlu0 %v7385_v36  ;;  %18888 = vst [vmem:[#allocation118_spill] sm:$0xff] %v16325_v24  ;;  %v16329_v45 = vpop.eup %12472  ;;  %12492 = vpow2.f32 %v6228_v44 }
 0xe4c   : > { %6312 = vadd.xlane.f32.xlu1 %v6311_v30  ;;  %v16331_v1 = vpop.eup %12474  ;;  %12494 = vpow2.f32 %v7299_v25  ;;  %v7391_v16 = vadd.f32 %v16329_v45, %v16325_v24 }
 0xe4d   : > { %v16335_v62 = vpop.eup %12476  ;;  %12496 = vpow2.f32 %v7301_v48 }
 0xe4e   : > { %v16337_v50 = vpop.eup %12478  ;;  %v6317_v44 = vadd.f32 %v16335_v62, %v16331_v1 }
 0xe4f   : > { %6321 = vadd.xlane.f32.xlu0 %v6320_v57  ;;  %18889 = vst [vmem:[#allocation116_spill] sm:$0xff] %v16337_v50  ;;  %v16341_v34 = vpop.eup %12480 }
 0xe50   : > { %7389 = vadd.xlane.f32.xlu1 %v7388_v52  ;;  %18890 = vst [vmem:[#allocation110_spill] sm:$0xff] %v16341_v34  ;;  %v16343_v36 = vpop.eup %12482  ;;  %v7397_v30 = vadd.f32 %v16341_v34, %v16337_v50 }
 0xe51   : > { %18891 = vst [vmem:[#allocation126_spill] sm:$0xff] %v16343_v36  ;;  %v16347_v9 = vpop.eup %12484 }
 0xe52   : > { %18892 = vst [vmem:[#allocation124_spill] sm:$0xff] %v16347_v9  ;;  %v16349_v22 = vpop.eup %12486  ;;  %v7394_v48 = vadd.f32 %v16347_v9, %v16343_v36 }
 0xe53   : > { %7392 = vadd.xlane.f32.xlu0 %v7391_v16  ;;  %18893 = vst [vmem:[#allocation111_spill] sm:$0xff] %v16349_v22  ;;  %v16353_v25 = vpop.eup %12488 }
 0xe54   : > { %6318 = vadd.xlane.f32.xlu1 %v6317_v44  ;;  %18894 = vst [vmem:[#allocation108_spill] sm:$0xff] %v16353_v25  ;;  %v16355_v57 = vpop.eup %12490  ;;  %v7403_v16 = vadd.f32 %v16353_v25, %v16349_v22 }
 0xe55   : > { %18895 = vst [vmem:[#allocation109_spill] sm:$0xff] %v16355_v57  ;;  %v16359_v52 = vpop.eup %12492 }
 0xe56   : > { %18896 = vst [vmem:[#allocation51_spill] sm:$0xff] %v16359_v52  ;;  %v16363_v8 = vpop.eup %12494  ;;  %v6323_v44 = vadd.f32 %v16359_v52, %v16355_v57 }
 0xe57   : > { %7398 = vadd.xlane.f32.xlu0 %v7397_v30  ;;  %18897 = vst [vmem:[#allocation73_spill] sm:$0xff] %v16363_v8  ;;  %v16367_v50 = vpop.eup %12496 }
 0xe58   : > { %7395 = vadd.xlane.f32.xlu1 %v7394_v48  ;;  %18898 = vst [vmem:[#allocation74_spill] sm:$0xff] %v16367_v50  ;;  %v7400_v30 = vadd.f32 %v16367_v50, %v16363_v8 }
 0xe5b   : > { %7404 = vadd.xlane.f32.xlu0 %v7403_v16 }
 0xe5c   : > { %6324 = vadd.xlane.f32.xlu1 %v6323_v44 }
 0xe60   : > { %7401 = vadd.xlane.f32.xlu1 %v7400_v30 }
 0xe7e   : > { %v7321_v34 = vpop.xlane.xlu0 %7320 }
 0xe7f   : > { %12498 = vrcp.f32 %v7321_v34 }
 0xe82   : > { %v6262_v26 = vpop.xlane.xlu0 %6261  ;;  %v7324_v48 = vpop.xlane.xlu1 %7323 }
 0xe83   : > { %12500 = vrcp.f32 %v7324_v48 }
 0xe86   : > { %v7120_v24 = vpop.xlane.xlu1 %7119  ;;  %v7327_v22 = vpop.xlane.xlu0 %7326 }
 0xe87   : > { %v7185_v25 = vsub.f32 %v15824_v17, %v7120_v24  ;;  %v7186_v16 = vsub.f32 %v15826_v31, %v7120_v24  ;;  %12502 = vrcp.f32 %v7327_v22 }
 0xe89   : > { %v7307_v36 = vmul.f32 1.442695, %v7185_v25  ;;  %v7309_v57 = vmul.f32 1.442695, %v7186_v16  ;;  %v12499_v52 = vpop.eup %12498 }
 0xe8a   : > { %v7448_v31 = vmul.f32 %v12499_v52, %v15926_v4 }
 0xe8b   : > { %12504 = vpow2.f32 %v7307_v36  ;;  %v7447_v36 = vmul.f32 %v12499_v52, %v15924_v19 }
 0xe8c   : > { %v7123_v44 = vpop.xlane.xlu0 %7122  ;;  %12506 = vpow2.f32 %v7309_v57 }
 0xe8d   : > { %v7187_v30 = vsub.f32 %v15836_v43, %v7123_v44  ;;  %v7188_v34 = vsub.f32 %v15838_v32, %v7123_v44  ;;  %12508 = vrcp.f32 %v6262_v26  ;;  %v7330_v8 = vpop.xlane.xlu1 %7329  ;;  %v12501_v48 = vpop.eup %12500 }
 0xe8e   : > { %12510 = vrcp.f32 %v7330_v8  ;;  %v7450_v24 = vmul.f32 %v12501_v48, %v15941_v28  ;;  %v7449_v22 = vmul.f32 %v12501_v48, %v15939_v7 }
 0xe8f   : > { %v7311_v50 = vmul.f32 1.442695, %v7187_v30  ;;  %v7313_v9 = vmul.f32 1.442695, %v7188_v34  ;;  %v18899_v34 = vld [vmem:[#allocation89_spill] sm:$0xff] }
 0xe90   : > { %v7333_v17 = vpop.xlane.xlu0 %7332  ;;  %v7512_v25 = vpack.c.bf16 %v7450_v24, %v7448_v31  ;;  %v7511_v32 = vpack.c.bf16 %v7449_v22, %v7447_v36 }
 0xe91   : > { %12512 = vpow2.f32 %v7311_v50  ;;  %v6265_v43 = vpop.xlane.xlu1 %6264  ;;  %v12503_v57 = vpop.eup %12502 }
 0xe92   : > { %12514 = vpow2.f32 %v7313_v9  ;;  %7545 = vmatprep.subr.bf16.mxu0 %v7512_v25  ;;  %v7452_v52 = vmul.f32 %v12503_v57, %v15959_v12  ;;  %v7451_v30 = vmul.f32 %v12503_v57, %v15955_v60 }
 0xe93   : > { %12516 = vrcp.f32 %v6265_v43  ;;  %7546 = vmatpush1.bf16.xpose.msra.mxu0 %v7511_v32 }
 0xe94   : > { %v6268_v26 = vpop.xlane.xlu0 %6267  ;;  %12518 = vrcp.f32 %v7333_v17 }
 0xe95   : > { %v16379_v8 = vpop.eup %12504  ;;  %v7336_v4 = vpop.xlane.xlu1 %7335 }
 0xe96   : > { %v16381_v16 = vpop.eup %12506  ;;  %12520 = vrcp.f32 %v7336_v4  ;;  %v18900_v4 = vld [vmem:[#allocation47_spill] sm:$0xff] }
 0xe97   : > { %v12509_v19 = vpop.eup %12508  ;;  %v7406_v7 = vadd.f32 %v16381_v16, %v16379_v8  ;;  %12522 = vrcp.f32 %v6268_v26  ;;  %v18903_v26 = vld [vmem:[#allocation48_spill] sm:$0xff] }
 0xe98   : > { %v7339_v28 = vpop.xlane.xlu0 %7338  ;;  %v12511_v50 = vpop.eup %12510 }
 0xe99   : > { %v7126_v9 = vpop.xlane.xlu1 %7125  ;;  %7407 = vadd.xlane.f32.xlu1 %v7406_v7  ;;  %v7454_v44 = vmul.f32 %v12511_v50, %v15983_v51  ;;  %v7453_v48 = vmul.f32 %v12511_v50, %v18899_v34  ;;  %12524 = vrcp.f32 %v7339_v28  ;;  %v6379_v7 = vmul.f32 %v12509_v19, %v18900_v4 }
 0xe9a   : > { %v7189_v31 = vsub.f32 %v15845_v21, %v7126_v9  ;;  %v7190_v24 = vsub.f32 %v15847_v53, %v7126_v9  ;;  %v18901_v53 = vld [vmem:[#allocation49_spill] sm:$0xff]  ;;  %v18902_v9 = vld [vmem:[#allocation42_spill] sm:$0xff] }
 0xe9b   : > { %v16389_v17 = vpop.eup %12512  ;;  %v7514_v43 = vpack.c.bf16 %v7454_v44, %v7452_v52  ;;  %v7513_v25 = vpack.c.bf16 %v7453_v48, %v7451_v30  ;;  %v6378_v52 = vmul.f32 %v12509_v19, %v18902_v9 }
 0xe9c   : > { %v16393_v36 = vpop.eup %12514  ;;  %v6274_v22 = vpop.xlane.xlu0 %6273  ;;  %v7315_v32 = vmul.f32 1.442695, %v7189_v31  ;;  %v7317_v12 = vmul.f32 1.442695, %v7190_v24  ;;  %v18904_v24 = vld [vmem:[#allocation93_spill] sm:$0xff] }
 0xe9d   : > { %v7409_v51 = vadd.f32 %v16393_v36, %v16389_v17  ;;  %v12517_v60 = vpop.eup %12516  ;;  %7547 = vmatprep.subr.bf16.mxu0 %v7514_v43  ;;  %v7342_v57 = vpop.xlane.xlu1 %7341 }
 0xe9e   : > { %v12519_v21 = vpop.eup %12518  ;;  %12526 = vpow2.f32 %v7315_v32  ;;  %7548 = vmatpush1.bf16.xpose.msra.mxu0 %v7513_v25  ;;  %v6381_v50 = vmul.f32 %v12517_v60, %v18901_v53  ;;  %v6380_v44 = vmul.f32 %v12517_v60, %v18903_v26  ;;  %v18905_v32 = vld [vmem:[#allocation91_spill] sm:$0xff] }
 0xe9f   : > { %7410 = vadd.xlane.f32.xlu0 %v7409_v51  ;;  %12528 = vpow2.f32 %v7317_v12  ;;  %v7456_v43 = vmul.f32 %v12519_v21, %v18904_v24  ;;  %v7455_v25 = vmul.f32 %v12519_v21, %v18905_v32 }
 0xea0   : > { %v7345_v30 = vpop.xlane.xlu0 %7344  ;;  %v12521_v34 = vpop.eup %12520  ;;  %12530 = vrcp.f32 %v7342_v57  ;;  %v6433_v48 = vpack.c.bf16 %v6381_v50, %v6379_v7  ;;  %v6432_v28 = vpack.c.bf16 %v6380_v44, %v6378_v52 }
 0xea1   : > { %v6271_v31 = vpop.xlane.xlu1 %6270  ;;  %v7458_v4 = vmul.f32 %v12521_v34, %v16014_v0  ;;  %v7457_v51 = vmul.f32 %v12521_v34, %v16012_v10  ;;  %v12523_v7 = vpop.eup %12522 }
 0xea2   : > { %6466 = vmatprep.subr.bf16.mxu1 %v6433_v48  ;;  %12532 = vrcp.f32 %v6271_v31  ;;  %v6382_v31 = vmul.f32 %v12523_v7, %v15908_v61  ;;  %v3079_v61 = vld [vmem:[%s18027_s6 + $0x50] sm:$0xff] }
 0xea3   : > { %6467 = vmatpush1.bf16.xpose.msra.mxu1 %v6432_v28  ;;  %v7516_v60 = vpack.c.bf16 %v7458_v4, %v7456_v43  ;;  %v7515_v12 = vpack.c.bf16 %v7457_v51, %v7455_v25  ;;  %12534 = vrcp.f32 %v7345_v30  ;;  %v12525_v53 = vpop.eup %12524 }
 0xea4   : > { %v6280_v19 = vpop.xlane.xlu0 %6279  ;;  %v7460_v44 = vmul.f32 %v12525_v53, %v16034_v41  ;;  %v7459_v34 = vmul.f32 %v12525_v53, %v16030_v2 }
 0xea5   : > { %7549 = vmatprep.subr.bf16.mxu0 %v7516_v60  ;;  %v7348_v57 = vpop.xlane.xlu1 %7347  ;;  %v18906_v60 = vld [vmem:[#allocation54_spill] sm:$0xff] }
 0xea6   : > { %12536 = vrcp.f32 %v7348_v57  ;;  %7550 = vmatpush1.bf16.xpose.msra.mxu0 %v7515_v12 }
 0xea7   : > { %12538 = vrcp.f32 %v6274_v22  ;;  %v6383_v22 = vmul.f32 %v12523_v7, %v15910_v56 }
 0xea8   : > { %v7351_v50 = vpop.xlane.xlu0 %7350  ;;  %v16405_v9 = vpop.eup %12526 }
 0xea9   : > { %v16407_v0 = vpop.eup %12528  ;;  %v6277_v10 = vpop.xlane.xlu1 %6276 }
 0xeaa   : > { %v12531_v21 = vpop.eup %12530  ;;  %12540 = vrcp.f32 %v6277_v10  ;;  %v7412_v52 = vadd.f32 %v16407_v0, %v16405_v9 }
 0xeab   : > { %v7462_v30 = vmul.f32 %v12531_v21, %v16053_v23  ;;  %v7461_v48 = vmul.f32 %v12531_v21, %v16050_v18  ;;  %12542 = vrcp.f32 %v7351_v50 }
 0xeac   : > { %v6286_v26 = vpop.xlane.xlu0 %6285  ;;  %v12533_v28 = vpop.eup %12532  ;;  %7413 = vadd.xlane.f32.xlu1 %v7412_v52 }
 0xead   : > { %v7518_v24 = vpack.c.bf16 %v7462_v30, %v7460_v44  ;;  %v7354_v43 = vpop.xlane.xlu1 %7353  ;;  %v7517_v4 = vpack.c.bf16 %v7461_v48, %v7459_v34  ;;  %v6385_v32 = vmul.f32 %v12533_v28, %v15921_v6  ;;  %v6384_v41 = vmul.f32 %v12533_v28, %v15918_v29  ;;  %v12535_v25 = vpop.eup %12534  ;;  %v18907_v29 = vld [vmem:[#allocation38_spill] sm:$0xff]  ;;  %v18909_v30 = vld [vmem:[#allocation53_spill] sm:$0xff]  ;;  %v18910_v48 = vld [vmem:[#allocation35_spill] sm:$0xff] }
 0xeae   : > { %12544 = vrcp.f32 %v7354_v43  ;;  %v7464_v12 = vmul.f32 %v12535_v25, %v18906_v60  ;;  %v18915_v60 = vld [vmem:[#allocation58_spill] sm:$0xff] }
 0xeaf   : > { %12546 = vrcp.f32 %v6280_v19  ;;  %7551 = vmatprep.subr.bf16.mxu0 %v7518_v24  ;;  %v6435_v18 = vpack.c.bf16 %v6385_v32, %v6383_v22  ;;  %v6434_v23 = vpack.c.bf16 %v6384_v41, %v6382_v31  ;;  %v18908_v19 = vld [vmem:[#allocation55_spill] sm:$0xff]  ;;  %v18912_v31 = vld [vmem:[#allocation46_spill] sm:$0xff] }
 0xeb0   : > { %v7357_v2 = vpop.xlane.xlu0 %7356  ;;  %v12537_v51 = vpop.eup %12536  ;;  %7552 = vmatpush1.bf16.xpose.msra.mxu0 %v7517_v4  ;;  %v7463_v53 = vmul.f32 %v12535_v25, %v18908_v19 }
 0xeb1   : > { %6468 = vmatprep.subr.bf16.mxu1 %v6435_v18  ;;  %v6283_v56 = vpop.xlane.xlu1 %6282  ;;  %v7466_v6 = vmul.f32 %v12537_v51, %v16086_v49  ;;  %v7465_v57 = vmul.f32 %v12537_v51, %v18907_v29  ;;  %v12539_v7 = vpop.eup %12538  ;;  %v18911_v49 = vld [vmem:[#allocation52_spill] sm:$0xff]  ;;  %v18916_v29 = vld [vmem:[#allocation103_spill] sm:$0xff] }
 0xeb2   : > { %12548 = vrcp.f32 %v6283_v56  ;;  %6469 = vmatpush1.bf16.xpose.msra.mxu1 %v6434_v23  ;;  %v6387_v34 = vmul.f32 %v12539_v7, %v18909_v30  ;;  %v6386_v22 = vmul.f32 %v12539_v7, %v18911_v49  ;;  %v18913_v23 = vld [vmem:[#allocation94_spill] sm:$0xff]  ;;  %v18914_v56 = vld [vmem:[#allocation59_spill] sm:$0xff]  ;;  %v18918_v30 = vld [vmem:[#allocation36_spill] sm:$0xff] }
 0xeb3   : > { %v7520_v10 = vpack.c.bf16 %v7466_v6, %v7464_v12  ;;  %12550 = vrcp.f32 %v7357_v2  ;;  %v7519_v52 = vpack.c.bf16 %v7465_v57, %v7463_v53  ;;  %v3080_v6 = vld [vmem:[%s18027_s6 + $0x58] sm:$0xff] }
 0xeb4   : > { %v6292_v50 = vpop.xlane.xlu0 %6291  ;;  %v12541_v21 = vpop.eup %12540 }
 0xeb5   : > { %3133 = vperm.xlu0 %11364, %v3079_v61   ;;  %7553 = vmatprep.subr.bf16.mxu0 %v7520_v10  ;;  %v7360_v44 = vpop.xlane.xlu1 %7359  ;;  %v6389_v28 = vmul.f32 %v12541_v21, %v18910_v48  ;;  %v6388_v24 = vmul.f32 %v12541_v21, %v18912_v31  ;;  %v12543_v43 = vpop.eup %12542  ;;  %v18917_v10 = vld [vmem:[#allocation90_spill] sm:$0xff]  ;;  %v18919_v48 = vld [vmem:[#allocation92_spill] sm:$0xff] }
 0xeb6   : > { %12552 = vrcp.f32 %v7360_v44  ;;  %v7468_v51 = vmul.f32 %v12543_v43, %v18913_v23  ;;  %v7467_v57 = vmul.f32 %v12543_v43, %v18916_v29 }
 0xeb7   : > { %v6437_v32 = vpack.c.bf16 %v6389_v28, %v6387_v34  ;;  %v6436_v41 = vpack.c.bf16 %v6388_v24, %v6386_v22  ;;  %12554 = vrcp.f32 %v6286_v26 }
 0xeb8   : > { %v7363_v4 = vpop.xlane.xlu0 %7362  ;;  %v12545_v25 = vpop.eup %12544  ;;  %7554 = vmatpush1.bf16.xpose.msra.mxu0 %v7519_v52 }
 0xeb9   : > { %v12547_v2 = vpop.eup %12546  ;;  %6470 = vmatprep.subr.bf16.mxu1 %v6437_v32  ;;  %v6289_v18 = vpop.xlane.xlu1 %6288  ;;  %v7470_v61 = vmul.f32 %v12545_v25, %v18914_v56  ;;  %v7469_v12 = vmul.f32 %v12545_v25, %v18915_v60  ;;  %v18920_v32 = vld [vmem:[#allocation61_spill] sm:$0xff] }
 0xeba   : > { %12556 = vrcp.f32 %v6289_v18  ;;  %6471 = vmatpush1.bf16.xpose.msra.mxu1 %v6436_v41  ;;  %v6391_v21 = vmul.f32 %v12547_v2, %v18917_v10  ;;  %v6390_v34 = vmul.f32 %v12547_v2, %v18918_v30  ;;  %v18921_v18 = vld [vmem:[#allocation105_spill] sm:$0xff]  ;;  %v18922_v2 = vld [vmem:[#allocation60_spill] sm:$0xff] }
 0xebb   : > { %v7522_v26 = vpack.c.bf16 %v7470_v61, %v7468_v51  ;;  %12558 = vrcp.f32 %v7363_v4  ;;  %v7521_v53 = vpack.c.bf16 %v7469_v12, %v7467_v57  ;;  %v18924_v57 = vld [vmem:[#allocation57_spill] sm:$0xff] }
 0xebc   : > { %v6298_v7 = vpop.xlane.xlu0 %6297  ;;  %v12549_v19 = vpop.eup %12548 }
 0xebd   : > { %3138 = vperm.xlu1 %11365, %v3080_v6   ;;  %7555 = vmatprep.subr.bf16.mxu0 %v7522_v26  ;;  %v7366_v52 = vpop.xlane.xlu1 %7365  ;;  %v6393_v44 = vmul.f32 %v12549_v19, %v16024_v40  ;;  %v6392_v28 = vmul.f32 %v12549_v19, %v18919_v48  ;;  %v12551_v49 = vpop.eup %12550  ;;  %v18923_v6 = vld [vmem:[#allocation40_spill] sm:$0xff]  ;;  %v18925_v19 = vld [vmem:[#allocation39_spill] sm:$0xff] }
 0xebe   : > { %12560 = vrcp.f32 %v7366_v52  ;;  %v7472_v41 = vmul.f32 %v12551_v49, %v18920_v32  ;;  %v7471_v51 = vmul.f32 %v12551_v49, %v18922_v2  ;;  %v18930_v32 = vld [vmem:[#allocation96_spill] sm:$0xff] }
 0xebf   : > { %v6439_v31 = vpack.c.bf16 %v6393_v44, %v6391_v21  ;;  %v6438_v24 = vpack.c.bf16 %v6392_v28, %v6390_v34  ;;  %12562 = vrcp.f32 %v6292_v50  ;;  %v18927_v28 = vld [vmem:[#allocation97_spill] sm:$0xff] }
 0xec0   : > { %v7369_v22 = vpop.xlane.xlu0 %7368  ;;  %v12553_v43 = vpop.eup %12552  ;;  %7556 = vmatpush1.bf16.xpose.msra.mxu0 %v7521_v53  ;;  %v18926_v53 = vld [vmem:[#allocation37_spill] sm:$0xff] }
 0xec1   : > { %6472 = vmatprep.subr.bf16.mxu1 %v6439_v31  ;;  %v6295_v4 = vpop.xlane.xlu1 %6294  ;;  %v7474_v25 = vmul.f32 %v12553_v43, %v16158_v33  ;;  %v7473_v40 = vmul.f32 %v12553_v43, %v18921_v18  ;;  %v12555_v23 = vpop.eup %12554 }
 0xec2   : > { %12564 = vrcp.f32 %v6295_v4  ;;  %6473 = vmatpush1.bf16.xpose.msra.mxu1 %v6438_v24  ;;  %v6395_v29 = vmul.f32 %v12555_v23, %v18923_v6  ;;  %v6394_v33 = vmul.f32 %v12555_v23, %v18925_v19  ;;  %v18929_v24 = vld [vmem:[#allocation63_spill] sm:$0xff] }
 0xec3   : > { %v7524_v61 = vpack.c.bf16 %v7474_v25, %v7472_v41  ;;  %12566 = vrcp.f32 %v7369_v22  ;;  %v7523_v12 = vpack.c.bf16 %v7473_v40, %v7471_v51  ;;  %v18928_v22 = vld [vmem:[#allocation98_spill] sm:$0xff]  ;;  %v18931_v51 = vld [vmem:[#allocation101_spill] sm:$0xff] }
 0xec4   : > { %v6304_v56 = vpop.xlane.xlu0 %6303  ;;  %v12557_v60 = vpop.eup %12556 }
 0xec5   : > { %7557 = vmatprep.subr.bf16.mxu0 %v7524_v61  ;;  %v7372_v50 = vpop.xlane.xlu1 %7371  ;;  %v6397_v26 = vmul.f32 %v12557_v60, %v18924_v57  ;;  %v6396_v10 = vmul.f32 %v12557_v60, %v18926_v53  ;;  %v12559_v21 = vpop.eup %12558  ;;  %v18932_v60 = vld [vmem:[#allocation107_spill] sm:$0xff] }
 0xec6   : > { %12568 = vrcp.f32 %v7372_v50  ;;  %v7476_v49 = vmul.f32 %v12559_v21, %v18927_v28  ;;  %v7475_v41 = vmul.f32 %v12559_v21, %v18930_v32  ;;  %v18933_v50 = vld [vmem:[#allocation95_spill] sm:$0xff]  ;;  %v18937_v32 = vld [vmem:[#allocation62_spill] sm:$0xff] }
 0xec7   : > { %v6441_v44 = vpack.c.bf16 %v6397_v26, %v6395_v29  ;;  %v6440_v30 = vpack.c.bf16 %v6396_v10, %v6394_v33  ;;  %12570 = vrcp.f32 %v6298_v7  ;;  %v10556_v7 = vld [vmem:[%s18028_s7 + $0x18] sm:$0xff]  ;;  %v18934_v29 = vld [vmem:[#allocation56_spill] sm:$0xff] }
 0xec8   : > { %v7375_v52 = vpop.xlane.xlu0 %7374  ;;  %v12561_v34 = vpop.eup %12560  ;;  %7558 = vmatpush1.bf16.xpose.msra.mxu0 %v7523_v12  ;;  %v7588_v19 = vpack.c.bf16 %v10556_v7, %v10556_v7 }
 0xec9   : > { %6474 = vmatprep.subr.bf16.mxu1 %v6441_v44  ;;  %v6301_v48 = vpop.xlane.xlu1 %6300  ;;  %v7478_v31 = vmul.f32 %v12561_v34, %v18928_v22  ;;  %v7477_v43 = vmul.f32 %v12561_v34, %v18929_v24  ;;  %v12563_v4 = vpop.eup %12562  ;;  %v18935_v44 = vld [vmem:[#allocation99_spill] sm:$0xff] }
 0xeca   : > { %12572 = vrcp.f32 %v6301_v48  ;;  %6475 = vmatpush1.bf16.xpose.msra.mxu1 %v6440_v30  ;;  %v6399_v61 = vmul.f32 %v12563_v4, %v18931_v51  ;;  %v6398_v6 = vmul.f32 %v12563_v4, %v18933_v50 }
 0xecb   : > { %v7526_v18 = vpack.c.bf16 %v7478_v31, %v7476_v49  ;;  %12574 = vrcp.f32 %v7375_v52  ;;  %v7525_v23 = vpack.c.bf16 %v7477_v43, %v7475_v41  ;;  %v18936_v49 = vld [vmem:[#allocation43_spill] sm:$0xff] }
 0xecc   : > { %v6310_v25 = vpop.xlane.xlu0 %6309  ;;  %v12565_v40 = vpop.eup %12564 }
 0xecd   : > { %7559 = vmatprep.subr.bf16.mxu0 %v7526_v18  ;;  %v7378_v2 = vpop.xlane.xlu1 %7377  ;;  %v6401_v12 = vmul.f32 %v12565_v40, %v18932_v60  ;;  %v6400_v57 = vmul.f32 %v12565_v40, %v18934_v29  ;;  %v12567_v26 = vpop.eup %12566 }
 0xece   : > { %12576 = vrcp.f32 %v7378_v2  ;;  %v7480_v30 = vmul.f32 %v12567_v26, %v18935_v44  ;;  %v7479_v22 = vmul.f32 %v12567_v26, %v18936_v49 }
 0xecf   : > { %v6443_v53 = vpack.c.bf16 %v6401_v12, %v6399_v61  ;;  %v6442_v10 = vpack.c.bf16 %v6400_v57, %v6398_v6  ;;  %12578 = vrcp.f32 %v6304_v56 }
 0xed0   : > { %v7381_v33 = vpop.xlane.xlu0 %7380  ;;  %v12569_v21 = vpop.eup %12568  ;;  %7560 = vmatpush1.bf16.xpose.msra.mxu0 %v7525_v23 }
 0xed1   : > { %6476 = vmatprep.subr.bf16.mxu1 %v6443_v53  ;;  %v6307_v52 = vpop.xlane.xlu1 %6306  ;;  %v7482_v34 = vmul.f32 %v12569_v21, %v16229_v55  ;;  %v7481_v48 = vmul.f32 %v12569_v21, %v16226_v46  ;;  %v12571_v28 = vpop.eup %12570  ;;  %v18938_v55 = vld [vmem:[#allocation113_spill] sm:$0xff] }
 0xed2   : > { %12580 = vrcp.f32 %v6307_v52  ;;  %6477 = vmatpush1.bf16.xpose.msra.mxu1 %v6442_v10  ;;  %v6403_v41 = vmul.f32 %v12571_v28, %v18937_v32  ;;  %v6402_v7 = vmul.f32 %v12571_v28, %v18938_v55  ;;  %v18939_v10 = vld [vmem:[#allocation64_spill] sm:$0xff] }
 0xed3   : > { %7591 = vxpose.xlu0.c.b16.start.end [1/1] (short) (narrow) %v7588_v19, 32  ;;  %v7528_v24 = vpack.c.bf16 %v7482_v34, %v7480_v30  ;;  %12582 = vrcp.f32 %v7381_v33  ;;  %v7527_v56 = vpack.c.bf16 %v7481_v48, %v7479_v22  ;;  %v7691_v48 = vld [vmem:[%s18029_s8 + $0x18] sm:$0xff]  ;;  %v7789_v32 = vld [vmem:[%s18030_s9 + $0x8] sm:$0xff] }
 0xed4   : > { %v6316_v31 = vpop.xlane.xlu0 %6315  ;;  %v12573_v43 = vpop.eup %12572  ;;  %v18942_v55 = vld [vmem:[#allocation104_spill] sm:$0xff] }
 0xed5   : > { %7561 = vmatprep.subr.bf16.mxu0 %v7528_v24  ;;  %v7384_v4 = vpop.xlane.xlu1 %7383  ;;  %v6405_v18 = vmul.f32 %v12573_v43, %v16205_v27  ;;  %v6404_v46 = vmul.f32 %v12573_v43, %v16177_v63  ;;  %v12575_v40 = vpop.eup %12574  ;;  %v10520_v63 = vld [vmem:[%s18028_s7 + $0x10] sm:$0xff]  ;;  %v18940_v24 = vld [vmem:[#allocation100_spill] sm:$0xff] }
 0xed6   : > { %12584 = vrcp.f32 %v7384_v4  ;;  %v7484_v12 = vmul.f32 %v12575_v40, %v16235_v58  ;;  %v7483_v29 = vmul.f32 %v12575_v40, %v16223_v11  ;;  %v6499_v33 = vpack.c.bf16 %v10520_v63, %v10520_v63  ;;  %v7688_v58 = vld [vmem:[%s18029_s8] sm:$0xff] }
 0xed7   : > { %v6445_v2 = vpack.c.bf16 %v6405_v18, %v6403_v41  ;;  %v6444_v51 = vpack.c.bf16 %v6404_v46, %v6402_v7  ;;  %12586 = vrcp.f32 %v6310_v25 }
 0xed8   : > { %v7387_v23 = vpop.xlane.xlu0 %7386  ;;  %v12577_v61 = vpop.eup %12576  ;;  %7562 = vmatpush1.bf16.xpose.msra.mxu0 %v7527_v56 }
 0xed9   : > { %6478 = vmatprep.subr.bf16.mxu1 %v6445_v2  ;;  %v6313_v60 = vpop.xlane.xlu1 %6312  ;;  %v7486_v50 = vmul.f32 %v12577_v61, %v16258_v37  ;;  %v7485_v27 = vmul.f32 %v12577_v61, %v16253_v14  ;;  %v12579_v6 = vpop.eup %12578  ;;  %v7821_v61 = vld [vmem:[%s18031_s10 + $0x8] sm:$0xff] }
 0xeda   : > { %12588 = vrcp.f32 %v6313_v60  ;;  %6479 = vmatpush1.bf16.xpose.msra.mxu1 %v6444_v51  ;;  %v6407_v37 = vmul.f32 %v12579_v6, %v16220_v39  ;;  %v6406_v21 = vmul.f32 %v12579_v6, %v18939_v10 }
 0xedb   : > { %v7530_v25 = vpack.c.bf16 %v7486_v50, %v7484_v12  ;;  %12590 = vrcp.f32 %v7387_v23  ;;  %v7529_v19 = vpack.c.bf16 %v7485_v27, %v7483_v29 }
 0xedc   : > { %v6322_v57 = vpop.xlane.xlu0 %6321  ;;  %v12581_v26 = vpop.eup %12580 }
 0xedd   : > { %7563 = vmatprep.subr.bf16.mxu0 %v7530_v25  ;;  %v7390_v14 = vpop.xlane.xlu1 %7389  ;;  %v6409_v53 = vmul.f32 %v12581_v26, %v16276_v38  ;;  %v6408_v11 = vmul.f32 %v12581_v26, %v16271_v20  ;;  %v12583_v52 = vpop.eup %12582  ;;  %v7791_v26 = vld [vmem:[%s18030_s9 + $0x18] sm:$0xff] }
 0xede   : > { %12592 = vrcp.f32 %v7390_v14  ;;  %v7488_v28 = vmul.f32 %v12583_v52, %v16267_v47 }
 0xedf   : > { %v6447_v44 = vpack.c.bf16 %v6409_v53, %v6407_v37  ;;  %v6446_v30 = vpack.c.bf16 %v6408_v11, %v6406_v21  ;;  %12594 = vrcp.f32 %v6316_v31  ;;  %v7487_v31 = vmul.f32 %v12583_v52, %v18940_v24  ;;  %v7823_v11 = vld [vmem:[%s18031_s10 + $0x18] sm:$0xff] }
 0xee0   : > { %7694 = vperm.xlu0 %11364, %v7688_v58   ;;  %v12585_v34 = vpop.eup %12584  ;;  %7564 = vmatpush1.bf16.xpose.msra.mxu0 %v7529_v19  ;;  %v7393_v39 = vpop.xlane.xlu0 %7392  ;;  %v18948_v24 = vld [vmem:[#allocation66_spill] sm:$0xff] }
 0xee1   : > { %6502 = vxpose.xlu1.c.b16.start.end [1/1] (short) (narrow) %v6499_v33, 32  ;;  %6480 = vmatprep.subr.bf16.mxu1 %v6447_v44  ;;  %v6319_v38 = vpop.xlane.xlu1 %6318  ;;  %v7490_v20 = vmul.f32 %v12585_v34, %v16292_v13  ;;  %v7489_v49 = vmul.f32 %v12585_v34, %v16287_v35  ;;  %v12587_v22 = vpop.eup %12586  ;;  %v7689_v35 = vld [vmem:[%s18029_s8 + $0x8] sm:$0xff]  ;;  %v18941_v13 = vld [vmem:[#allocation106_spill] sm:$0xff] }
 0xee2   : > { %12596 = vrcp.f32 %v6319_v38  ;;  %6481 = vmatpush1.bf16.xpose.msra.mxu1 %v6446_v30  ;;  %v6411_v41 = vmul.f32 %v12587_v22, %v18941_v13  ;;  %v6410_v7 = vmul.f32 %v12587_v22, %v18942_v55  ;;  %v18944_v33 = vld [vmem:[#allocation102_spill] sm:$0xff]  ;;  %v7861_v22 = vld [vmem:[%s18033_s12 + $0x8] sm:$0xff] }
 0xee3   : > { %v7532_v43 = vpack.c.bf16 %v7490_v20, %v7488_v28  ;;  %12598 = vrcp.f32 %v7393_v39  ;;  %v7531_v4 = vpack.c.bf16 %v7489_v49, %v7487_v31  ;;  %v18946_v30 = vld [vmem:[#allocation126_spill] sm:$0xff] }
 0xee4   : > { %7709 = vperm.xlu0 %11364, %v7691_v48   ;;  %v12589_v56 = vpop.eup %12588  ;;  %v7399_v60 = vpop.xlane.xlu0 %7398  ;;  %v18947_v39 = vld [vmem:[#allocation118_spill] sm:$0xff] }
 0xee5   : > { %7565 = vmatprep.subr.bf16.mxu0 %v7532_v43  ;;  %v7396_v47 = vpop.xlane.xlu1 %7395  ;;  %v6413_v18 = vmul.f32 %v12589_v56, %v16309_v3  ;;  %v6412_v46 = vmul.f32 %v12589_v56, %v16305_v42  ;;  %v12591_v40 = vpop.eup %12590  ;;  %v7690_v42 = vld [vmem:[%s18029_s8 + $0x10] sm:$0xff]  ;;  %v18949_v43 = vld [vmem:[#allocation51_spill] sm:$0xff] }
 0xee6   : > { %12600 = vrcp.f32 %v7396_v47  ;;  %v7492_v12 = vmul.f32 %v12591_v40, %v16301_v54  ;;  %v7491_v6 = vmul.f32 %v12591_v40, %v16295_v15  ;;  %v18951_v47 = vld [vmem:[#allocation109_spill] sm:$0xff]  ;;  %v18952_v40 = vld [vmem:[#allocation110_spill] sm:$0xff] }
 0xee7   : > { %v6449_v23 = vpack.c.bf16 %v6413_v18, %v6411_v41  ;;  %v6448_v2 = vpack.c.bf16 %v6412_v46, %v6410_v7  ;;  %12602 = vrcp.f32 %v6322_v57  ;;  %v7863_v7 = vld [vmem:[%s18033_s12 + $0x18] sm:$0xff]  ;;  %v7822_v46 = vld [vmem:[%s18031_s10 + $0x10] sm:$0xff] }
 0xee8   : > { %7799 = vperm.xlu0 %11364, %v7789_v32   ;;  %v12593_v51 = vpop.eup %12592  ;;  %7566 = vmatpush1.bf16.xpose.msra.mxu0 %v7531_v4  ;;  %v18950_v4 = vld [vmem:[#allocation65_spill] sm:$0xff] }
 0xee9   : > { %7699 = vperm.xlu1 %11365, %v7689_v35   ;;  %6482 = vmatprep.subr.bf16.mxu1 %v6449_v23  ;;  %v6325_v3 = vpop.xlane.xlu1 %6324  ;;  %v7494_v50 = vmul.f32 %v12593_v51, %v16323_v5  ;;  %v7493_v27 = vmul.f32 %v12593_v51, %v16319_v59  ;;  %v12595_v63 = vpop.eup %12594  ;;  %v7788_v59 = vld [vmem:[%s18030_s9] sm:$0xff]  ;;  %v18943_v5 = vld [vmem:[#allocation41_spill] sm:$0xff] }
 0xeea   : > { %12604 = vrcp.f32 %v6325_v3  ;;  %6483 = vmatpush1.bf16.xpose.msra.mxu1 %v6448_v2  ;;  %v6415_v19 = vmul.f32 %v12595_v63, %v18943_v5  ;;  %v6414_v58 = vmul.f32 %v12595_v63, %v18944_v33  ;;  %v18953_v2 = vld [vmem:[#allocation74_spill] sm:$0xff]  ;;  %v18955_v3 = vld [vmem:[#allocation116_spill] sm:$0xff]  ;;  %v7860_v63 = vld [vmem:[%s18033_s12] sm:$0xff] }
 0xeeb   : > { %v7534_v29 = vpack.c.bf16 %v7494_v50, %v7492_v12  ;;  %12606 = vrcp.f32 %v7399_v60  ;;  %v7533_v25 = vpack.c.bf16 %v7493_v27, %v7491_v6  ;;  %v7865_v27 = vld [vmem:[%s18033_s12 + $0x28] sm:$0xff]  ;;  %v7867_v6 = vld [vmem:[%s18033_s12 + $0x38] sm:$0xff]  ;;  %v8195_v5 = vld [vmem:[%s18035_s14 + $0x10] sm:$0xff] }
 0xeec   : > { %7831 = vperm.xlu0 %11364, %v7821_v61   ;;  %v12597_v57 = vpop.eup %12596  ;;  %v18954_v61 = vld [vmem:[#allocation73_spill] sm:$0xff] }
 0xeed   : > { %7704 = vperm.xlu1 %11365, %v7690_v42   ;;  %7567 = vmatprep.subr.bf16.mxu0 %v7534_v29  ;;  %v7402_v54 = vpop.xlane.xlu1 %7401  ;;  %v6417_v15 = vmul.f32 %v12597_v57, %v16335_v62  ;;  %v6416_v14 = vmul.f32 %v12597_v57, %v16331_v1  ;;  %v12599_v37 = vpop.eup %12598  ;;  %v7820_v62 = vld [vmem:[%s18031_s10] sm:$0xff]  ;;  %v18945_v1 = vld [vmem:[#allocation124_spill] sm:$0xff]  ;;  %v7862_v29 = vld [vmem:[%s18033_s12 + $0x10] sm:$0xff] }
 0xeee   : > { %12608 = vrcp.f32 %v7402_v54  ;;  %v7496_v52 = vmul.f32 %v12599_v37, %v16329_v45  ;;  %v7495_v38 = vmul.f32 %v12599_v37, %v18947_v39  ;;  %v7790_v45 = vld [vmem:[%s18030_s9 + $0x10] sm:$0xff]  ;;  %v8194_v57 = vld [vmem:[%s18035_s14 + $0x8] sm:$0xff] }
 0xeef   : > { %v6451_v53 = vpack.c.bf16 %v6417_v15, %v6415_v19  ;;  %v6450_v10 = vpack.c.bf16 %v6416_v14, %v6414_v58  ;;  %v7866_v54 = vld [vmem:[%s18033_s12 + $0x30] sm:$0xff]  ;;  %v7405_v19 = vpop.xlane.xlu0 %7404  ;;  %v18956_v37 = vld [vmem:[#allocation108_spill] sm:$0xff] }
 0xef0   : > { %7809 = vperm.xlu0 %11364, %v7791_v26   ;;  %v12601_v21 = vpop.eup %12600  ;;  %7568 = vmatpush1.bf16.xpose.msra.mxu0 %v7533_v25  ;;  %v7864_v25 = vld [vmem:[%s18033_s12 + $0x20] sm:$0xff]  ;;  %v8196_v26 = vld [vmem:[%s18035_s14 + $0x18] sm:$0xff]  ;;  %12610 = vrcp.f32 %v7405_v19 }
 0xef1   : > { %7794 = vperm.xlu1 %11365, %v7788_v59   ;;  %6484 = vmatprep.subr.bf16.mxu1 %v6451_v53  ;;  %v7498_v44 = vmul.f32 %v12601_v21, %v18945_v1  ;;  %v7497_v34 = vmul.f32 %v12601_v21, %v18946_v30  ;;  %v12603_v48 = vpop.eup %12602  ;;  %v8193_v59 = vld [vmem:[%s18035_s14] sm:$0xff]  ;;  %v18958_v1 = vld [vmem:[#allocation50_spill] sm:$0xff] }
 0xef2   : > { %6485 = vmatpush1.bf16.xpose.msra.mxu1 %v6450_v10  ;;  %v6419_v31 = vmul.f32 %v12603_v48, %v18948_v24  ;;  %v6418_v32 = vmul.f32 %v12603_v48, %v18950_v4  ;;  %v18957_v21 = vld [vmem:[#allocation111_spill] sm:$0xff]  ;;  %v18959_v30 = vld [vmem:[#allocation34_spill] sm:$0xff] }
 0xef3   : > { %v7536_v28 = vpack.c.bf16 %v7498_v44, %v7496_v52  ;;  %v7535_v49 = vpack.c.bf16 %v7497_v34, %v7495_v38 }
 0xef4   : > { %7841 = vperm.xlu0 %11364, %v7823_v11   ;;  %v12605_v20 = vpop.eup %12604 }
 0xef5   : > { %7826 = vperm.xlu1 %11365, %v7820_v62   ;;  %7569 = vmatprep.subr.bf16.mxu0 %v7536_v28  ;;  %v6421_v56 = vmul.f32 %v12605_v20, %v18949_v43  ;;  %v6420_v35 = vmul.f32 %v12605_v20, %v18951_v47  ;;  %v12607_v13 = vpop.eup %12606 }
 0xef6   : > { %v7500_v23 = vmul.f32 %v12607_v13, %v18952_v40  ;;  %v7499_v42 = vmul.f32 %v12607_v13, %v18955_v3  ;;  %v18962_v13 = vld [vmem:[#allocation33_spill] sm:$0xff] }
 0xef7   : > { %v6453_v41 = vpack.c.bf16 %v6421_v56, %v6419_v31  ;;  %v6452_v18 = vpack.c.bf16 %v6420_v35, %v6418_v32 }
 0xef8   : > { %7875 = vperm.xlu0 %11364, %v7861_v22   ;;  %v12609_v55 = vpop.eup %12608  ;;  %7570 = vmatpush1.bf16.xpose.msra.mxu0 %v7535_v49 }
 0xef9   : > { %7804 = vperm.xlu1 %11365, %v7790_v45   ;;  %6486 = vmatprep.subr.bf16.mxu1 %v6453_v41  ;;  %v7502_v51 = vmul.f32 %v12609_v55, %v18953_v2  ;;  %v7501_v60 = vmul.f32 %v12609_v55, %v18954_v61 }
 0xefa   : > { %6487 = vmatpush1.bf16.xpose.msra.mxu1 %v6452_v18  ;;  %v12611_v33 = vpop.eup %12610 }
 0xefb   : > { %v7538_v12 = vpack.c.bf16 %v7502_v51, %v7500_v23  ;;  %v7537_v50 = vpack.c.bf16 %v7501_v60, %v7499_v42  ;;  %v7504_v53 = vmul.f32 %v12611_v33, %v18956_v37  ;;  %v7503_v11 = vmul.f32 %v12611_v33, %v18957_v21  ;;  %v18966_v33 = vld [vmem:[#allocation72_spill] sm:$0xff] }
 0xefc   : > { %7885 = vperm.xlu0 %11364, %v7863_v7  }
 0xefd   : > { %7836 = vperm.xlu1 %11365, %v7822_v46   ;;  %7571 = vmatprep.subr.bf16.mxu0 %v7538_v12 }
 0xf00   : > { %7895 = vperm.xlu0 %11364, %v7865_v27   ;;  %7572 = vmatpush1.bf16.xpose.msra.mxu0 %v7537_v50 }
 0xf01   : > { %7870 = vperm.xlu1 %11365, %v7860_v63   ;;  %v16603_v63 = vld [vmem:[#allocation3] sm:$0xff] }
 0xf04   : > { %7905 = vperm.xlu0 %11364, %v7867_v6  }
 0xf05   : > { %7880 = vperm.xlu1 %11365, %v7862_v29   ;;  %v18963_v29 = vld [vmem:[#allocation68_spill] sm:$0xff] }
 0xf08   : > { %8204 = vperm.xlu0 %11364, %v8194_v57  }
 0xf09   : > { %7890 = vperm.xlu1 %11365, %v7864_v25  }
 0xf0c   : > { %8214 = vperm.xlu0 %11364, %v8196_v26   ;;  %v18964_v26 = vld [vmem:[#allocation70_spill] sm:$0xff] }
 0xf0d   : > { %7900 = vperm.xlu1 %11365, %v7866_v54  }
 0xf11   : > { %8199 = vperm.xlu1 %11365, %v8193_v59  }
 0xf15   : > { %8209 = vperm.xlu1 %11365, %v8195_v5   ;;  %v18965_v5 = vld [vmem:[#allocation71_spill] sm:$0xff] }
 0xf26   : > { %v7408_v15 = vpop.xlane.xlu1 %7407 }
 0xf27   : > { %12612 = vrcp.f32 %v7408_v15 }
 0xf2c   : > { %v7411_v58 = vpop.xlane.xlu0 %7410 }
 0xf2d   : > { %12614 = vrcp.f32 %v7411_v58 }
 0xf31   : > { %v12613_v14 = vpop.eup %12612 }
 0xf32   : > { %v7506_v10 = vmul.f32 %v12613_v14, %v16381_v16  ;;  %v7505_v62 = vmul.f32 %v12613_v14, %v16379_v8  ;;  %v18960_v16 = vmov 0   ;;  %v18961_v8 = vld [vmem:[#allocation44_spill] sm:$0xff]  ;;  %v18967_v14 = vld [vmem:[#allocation19_spill] sm:$0xff] }
 0xf34   : > { %v3134_v52 = vpop.permute.xlu0 %3133  ;;  %v7540_v48 = vpack.c.bf16 %v7506_v10, %v7504_v53  ;;  %v7539_v39 = vpack.c.bf16 %v7505_v62, %v7503_v11  ;;  %v18968_v10 = vld [vmem:[#allocation21_spill] sm:$0xff]  ;;  %v18969_v11 = vld [vmem:[#allocation24_spill] sm:$0xff] }
 0xf35   : > { %v3305_v44 = vadd.f32 %v18958_v1, %v3134_v52  ;;  %v3307_v34 = vadd.f32 %v18959_v30, %v3134_v52  ;;  %v18970_v1 = vld [vmem:[#allocation27_spill] sm:$0xff] }
 0xf36   : > { %7573 = vmatprep.subr.bf16.mxu0 %v7540_v48  ;;  %v18971_v48 = vld [vmem:[#allocation76_spill] sm:$0xff] }
 0xf37   : > { %v6454_v38 = vpack.c.bf16 %v3305_v44, %v3305_v44  ;;  %v6455_v28 = vpack.c.bf16 %v3307_v34, %v3307_v34  ;;  %7574 = vmatpush1.bf16.xpose.msra.mxu0 %v7539_v39  ;;  %v12615_v24 = vpop.eup %12614 }
 0xf38   : > { %v7508_v43 = vmul.f32 %v12615_v24, %v16393_v36  ;;  %v7507_v4 = vmul.f32 %v12615_v24, %v16389_v17  ;;  %v18974_v24 = vld [vmem:[#allocation79_spill] sm:$0xff] }
 0xf39   : > { %6488 = vmatprep.mubr.bf16.mxu1 %v6455_v28  ;;  %v7414_v20 = vpop.xlane.xlu1 %7413  ;;  %v7599_v50 = vpop.trf.xlu0 }
 0xf3a   : > { %6489 = vmatmul.mubr.bf16.vlgmr.msra.gmra.mrb[208].mxu1 %v6454_v38  ;;  %12616 = vrcp.f32 %v7414_v20  ;;  %v18972_v20 = vld [vmem:[#allocation78_spill] sm:$0xff] }
 0xf3b   : > { %6562 = vmatprep.mubr.bf16.mxu1 %v18960_v16 }
 0xf3d   : > { %v3139_v49 = vpop.permute.xlu1 %3138  ;;  %v7600_v27 = vpop.trf.xlu0 }
 0xf3e   : > { %v3313_v22 = vadd.f32 %v18961_v8, %v3139_v49  ;;  %v3311_v41 = vadd.f32 %v18962_v13, %v3139_v49 }
 0xf40   : > { %v7544_v45 = vpack.c.bf16 %v3313_v22, %v3313_v22  ;;  %v7543_v18 = vpack.c.bf16 %v3311_v41, %v3311_v41  ;;  %v18973_v22 = vld [vmem:[#allocation25_spill] sm:$0xff] }
 0xf42   : > { %7577 = vmatprep.mubr.bf16.mxu0 %v7544_v45 }
 0xf44   : > { %v12617_v31 = vpop.eup %12616 }
 0xf45   : > { %v7510_v56 = vmul.f32 %v12617_v31, %v16407_v0  ;;  %v7509_v32 = vmul.f32 %v12617_v31, %v16405_v9 }
 0xf47   : > { %v7542_v47 = vpack.c.bf16 %v7510_v56, %v7508_v43  ;;  %v7541_v35 = vpack.c.bf16 %v7509_v32, %v7507_v4  ;;  %v6510_v17 = vpop.trf.xlu1  ;;  %v18975_v32 = vld [vmem:[#allocation28_spill] sm:$0xff] }
 0xf49   : > { %7575 = vmatprep.subr.bf16.mxu0 %v7542_v47 }
 0xf4a   : > { %7576 = vmatpush1.bf16.xpose.msra.mxu0 %v7541_v35  ;;  %v18976_v35 = vld [vmem:[#allocation80_spill] sm:$0xff] }
 0xf4b   : > { %v6511_v9 = vpop.trf.xlu1 }
 0xf51   : > { %7578 = vmatmul.mubr.bf16.vlgmr.msra.gmra.mrb[120].mxu0 %v7543_v18 }
 0xf5f   : > { %v7695_v52 = vpop.permute.xlu0 %7694 }
 0xf68   : > { %v7700_v53 = vpop.permute.xlu1 %7699 }
 0xf6c   : > { %v7705_v56 = vpop.permute.xlu1 %7704 }
0x100d   : > { %v6490_v55 = vpop.f32.mrb[208].mxu1 }
0x100e   : > { %v6500_v7 = vpack.c.bf16 %v6490_v55, %v6490_v55  ;;  %v6492_v46 = vpop.f32.mrb[209].mxu1  ;;  %v18977_v55 = vld [vmem:[#allocation31_spill] sm:$0xff] }
0x100f   : > { %v6501_v40 = vpack.c.bf16 %v6492_v46, %v6492_v46  ;;  %v6494_v23 = vpop.f32.mrb[210].mxu1  ;;  %v7710_v46 = vpop.permute.xlu0 %7709 }
0x1010   : > { %v6525_v36 = vsel %vm5361_vm1, %v6500_v7, 0  ;;  %v6495_v0 = vpop.f32.mrb[211].mxu1 }
0x1011   : > { %10521 = vmatprep.subr.msk.bf16.mxu1 %vm5361_vm1, %v6501_v40 }
0x1012   : > { %6531 = vmatpush1.bf16.msra.mxu1 %v6525_v36  ;;  %v18978_v36 = vld [vmem:[#allocation32_spill] sm:$0xff] }
0x1015   : > { %10522 = vmatmul.mubr.msk.bf16.vlgmr.msra.gmra.mrb[136].mxu1 %vm3426_vm15, %v6510_v17 }
0x1016   : > { %6572 = vmatprep.mubr.bf16.mxu1 %v18960_v16 }
0x101d   : > { %10523 = vmatmul.mubr.msk.bf16.gmra.mrb[140].mxu1 %vm3426_vm15, %v6511_v9 }
0x101e   : > { %7651 = vmatprep.mubr.bf16.mxu1 %v18960_v16 }
0x1024   : > { %v7579_v2 = vpop.f32.mrb[120].mxu0 }
0x1025   : > { %v7589_v51 = vpack.c.bf16 %v7579_v2, %v7579_v2  ;;  %v7581_v61 = vpop.f32.mrb[121].mxu0 }
0x1026   : > { %v7590_v60 = vpack.c.bf16 %v7581_v61, %v7581_v61  ;;  %v7583_v3 = vpop.f32.mrb[122].mxu0 }
0x1027   : > { %v7614_v42 = vsel %vm5361_vm1, %v7589_v51, 0  ;;  %v7584_v12 = vpop.f32.mrb[123].mxu0 }
0x1028   : > { %10557 = vmatprep.subr.msk.bf16.mxu1 %vm5361_vm1, %v7590_v60 }
0x1029   : > { %7620 = vmatpush1.bf16.msra.mxu1 %v7614_v42 }
0x102c   : > { %10558 = vmatmul.mubr.msk.bf16.vlgmr.msra.gmra.mrb[136].mxu1 %vm3426_vm15, %v7599_v50 }
0x102d   : > { %7661 = vmatprep.mubr.bf16.mxu1 %v18960_v16 }
0x1034   : > { %10559 = vmatmul.mubr.msk.bf16.gmra.mrb[140].mxu1 %vm3426_vm15, %v7600_v27 }
0x1035   : > { %7996 = vmatprep.mubr.f32.mxu1 %v16603_v63 }
0x10ff   : > { %v7653_v6 = vpop.f32.mrb[136].mxu1 }
0x1100   : > { %v10990_v57 = vadd.f32 %v7653_v6, %v18963_v29  ;;  %v7655_v25 = vpop.f32.mrb[137].mxu1 }
0x1101   : > { %v10991_v54 = vadd.f32 %v7655_v25, %v18964_v26  ;;  %v7657_v59 = vpop.f32.mrb[138].mxu1 }
0x1102   : > { %v10992_v19 = vadd.f32 %v7657_v59, %v18965_v5  ;;  %v7659_v15 = vpop.f32.mrb[139].mxu1  ;;  %v7680_v62 = vadd.f32 %v10990_v57, %v18969_v11 }
0x1103   : > { %v10993_v58 = vadd.f32 %v7659_v15, %v18966_v33  ;;  %v7681_v44 = vadd.f32 %v10991_v54, %v18970_v1 }
0x1104   : > { %v7682_v37 = vadd.f32 %v10992_v19, %v18967_v14  ;;  %v16620_v8 = vadd.f32 %v7695_v52, %v7680_v62 }
0x1105   : > { %v7683_v21 = vadd.f32 %v10993_v58, %v18968_v10  ;;  %v16624_v4 = vadd.f32 %v7695_v52, %v7681_v44 }
0x1106   : > { %v16614_v34 = vadd.f32 %v7700_v53, %v7682_v37 }
0x1107   : > { %v7663_v30 = vpop.f32.mrb[140].mxu1  ;;  %v16617_v28 = vadd.f32 %v7700_v53, %v7683_v21 }
0x1108   : > { %v10994_v39 = vadd.f32 %v7663_v30, %v18971_v48  ;;  %v7665_v38 = vpop.f32.mrb[141].mxu1  ;;  %v7720_v41 = vadd.f32 %v16614_v34, %v16620_v8 }
0x1109   : > { %v10995_v16 = vadd.f32 %v7665_v38, %v18972_v20  ;;  %v7667_v49 = vpop.f32.mrb[142].mxu1  ;;  %v7729_v40 = vadd.f32 %v16617_v28, %v16624_v4 }
0x110a   : > { %v7684_v45 = vadd.f32 %v10994_v39, %v18973_v22  ;;  %v10996_v31 = vadd.f32 %v7667_v49, %v18974_v24  ;;  %v7669_v43 = vpop.f32.mrb[143].mxu1 }
0x110b   : > { %v7685_v47 = vadd.f32 %v10995_v16, %v18975_v32  ;;  %v10997_v13 = vadd.f32 %v7669_v43, %v18976_v35 }
0x110c   : > { %v16630_v18 = vadd.f32 %v7705_v56, %v7684_v45  ;;  %v7686_v7 = vadd.f32 %v10996_v31, %v18977_v55 }
0x110d   : > { %v16635_v23 = vadd.f32 %v7705_v56, %v7685_v47  ;;  %v7687_v0 = vadd.f32 %v10997_v13, %v18978_v36  ;;  %v7800_v36 = vpop.permute.xlu0 %7799 }
0x110e   : > { %v7721_v17 = vadd.f32 %v7720_v41, %v16630_v18  ;;  %v16639_v9 = vadd.f32 %v7710_v46, %v7686_v7 }
0x110f   : > { %v7730_v2 = vadd.f32 %v7729_v40, %v16635_v23  ;;  %v16642_v51 = vadd.f32 %v7710_v46, %v7687_v0  ;;  %v7795_v0 = vpop.permute.xlu1 %7794 }
0x1110   : > { %v7722_v61 = vadd.f32 %v7721_v17, %v16639_v9 }
0x1111   : > { %v7731_v60 = vadd.f32 %v7730_v2, %v16642_v51 }
0x1112   : > { %v7723_v3 = vrot.slane %v7722_v61, 4 }
0x1113   : > { %v7732_v42 = vrot.slane %v7731_v60, 4 }
0x1114   : > { %v7724_v12 = vadd.f32 %v7723_v3, %v7722_v61  ;;  %v7827_v3 = vpop.permute.xlu1 %7826 }
0x1115   : > { %v7733_v50 = vadd.f32 %v7732_v42, %v7731_v60  ;;  %v7832_v60 = vpop.permute.xlu0 %7831 }
0x1116   : > { %v7725_v27 = vrot.slane %v7724_v12, 2 }
0x1117   : > { %v7734_v6 = vrot.slane %v7733_v50, 2 }
0x1118   : > { %v7726_v29 = vadd.f32 %v7725_v27, %v7724_v12  ;;  %v7805_v12 = vpop.permute.xlu1 %7804 }
0x1119   : > { %v7735_v57 = vadd.f32 %v7734_v6, %v7733_v50  ;;  %v7810_v42 = vpop.permute.xlu0 %7809 }
0x111a   : > { %v7727_v25 = vrot.slane %v7726_v29, 1 }
0x111b   : > { %v7736_v26 = vrot.slane %v7735_v57, 1 }
0x111c   : > { %v7728_v54 = vadd.f32 %v7727_v25, %v7726_v29 }
0x111d   : > { %v7737_v59 = vadd.f32 %v7736_v26, %v7735_v57 }
0x111e   : > { %v7738_v5 = vmul.f32 0.03125, %v7728_v54 }
0x111f   : > { %v7739_v19 = vmul.f32 0.03125, %v7737_v59 }
0x1120   : > { %v7740_v15 = vsub.f32 %v16620_v8, %v7738_v5  ;;  %v7742_v33 = vsub.f32 %v16614_v34, %v7738_v5  ;;  %v7744_v58 = vsub.f32 %v16630_v18, %v7738_v5  ;;  %v7746_v10 = vsub.f32 %v16639_v9, %v7738_v5 }
0x1121   : > { %v7741_v14 = vsub.f32 %v16624_v4, %v7739_v19  ;;  %v7743_v37 = vsub.f32 %v16617_v28, %v7739_v19  ;;  %v7745_v53 = vsub.f32 %v16635_v23, %v7739_v19  ;;  %v7747_v62 = vsub.f32 %v16642_v51, %v7739_v19 }
0x1122   : > { %v7748_v21 = vmul.f32 %v7740_v15, %v7740_v15  ;;  %v7750_v11 = vmul.f32 %v7742_v33, %v7742_v33  ;;  %v7752_v44 = vmul.f32 %v7744_v58, %v7744_v58  ;;  %v7754_v38 = vmul.f32 %v7746_v10, %v7746_v10 }
0x1123   : > { %v7749_v52 = vmul.f32 %v7741_v14, %v7741_v14  ;;  %v7751_v1 = vmul.f32 %v7743_v37, %v7743_v37  ;;  %v7753_v48 = vmul.f32 %v7745_v53, %v7745_v53  ;;  %v7755_v16 = vmul.f32 %v7747_v62, %v7747_v62 }
0x1124   : > { %v7756_v30 = vadd.f32 %v7750_v11, %v7748_v21 }
0x1125   : > { %v7765_v39 = vadd.f32 %v7751_v1, %v7749_v52 }
0x1126   : > { %v7757_v20 = vadd.f32 %v7756_v30, %v7752_v44  ;;  %v7842_v30 = vpop.permute.xlu0 %7841 }
0x1127   : > { %v7766_v49 = vadd.f32 %v7765_v39, %v7753_v48  ;;  %v7837_v48 = vpop.permute.xlu1 %7836 }
0x1128   : > { %v7758_v22 = vadd.f32 %v7757_v20, %v7754_v38 }
0x1129   : > { %v7767_v45 = vadd.f32 %v7766_v49, %v7755_v16 }
0x112a   : > { %v7759_v24 = vrot.slane %v7758_v22, 4 }
0x112b   : > { %v7768_v31 = vrot.slane %v7767_v45, 4 }
0x112c   : > { %v7760_v43 = vadd.f32 %v7759_v24, %v7758_v22  ;;  %v7853_v24 = vld [vmem:[%s18032_s11 + $0x8] sm:$0xff] }
0x112d   : > { %v7769_v56 = vadd.f32 %v7768_v31, %v7767_v45  ;;  %v7852_v45 = vld [vmem:[%s18032_s11] sm:$0xff]  ;;  %v7854_v31 = vld [vmem:[%s18032_s11 + $0x10] sm:$0xff] }
0x112e   : > { %v7761_v32 = vrot.slane %v7760_v43, 2 }
0x112f   : > { %v7770_v47 = vrot.slane %v7769_v56, 2 }
0x1130   : > { %v7762_v35 = vadd.f32 %v7761_v32, %v7760_v43  ;;  %v7855_v43 = vld [vmem:[%s18032_s11 + $0x18] sm:$0xff]  ;;  %v7857_v32 = vld [vmem:[%s18032_s11 + $0x28] sm:$0xff] }
0x1131   : > { %v7771_v13 = vadd.f32 %v7770_v47, %v7769_v56  ;;  %v7856_v56 = vld [vmem:[%s18032_s11 + $0x20] sm:$0xff]  ;;  %v7858_v47 = vld [vmem:[%s18032_s11 + $0x30] sm:$0xff] }
0x1132   : > { %v7763_v41 = vrot.slane %v7762_v35, 1 }
0x1133   : > { %v7772_v55 = vrot.slane %v7771_v13, 1 }
0x1134   : > { %v7764_v7 = vadd.f32 %v7763_v41, %v7762_v35  ;;  %v7859_v35 = vld [vmem:[%s18032_s11 + $0x38] sm:$0xff] }
0x1135   : > { %v7773_v46 = vadd.f32 %v7772_v55, %v7771_v13  ;;  %v7871_v13 = vpop.permute.xlu1 %7870 }
0x1136   : > { %v7774_v40 = vmul.f32 0.03125, %v7764_v7 }
0x1137   : > { %v7775_v17 = vmul.f32 0.03125, %v7773_v46 }
0x1138   : > { %v7776_v2 = vadd.f32 1e-05, %v7774_v40 }
0x1139   : > { %v7777_v61 = vadd.f32 1e-05, %v7775_v17 }
0x113a   : > { %12618 = vrsqrt.f32 %v7776_v2 }
0x113b   : > { %12620 = vrsqrt.f32 %v7777_v61 }
0x1144   : > { %v12619_v50 = vpop.eup %12618 }
0x1145   : > { %v12621_v27 = vpop.eup %12620  ;;  %v7786_v6 = vmul.f32 %v12619_v50, %v7746_v10  ;;  %v7780_v29 = vmul.f32 %v12619_v50, %v7740_v15  ;;  %v7782_v57 = vmul.f32 %v12619_v50, %v7742_v33  ;;  %v7784_v25 = vmul.f32 %v12619_v50, %v7744_v58 }
0x1146   : > { %v7781_v26 = vmul.f32 %v12621_v27, %v7741_v14  ;;  %v7783_v54 = vmul.f32 %v12621_v27, %v7743_v37  ;;  %v7785_v59 = vmul.f32 %v12621_v27, %v7745_v53  ;;  %v7787_v5 = vmul.f32 %v12621_v27, %v7747_v62  ;;  %v7881_v27 = vpop.permute.xlu1 %7880 }
0x1147   : > { %v7812_v19 = vmul.f32 %v7795_v0, %v7780_v29  ;;  %v7814_v21 = vmul.f32 %v7800_v36, %v7782_v57  ;;  %v7816_v20 = vmul.f32 %v7805_v12, %v7784_v25  ;;  %v7818_v16 = vmul.f32 %v7810_v42, %v7786_v6 }
0x1148   : > { %v7813_v11 = vmul.f32 %v7795_v0, %v7781_v26  ;;  %v7815_v52 = vmul.f32 %v7800_v36, %v7783_v54  ;;  %v7817_v1 = vmul.f32 %v7805_v12, %v7785_v59  ;;  %v7819_v44 = vmul.f32 %v7810_v42, %v7787_v5  ;;  %v7876_v36 = vpop.permute.xlu0 %7875 }
0x1149   : > { %v7844_v39 = vadd.f32 %v7827_v3, %v7812_v19  ;;  %v7846_v38 = vadd.f32 %v7832_v60, %v7814_v21  ;;  %v7848_v53 = vadd.f32 %v7837_v48, %v7816_v20  ;;  %v7850_v62 = vadd.f32 %v7842_v30, %v7818_v16 }
0x114a   : > { %v7845_v10 = vadd.f32 %v7827_v3, %v7813_v11  ;;  %v7847_v15 = vadd.f32 %v7832_v60, %v7815_v52  ;;  %v7849_v33 = vadd.f32 %v7837_v48, %v7817_v1  ;;  %v7851_v58 = vadd.f32 %v7842_v30, %v7819_v44 }
0x114b   : > { %v10770_v37 = vpack.c.bf16 %v7846_v38, %v7844_v39  ;;  %v10774_v22 = vpack.c.bf16 %v7850_v62, %v7848_v53  ;;  %v7891_v62 = vpop.permute.xlu1 %7890 }
0x114c   : > { %v10768_v14 = vpack.c.bf16 %v7847_v15, %v7845_v10  ;;  %v10772_v49 = vpack.c.bf16 %v7851_v58, %v7849_v33  ;;  %v7886_v1 = vpop.permute.xlu0 %7885 }
0x114e   : > { %10769 = vmatprep.subr.bf16.mxu1 %v10768_v14 }
0x114f   : > { %10771 = vmatpush1.bf16.msra.mxu1 %v10770_v37 }
0x1150   : > { %10773 = vmatprep.subr.bf16.mxu1 %v10772_v49 }
0x1153   : > { %10775 = vmatpush1.bf16.msra.mxu1 %v10774_v22 }
0x1156   : > { %10560 = vmatmul.mubr.msk.f32.vlgmr.msra.gmra.mrb[212].mxu1 %vm3141_vm11, %v7852_v45 }
0x1157   : > { %8002 = vmatprep.mubr.f32.mxu1 %v16603_v63 }
0x115a   : > { %10561 = vmatmul.mubr.msk.f32.gmra.mrb[214].mxu1 %vm3141_vm11, %v7853_v24 }
0x115b   : > { %8008 = vmatprep.mubr.f32.mxu1 %v16603_v63 }
0x115e   : > { %10562 = vmatmul.mubr.msk.f32.gmra.mrb[216].mxu1 %vm3141_vm11, %v7854_v31 }
0x115f   : > { %8014 = vmatprep.mubr.f32.mxu1 %v16603_v63 }
0x1162   : > { %10563 = vmatmul.mubr.msk.f32.gmra.mrb[218].mxu1 %vm3141_vm11, %v7855_v43 }
0x1163   : > { %8020 = vmatprep.mubr.f32.mxu1 %v16603_v63 }
0x1166   : > { %10564 = vmatmul.mubr.msk.f32.gmra.mrb[220].mxu1 %vm3141_vm11, %v7856_v56 }
0x1167   : > { %8026 = vmatprep.mubr.f32.mxu1 %v16603_v63 }
0x116a   : > { %10565 = vmatmul.mubr.msk.f32.gmra.mrb[222].mxu1 %vm3141_vm11, %v7857_v32 }
0x116b   : > { %8032 = vmatprep.mubr.f32.mxu1 %v16603_v63 }
0x116e   : > { %10566 = vmatmul.mubr.msk.f32.gmra.mrb[224].mxu1 %vm3141_vm11, %v7858_v47 }
0x116f   : > { %8038 = vmatprep.mubr.f32.mxu1 %v16603_v63 }
0x1172   : > { %10567 = vmatmul.mubr.msk.f32.gmra.mrb[226].mxu1 %vm3141_vm11, %v7859_v35 }
0x1173   : > { %8294 = vmatprep.mubr.f32.mxu1 %v16603_v63 }
0x1229   : > { %v7998_v41 = vpop.f32.mrb[212].mxu1 }
0x122a   : > { %v16694_v55 = vadd.f32 %v7998_v41, %v7871_v13  ;;  %v8000_v7 = vpop.f32.mrb[213].mxu1 }
0x122b   : > { %v16696_v46 = vadd.f32 %v8000_v7, %v7871_v13 }
0x122c   : > { %v8045_v40 = vmul.f32 %v16694_v55, %v16694_v55 }
0x122d   : > { %v8046_v0 = vmul.f32 %v16696_v46, %v16696_v46  ;;  %v8004_v17 = vpop.f32.mrb[214].mxu1 }
0x122e   : > { %v8061_v2 = vmul.f32 %v8045_v40, %v16694_v55  ;;  %v16703_v61 = vadd.f32 %v8004_v17, %v7876_v36  ;;  %v8006_v60 = vpop.f32.mrb[215].mxu1 }
0x122f   : > { %v8062_v3 = vmul.f32 %v8046_v0, %v16696_v46  ;;  %v16706_v42 = vadd.f32 %v8006_v60, %v7876_v36  ;;  %v7896_v0 = vpop.permute.xlu0 %7895 }
0x1230   : > { %v8077_v12 = vmul.f32 0.044715, %v8061_v2  ;;  %v8047_v50 = vmul.f32 %v16703_v61, %v16703_v61 }
0x1231   : > { %v8078_v6 = vmul.f32 0.044715, %v8062_v3  ;;  %v8048_v29 = vmul.f32 %v16706_v42, %v16706_v42  ;;  %v8010_v57 = vpop.f32.mrb[216].mxu1 }
0x1232   : > { %v8093_v25 = vadd.f32 %v8077_v12, %v16694_v55  ;;  %v8063_v26 = vmul.f32 %v8047_v50, %v16703_v61  ;;  %v16714_v54 = vadd.f32 %v8010_v57, %v7881_v27  ;;  %v8012_v59 = vpop.f32.mrb[217].mxu1 }
0x1233   : > { %v8064_v5 = vmul.f32 %v8048_v29, %v16706_v42  ;;  %v16717_v19 = vadd.f32 %v8012_v59, %v7881_v27  ;;  %v8094_v44 = vadd.f32 %v8078_v6, %v16696_v46 }
0x1234   : > { %v8109_v21 = vmul.f32 0.7978846, %v8093_v25  ;;  %v8079_v11 = vmul.f32 0.044715, %v8063_v26  ;;  %v8049_v52 = vmul.f32 %v16714_v54, %v16714_v54 }
0x1235   : > { %v8080_v30 = vmul.f32 0.044715, %v8064_v5  ;;  %v8050_v48 = vmul.f32 %v16717_v19, %v16717_v19  ;;  %v8016_v39 = vpop.f32.mrb[218].mxu1  ;;  %v8110_v49 = vmul.f32 0.7978846, %v8094_v44 }
0x1236   : > { %12622 = vtanh.f32 %v8109_v21  ;;  %v8095_v38 = vadd.f32 %v8079_v11, %v16703_v61  ;;  %v8065_v20 = vmul.f32 %v8049_v52, %v16714_v54  ;;  %v16726_v16 = vadd.f32 %v8016_v39, %v7886_v1  ;;  %v8018_v10 = vpop.f32.mrb[219].mxu1  ;;  %v7901_v11 = vpop.permute.xlu1 %7900 }
0x1237   : > { %v8096_v15 = vadd.f32 %v8080_v30, %v16706_v42  ;;  %v8066_v33 = vmul.f32 %v8050_v48, %v16717_v19  ;;  %v16730_v58 = vadd.f32 %v8018_v10, %v7886_v1 }
0x1238   : > { %v8111_v14 = vmul.f32 0.7978846, %v8095_v38  ;;  %v8081_v37 = vmul.f32 0.044715, %v8065_v20  ;;  %v8051_v53 = vmul.f32 %v16726_v16, %v16726_v16 }
0x1239   : > { %v8082_v22 = vmul.f32 0.044715, %v8066_v33  ;;  %v8052_v45 = vmul.f32 %v16730_v58, %v16730_v58  ;;  %v8022_v24 = vpop.f32.mrb[220].mxu1  ;;  %v8112_v47 = vmul.f32 0.7978846, %v8096_v15 }
0x123a   : > { %12624 = vtanh.f32 %v8111_v14  ;;  %v8097_v31 = vadd.f32 %v8081_v37, %v16714_v54  ;;  %v8067_v43 = vmul.f32 %v8051_v53, %v16726_v16  ;;  %v16738_v56 = vadd.f32 %v8022_v24, %v7891_v62  ;;  %v8024_v32 = vpop.f32.mrb[221].mxu1 }
0x123b   : > { %v8098_v35 = vadd.f32 %v8082_v22, %v16717_v19  ;;  %v8068_v13 = vmul.f32 %v8052_v45, %v16730_v58  ;;  %v16742_v41 = vadd.f32 %v8024_v32, %v7891_v62  ;;  %12626 = vtanh.f32 %v8110_v49 }
0x123c   : > { %v8113_v7 = vmul.f32 0.7978846, %v8097_v31  ;;  %v8083_v40 = vmul.f32 0.044715, %v8067_v43  ;;  %v8053_v36 = vmul.f32 %v16738_v56, %v16738_v56 }
0x123d   : > { %v8114_v17 = vmul.f32 0.7978846, %v8098_v35  ;;  %v8084_v2 = vmul.f32 0.044715, %v8068_v13  ;;  %v8054_v60 = vmul.f32 %v16742_v41, %v16742_v41  ;;  %v8028_v3 = vpop.f32.mrb[222].mxu1 }
0x123e   : > { %12628 = vtanh.f32 %v8113_v7  ;;  %v8099_v12 = vadd.f32 %v8083_v40, %v16726_v16  ;;  %v8069_v50 = vmul.f32 %v8053_v36, %v16738_v56  ;;  %v16750_v27 = vadd.f32 %v8028_v3, %v7896_v0  ;;  %v8030_v6 = vpop.f32.mrb[223].mxu1 }
0x123f   : > { %12630 = vtanh.f32 %v8112_v47  ;;  %v8100_v29 = vadd.f32 %v8084_v2, %v16730_v58  ;;  %v8070_v57 = vmul.f32 %v8054_v60, %v16742_v41  ;;  %v16754_v25 = vadd.f32 %v8030_v6, %v7896_v0  ;;  %v7906_v47 = vpop.permute.xlu0 %7905 }
0x1240   : > { %v12623_v26 = vpop.eup %12622  ;;  %12632 = vtanh.f32 %v8114_v17  ;;  %v8115_v59 = vmul.f32 0.7978846, %v8099_v12  ;;  %v8085_v5 = vmul.f32 0.044715, %v8069_v50  ;;  %v8055_v21 = vmul.f32 %v16750_v27, %v16750_v27 }
0x1241   : > { %v8141_v52 = vadd.f32 1.0, %v12623_v26  ;;  %v8116_v1 = vmul.f32 0.7978846, %v8100_v29  ;;  %v8086_v44 = vmul.f32 0.044715, %v8070_v57  ;;  %v8056_v30 = vmul.f32 %v16754_v25, %v16754_v25  ;;  %v8034_v48 = vpop.f32.mrb[224].mxu1 }
0x1242   : > { %12634 = vtanh.f32 %v8115_v59  ;;  %v8101_v39 = vadd.f32 %v8085_v5, %v16738_v56  ;;  %v8071_v38 = vmul.f32 %v8055_v21, %v16750_v27  ;;  %v16762_v20 = vadd.f32 %v8034_v48, %v7901_v11  ;;  %v8036_v10 = vpop.f32.mrb[225].mxu1 }
0x1243   : > { %v8157_v15 = vmul.f32 0.5, %v8141_v52  ;;  %12636 = vtanh.f32 %v8116_v1  ;;  %v8102_v33 = vadd.f32 %v8086_v44, %v16742_v41  ;;  %v8072_v14 = vmul.f32 %v8056_v30, %v16754_v25 }
0x1244   : > { %v12625_v37 = vpop.eup %12624  ;;  %v8117_v53 = vmul.f32 0.7978846, %v8101_v39  ;;  %v8087_v62 = vmul.f32 0.044715, %v8071_v38  ;;  %v8057_v49 = vmul.f32 %v16762_v20, %v16762_v20  ;;  %v16768_v22 = vadd.f32 %v8036_v10, %v7901_v11 }
0x1245   : > { %v16771_v45 = vmul.f32 %v8157_v15, %v16694_v55  ;;  %v8143_v24 = vadd.f32 1.0, %v12625_v37  ;;  %v8118_v31 = vmul.f32 0.7978846, %v8102_v33  ;;  %v8088_v43 = vmul.f32 0.044715, %v8072_v14  ;;  %v8040_v32 = vpop.f32.mrb[226].mxu1  ;;  %v12627_v36 = vpop.eup %12626 }
0x1246   : > { %12638 = vtanh.f32 %v8117_v53  ;;  %v8103_v35 = vadd.f32 %v8087_v62, %v16750_v27  ;;  %v8073_v13 = vmul.f32 %v8057_v49, %v16762_v20  ;;  %v8058_v7 = vmul.f32 %v16768_v22, %v16768_v22  ;;  %v8042_v40 = vpop.f32.mrb[227].mxu1 }
0x1247   : > { %v8159_v0 = vmul.f32 0.5, %v8143_v24  ;;  %12640 = vtanh.f32 %v8118_v31  ;;  %v8104_v55 = vadd.f32 %v8088_v43, %v16754_v25  ;;  %v16778_v17 = vadd.f32 %v8040_v32, %v7906_v47 }
0x1248   : > { %v12629_v2 = vpop.eup %12628  ;;  %v8119_v60 = vmul.f32 0.7978846, %v8103_v35  ;;  %v8089_v3 = vmul.f32 0.044715, %v8073_v13  ;;  %v8074_v12 = vmul.f32 %v8058_v7, %v16768_v22  ;;  %v16781_v50 = vadd.f32 %v8042_v40, %v7906_v47 }
0x1249   : > { %v12631_v6 = vpop.eup %12630  ;;  %v8175_v29 = vmul.f32 %v8159_v0, %v16703_v61  ;;  %v8145_v57 = vadd.f32 1.0, %v12629_v2  ;;  %v8120_v26 = vmul.f32 0.7978846, %v8104_v55  ;;  %v8059_v59 = vmul.f32 %v16778_v17, %v16778_v17 }
0x124a   : > { %v12633_v5 = vpop.eup %12632  ;;  %12642 = vtanh.f32 %v8119_v60  ;;  %v8105_v21 = vadd.f32 %v8089_v3, %v16762_v20  ;;  %v8090_v11 = vmul.f32 0.044715, %v8074_v12  ;;  %v8060_v52 = vmul.f32 %v16781_v50, %v16781_v50 }
0x124b   : > { %v8161_v1 = vmul.f32 0.5, %v8145_v57  ;;  %12644 = vtanh.f32 %v8120_v26  ;;  %v8075_v44 = vmul.f32 %v8059_v59, %v16778_v17  ;;  %v8142_v30 = vadd.f32 1.0, %v12627_v36 }
0x124c   : > { %v12635_v48 = vpop.eup %12634  ;;  %v8121_v61 = vmul.f32 0.7978846, %v8105_v21  ;;  %v8106_v39 = vadd.f32 %v8090_v11, %v16768_v22  ;;  %v8076_v38 = vmul.f32 %v8060_v52, %v16781_v50  ;;  %v8144_v10 = vadd.f32 1.0, %v12631_v6 }
0x124d   : > { %v12637_v15 = vpop.eup %12636  ;;  %v8177_v33 = vmul.f32 %v8161_v1, %v16714_v54  ;;  %v8147_v14 = vadd.f32 1.0, %v12635_v48  ;;  %v8091_v37 = vmul.f32 0.044715, %v8075_v44  ;;  %v8158_v53 = vmul.f32 0.5, %v8142_v30 }
0x124e   : > { %12646 = vtanh.f32 %v8121_v61  ;;  %v8122_v62 = vmul.f32 0.7978846, %v8106_v39  ;;  %v8092_v49 = vmul.f32 0.044715, %v8076_v38  ;;  %v8160_v24 = vmul.f32 0.5, %v8144_v10 }
0x124f   : > { %v8163_v31 = vmul.f32 0.5, %v8147_v14  ;;  %v8107_v43 = vadd.f32 %v8091_v37, %v16778_v17  ;;  %v8174_v32 = vmul.f32 %v8158_v53, %v16696_v46  ;;  %v10778_v47 = vpack.c.bf16 %v8175_v29, %v16771_v45 }
0x1250   : > { %v12639_v35 = vpop.eup %12638  ;;  %12648 = vtanh.f32 %v8122_v62  ;;  %v8108_v13 = vadd.f32 %v8092_v49, %v16781_v50  ;;  %v8176_v54 = vmul.f32 %v8160_v24, %v16706_v42  ;;  %v8146_v7 = vadd.f32 1.0, %v12633_v5 }
0x1251   : > { %v12641_v40 = vpop.eup %12640  ;;  %v8179_v36 = vmul.f32 %v8163_v31, %v16726_v16  ;;  %v8149_v0 = vadd.f32 1.0, %v12639_v35  ;;  %v8123_v55 = vmul.f32 0.7978846, %v8107_v43  ;;  %v8148_v2 = vadd.f32 1.0, %v12637_v15 }
0x1252   : > { %v8124_v60 = vmul.f32 0.7978846, %v8108_v13  ;;  %v10776_v3 = vpack.c.bf16 %v8176_v54, %v8174_v32  ;;  %v8162_v12 = vmul.f32 0.5, %v8146_v7  ;;  %v8150_v6 = vadd.f32 1.0, %v12641_v40 }
0x1253   : > { %12650 = vtanh.f32 %v8123_v55  ;;  %v8164_v46 = vmul.f32 0.5, %v8148_v2  ;;  %v10782_v45 = vpack.c.bf16 %v8179_v36, %v8177_v33  ;;  %v8165_v26 = vmul.f32 0.5, %v8149_v0  ;;  %v8205_v36 = vpop.permute.xlu0 %8204  ;;  %v18979_v2 = vld [vmem:[#allocation9_spill] sm:$0xff] }
0x1254   : > { %v12643_v29 = vpop.eup %12642  ;;  %12652 = vtanh.f32 %v8124_v60  ;;  %10777 = vmatprep.subr.bf16.mxu1 %v10776_v3  ;;  %v8178_v59 = vmul.f32 %v8162_v12, %v16717_v19  ;;  %v8166_v21 = vmul.f32 0.5, %v8150_v6  ;;  %v18980_v6 = vld [vmem:[#allocation12_spill] sm:$0xff] }
0x1255   : > { %v12645_v57 = vpop.eup %12644  ;;  %v8151_v42 = vadd.f32 1.0, %v12643_v29  ;;  %10779 = vmatpush1.bf16.msra.mxu1 %v10778_v47  ;;  %v8180_v16 = vmul.f32 %v8164_v46, %v16730_v58  ;;  %v8181_v30 = vmul.f32 %v8165_v26, %v16738_v56  ;;  %v8189_v47 = vld [vmem:[%s18034_s13] sm:$0xff] }
0x1256   : > { %v8152_v5 = vadd.f32 1.0, %v12645_v57  ;;  %v8182_v38 = vmul.f32 %v8166_v21, %v16742_v41  ;;  %v18983_v21 = vld [vmem:[#allocation18_spill] sm:$0xff] }
0x1257   : > { %v8167_v11 = vmul.f32 0.5, %v8151_v42  ;;  %v10780_v52 = vpack.c.bf16 %v8180_v16, %v8178_v59 }
0x1258   : > { %v12647_v1 = vpop.eup %12646  ;;  %v8168_v44 = vmul.f32 0.5, %v8152_v5 }
0x1259   : > { %v8183_v48 = vmul.f32 %v8167_v11, %v16750_v27  ;;  %10781 = vmatprep.subr.bf16.mxu1 %v10780_v52  ;;  %v8153_v39 = vadd.f32 1.0, %v12647_v1 }
0x125a   : > { %v12649_v61 = vpop.eup %12648  ;;  %10783 = vmatpush1.bf16.msra.mxu1 %v10782_v45  ;;  %v8184_v19 = vmul.f32 %v8168_v44, %v16754_v25 }
0x125b   : > { %v10786_v10 = vpack.c.bf16 %v8183_v48, %v8181_v30  ;;  %v8154_v58 = vadd.f32 1.0, %v12649_v61  ;;  %v8169_v37 = vmul.f32 0.5, %v8153_v39  ;;  %v18984_v48 = vld [vmem:[#allocation10_spill] sm:$0xff] }
0x125c   : > { %v10784_v15 = vpack.c.bf16 %v8184_v19, %v8182_v38  ;;  %v18985_v19 = vld [vmem:[#allocation13_spill] sm:$0xff] }
0x125d   : > { %v12651_v33 = vpop.eup %12650  ;;  %v8170_v62 = vmul.f32 0.5, %v8154_v58  ;;  %v8185_v24 = vmul.f32 %v8169_v37, %v16762_v20  ;;  %v8190_v20 = vld [vmem:[%s18034_s13 + $0x8] sm:$0xff]  ;;  %v18987_v37 = vld [vmem:[#allocation14_spill] sm:$0xff] }
0x125e   : > { %v12653_v14 = vpop.eup %12652  ;;  %v8155_v53 = vadd.f32 1.0, %v12651_v33  ;;  %10785 = vmatprep.subr.bf16.mxu1 %v10784_v15 }
0x125f   : > { %10787 = vmatpush1.bf16.msra.mxu1 %v10786_v10  ;;  %v8156_v56 = vadd.f32 1.0, %v12653_v14  ;;  %v8186_v41 = vmul.f32 %v8170_v62, %v16768_v22  ;;  %v8191_v22 = vld [vmem:[%s18034_s13 + $0x10] sm:$0xff]  ;;  %v18988_v62 = vld [vmem:[#allocation15_spill] sm:$0xff] }
0x1260   : > { %v8171_v27 = vmul.f32 0.5, %v8155_v53 }
0x1261   : > { %v8172_v49 = vmul.f32 0.5, %v8156_v56 }
0x1262   : > { %v8187_v31 = vmul.f32 %v8171_v27, %v16778_v17  ;;  %v8192_v17 = vld [vmem:[%s18034_s13 + $0x18] sm:$0xff] }
0x1263   : > { %v8188_v25 = vmul.f32 %v8172_v49, %v16781_v50  ;;  %v8200_v50 = vpop.permute.xlu1 %8199  ;;  %v18989_v49 = vld [vmem:[#allocation16_spill] sm:$0xff] }
0x1264   : > { %v10790_v43 = vpack.c.bf16 %v8187_v31, %v8185_v24  ;;  %v18991_v31 = vld [vmem:[#allocation22_spill] sm:$0xff] }
0x1265   : > { %v10788_v32 = vpack.c.bf16 %v8188_v25, %v8186_v41  ;;  %v18992_v25 = vld [vmem:[#allocation23_spill] sm:$0xff] }
0x1267   : > { %10789 = vmatprep.subr.bf16.mxu1 %v10788_v32  ;;  %v8210_v26 = vpop.permute.xlu1 %8209  ;;  %v18993_v32 = vld [vmem:[#allocation26_spill] sm:$0xff] }
0x1268   : > { %10791 = vmatpush1.bf16.msra.mxu1 %v10790_v43 }
0x126b   : > { %10568 = vmatmul.mubr.msk.f32.vlgmr.msra.gmra.mrb[228].mxu1 %vm8217_vm10, %v8189_v47 }
0x126c   : > { %8300 = vmatprep.mubr.f32.mxu1 %v16603_v63 }
0x126f   : > { %10569 = vmatmul.mubr.msk.f32.gmra.mrb[230].mxu1 %vm8217_vm10, %v8190_v20  ;;  %v18994_v20 = vld [vmem:[#allocation29_spill] sm:$0xff] }
0x1270   : > { %8306 = vmatprep.mubr.f32.mxu1 %v16603_v63 }
0x1273   : > { %10570 = vmatmul.mubr.msk.f32.gmra.mrb[232].mxu1 %vm8217_vm10, %v8191_v22 }
0x1274   : > { %8312 = vmatprep.mubr.f32.mxu1 %v16603_v63 }
0x1277   : > { %10571 = vmatmul.mubr.msk.f32.gmra.mrb[234].mxu1 %vm8217_vm10, %v8192_v17  ;;  %v18995_v17 = vld [vmem:[#allocation30_spill] sm:$0xff] }
0x1278   : > { %8779 = vmatprep.mubr.f32.mxu1 %v16603_v63 }
0x133e   : > { %v8296_v35 = vpop.f32.mrb[228].mxu1 }
0x133f   : > { %v8297_v13 = vadd.f32 %v8296_v35, %v8200_v50  ;;  %v8298_v54 = vpop.f32.mrb[229].mxu1 }
0x1340   : > { %v8299_v7 = vadd.f32 %v8298_v54, %v8200_v50 }
0x1341   : > { %v8319_v40 = vadd.f32 %v8297_v13, %v16620_v8 }
0x1342   : > { %v8320_v0 = vadd.f32 %v8299_v7, %v16624_v4  ;;  %v8302_v55 = vpop.f32.mrb[230].mxu1  ;;  %v18982_v4 = vld [vmem:[#allocation17_spill] sm:$0xff] }
0x1343   : > { %v8445_v60 = vadd.f32 %v8319_v40, %v18979_v2  ;;  %v8303_v3 = vadd.f32 %v8302_v55, %v8205_v36  ;;  %v8304_v12 = vpop.f32.mrb[231].mxu1  ;;  %v8505_v59 = vadd.f32 %v8319_v40, %v18982_v4 }
0x1344   : > { %v8446_v46 = vadd.f32 %v8320_v0, %v18980_v6  ;;  %v8305_v45 = vadd.f32 %v8304_v12, %v8205_v36  ;;  %v16833_v29 = vadd.f32 %v8320_v0, %v8319_v40  ;;  %v8506_v11 = vadd.f32 %v8320_v0, %v18983_v21 }
0x1345   : > { %v8321_v57 = vadd.f32 %v8303_v3, %v16614_v34  ;;  %8461 = vrot.lane.b32.xlu1 %v8445_v60, %s18981_s29  ;;  %v8215_v34 = vpop.permute.xlu0 %8214 }
0x1346   : > { %v8322_v8 = vadd.f32 %v8305_v45, %v16617_v28  ;;  %v8308_v42 = vpop.f32.mrb[232].mxu1  ;;  %8463 = vrot.lane.b32.xlu0 %v8446_v46, %s18981_s29 }
0x1347   : > { %v8309_v16 = vadd.f32 %v8308_v42, %v8210_v26  ;;  %v8310_v5 = vpop.f32.mrb[233].mxu1  ;;  %v8447_v61 = vadd.f32 %v8321_v57, %v18984_v48 }
0x1348   : > { %v8311_v52 = vadd.f32 %v8310_v5, %v8210_v26  ;;  %v16841_v1 = vadd.f32 %v8322_v8, %v8321_v57  ;;  %v8448_v10 = vadd.f32 %v8322_v8, %v18985_v19  ;;  %v8508_v53 = vadd.f32 %v8322_v8, %v18987_v37 }
0x1349   : > { %v8323_v44 = vadd.f32 %v8309_v16, %v16630_v18  ;;  %8521 = vrot.lane.b32.xlu1 %v8505_v59, %s18981_s29 }
0x134a   : > { %v8324_v30 = vadd.f32 %v8311_v52, %v16635_v23  ;;  %v8314_v28 = vpop.f32.mrb[234].mxu1  ;;  %8523 = vrot.lane.b32.xlu0 %v8506_v11, %s18981_s29  ;;  %v18986_v23 = vld [vmem:[#allocation11_spill] sm:$0xff] }
0x134b   : > { %v8315_v39 = vadd.f32 %v8314_v28, %v8215_v34  ;;  %v8316_v38 = vpop.f32.mrb[235].mxu1  ;;  %v8507_v14 = vadd.f32 %v8321_v57, %v18986_v23  ;;  %v8449_v27 = vadd.f32 %v8323_v44, %v18988_v62 }
0x134c   : > { %v8317_v58 = vadd.f32 %v8316_v38, %v8215_v34  ;;  %v16849_v15 = vadd.f32 %v8324_v30, %v8323_v44  ;;  %v8510_v41 = vadd.f32 %v8324_v30, %v18991_v31 }
0x134d   : > { %v8325_v33 = vadd.f32 %v8315_v39, %v16639_v9  ;;  %8465 = vrot.lane.b32.xlu1 %v8447_v61, %s18981_s29  ;;  %v8450_v9 = vadd.f32 %v8324_v30, %v18989_v49 }
0x134e   : > { %v8326_v18 = vadd.f32 %v8317_v58, %v16642_v51  ;;  %8467 = vrot.lane.b32.xlu0 %v8448_v10, %s18981_s29  ;;  %v18990_v51 = vld [vmem:[#allocation20_spill] sm:$0xff] }
0x134f   : > { %v8509_v24 = vadd.f32 %v8323_v44, %v18990_v51  ;;  %v8451_v43 = vadd.f32 %v8325_v33, %v18992_v25  ;;  %v8511_v22 = vadd.f32 %v8325_v33, %v18994_v20 }
0x1350   : > { %v16857_v56 = vadd.f32 %v8326_v18, %v8325_v33  ;;  %v8452_v47 = vadd.f32 %v8326_v18, %v18993_v32  ;;  %v8512_v50 = vadd.f32 %v8326_v18, %v18995_v17 }
0x1351   : > { %8525 = vrot.lane.b32.xlu1 %v8507_v14, %s18981_s29 }
0x1352   : > { %8527 = vrot.lane.b32.xlu0 %v8508_v53, %s18981_s29 }
0x1355   : > { %8469 = vrot.lane.b32.xlu1 %v8449_v27, %s18981_s29 }
0x1356   : > { %8471 = vrot.lane.b32.xlu0 %v8450_v9, %s18981_s29 }
0x1359   : > { %8529 = vrot.lane.b32.xlu1 %v8509_v24, %s18981_s29 }
0x135a   : > { %8531 = vrot.lane.b32.xlu0 %v8510_v41, %s18981_s29 }
0x135d   : > { %8473 = vrot.lane.b32.xlu1 %v8451_v43, %s18981_s29 }
0x135e   : > { %8475 = vrot.lane.b32.xlu0 %v8452_v47, %s18981_s29 }
0x1361   : > { %8533 = vrot.lane.b32.xlu1 %v8511_v22, %s18981_s29 }
0x1362   : > { %8535 = vrot.lane.b32.xlu0 %v8512_v50, %s18981_s29  ;;  %s19118_s29 = smov 94  }
0x13b7   : > { %v8462_v35 = vpop.permute.xlu1 %8461 }
0x13b8   : > { %8493 = vst.msk [vmem:[#allocation3] sm:$0xff] %vm702_vm3, %v8462_v35  ;;  %v8464_v13 = vpop.permute.xlu0 %8463 }
0x13b9   : > { %v16879_v54 = vsel %vm693_vm4, %v8462_v35, %v8464_v13  ;;  %8495 = vst.msk [vmem:[#allocation3 + $0x10] sm:$0xff] %vm693_vm4, %v8464_v13 }
0x13bb   : > { %v8522_v7 = vpop.permute.xlu1 %8521 }
0x13bc   : > { %8553 = vst.msk [vmem:[#allocation3 + $0x60] sm:$0xff] %vm702_vm3, %v8522_v7  ;;  %v8524_v40 = vpop.permute.xlu0 %8523 }
0x13bd   : > { %v16884_v36 = vsel %vm693_vm4, %v8522_v7, %v8524_v40  ;;  %8555 = vst.msk [vmem:[#allocation3 + $0x70] sm:$0xff] %vm693_vm4, %v8524_v40 }
0x13bf   : > { %v8466_v0 = vpop.permute.xlu1 %8465  ;;  %v16921_v11 = vld [vmem:[#allocation3] sm:$0xff] }
0x13c0   : > { %8496 = vst.msk [vmem:[#allocation3 + $0x18] sm:$0xff] %vm702_vm3, %v8466_v0  ;;  %v8468_v55 = vpop.permute.xlu0 %8467  ;;  %v8600_v2 = vld [vmem:[#allocation3 + $0x10] sm:$0xff] }
0x13c1   : > { %v16889_v60 = vsel %vm693_vm4, %v8466_v0, %v8468_v55  ;;  %8498 = vst.msk [vmem:[#allocation3 + $0x28] sm:$0xff] %vm693_vm4, %v8468_v55  ;;  %v16893_v3 = vpack.i.bf16 %v8600_v2, %v16879_v54 }
0x13c3   : > { %18996 = vst [vmem:[#allocation112_spill] sm:$0xff] %v16893_v3  ;;  %v8526_v6 = vpop.permute.xlu1 %8525  ;;  %11367 = vrot.lane.b32.xlu1 %v16893_v3, %s18997_s30  ;;  %v16943_v38 = vld [vmem:[#allocation3 + $0x60] sm:$0xff] }
0x13c4   : > { %8556 = vst.msk [vmem:[#allocation3 + $0x78] sm:$0xff] %vm702_vm3, %v8526_v6  ;;  %v8528_v46 = vpop.permute.xlu0 %8527  ;;  %v8604_v45 = vld [vmem:[#allocation3 + $0x70] sm:$0xff] }
0x13c5   : > { %v16901_v57 = vsel %vm693_vm4, %v8526_v6, %v8528_v46  ;;  %8558 = vst.msk [vmem:[#allocation3 + $0x88] sm:$0xff] %vm693_vm4, %v8528_v46  ;;  %v16905_v26 = vpack.i.bf16 %v8604_v45, %v16884_v36 }
0x13c7   : > { %18998 = vst [vmem:[#allocation45_spill] sm:$0xff] %v16905_v26  ;;  %v8470_v42 = vpop.permute.xlu1 %8469  ;;  %11372 = vrot.lane.b32.xlu1 %v16905_v26, %s18997_s30  ;;  %v16911_v4 = vld [vmem:[#allocation3 + $0x18] sm:$0xff] }
0x13c8   : > { %8499 = vst.msk [vmem:[#allocation3 + $0x30] sm:$0xff] %vm702_vm3, %v8470_v42  ;;  %v8472_v59 = vpop.permute.xlu0 %8471  ;;  %v8601_v16 = vld [vmem:[#allocation3 + $0x28] sm:$0xff]  ;;  %v16927_v44 = vpack.i.bf16 %v16911_v4, %v16921_v11 }
0x13c9   : > { %v16915_v5 = vsel %vm693_vm4, %v8470_v42, %v8472_v59  ;;  %8501 = vst.msk [vmem:[#allocation3 + $0x40] sm:$0xff] %vm693_vm4, %v8472_v59  ;;  %v16919_v21 = vpack.i.bf16 %v8601_v16, %v16889_v60 }
0x13ca   : > { %18999 = vst [vmem:[#allocation67_spill] sm:$0xff] %v16927_v44 }
0x13cb   : > { %v8530_v34 = vpop.permute.xlu1 %8529  ;;  %11377 = vrot.lane.b32.xlu1 %v16893_v3, %s19000_s26  ;;  %11507 = vrot.lane.b32.xlu0 %v16919_v21, %s18997_s30  ;;  %v16933_v30 = vld [vmem:[#allocation3 + $0x78] sm:$0xff] }
0x13cc   : > { %8559 = vst.msk [vmem:[#allocation3 + $0x90] sm:$0xff] %vm702_vm3, %v8530_v34  ;;  %v8532_v28 = vpop.permute.xlu0 %8531  ;;  %v8605_v48 = vld [vmem:[#allocation3 + $0x88] sm:$0xff]  ;;  %v16949_v10 = vpack.i.bf16 %v16933_v30, %v16943_v38 }
0x13cd   : > { %v16937_v61 = vsel %vm693_vm4, %v8530_v34, %v8532_v28  ;;  %8561 = vst.msk [vmem:[#allocation3 + $0xa0] sm:$0xff] %vm693_vm4, %v8532_v28  ;;  %v16941_v39 = vpack.i.bf16 %v8605_v48, %v16901_v57 }
0x13ce   : > { %19002 = vst [vmem:[#allocation115_spill] sm:$0xff] %v16949_v10 }
0x13cf   : > { %19001 = vst [vmem:[#allocation114_spill] sm:$0xff] %v16941_v39  ;;  %v8474_v58 = vpop.permute.xlu1 %8473  ;;  %11382 = vrot.lane.b32.xlu1 %v16905_v26, %s19000_s26  ;;  %11512 = vrot.lane.b32.xlu0 %v16941_v39, %s18997_s30  ;;  %v16977_v27 = vld [vmem:[#allocation3 + $0x30] sm:$0xff] }
0x13d0   : > { %8502 = vst.msk [vmem:[#allocation3 + $0x48] sm:$0xff] %vm702_vm3, %v8474_v58  ;;  %v8476_v33 = vpop.permute.xlu0 %8475  ;;  %v8602_v43 = vld [vmem:[#allocation3 + $0x40] sm:$0xff] }
0x13d1   : > { %v16957_v18 = vsel %vm693_vm4, %v8474_v58, %v8476_v33  ;;  %8504 = vst.msk [vmem:[#allocation3 + $0x58] sm:$0xff] %vm693_vm4, %v8476_v33  ;;  %v17038_v32 = vpack.i.bf16 %v8602_v43, %v16915_v5 }
0x13d3   : > { %v8534_v14 = vpop.permute.xlu1 %8533  ;;  %11387 = vrot.lane.b32.xlu1 %v16893_v3, %s19003_s2  ;;  %11517 = vrot.lane.b32.xlu0 %v16919_v21, %s19000_s26  ;;  %v16991_v24 = vld [vmem:[#allocation3 + $0x90] sm:$0xff]  ;;  %19010 = vst [vmem:[#allocation81_spill] sm:$0xff] %v17038_v32 }
0x13d4   : > { %8562 = vst.msk [vmem:[#allocation3 + $0xa8] sm:$0xff] %vm702_vm3, %v8534_v14  ;;  %v8536_v37 = vpop.permute.xlu0 %8535  ;;  %19005 = vst [vmem:[#allocation117_spill] sm:$0xff] %v16991_v24  ;;  %v8606_v47 = vld [vmem:[#allocation3 + $0xa0] sm:$0xff]  ;;  %vm19015_vm3 = vcmask 916480  }
0x13d5   : > { %v16968_v53 = vsel %vm693_vm4, %v8534_v14, %v8536_v37  ;;  %8564 = vst.msk [vmem:[#allocation3 + $0xb8] sm:$0xff] %vm693_vm4, %v8536_v37  ;;  %v17045_v20 = vpack.i.bf16 %v8606_v47, %v16937_v61  ;;  %vm19017_vm4 = vmmov %vm19015_vm3 }
0x13d6   : > { %vm19019_vm15 = vmmov %vm19015_vm3 }
0x13d7   : > { %11392 = vrot.lane.b32.xlu1 %v16905_v26, %s19003_s2  ;;  %11522 = vrot.lane.b32.xlu0 %v16941_v39, %s19000_s26  ;;  %v16979_v49 = vld [vmem:[#allocation3 + $0x48] sm:$0xff]  ;;  %vm19021_vm1 = vmmov %vm19015_vm3 }
0x13d8   : > { %v16983_v9 = vpack.i.bf16 %v16979_v49, %v16977_v27  ;;  %v8603_v22 = vld [vmem:[#allocation3 + $0x58] sm:$0xff] }
0x13d9   : > { %v17092_v17 = vpack.i.bf16 %v8603_v22, %v16957_v18 }
0x13db   : > { %11397 = vrot.lane.b32.xlu1 %v16893_v3, %s19004_s24  ;;  %11527 = vrot.lane.b32.xlu0 %v16919_v21, %s19003_s2  ;;  %v16993_v31 = vld [vmem:[#allocation3 + $0xa8] sm:$0xff] }
0x13dc   : > { %19006 = vst [vmem:[#allocation69_spill] sm:$0xff] %v16993_v31  ;;  %v16997_v41 = vpack.i.bf16 %v16993_v31, %v16991_v24  ;;  %v8607_v50 = vld [vmem:[#allocation3 + $0xb8] sm:$0xff] }
0x13dd   : > { %v17101_v13 = vpack.i.bf16 %v8607_v50, %v16968_v53 }
0x13df   : > { %11402 = vrot.lane.b32.xlu1 %v16905_v26, %s19004_s24  ;;  %11532 = vrot.lane.b32.xlu0 %v16941_v39, %s19003_s2 }
0x13e3   : > { %11407 = vrot.lane.b32.xlu1 %v16893_v3, %s19007_s27  ;;  %11537 = vrot.lane.b32.xlu0 %v16919_v21, %s19004_s24 }
0x13e7   : > { %11412 = vrot.lane.b32.xlu1 %v16905_v26, %s19007_s27  ;;  %11542 = vrot.lane.b32.xlu0 %v16941_v39, %s19004_s24 }
0x13eb   : > { %11417 = vrot.lane.b32.xlu1 %v16893_v3, %s19008_s0  ;;  %11547 = vrot.lane.b32.xlu0 %v16919_v21, %s19007_s27 }
0x13ef   : > { %11422 = vrot.lane.b32.xlu1 %v16905_v26, %s19008_s0  ;;  %11552 = vrot.lane.b32.xlu0 %v16941_v39, %s19007_s27 }
0x13f3   : > { %11427 = vrot.lane.b32.xlu1 %v16893_v3, %s19009_s25  ;;  %11557 = vrot.lane.b32.xlu0 %v16919_v21, %s19008_s0 }
0x13f7   : > { %11432 = vrot.lane.b32.xlu1 %v16905_v26, %s19009_s25  ;;  %11562 = vrot.lane.b32.xlu0 %v16941_v39, %s19008_s0 }
0x13fb   : > { %11437 = vrot.lane.b32.xlu1 %v16927_v44, %s18997_s30  ;;  %11567 = vrot.lane.b32.xlu0 %v16919_v21, %s19009_s25 }
0x13ff   : > { %11442 = vrot.lane.b32.xlu1 %v16949_v10, %s18997_s30  ;;  %11572 = vrot.lane.b32.xlu0 %v16941_v39, %s19009_s25 }
0x1403   : > { %11447 = vrot.lane.b32.xlu1 %v16927_v44, %s19000_s26  ;;  %11577 = vrot.lane.b32.xlu0 %v17038_v32, %s18997_s30 }
0x1407   : > { %11452 = vrot.lane.b32.xlu1 %v16949_v10, %s19000_s26  ;;  %11582 = vrot.lane.b32.xlu0 %v17045_v20, %s18997_s30 }
0x140b   : > { %11457 = vrot.lane.b32.xlu1 %v16927_v44, %s19003_s2  ;;  %11587 = vrot.lane.b32.xlu0 %v17038_v32, %s19000_s26 }
0x140f   : > { %11462 = vrot.lane.b32.xlu1 %v16949_v10, %s19003_s2  ;;  %11592 = vrot.lane.b32.xlu0 %v17045_v20, %s19000_s26 }
0x1413   : > { %11467 = vrot.lane.b32.xlu1 %v16927_v44, %s19004_s24  ;;  %11597 = vrot.lane.b32.xlu0 %v17038_v32, %s19003_s2 }
0x1417   : > { %11472 = vrot.lane.b32.xlu1 %v16949_v10, %s19004_s24  ;;  %11602 = vrot.lane.b32.xlu0 %v17045_v20, %s19003_s2 }
0x141b   : > { %11477 = vrot.lane.b32.xlu1 %v16927_v44, %s19007_s27  ;;  %11607 = vrot.lane.b32.xlu0 %v17038_v32, %s19004_s24 }
0x141f   : > { %11482 = vrot.lane.b32.xlu1 %v16949_v10, %s19007_s27  ;;  %11612 = vrot.lane.b32.xlu0 %v17045_v20, %s19004_s24 }
0x1423   : > { %11487 = vrot.lane.b32.xlu1 %v16927_v44, %s19008_s0  ;;  %11617 = vrot.lane.b32.xlu0 %v17038_v32, %s19007_s27 }
0x1427   : > { %11492 = vrot.lane.b32.xlu1 %v16949_v10, %s19008_s0  ;;  %11622 = vrot.lane.b32.xlu0 %v17045_v20, %s19007_s27 }
0x142b   : > { %11497 = vrot.lane.b32.xlu1 %v16927_v44, %s19009_s25  ;;  %11627 = vrot.lane.b32.xlu0 %v17038_v32, %s19008_s0 }
0x142f   : > { %11502 = vrot.lane.b32.xlu1 %v16949_v10, %s19009_s25  ;;  %11632 = vrot.lane.b32.xlu0 %v17045_v20, %s19008_s0 }
0x1433   : > { %11637 = vrot.lane.b32.xlu0 %v17038_v32, %s19009_s25  ;;  %11707 = vrot.lane.b32.xlu1 %v17092_v17, %s18997_s30 }
0x1435   : > { %v17098_v35 = vpop.permute.xlu1 %11367 }
0x1436   : > { %v11370_v40 = vunpack.i.h.bf16 %v17098_v35  ;;  %v18319_v0 = vunpack.i.l.bf16 %v17098_v35 }
0x1437   : > { %11642 = vrot.lane.b32.xlu0 %v16983_v9, %s18997_s30  ;;  %11712 = vrot.lane.b32.xlu1 %v17101_v13, %s18997_s30 }
0x1438   : > { %v8681_v45 = vsel %vm770_vm8, %v18319_v0, %v11370_v40 }
0x1439   : > { %v17107_v7 = vpop.permute.xlu1 %11372 }
0x143b   : > { %11647 = vrot.lane.b32.xlu0 %v16997_v41, %s18997_s30  ;;  %s10170_s30 = sshll.u32 %s19217_s22, 3 }
0x143d   : > { %v17113_v55 = vpop.permute.xlu0 %11507  ;;  %v17115_v2 = vpop.permute.xlu1 %11377 }
0x143e   : > { %v11510_v6 = vunpack.i.h.bf16 %v17113_v55  ;;  %v18320_v46 = vunpack.i.l.bf16 %v17113_v55  ;;  %v11380_v28 = vunpack.i.h.bf16 %v17115_v2  ;;  %v18315_v48 = vunpack.i.l.bf16 %v17115_v2 }
0x1440   : > { %v8683_v42 = vsel %vm770_vm8, %v18320_v46, %v11510_v6  ;;  %v17140_v43 = vsel %vm1166_vm12, %v18315_v48, %v11380_v28 }
0x1441   : > { %v17125_v59 = vpop.permute.xlu0 %11512  ;;  %v17127_v16 = vpop.permute.xlu1 %11382  ;;  %v10798_v34 = vpack.c.bf16 %v8683_v42, %v8681_v45  ;;  %19011 = vst [vmem:[#allocation82_spill] sm:$0xff] %v17140_v43 }
0x1442   : > { %v11385_v47 = vunpack.i.h.bf16 %v17127_v16  ;;  %v18313_v22 = vunpack.i.l.bf16 %v17127_v16 }
0x1443   : > { %10799 = vmatprep.subr.bf16.mxu1 %v10798_v34 }
0x1444   : > { %v17160_v28 = vsel %vm1166_vm12, %v18313_v22, %v11385_v47 }
0x1445   : > { %v17131_v58 = vpop.permute.xlu0 %11517  ;;  %v17133_v33 = vpop.permute.xlu1 %11387  ;;  %19013 = vst [vmem:[#allocation130_spill] sm:$0xff] %v17160_v28 }
0x1446   : > { %v11520_v14 = vunpack.i.h.bf16 %v17131_v58  ;;  %v18317_v37 = vunpack.i.l.bf16 %v17131_v58  ;;  %v11390_v25 = vunpack.i.h.bf16 %v17133_v33 }
0x1448   : > { %v17147_v50 = vsel %vm1166_vm12, %v18317_v37, %v11520_v14  ;;  %v18316_v14 = vunpack.i.l.bf16 %v17133_v33 }
0x1449   : > { %19012 = vst [vmem:[#allocation119_spill] sm:$0xff] %v17147_v50  ;;  %v17151_v6 = vpop.permute.xlu0 %11522  ;;  %v17153_v45 = vpop.permute.xlu1 %11392 }
0x144a   : > { %v11525_v42 = vunpack.i.h.bf16 %v17151_v6  ;;  %v18314_v34 = vunpack.i.l.bf16 %v17151_v6  ;;  %v17180_v23 = vsel %vm19015_vm3, %v18316_v14, %v11390_v25  ;;  %v11395_v52 = vunpack.i.h.bf16 %v17153_v45 }
0x144b   : > { %19016 = vst [vmem:[#allocation138_spill] sm:$0xff] %v17180_v23  ;;  %vm19024_vm3 = vcmask 908288  }
0x144c   : > { %v17167_v40 = vsel %vm1166_vm12, %v18314_v34, %v11525_v42  ;;  %v18322_v42 = vunpack.i.l.bf16 %v17153_v45 }
0x144d   : > { %19014 = vst [vmem:[#allocation128_spill] sm:$0xff] %v17167_v40  ;;  %v17171_v19 = vpop.permute.xlu0 %11527  ;;  %v17173_v8 = vpop.permute.xlu1 %11397 }
0x144e   : > { %v11530_v51 = vunpack.i.h.bf16 %v17171_v19  ;;  %v18318_v47 = vunpack.i.l.bf16 %v17171_v19  ;;  %v17200_v14 = vsel %vm19019_vm15, %v18322_v42, %v11395_v52  ;;  %v11400_v37 = vunpack.i.h.bf16 %v17173_v8  ;;  %vm19029_vm15 = vmmov %vm19024_vm3 }
0x144f   : > { %19020 = vst [vmem:[#allocation120_spill] sm:$0xff] %v17200_v14 }
0x1450   : > { %v17187_v62 = vsel %vm19017_vm4, %v18318_v47, %v11530_v51  ;;  %vm19026_vm4 = vmmov %vm19024_vm3 }
0x1451   : > { %19018 = vst [vmem:[#allocation136_spill] sm:$0xff] %v17187_v62  ;;  %v17191_v22 = vpop.permute.xlu0 %11532  ;;  %v17193_v34 = vpop.permute.xlu1 %11402  ;;  %v19023_v62 = vunpack.i.l.bf16 %v17173_v8 }
0x1452   : > { %v11535_v48 = vunpack.i.h.bf16 %v17191_v22  ;;  %v18324_v25 = vunpack.i.l.bf16 %v17191_v22  ;;  %v11405_v42 = vunpack.i.h.bf16 %v17193_v34 }
0x1454   : > { %v17207_v12 = vsel %vm19021_vm1, %v18324_v25, %v11535_v48  ;;  %v17222_v48 = vsel %vm19024_vm3, %v19023_v62, %v11400_v37  ;;  %v19028_v37 = vunpack.i.l.bf16 %v17193_v34  ;;  %vm19031_vm1 = vmmov %vm19024_vm3  ;;  %vm19055_vm3 = vcmask 916480  }
0x1455   : > { %19022 = vst [vmem:[#allocation121_spill] sm:$0xff] %v17207_v12  ;;  %v17211_v0 = vpop.permute.xlu0 %11537  ;;  %v17213_v46 = vpop.permute.xlu1 %11407  ;;  %19025 = vst [vmem:[#allocation122_spill] sm:$0xff] %v17222_v48 }
0x1456   : > { %v11540_v23 = vunpack.i.h.bf16 %v17211_v0  ;;  %v18328_v52 = vunpack.i.l.bf16 %v17211_v0  ;;  %v11410_v62 = vunpack.i.h.bf16 %v17213_v46  ;;  %v19033_v40 = vunpack.i.l.bf16 %v17213_v46 }
0x1458   : > { %v17227_v47 = vsel %vm19026_vm4, %v18328_v52, %v11540_v23  ;;  %v17244_v52 = vsel %vm19029_vm15, %v19028_v37, %v11405_v42  ;;  %v17262_v42 = vsel %vm1881_vm2, %v19033_v40, %v11410_v62  ;;  %vm19057_vm4 = vmmov %vm19055_vm3 }
0x1459   : > { %19027 = vst [vmem:[#allocation75_spill] sm:$0xff] %v17227_v47  ;;  %v17229_v25 = vpop.permute.xlu0 %11542  ;;  %v17231_v14 = vpop.permute.xlu1 %11412  ;;  %19030 = vst [vmem:[#allocation77_spill] sm:$0xff] %v17244_v52 }
0x145a   : > { %v11545_v28 = vunpack.i.h.bf16 %v17229_v25  ;;  %v18332_v51 = vunpack.i.l.bf16 %v17229_v25  ;;  %8328 = vadd.xlane.f32.xlu0 %v16833_v29  ;;  %19034 = vst [vmem:[#allocation86_spill] sm:$0xff] %v17262_v42  ;;  %v11415_v37 = vunpack.i.h.bf16 %v17231_v14  ;;  %vm19059_vm15 = vmmov %vm19055_vm3 }
0x145b   : > { %8331 = vadd.xlane.f32.xlu1 %v16841_v1 }
0x145c   : > { %v17249_v12 = vsel %vm19031_vm1, %v18332_v51, %v11545_v28  ;;  %v18341_v28 = vunpack.i.l.bf16 %v17231_v14  ;;  %vm19061_vm1 = vmmov %vm19055_vm3 }
0x145d   : > { %19032 = vst [vmem:[#allocation85_spill] sm:$0xff] %v17249_v12  ;;  %v17251_v48 = vpop.permute.xlu0 %11547  ;;  %v17253_v47 = vpop.permute.xlu1 %11417 }
0x145e   : > { %v11550_v1 = vunpack.i.h.bf16 %v17251_v48  ;;  %v18337_v23 = vunpack.i.l.bf16 %v17251_v48  ;;  %v17282_v62 = vsel %vm1881_vm2, %v18341_v28, %v11415_v37  ;;  %v11420_v10 = vunpack.i.h.bf16 %v17253_v47 }
0x145f   : > { %19036 = vst [vmem:[#allocation125_spill] sm:$0xff] %v17282_v62 }
0x1460   : > { %v17269_v51 = vsel %vm1881_vm2, %v18337_v23, %v11550_v1  ;;  %v18347_v1 = vunpack.i.l.bf16 %v17253_v47 }
0x1461   : > { %19035 = vst [vmem:[#allocation123_spill] sm:$0xff] %v17269_v51  ;;  %v17273_v52 = vpop.permute.xlu0 %11552  ;;  %v17275_v12 = vpop.permute.xlu1 %11422 }
0x1462   : > { %v11555_v39 = vunpack.i.h.bf16 %v17273_v52  ;;  %v18343_v40 = vunpack.i.l.bf16 %v17273_v52  ;;  %v17302_v28 = vsel %vm2122_vm9, %v18347_v1, %v11420_v10  ;;  %v11425_v26 = vunpack.i.h.bf16 %v17275_v12 }
0x1463   : > { %19038 = vst [vmem:[#allocation129_spill] sm:$0xff] %v17302_v28  ;;  %v19040_v44 = vunpack.i.l.bf16 %v17275_v12 }
0x1464   : > { %v17289_v29 = vsel %vm1881_vm2, %v18343_v40, %v11555_v39 }
0x1465   : > { %19037 = vst [vmem:[#allocation127_spill] sm:$0xff] %v17289_v29  ;;  %v17293_v42 = vpop.permute.xlu0 %11557  ;;  %v17295_v51 = vpop.permute.xlu1 %11427 }
0x1466   : > { %v11560_v32 = vunpack.i.h.bf16 %v17293_v42  ;;  %v18349_v37 = vunpack.i.l.bf16 %v17293_v42  ;;  %v11430_v1 = vunpack.i.h.bf16 %v17295_v51 }
0x1468   : > { %v17309_v23 = vsel %vm2122_vm9, %v18349_v37, %v11560_v32  ;;  %v17324_v32 = vsel %vm2122_vm9, %v19040_v44, %v11425_v26  ;;  %v19045_v37 = vunpack.i.l.bf16 %v17113_v55 }
0x1469   : > { %19039 = vst [vmem:[#allocation83_spill] sm:$0xff] %v17309_v23  ;;  %v17313_v62 = vpop.permute.xlu0 %11562  ;;  %v17315_v29 = vpop.permute.xlu1 %11432  ;;  %19041 = vst [vmem:[#allocation84_spill] sm:$0xff] %v17324_v32 }
0x146a   : > { %v11565_v3 = vunpack.i.h.bf16 %v17313_v62  ;;  %v18354_v10 = vunpack.i.l.bf16 %v17313_v62  ;;  %v11435_v50 = vunpack.i.h.bf16 %v17315_v29  ;;  %v18362_v24 = vunpack.i.l.bf16 %v17315_v29 }
0x146c   : > { %v17329_v40 = vsel %vm2122_vm9, %v18354_v10, %v11565_v3  ;;  %11727 = vrot.lane.b32.xlu1 %v17092_v17, %s19000_s26  ;;  %v19043_v3 = vunpack.i.l.bf16 %v17295_v51 }
0x146d   : > { %19042 = vst [vmem:[#allocation133_spill] sm:$0xff] %v17329_v40  ;;  %v17335_v28 = vpop.permute.xlu0 %11567  ;;  %v11438_v23 = vpop.permute.xlu1 %11437  ;;  %v19046_v40 = vunpack.i.l.bf16 %v17098_v35 }
0x146e   : > { %v11570_v39 = vunpack.i.h.bf16 %v17335_v28  ;;  %v18360_v43 = vunpack.i.l.bf16 %v17335_v28  ;;  %v11440_v26 = vunpack.i.h.bf16 %v11438_v23  ;;  %v11439_v44 = vunpack.i.l.bf16 %v11438_v23 }
0x146f   : > { %v17343_v10 = vsel %vm2363_vm13, %v19043_v3, %v11430_v1 }
0x1470   : > { %19044 = vst [vmem:[#allocation134_spill] sm:$0xff] %v17343_v10  ;;  %v8682_v32 = vsel %vm770_vm8, %v11440_v26, %v19045_v37  ;;  %v8680_v31 = vsel %vm770_vm8, %v11439_v44, %v19046_v40  ;;  %11652 = vrot.lane.b32.xlu0 %v16983_v9, %s19000_s26  ;;  %11732 = vrot.lane.b32.xlu1 %v17101_v13, %s19000_s26  ;;  %v18359_v37 = vmov 0.0|0.0  }
0x1471   : > { %v17359_v23 = vsel %vm2363_vm13, %v18360_v43, %v11570_v39  ;;  %v10800_v1 = vpack.c.bf16 %v8682_v32, %v8680_v31  ;;  %v17361_v3 = vpop.permute.xlu0 %11572  ;;  %v17363_v55 = vpop.permute.xlu1 %11442  ;;  %10792 = vmatprep.subr.bf16.mxu0 %v18359_v37  ;;  %v17377_v31 = vsel %vm2363_vm13, %v18362_v24, %v11435_v50  ;;  %v19050_v43 = vunpack.i.l.bf16 %v17131_v58 }
0x1472   : > { %19047 = vst [vmem:[#allocation131_spill] sm:$0xff] %v17359_v23  ;;  %v11575_v40 = vunpack.i.h.bf16 %v17361_v3  ;;  %v18363_v26 = vunpack.i.l.bf16 %v17361_v3  ;;  %19048 = vst [vmem:[#allocation132_spill] sm:$0xff] %v17377_v31  ;;  %v19051_v50 = vunpack.i.l.bf16 %v17115_v2 }
0x1473   : > { %10801 = vmatpush1.bf16.msra.mxu1 %v10800_v1 }
0x1474   : > { %11657 = vrot.lane.b32.xlu0 %v16997_v41, %s19000_s26  ;;  %11737 = vrot.lane.b32.xlu1 %v17092_v17, %s19003_s2  ;;  %v17382_v39 = vsel %vm2363_vm13, %v18363_v26, %v11575_v40 }
0x1475   : > { %19049 = vst [vmem:[#allocation139_spill] sm:$0xff] %v17382_v39  ;;  %v17384_v32 = vpop.permute.xlu0 %11577  ;;  %v11448_v44 = vpop.permute.xlu1 %11447 }
0x1476   : > { %v11450_v35 = vunpack.i.h.bf16 %v11448_v44  ;;  %v11449_v37 = vunpack.i.l.bf16 %v11448_v44 }
0x1478   : > { %v17391_v10 = vsel %vm1166_vm12, %v11450_v35, %v19050_v43  ;;  %v17396_v24 = vsel %vm1166_vm12, %v11449_v37, %v19051_v50  ;;  %11662 = vrot.lane.b32.xlu0 %v16983_v9, %s19003_s2  ;;  %11742 = vrot.lane.b32.xlu1 %v17101_v13, %s19003_s2  ;;  %v19052_v35 = vunpack.i.l.bf16 %v17151_v6  ;;  %v19053_v37 = vunpack.i.l.bf16 %v17127_v16 }
0x1479   : > { %v17404_v44 = vpop.permute.xlu0 %11582  ;;  %v11453_v58 = vpop.permute.xlu1 %11452 }
0x147a   : > { %v11455_v1 = vunpack.i.h.bf16 %v11453_v58  ;;  %v11454_v43 = vunpack.i.l.bf16 %v11453_v58 }
0x147c   : > { %v17409_v2 = vsel %vm1166_vm12, %v11455_v1, %v19052_v35  ;;  %v17414_v50 = vsel %vm1166_vm12, %v11454_v43, %v19053_v37  ;;  %11667 = vrot.lane.b32.xlu0 %v16997_v41, %s19003_s2  ;;  %11747 = vrot.lane.b32.xlu1 %v17092_v17, %s19004_s24  ;;  %v19054_v35 = vunpack.i.l.bf16 %v17171_v19  ;;  %v19056_v43 = vunpack.i.l.bf16 %v17133_v33 }
0x147d   : > { %v17422_v58 = vpop.permute.xlu0 %11587  ;;  %v11458_v6 = vpop.permute.xlu1 %11457 }
0x147e   : > { %v11460_v26 = vunpack.i.h.bf16 %v11458_v6  ;;  %v11459_v1 = vunpack.i.l.bf16 %v11458_v6 }
0x1480   : > { %v17427_v16 = vsel %vm19055_vm3, %v11460_v26, %v19054_v35  ;;  %v17432_v37 = vsel %vm19057_vm4, %v11459_v1, %v19056_v43  ;;  %11672 = vrot.lane.b32.xlu0 %v16983_v9, %s19004_s24  ;;  %11752 = vrot.lane.b32.xlu1 %v17101_v13, %s19004_s24  ;;  %v19058_v35 = vunpack.i.l.bf16 %v17191_v22  ;;  %v19060_v1 = vunpack.i.l.bf16 %v17153_v45 }
0x1481   : > { %v17440_v6 = vpop.permute.xlu0 %11592  ;;  %v11463_v19 = vpop.permute.xlu1 %11462  ;;  %vm19063_vm3 = vcmask 908288  }
0x1482   : > { %v11465_v31 = vunpack.i.h.bf16 %v11463_v19  ;;  %v11464_v26 = vunpack.i.l.bf16 %v11463_v19  ;;  %vm19066_vm4 = vmmov %vm19063_vm3 }
0x1484   : > { %v17445_v33 = vsel %vm19059_vm15, %v11465_v31, %v19058_v35  ;;  %v17450_v43 = vsel %vm19061_vm1, %v11464_v26, %v19060_v1  ;;  %11677 = vrot.lane.b32.xlu0 %v16997_v41, %s19004_s24  ;;  %11757 = vrot.lane.b32.xlu1 %v17092_v17, %s19007_s27  ;;  %v19062_v35 = vunpack.i.l.bf16 %v17211_v0  ;;  %v19065_v26 = vunpack.i.l.bf16 %v17173_v8  ;;  %vm19069_vm15 = vmmov %vm19063_vm3 }
0x1485   : > { %v17458_v19 = vpop.permute.xlu0 %11597  ;;  %v11468_v22 = vpop.permute.xlu1 %11467  ;;  %vm19072_vm1 = vmmov %vm19063_vm3 }
0x1486   : > { %v11470_v39 = vunpack.i.h.bf16 %v11468_v22  ;;  %v11469_v31 = vunpack.i.l.bf16 %v11468_v22 }
0x1488   : > { %v17463_v45 = vsel %vm19063_vm3, %v11470_v39, %v19062_v35  ;;  %v17468_v1 = vsel %vm19066_vm4, %v11469_v31, %v19065_v26  ;;  %11682 = vrot.lane.b32.xlu0 %v16983_v9, %s19007_s27  ;;  %11762 = vrot.lane.b32.xlu1 %v17101_v13, %s19007_s27  ;;  %v19068_v35 = vunpack.i.l.bf16 %v17229_v25  ;;  %v19071_v31 = vunpack.i.l.bf16 %v17193_v34  ;;  %vm17616_vm3 = vmpackc.low %vm12856_vm7, %vm12856_vm7 }
0x1489   : > { %19064 = vst [vmem:[#allocation140_spill] sm:$0xff] %v17463_v45  ;;  %19067 = vst [vmem:[#allocation87_spill] sm:$0xff] %v17468_v1  ;;  %v17476_v22 = vpop.permute.xlu0 %11602  ;;  %v11473_v0 = vpop.permute.xlu1 %11472 }
0x148a   : > { %v11475_v23 = vunpack.i.h.bf16 %v11473_v0  ;;  %v11474_v39 = vunpack.i.l.bf16 %v11473_v0  ;;  %vm17690_vm7 = vmpackc.low %vm13012_vm5, %vm13012_vm5 }
0x148c   : > { %v17481_v8 = vsel %vm19069_vm15, %v11475_v23, %v19068_v35  ;;  %v17486_v26 = vsel %vm19072_vm1, %v11474_v39, %v19071_v31  ;;  %11687 = vrot.lane.b32.xlu0 %v16997_v41, %s19007_s27  ;;  %11767 = vrot.lane.b32.xlu1 %v17092_v17, %s19008_s0  ;;  %v19074_v35 = vunpack.i.l.bf16 %v17251_v48  ;;  %v19076_v39 = vunpack.i.l.bf16 %v17213_v46 }
0x148d   : > { %19070 = vst [vmem:[#allocation88_spill] sm:$0xff] %v17481_v8  ;;  %19073 = vst [vmem:[#allocation135_spill] sm:$0xff] %v17486_v26  ;;  %v17494_v0 = vpop.permute.xlu0 %11607  ;;  %v11478_v25 = vpop.permute.xlu1 %11477  ;;  %v19078_v48 = vunpack.i.l.bf16 %v17273_v52  ;;  %v19080_v46 = vunpack.i.l.bf16 %v17231_v14  ;;  %v19082_v52 = vunpack.i.l.bf16 %v17293_v42  ;;  %v19084_v14 = vunpack.i.l.bf16 %v17253_v47 }
0x148e   : > { %v11480_v1 = vunpack.i.h.bf16 %v11478_v25  ;;  %v11479_v23 = vunpack.i.l.bf16 %v11478_v25  ;;  %v19087_v42 = vunpack.i.l.bf16 %v17313_v62  ;;  %v19089_v47 = vunpack.i.l.bf16 %v17275_v12 }
0x148f   : > { %v19092_v62 = vunpack.i.l.bf16 %v17335_v28  ;;  %v19094_v12 = vunpack.i.l.bf16 %v17295_v51  ;;  %v11580_v28 = vunpack.i.h.bf16 %v17384_v32  ;;  %v19097_v51 = vunpack.i.l.bf16 %v17361_v3 }
0x1490   : > { %v17499_v34 = vsel %vm1881_vm2, %v11480_v1, %v19074_v35  ;;  %v17504_v31 = vsel %vm1881_vm2, %v11479_v23, %v19076_v39  ;;  %11692 = vrot.lane.b32.xlu0 %v16983_v9, %s19008_s0 }
0x1491   : > { %19075 = vst [vmem:[#allocation137_spill] sm:$0xff] %v17499_v34  ;;  %19077 = vst [vmem:[#allocation89_spill] sm:$0xff] %v17504_v31  ;;  %v17510_v26 = vpop.permute.xlu0 %11612  ;;  %v11483_v8 = vpop.permute.xlu1 %11482 }
0x1492   : > { %v11485_v25 = vunpack.i.h.bf16 %v11483_v8  ;;  %v11484_v45 = vunpack.i.l.bf16 %v11483_v8 }
0x1494   : > { %v17515_v1 = vsel %vm1881_vm2, %v11485_v25, %v19078_v48  ;;  %v17520_v23 = vsel %vm1881_vm2, %v11484_v45, %v19080_v46  ;;  %11697 = vrot.lane.b32.xlu0 %v16997_v41, %s19008_s0 }
0x1495   : > { %19079 = vst [vmem:[#allocation47_spill] sm:$0xff] %v17515_v1  ;;  %19081 = vst [vmem:[#allocation49_spill] sm:$0xff] %v17520_v23  ;;  %v17526_v39 = vpop.permute.xlu0 %11617  ;;  %v11488_v40 = vpop.permute.xlu1 %11487  ;;  %v11585_v1 = vunpack.i.h.bf16 %v17404_v44 }
0x1496   : > { %v11490_v8 = vunpack.i.h.bf16 %v11488_v40  ;;  %v11489_v31 = vunpack.i.l.bf16 %v11488_v40 }
0x1498   : > { %v17531_v25 = vsel %vm2122_vm9, %v11490_v8, %v19082_v52  ;;  %v17536_v45 = vsel %vm2122_vm9, %v11489_v31, %v19084_v14  ;;  %11702 = vrot.lane.b32.xlu0 %v16983_v9, %s19009_s25 }
0x1499   : > { %19083 = vst [vmem:[#allocation42_spill] sm:$0xff] %v17531_v25  ;;  %19085 = vst [vmem:[#allocation48_spill] sm:$0xff] %v17536_v45  ;;  %v17542_v46 = vpop.permute.xlu0 %11622  ;;  %v11493_v35 = vpop.permute.xlu1 %11492 }
0x149a   : > { %19086 = vst [vmem:[#allocation93_spill] sm:$0xff] %v17542_v46  ;;  %v11495_v40 = vunpack.i.h.bf16 %v11493_v35  ;;  %v11494_v23 = vunpack.i.l.bf16 %v11493_v35 }
0x149c   : > { %v17547_v8 = vsel %vm2122_vm9, %v11495_v40, %v19087_v42  ;;  %v17552_v31 = vsel %vm2122_vm9, %v11494_v23, %v19089_v47  ;;  %11717 = vrot.lane.b32.xlu0 %v17045_v20, %s19009_s25  ;;  %v11515_v42 = vunpack.i.h.bf16 %v17125_v59 }
0x149d   : > { %19088 = vst [vmem:[#allocation91_spill] sm:$0xff] %v17547_v8  ;;  %19090 = vst [vmem:[#allocation54_spill] sm:$0xff] %v17552_v31  ;;  %v17558_v14 = vpop.permute.xlu0 %11627  ;;  %v11498_v48 = vpop.permute.xlu1 %11497 }
0x149e   : > { %19091 = vst [vmem:[#allocation38_spill] sm:$0xff] %v17558_v14  ;;  %v11500_v35 = vunpack.i.h.bf16 %v11498_v48  ;;  %v11499_v45 = vunpack.i.l.bf16 %v11498_v48 }
0x14a0   : > { %v17563_v40 = vsel %vm2363_vm13, %v11500_v35, %v19092_v62  ;;  %v17568_v23 = vsel %vm2363_vm13, %v11499_v45, %v19094_v12  ;;  %11722 = vrot.lane.b32.xlu0 %v16997_v41, %s19009_s25  ;;  %v11579_v35 = vunpack.i.l.bf16 %v17384_v32  ;;  %v19099_v62 = vunpack.i.l.bf16 %v17315_v29 }
0x14a1   : > { %19093 = vst [vmem:[#allocation55_spill] sm:$0xff] %v17563_v40  ;;  %19095 = vst [vmem:[#allocation53_spill] sm:$0xff] %v17568_v23  ;;  %v17574_v47 = vpop.permute.xlu0 %11632  ;;  %v11503_v52 = vpop.permute.xlu1 %11502  ;;  %v11514_v23 = vunpack.i.l.bf16 %v17125_v59 }
0x14a2   : > { %19096 = vst [vmem:[#allocation35_spill] sm:$0xff] %v17574_v47  ;;  %v11505_v48 = vunpack.i.h.bf16 %v11503_v52  ;;  %v11504_v31 = vunpack.i.l.bf16 %v11503_v52  ;;  %v8685_v29 = vsel %vm770_vm8, %v11579_v35, %v11580_v28  ;;  %v11445_v52 = vunpack.i.h.bf16 %v17363_v55 }
0x14a3   : > { %v8691_v59 = vsel %vm770_vm8, %v11514_v23, %v11515_v42 }
0x14a4   : > { %v17581_v45 = vsel %vm2363_vm13, %v11505_v48, %v19097_v51  ;;  %v17586_v12 = vsel %vm2363_vm13, %v11504_v31, %v19099_v62  ;;  %v11375_v48 = vunpack.i.h.bf16 %v17107_v7  ;;  %v11374_v51 = vunpack.i.l.bf16 %v17107_v7 }
0x14a5   : > { %19098 = vst [vmem:[#allocation52_spill] sm:$0xff] %v17581_v45  ;;  %19100 = vst [vmem:[#allocation46_spill] sm:$0xff] %v17586_v12  ;;  %v17592_v40 = vpop.permute.xlu0 %11637  ;;  %v11708_v32 = vpop.permute.xlu1 %11707  ;;  %v11444_v12 = vunpack.i.l.bf16 %v17363_v55  ;;  %v8690_v55 = vsel %vm770_vm8, %v11445_v52, %v11514_v23 }
0x14a6   : > { %19101 = vst [vmem:[#allocation94_spill] sm:$0xff] %v17592_v40  ;;  %v11710_v47 = vunpack.i.h.bf16 %v11708_v32  ;;  %v11709_v3 = vunpack.i.l.bf16 %v11708_v32 }
0x14a8   : > { %v8687_v31 = vsel %vm770_vm8, %v11709_v3, %v11710_v47  ;;  %v8689_v47 = vsel %vm770_vm8, %v11374_v51, %v11375_v48  ;;  %v19110_v48 = vpack.c.bf16 %v16957_v18, %v16915_v5  ;;  %v19136_v5 = vld [vmem:[#allocation128_spill] sm:$0xff] }
0x14a9   : > { %v11643_v62 = vpop.permute.xlu0 %11642  ;;  %v11713_v8 = vpop.permute.xlu1 %11712  ;;  %v10802_v25 = vpack.c.bf16 %v8687_v31, %v8685_v29  ;;  %v11584_v29 = vunpack.i.l.bf16 %v17404_v44  ;;  %v10806_v46 = vpack.c.bf16 %v8691_v59, %v8689_v47  ;;  %v19130_v59 = vld [vmem:[#allocation112_spill] sm:$0xff] }
0x14aa   : > { %v11645_v45 = vunpack.i.h.bf16 %v11643_v62  ;;  %v11644_v40 = vunpack.i.l.bf16 %v11643_v62  ;;  %v11715_v32 = vunpack.i.h.bf16 %v11713_v8  ;;  %v11714_v14 = vunpack.i.l.bf16 %v11713_v8 }
0x14ab   : > { %10803 = vmatprep.subr.bf16.mxu1 %v10802_v25  ;;  %v8688_v62 = vsel %vm770_vm8, %v11444_v12, %v11374_v51  ;;  %v19129_v51 = vld [vmem:[#allocation67_spill] sm:$0xff] }
0x14ac   : > { %v8684_v7 = vsel %vm770_vm8, %v11644_v40, %v11579_v35  ;;  %v8686_v28 = vsel %vm770_vm8, %v11645_v45, %v11709_v3  ;;  %v8695_v25 = vsel %vm770_vm8, %v11714_v14, %v11715_v32  ;;  %v10808_v40 = vpack.c.bf16 %v8690_v55, %v8688_v62  ;;  %v19131_v32 = vld [vmem:[#allocation45_spill] sm:$0xff] }
0x14ad   : > { %v10804_v42 = vpack.c.bf16 %v8686_v28, %v8684_v7  ;;  %v11648_v31 = vpop.permute.xlu0 %11647  ;;  %v8693_v35 = vsel %vm770_vm8, %v11584_v29, %v11585_v1  ;;  %v19132_v7 = vld [vmem:[#allocation81_spill] sm:$0xff]  ;;  %v10046_v28 = vld [vmem:[%s18037_s16] sm:$0x1f]  ;;  %v11595_v1 = vunpack.i.h.bf16 %v17440_v6 }
0x14ae   : > { %v11650_v34 = vunpack.i.h.bf16 %v11648_v31  ;;  %v11649_v8 = vunpack.i.l.bf16 %v11648_v31  ;;  %v10810_v3 = vpack.c.bf16 %v8695_v25, %v8693_v35  ;;  %v11589_v31 = vunpack.i.l.bf16 %v17422_v58 }
0x14af   : > { %10805 = vmatpush1.bf16.msra.mxu1 %v10804_v42  ;;  %v11590_v42 = vunpack.i.h.bf16 %v17422_v58 }
0x14b0   : > { %8334 = vadd.xlane.f32.xlu1 %v16849_v15  ;;  %10807 = vmatprep.subr.bf16.mxu1 %v10806_v46  ;;  %v8692_v44 = vsel %vm770_vm8, %v11649_v8, %v11584_v29  ;;  %v8694_v45 = vsel %vm770_vm8, %v11650_v34, %v11714_v14  ;;  %v10573_v15 = vld [vmem:[%s18036_s15 + $0x8] sm:$0x1f]  ;;  %vm17626_vm8 = vmpackc.low %vm12845_vm6, %vm12845_vm6  ;;  %v19108_v46 = vpack.c.bf16 %v16889_v60, %v16879_v54 }
0x14b1   : > { %v10812_v52 = vpack.c.bf16 %v8694_v45, %v8692_v44  ;;  %v19109_v14 = vpack.c.bf16 %v16911_v4, %v16921_v11  ;;  %v19111_v54 = vpack.c.bf16 %v16979_v49, %v16977_v27  ;;  %v19112_v60 = vpack.c.bf16 %v16901_v57, %v16884_v36  ;;  %vm17673_vm6 = vmpackc.low %vm12917_vm14, %vm12917_vm14  ;;  %v19119_v57 = vld [vmem:[#allocation69_spill] sm:$0xff]  ;;  %v19126_v27 = vld [vmem:[#allocation82_spill] sm:$0xff] }
0x14b2   : > { %v19113_v4 = vpack.c.bf16 %v16933_v30, %v16943_v38  ;;  %v19120_v11 = vld [vmem:[#allocation117_spill] sm:$0xff]  ;;  %v19128_v49 = vpack.c.bf16 %v17391_v10, %v17396_v24  ;;  %v19133_v24 = vld [vmem:[#allocation115_spill] sm:$0xff]  ;;  %v19134_v10 = vld [vmem:[#allocation114_spill] sm:$0xff]  ;;  %v19135_v44 = vmov 0.0|0.0   ;;  %vm12680_vm14 = vmmov 0  }
0x14b3   : > { %10809 = vmatpush1.bf16.msra.mxu1 %v10808_v40  ;;  %v19121_v30 = vpack.c.bf16 %v19119_v57, %v19120_v11  ;;  %10703 = vmatprep.mubr.msk.f32.mxu0 %vm12680_vm14, %v16603_v63  ;;  %v19137_v57 = vld [vmem:[#allocation130_spill] sm:$0xff] }
0x14b4   : > { %10811 = vmatprep.subr.bf16.mxu1 %v10810_v3  ;;  %v19138_v11 = vpack.c.bf16 %v19136_v5, %v19137_v57  ;;  %v19157_v5 = vld [vmem:[#allocation75_spill] sm:$0xff]  ;;  %v19158_v57 = vld [vmem:[#allocation122_spill] sm:$0xff] }
0x14b7   : > { %10813 = vmatpush1.bf16.msra.mxu1 %v10812_v52 }
0x14b8   : > { %10816 = vmatprep.subr.msk.bf16.mxu1 %vm17616_vm3, %v19108_v46  ;;  %v11594_v46 = vunpack.i.l.bf16 %v17440_v6 }
0x14ba   : > { %10574 = vmatmul.mubr.msk.f32.vlgmr.msra.gmra.mrb[236].mxu1 %vm8217_vm10, %v10573_v15  ;;  %v8923_v6 = vsel %vm1166_vm12, %v11594_v46, %v11595_v1 }
0x14bb   : > { %10819 = vmatpush1.bf16.msk.msra.mxu1 %vm17626_vm8, %v19109_v14  ;;  %8853 = vmatprep.mubr.f32.mxu1 %v16603_v63 }
0x14bc   : > { %10822 = vmatprep.subr.msk.bf16.mxu1 %vm17616_vm3, %v19110_v48 }
0x14bf   : > { %8337 = vadd.xlane.f32.xlu0 %v16857_v56  ;;  %10825 = vmatpush1.bf16.msk.msra.mxu1 %vm17626_vm8, %v19111_v54  ;;  %v19114_v56 = vpack.c.bf16 %v16968_v53, %v16937_v61  ;;  %v8565_v61 = vld [vmem:[%s18036_s15] sm:$0x1f] }
0x14c0   : > { %10828 = vmatprep.subr.msk.bf16.mxu1 %vm17616_vm3, %v19112_v60  ;;  %v19125_v53 = vld [vmem:[#allocation119_spill] sm:$0xff] }
0x14c1   : > { %11777 = vrot.lane.b32.xlu1 %v17101_v13, %s19008_s0  ;;  %s640_s0 = scalar_lea.vmem %s18041_s20, %s10170_s30 }
0x14c3   : > { %10831 = vmatpush1.bf16.msk.msra.mxu1 %vm17626_vm8, %v19113_v4 }
0x14c4   : > { %10834 = vmatprep.subr.msk.bf16.mxu1 %vm17616_vm3, %v19114_v56 }
0x14c5   : > { %11782 = vrot.lane.b32.xlu1 %v16919_v21, %s19118_s29  ;;  %v19127_v21 = vpack.c.bf16 %v19125_v53, %v19126_v27 }
0x14c7   : > { %10837 = vmatpush1.bf16.msk.msra.mxu1 %vm17626_vm8, %v19121_v30 }
0x14c8   : > { %10840 = vmatprep.subr.msk.bf16.mxu1 %vm17673_vm6, %v19127_v21 }
0x14c9   : > { %11787 = vrot.lane.b32.xlu1 %v17092_v17, %s19009_s25 }
0x14ca   : > { %10591 = vmatmul.mubr.msk.f32.vlgmr.msra.gmra.mrb[236].mxu1 %vm8217_vm10, %v8565_v61 }
0x14cb   : > { %10843 = vmatpush1.bf16.msk.msra.mxu1 %vm17690_vm7, %v19128_v49  ;;  %9025 = vmatprep.mubr.f32.mxu1 %v16603_v63  ;;  %v19139_v49 = vpack.c.bf16 %v17409_v2, %v17414_v50  ;;  %v10592_v2 = vld [vmem:[%s18036_s15 + $0x10] sm:$0x1f] }
0x14cd   : > { %11792 = vrot.lane.b32.xlu1 %v19129_v51, %s19118_s29  ;;  %v11600_v51 = vunpack.i.h.bf16 %v17458_v19 }
0x14d1   : > { %11807 = vrot.lane.b32.xlu1 %v17101_v13, %s19009_s25  ;;  %s10689_s25 = sshll.u32 %s19217_s22, 4 }
0x14d5   : > { %11772 = vrot.lane.b32.xlu0 %v19130_v59, %s19118_s29  ;;  %11812 = vrot.lane.b32.xlu1 %v19131_v32, %s19118_s29  ;;  %v11599_v59 = vunpack.i.l.bf16 %v17458_v19 }
0x14d9   : > { %11797 = vrot.lane.b32.xlu0 %v19132_v7, %s19118_s29  ;;  %11822 = vrot.lane.b32.xlu1 %v17092_v17, %s19118_s29 }
0x14dd   : > { %11802 = vrot.lane.b32.xlu0 %v16983_v9, %s19118_s29  ;;  %11827 = vrot.lane.b32.xlu1 %v19133_v24, %s19118_s29 }
0x14e1   : > { %11817 = vrot.lane.b32.xlu0 %v19134_v10, %s19118_s29  ;;  %11837 = vrot.lane.b32.xlu1 %v17101_v13, %s19118_s29 }
0x14e5   : > { %11832 = vrot.lane.b32.xlu0 %v17045_v20, %s19118_s29  ;;  %10049 = vperm.xlu1 %11365, %v10046_v28   ;;  %v19141_v28 = vld [vmem:[#allocation136_spill] sm:$0xff] }
0x14e7   : > { %v8329_v17 = vpop.xlane.xlu0 %8328 }
0x14e8   : > { %v8340_v47 = vmul.f32 0.00390625, %v8329_v17  ;;  %v8332_v9 = vpop.xlane.xlu1 %8331  ;;  %v19142_v17 = vld [vmem:[#allocation138_spill] sm:$0xff] }
0x14e9   : > { %v8341_v29 = vmul.f32 0.00390625, %v8332_v9  ;;  %11842 = vrot.lane.b32.xlu0 %v16997_v41, %s19118_s29  ;;  %v8915_v41 = vsel %vm1166_vm12, %v11589_v31, %v11590_v42  ;;  %s636_s29 = scalar_lea.vmem %s18040_s19, %s10689_s25 }
0x14eb   : > { %v10793_v13 = vpack.c.bf16 %v8341_v29, %v8340_v47  ;;  %v11653_v55 = vpop.permute.xlu0 %11652  ;;  %v19143_v47 = vpack.c.bf16 %v19141_v28, %v19142_v17  ;;  %v19167_v28 = vld [vmem:[#allocation85_spill] sm:$0xff] }
0x14ec   : > { %v11655_v62 = vunpack.i.h.bf16 %v11653_v55  ;;  %v11654_v8 = vunpack.i.l.bf16 %v11653_v55  ;;  %v11728_v25 = vpop.permute.xlu1 %11727  ;;  %v19168_v17 = vld [vmem:[#allocation77_spill] sm:$0xff] }
0x14ed   : > { %v11730_v40 = vunpack.i.h.bf16 %v11728_v25  ;;  %v11729_v35 = vunpack.i.l.bf16 %v11728_v25  ;;  %10794 = vmatpush3.bf16.msra.mxu0 %v10793_v13  ;;  %v11604_v25 = vunpack.i.l.bf16 %v17476_v22 }
0x14ee   : > { %v8914_v20 = vsel %vm1166_vm12, %v11654_v8, %v11589_v31  ;;  %10795 = vmatprep.subr.bf16.mxu0 %v19135_v44  ;;  %v11605_v8 = vunpack.i.h.bf16 %v17476_v22 }
0x14ef   : > { %v8916_v45 = vsel %vm1166_vm12, %v11655_v62, %v11729_v35  ;;  %v8917_v58 = vsel %vm1166_vm12, %v11729_v35, %v11730_v40  ;;  %v11658_v3 = vpop.permute.xlu0 %11657  ;;  %v19147_v62 = vpack.c.bf16 %v17427_v16, %v17432_v37  ;;  %v19149_v37 = vld [vmem:[#allocation121_spill] sm:$0xff] }
0x14f0   : > { %v10844_v23 = vpack.c.bf16 %v8917_v58, %v8915_v41  ;;  %v10847_v52 = vpack.c.bf16 %v8916_v45, %v8914_v20  ;;  %v11733_v15 = vpop.permute.xlu1 %11732  ;;  %v11660_v54 = vunpack.i.h.bf16 %v11658_v3  ;;  %v11659_v60 = vunpack.i.l.bf16 %v11658_v3  ;;  %v19150_v41 = vld [vmem:[#allocation120_spill] sm:$0xff] }
0x14f1   : > { %v11735_v14 = vunpack.i.h.bf16 %v11733_v15  ;;  %v11734_v48 = vunpack.i.l.bf16 %v11733_v15  ;;  %v19151_v45 = vpack.c.bf16 %v19149_v37, %v19150_v41  ;;  %v10628_v37 = vld [vmem:[%s18036_s15 + $0x20] sm:$0x1f] }
0x14f2   : > { %10846 = vmatprep.subr.msk.bf16.mxu1 %vm17673_vm6, %v10844_v23  ;;  %v8922_v30 = vsel %vm1166_vm12, %v11659_v60, %v11594_v46  ;;  %v19155_v46 = vpack.c.bf16 %v17445_v33, %v17450_v43  ;;  %v10610_v33 = vld [vmem:[%s18036_s15 + $0x18] sm:$0x1f] }
0x14f3   : > { %v8925_v4 = vsel %vm1166_vm12, %v11734_v48, %v11735_v14  ;;  %10849 = vmatpush1.bf16.msk.msra.mxu1 %vm17690_vm7, %v10847_v52  ;;  %v8924_v61 = vsel %vm1166_vm12, %v11660_v54, %v11734_v48  ;;  %v11663_v53 = vpop.permute.xlu0 %11662  ;;  %vm19140_vm12 = vcmask 916480   ;;  %v11610_v14 = vunpack.i.h.bf16 %v17494_v0 }
0x14f4   : > { %v11738_v56 = vpop.permute.xlu1 %11737  ;;  %10852 = vmatprep.subr.msk.bf16.mxu1 %vm17673_vm6, %v19138_v11  ;;  %v10856_v38 = vpack.c.bf16 %v8925_v4, %v8923_v6  ;;  %v10859_v32 = vpack.c.bf16 %v8924_v61, %v8922_v30  ;;  %v11665_v7 = vunpack.i.h.bf16 %v11663_v53  ;;  %v11664_v24 = vunpack.i.l.bf16 %v11663_v53  ;;  %vm19144_vm5 = vmmov %vm19140_vm12 }
0x14f5   : > { %v11740_v27 = vunpack.i.h.bf16 %v11738_v56  ;;  %v11739_v21 = vunpack.i.l.bf16 %v11738_v56  ;;  %v9089_v19 = vsel %vm19144_vm5, %v11599_v59, %v11600_v51  ;;  %vm19145_vm4 = vmmov %vm19144_vm5  ;;  %v11609_v48 = vunpack.i.l.bf16 %v17494_v0 }
0x14f6   : > { %v9088_v9 = vsel %vm19145_vm4, %v11664_v24, %v11599_v59  ;;  %vm19146_vm15 = vmmov %vm19145_vm4  ;;  %v19159_v11 = vpack.c.bf16 %v19157_v5, %v19158_v57  ;;  %v11615_v59 = vunpack.i.h.bf16 %v17510_v26 }
0x14f7   : > { %10855 = vmatpush1.bf16.msk.msra.mxu1 %vm17690_vm7, %v19139_v49  ;;  %v9091_v10 = vsel %vm19140_vm12, %v11739_v21, %v11740_v27  ;;  %v9090_v29 = vsel %vm19146_vm15, %v11665_v7, %v11739_v21  ;;  %v11668_v31 = vpop.permute.xlu0 %11667  ;;  %vm19148_vm1 = vmmov %vm19145_vm4  ;;  %vm19156_vm4 = vcmask 908288   ;;  %v19163_v21 = vld [vmem:[#allocation140_spill] sm:$0xff]  ;;  %v19164_v49 = vld [vmem:[#allocation87_spill] sm:$0xff] }
0x14f8   : > { %10858 = vmatprep.subr.msk.bf16.mxu1 %vm17673_vm6, %v10856_v38  ;;  %v11743_v50 = vpop.permute.xlu1 %11742  ;;  %v10868_v42 = vpack.c.bf16 %v9091_v10, %v9089_v19  ;;  %v10871_v40 = vpack.c.bf16 %v9090_v29, %v9088_v9  ;;  %v11670_v35 = vunpack.i.h.bf16 %v11668_v31  ;;  %v11669_v20 = vunpack.i.l.bf16 %v11668_v31  ;;  %vm19152_vm14 = vmmov %vm19148_vm1 }
0x14f9   : > { %v11745_v13 = vunpack.i.h.bf16 %v11743_v50  ;;  %v11744_v55 = vunpack.i.l.bf16 %v11743_v50  ;;  %v9097_v58 = vsel %vm19152_vm14, %v11604_v25, %v11605_v8  ;;  %vm19153_vm12 = vmmov %vm19148_vm1  ;;  %v19165_v51 = vpack.c.bf16 %v19163_v21, %v19164_v49 }
0x14fa   : > { %v9096_v3 = vsel %vm19153_vm12, %v11669_v20, %v11604_v25  ;;  %vm19154_vm5 = vmmov %vm19148_vm1  ;;  %v11620_v25 = vunpack.i.h.bf16 %v17526_v39 }
0x14fb   : > { %10861 = vmatpush1.bf16.msk.msra.mxu1 %vm17690_vm7, %v10859_v32  ;;  %v9099_v44 = vsel %vm19148_vm1, %v11744_v55, %v11745_v13  ;;  %v9098_v22 = vsel %vm19154_vm5, %v11670_v35, %v11744_v55  ;;  %v11673_v52 = vpop.permute.xlu0 %11672  ;;  %vm19160_vm15 = vmmov %vm19156_vm4  ;;  %v11614_v32 = vunpack.i.l.bf16 %v17510_v26  ;;  %v19173_v55 = vld [vmem:[#allocation88_spill] sm:$0xff] }
0x14fc   : > { %10864 = vmatprep.subr.msk.bf16.mxu1 %vm17616_vm3, %v19143_v47  ;;  %v11748_v16 = vpop.permute.xlu1 %11747  ;;  %v10880_v23 = vpack.c.bf16 %v9099_v44, %v9097_v58  ;;  %v10883_v54 = vpack.c.bf16 %v9098_v22, %v9096_v3  ;;  %v11675_v60 = vunpack.i.h.bf16 %v11673_v52  ;;  %v11674_v4 = vunpack.i.l.bf16 %v11673_v52  ;;  %vm19161_vm1 = vmmov %vm19156_vm4  ;;  %v19177_v58 = vld [vmem:[#allocation86_spill] sm:$0xff] }
0x14fd   : > { %v11750_v15 = vunpack.i.h.bf16 %v11748_v16  ;;  %v11749_v1 = vunpack.i.l.bf16 %v11748_v16  ;;  %v9263_v6 = vsel %vm19160_vm15, %v11609_v48, %v11610_v14  ;;  %vm19162_vm14 = vmmov %vm19161_vm1  ;;  %v19169_v47 = vpack.c.bf16 %v19167_v28, %v19168_v17  ;;  %v19179_v14 = vld [vmem:[#allocation137_spill] sm:$0xff] }
0x14fe   : > { %10609 = vmatmul.mubr.msk.f32.vlgmr.msra.gmra.mrb[236].mxu1 %vm8217_vm10, %v10592_v2  ;;  %v9262_v0 = vsel %vm19161_vm1, %v11674_v4, %v11609_v48  ;;  %vm19166_vm12 = vmmov %vm19161_vm1  ;;  %v19180_v48 = vld [vmem:[#allocation89_spill] sm:$0xff] }
0x14ff   : > { %10867 = vmatpush1.bf16.msk.msra.mxu1 %vm17626_vm8, %v19147_v62  ;;  %9199 = vmatprep.mubr.f32.mxu1 %v16603_v63  ;;  %v9265_v43 = vsel %vm19156_vm4, %v11749_v1, %v11750_v15  ;;  %v9264_v30 = vsel %vm19162_vm14, %v11675_v60, %v11749_v1  ;;  %v11678_v38 = vpop.permute.xlu0 %11677  ;;  %vm19170_vm5 = vmmov %vm19161_vm1  ;;  %v19174_v62 = vld [vmem:[#allocation135_spill] sm:$0xff]  ;;  %v19182_v60 = vld [vmem:[#allocation93_spill] sm:$0xff] }
0x1500   : > { %10870 = vmatprep.subr.msk.bf16.mxu1 %vm17616_vm3, %v10868_v42  ;;  %v11753_v56 = vpop.permute.xlu1 %11752  ;;  %v10890_v61 = vpack.c.bf16 %v9265_v43, %v9263_v6  ;;  %v10892_v7 = vpack.c.bf16 %v9264_v30, %v9262_v0  ;;  %v11680_v24 = vunpack.i.h.bf16 %v11678_v38  ;;  %v11679_v10 = vunpack.i.l.bf16 %v11678_v38  ;;  %vm19171_vm4 = vmmov %vm19161_vm1  ;;  %v19183_v6 = vld [vmem:[#allocation127_spill] sm:$0xff]  ;;  %v19184_v0 = vld [vmem:[#allocation125_spill] sm:$0xff] }
0x1501   : > { %v11755_v53 = vunpack.i.h.bf16 %v11753_v56  ;;  %v11754_v27 = vunpack.i.l.bf16 %v11753_v56  ;;  %v9271_v19 = vsel %vm19170_vm5, %v11614_v32, %v11615_v59  ;;  %vm19172_vm15 = vmmov %vm19161_vm1  ;;  %v19175_v8 = vpack.c.bf16 %v19173_v55, %v19174_v62  ;;  %v19186_v59 = vld [vmem:[#allocation47_spill] sm:$0xff]  ;;  %v19193_v62 = vld [vmem:[#allocation42_spill] sm:$0xff] }
0x1502   : > { %v9270_v9 = vsel %vm19171_vm4, %v11679_v10, %v11614_v32  ;;  %v11625_v4 = vunpack.i.h.bf16 %v19182_v60  ;;  %v19185_v30 = vpack.c.bf16 %v19183_v6, %v19184_v0  ;;  %v19187_v32 = vld [vmem:[#allocation49_spill] sm:$0xff] }
0x1503   : > { %10873 = vmatpush1.bf16.msk.msra.mxu1 %vm17626_vm8, %v10871_v40  ;;  %v9273_v2 = vsel %vm19166_vm12, %v11754_v27, %v11755_v53  ;;  %v9272_v29 = vsel %vm19172_vm15, %v11680_v24, %v11754_v27  ;;  %v11683_v31 = vpop.permute.xlu0 %11682  ;;  %v11619_v40 = vunpack.i.l.bf16 %v17526_v39  ;;  %v19189_v24 = vld [vmem:[#allocation38_spill] sm:$0xff] }
0x1504   : > { %10876 = vmatprep.subr.msk.bf16.mxu1 %vm17616_vm3, %v19151_v45  ;;  %v11758_v50 = vpop.permute.xlu1 %11757  ;;  %v10898_v42 = vpack.c.bf16 %v9273_v2, %v9271_v19  ;;  %v10900_v35 = vpack.c.bf16 %v9272_v29, %v9270_v9  ;;  %v11685_v20 = vunpack.i.h.bf16 %v11683_v31  ;;  %v11684_v44 = vunpack.i.l.bf16 %v11683_v31  ;;  %v19176_v45 = vld [vmem:[#allocation123_spill] sm:$0xff]  ;;  %v10630_v19 = vld [vmem:[%s18036_s15 + $0x28] sm:$0x1f]  ;;  %v19191_v29 = vld [vmem:[#allocation129_spill] sm:$0xff] }
0x1505   : > { %v11760_v26 = vunpack.i.h.bf16 %v11758_v50  ;;  %v11759_v13 = vunpack.i.l.bf16 %v11758_v50  ;;  %v19178_v3 = vpack.c.bf16 %v19176_v45, %v19177_v58  ;;  %v9421_v22 = vsel %vm1881_vm2, %v11619_v40, %v11620_v25  ;;  %v19190_v9 = vld [vmem:[#allocation83_spill] sm:$0xff] }
0x1506   : > { %v9420_v39 = vsel %vm1881_vm2, %v11684_v44, %v11619_v40  ;;  %v11630_v10 = vunpack.i.h.bf16 %v19189_v24  ;;  %v11629_v2 = vunpack.i.l.bf16 %v19189_v24  ;;  %v19207_v24 = vld [vmem:[#allocation55_spill] sm:$0xff] }
0x1507   : > { %10879 = vmatpush1.bf16.msk.msra.mxu1 %vm17626_vm8, %v19155_v46  ;;  %v9423_v16 = vsel %vm1881_vm2, %v11759_v13, %v11760_v26  ;;  %v11688_v15 = vpop.permute.xlu0 %11687 }
0x1508   : > { %10882 = vmatprep.subr.msk.bf16.mxu1 %vm17616_vm3, %v10880_v23  ;;  %v11763_v41 = vpop.permute.xlu1 %11762  ;;  %v9422_v23 = vsel %vm1881_vm2, %v11685_v20, %v11759_v13  ;;  %v10908_v52 = vpack.c.bf16 %v9423_v16, %v9421_v22  ;;  %v11690_v56 = vunpack.i.h.bf16 %v11688_v15  ;;  %v11689_v5 = vunpack.i.l.bf16 %v11688_v15  ;;  %v19197_v20 = vld [vmem:[#allocation84_spill] sm:$0xff]  ;;  %v19202_v22 = vld [vmem:[#allocation35_spill] sm:$0xff] }
0x1509   : > { %v11765_v1 = vunpack.i.h.bf16 %v11763_v41  ;;  %v11764_v46 = vunpack.i.l.bf16 %v11763_v41  ;;  %v10911_v43 = vpack.c.bf16 %v9422_v23, %v9420_v39  ;;  %v9595_v31 = vsel %vm2122_vm9, %v11629_v2, %v11630_v10  ;;  %v19200_v41 = vld [vmem:[#allocation54_spill] sm:$0xff]  ;;  %v19208_v10 = vld [vmem:[#allocation53_spill] sm:$0xff] }
0x150a   : > { %v11635_v39 = vunpack.i.h.bf16 %v19202_v22  ;;  %v11634_v23 = vunpack.i.l.bf16 %v19202_v22 }
0x150b   : > { %10885 = vmatpush1.bf16.msk.msra.mxu1 %vm17626_vm8, %v10883_v54  ;;  %v19181_v54 = vpack.c.bf16 %v19179_v14, %v19180_v48  ;;  %v9431_v57 = vsel %vm1881_vm2, %v11764_v46, %v11765_v1  ;;  %v9430_v53 = vsel %vm1881_vm2, %v11690_v56, %v11764_v46  ;;  %v11693_v21 = vpop.permute.xlu0 %11692 }
0x150c   : > { %10887 = vmatprep.subr.bf16.mxu1 %v19159_v11  ;;  %v11768_v11 = vpop.permute.xlu1 %11767  ;;  %v11695_v28 = vunpack.i.h.bf16 %v11693_v21  ;;  %v11694_v17 = vunpack.i.l.bf16 %v11693_v21 }
0x150d   : > { %v11770_v49 = vunpack.i.h.bf16 %v11768_v11 }
0x150e   : > { %10627 = vmatmul.mubr.msk.f32.vlgmr.msra.gmra.mrb[236].mxu1 %vm8217_vm10, %v10610_v33  ;;  %v11624_v33 = vunpack.i.l.bf16 %v19182_v60  ;;  %v9594_v26 = vsel %vm2122_vm9, %v11694_v17, %v11629_v2  ;;  %v19209_v2 = vpack.c.bf16 %v19207_v24, %v19208_v10 }
0x150f   : > { %10889 = vmatpush1.bf16.msra.mxu1 %v19165_v51  ;;  %9357 = vmatprep.mubr.f32.mxu1 %v16603_v63  ;;  %v11769_v51 = vunpack.i.l.bf16 %v11768_v11  ;;  %v11698_v16 = vpop.permute.xlu0 %11697 }
0x1510   : > { %10891 = vmatprep.subr.bf16.mxu1 %v10890_v61  ;;  %v9429_v61 = vsel %vm1881_vm2, %v11624_v33, %v11625_v4  ;;  %v9428_v38 = vsel %vm1881_vm2, %v11689_v5, %v11624_v33  ;;  %v11700_v1 = vunpack.i.h.bf16 %v11698_v16  ;;  %vm8419_vm2 = vcmask 7168  }
0x1511   : > { %v10920_v27 = vpack.c.bf16 %v9431_v57, %v9429_v61  ;;  %v10923_v50 = vpack.c.bf16 %v9430_v53, %v9428_v38  ;;  %v9596_v13 = vsel %vm2122_vm9, %v11695_v28, %v11769_v51  ;;  %v19203_v57 = vld [vmem:[#allocation94_spill] sm:$0xff]  ;;  %v10648_v61 = vld [vmem:[%s18036_s15 + $0x30] sm:$0x1f]  ;;  %v19204_v53 = vld [vmem:[#allocation131_spill] sm:$0xff] }
0x1512   : > { %v10935_v40 = vpack.c.bf16 %v9596_v13, %v9594_v26  ;;  %v11640_v11 = vunpack.i.h.bf16 %v19203_v57  ;;  %v11639_v6 = vunpack.i.l.bf16 %v19203_v57 }
0x1513   : > { %10893 = vmatpush1.bf16.msra.mxu1 %v10892_v7  ;;  %v19188_v7 = vpack.c.bf16 %v19186_v59, %v19187_v32  ;;  %v11703_v58 = vpop.permute.xlu0 %11702 }
0x1514   : > { %10895 = vmatprep.subr.bf16.mxu1 %v19169_v47  ;;  %v9597_v47 = vsel %vm2122_vm9, %v11769_v51, %v11770_v49  ;;  %v11704_v0 = vunpack.i.l.bf16 %v11703_v58  ;;  %v11705_v49 = vunpack.i.h.bf16 %v11703_v58  ;;  %v9769_v12 = vsel %vm2363_vm13, %v11639_v6, %v11640_v11 }
0x1515   : > { %v10932_v55 = vpack.c.bf16 %v9597_v47, %v9595_v31 }
0x1516   : > { %v9768_v32 = vsel %vm2363_vm13, %v11704_v0, %v11639_v6  ;;  %v10666_v6 = vld [vmem:[%s18036_s15 + $0x38] sm:$0x1f] }
0x1517   : > { %10897 = vmatpush1.bf16.msra.mxu1 %v19175_v8  ;;  %v19194_v8 = vld [vmem:[#allocation48_spill] sm:$0xff]  ;;  %v11718_v46 = vpop.permute.xlu0 %11717 }
0x1518   : > { %10899 = vmatprep.subr.bf16.mxu1 %v10898_v42  ;;  %v19192_v42 = vpack.c.bf16 %v19190_v9, %v19191_v29  ;;  %v19195_v25 = vpack.c.bf16 %v19193_v62, %v19194_v8  ;;  %v11720_v29 = vunpack.i.h.bf16 %v11718_v46 }
0x151b   : > { %10901 = vmatpush1.bf16.msra.mxu1 %v10900_v35  ;;  %v19196_v35 = vld [vmem:[#allocation133_spill] sm:$0xff] }
0x151c   : > { %10904 = vmatprep.subr.msk.bf16.mxu1 %vm17673_vm6, %v19178_v3  ;;  %v19198_v44 = vpack.c.bf16 %v19196_v35, %v19197_v20  ;;  %v19211_v35 = vld [vmem:[#allocation132_spill] sm:$0xff] }
0x151e   : > { %10629 = vmatmul.mubr.msk.f32.vlgmr.msra.gmra.mrb[236].mxu1 %vm8217_vm10, %v10628_v37  ;;  %v19199_v37 = vld [vmem:[#allocation91_spill] sm:$0xff] }
0x151f   : > { %10907 = vmatpush1.bf16.msk.msra.mxu1 %vm17690_vm7, %v19181_v54  ;;  %9531 = vmatprep.mubr.f32.mxu1 %v16603_v63  ;;  %v19201_v45 = vpack.c.bf16 %v19199_v37, %v19200_v41  ;;  %v9603_v54 = vsel %vm2122_vm9, %v11634_v23, %v11635_v39 }
0x1520   : > { %10910 = vmatprep.subr.msk.bf16.mxu1 %vm17673_vm6, %v10908_v52  ;;  %v11699_v52 = vunpack.i.l.bf16 %v11698_v16 }
0x1522   : > { %v9602_v60 = vsel %vm2122_vm9, %v11699_v52, %v11634_v23  ;;  %v19213_v52 = vld [vmem:[#allocation52_spill] sm:$0xff] }
0x1523   : > { %10913 = vmatpush1.bf16.msk.msra.mxu1 %vm17690_vm7, %v10911_v43 }
0x1524   : > { %10916 = vmatprep.subr.msk.bf16.mxu1 %vm17673_vm6, %v19185_v30  ;;  %v11723_v30 = vpop.permute.xlu0 %11722 }
0x1525   : > { %v11724_v26 = vunpack.i.l.bf16 %v11723_v30 }
0x1527   : > { %10919 = vmatpush1.bf16.msk.msra.mxu1 %vm17690_vm7, %v19188_v7 }
0x1528   : > { %10922 = vmatprep.subr.msk.bf16.mxu1 %vm17673_vm6, %v10920_v27  ;;  %v19205_v27 = vld [vmem:[#allocation134_spill] sm:$0xff] }
0x1529   : > { %v19206_v21 = vpack.c.bf16 %v19204_v53, %v19205_v27 }
0x152b   : > { %10925 = vmatpush1.bf16.msk.msra.mxu1 %vm17690_vm7, %v10923_v50 }
0x152c   : > { %10928 = vmatprep.subr.msk.bf16.mxu1 %vm17616_vm3, %v19192_v42  ;;  %v11719_v42 = vunpack.i.l.bf16 %v11718_v46 }
0x152e   : > { %10647 = vmatmul.mubr.msk.f32.vlgmr.msra.gmra.mrb[236].mxu1 %vm8217_vm10, %v10630_v19  ;;  %v9777_v58 = vsel %vm2363_vm13, %v11719_v42, %v11720_v29 }
0x152f   : > { %10931 = vmatpush1.bf16.msk.msra.mxu1 %vm17626_vm8, %v19195_v25  ;;  %9705 = vmatprep.mubr.f32.mxu1 %v16603_v63 }
0x1530   : > { %10934 = vmatprep.subr.msk.bf16.mxu1 %vm17616_vm3, %v10932_v55  ;;  %v11725_v55 = vunpack.i.h.bf16 %v11723_v30 }
0x1533   : > { %10937 = vmatpush1.bf16.msk.msra.mxu1 %vm17626_vm8, %v10935_v40  ;;  %v19210_v40 = vld [vmem:[#allocation139_spill] sm:$0xff] }
0x1534   : > { %10940 = vmatprep.subr.msk.bf16.mxu1 %vm17616_vm3, %v19198_v44  ;;  %v19212_v20 = vpack.c.bf16 %v19210_v40, %v19211_v35 }
0x1537   : > { %10943 = vmatpush1.bf16.msk.msra.mxu1 %vm17626_vm8, %v19201_v45  ;;  %v8344_v45 = vld [vmem:[%s18038_s17] sm:$0xff] }
0x153d   : > { %v8335_v3 = vpop.xlane.xlu1 %8334 }
0x153e   : > { %v8342_v28 = vmul.f32 0.00390625, %v8335_v3  ;;  %v9776_v3 = vsel %vm2363_vm13, %v11724_v26, %v11719_v42 }
0x1541   : > { %v11778_v15 = vpop.permute.xlu1 %11777 }
0x1542   : > { %v11780_v14 = vunpack.i.h.bf16 %v11778_v15  ;;  %v11779_v48 = vunpack.i.l.bf16 %v11778_v15  ;;  %v19214_v15 = vld [vmem:[#allocation46_spill] sm:$0xff] }
0x1544   : > { %v9604_v4 = vsel %vm2122_vm9, %v11700_v1, %v11779_v48  ;;  %v9605_v33 = vsel %vm2122_vm9, %v11779_v48, %v11780_v14  ;;  %v19215_v1 = vpack.c.bf16 %v19213_v52, %v19214_v15 }
0x1545   : > { %v10944_v43 = vpack.c.bf16 %v9605_v33, %v9603_v54  ;;  %v10947_v56 = vpack.c.bf16 %v9604_v4, %v9602_v60  ;;  %v17927_v5 = vpop.permute.xlu1 %11782 }
0x1546   : > { %v11785_v44 = vunpack.i.h.bf16 %v17927_v5  ;;  %v11784_v16 = vunpack.i.l.bf16 %v17927_v5 }
0x1547   : > { %10946 = vmatprep.subr.msk.bf16.mxu1 %vm17616_vm3, %v10944_v43 }
0x1548   : > { %10949 = vmatpush1.bf16.msk.msra.mxu1 %vm17626_vm8, %v10947_v56  ;;  %v9925_v33 = vsel %vm2596_vm0, %v11784_v16, %v11785_v44 }
0x1549   : > { %v11788_v38 = vpop.permute.xlu1 %11787  ;;  %10951 = vmatprep.subr.bf16.mxu1 %v19206_v21 }
0x154a   : > { %v11790_v51 = vunpack.i.h.bf16 %v11788_v38  ;;  %v11789_v59 = vunpack.i.l.bf16 %v11788_v38 }
0x154b   : > { %10665 = vmatmul.mubr.msk.f32.vlgmr.msra.gmra.mrb[236].mxu1 %vm8217_vm10, %v10648_v61 }
0x154c   : > { %v9770_v34 = vsel %vm2363_vm13, %v11705_v49, %v11789_v59  ;;  %v8338_v7 = vpop.xlane.xlu0 %8337  ;;  %10953 = vmatpush1.bf16.msra.mxu1 %v19209_v2  ;;  %v9771_v50 = vsel %vm2363_vm13, %v11789_v59, %v11790_v51  ;;  %9863 = vmatprep.mubr.f32.mxu1 %v16603_v63 }
0x154d   : > { %v10956_v17 = vpack.c.bf16 %v9770_v34, %v9768_v32  ;;  %v8343_v47 = vmul.f32 0.00390625, %v8338_v7  ;;  %v11793_v19 = vpop.permute.xlu1 %11792  ;;  %v10954_v9 = vpack.c.bf16 %v9771_v50, %v9769_v12 }
0x154e   : > { %v11795_v14 = vunpack.i.h.bf16 %v11793_v19  ;;  %v11794_v48 = vunpack.i.l.bf16 %v11793_v19 }
0x154f   : > { %v10796_v31 = vpack.c.bf16 %v8343_v47, %v8342_v28  ;;  %10955 = vmatprep.subr.bf16.mxu1 %v10954_v9 }
0x1550   : > { %v11773_v13 = vpop.permute.xlu0 %11772  ;;  %10957 = vmatpush1.bf16.msra.mxu1 %v10956_v17  ;;  %v9924_v0 = vsel %vm2596_vm0, %v11795_v14, %v11784_v16 }
0x1551   : > { %v11775_v62 = vunpack.i.h.bf16 %v11773_v13  ;;  %v11774_v8 = vunpack.i.l.bf16 %v11773_v13  ;;  %10797 = vmatpush3.bf16.msra.mxu0 %v10796_v31  ;;  %v11808_v25 = vpop.permute.xlu1 %11807  ;;  %10959 = vmatprep.subr.bf16.mxu1 %v19212_v20 }
0x1552   : > { %v11810_v37 = vunpack.i.h.bf16 %v11808_v25  ;;  %v11809_v41 = vunpack.i.l.bf16 %v11808_v25 }
0x1553   : > { %v9923_v22 = vsel %vm2596_vm0, %v11774_v8, %v11775_v62  ;;  %v9922_v43 = vsel %vm2596_vm0, %v11794_v48, %v11774_v8 }
0x1554   : > { %v9778_v39 = vsel %vm2363_vm13, %v11725_v55, %v11809_v41  ;;  %v11798_v23 = vpop.permute.xlu0 %11797  ;;  %10961 = vmatpush1.bf16.msra.mxu1 %v19215_v1  ;;  %v9779_v46 = vsel %vm2363_vm13, %v11809_v41, %v11810_v37  ;;  %10704 = vmatmul.mubr.msk.f32.vlgmr.msra.gmra.mrb[124].mxu0 %vm3141_vm11, %v8344_v45  ;;  %v10966_v56 = vpack.c.bf16 %v9925_v33, %v9923_v22  ;;  %v8345_v22 = vld [vmem:[%s18039_s18] sm:$0xff] }
0x1555   : > { %v10964_v54 = vpack.c.bf16 %v9778_v39, %v9776_v3  ;;  %v11813_v60 = vpop.permute.xlu1 %11812  ;;  %v10962_v4 = vpack.c.bf16 %v9779_v46, %v9777_v58  ;;  %v11800_v5 = vunpack.i.h.bf16 %v11798_v23  ;;  %v11799_v57 = vunpack.i.l.bf16 %v11798_v23  ;;  %v10668_v3 = vld [vmem:[%s18036_s15 + $0x40] sm:$0x1f] }
0x1556   : > { %v10969_v53 = vpack.c.bf16 %v9924_v0, %v9922_v43  ;;  %v11815_v49 = vunpack.i.h.bf16 %v11813_v60  ;;  %v11814_v51 = vunpack.i.l.bf16 %v11813_v60 }
0x1557   : > { %10963 = vmatprep.subr.bf16.mxu1 %v10962_v4  ;;  %v9927_v12 = vsel %vm2596_vm0, %v11799_v57, %v11800_v5 }
0x1558   : > { %v11803_v11 = vpop.permute.xlu0 %11802  ;;  %10965 = vmatpush1.bf16.msra.mxu1 %v10964_v54  ;;  %v9931_v19 = vsel %vm2596_vm0, %v11814_v51, %v11815_v49 }
0x1559   : > { %v11805_v30 = vunpack.i.h.bf16 %v11803_v11  ;;  %v11804_v61 = vunpack.i.l.bf16 %v11803_v11  ;;  %v11823_v38 = vpop.permute.xlu1 %11822  ;;  %10968 = vmatprep.subr.msk.bf16.mxu1 %vm17673_vm6, %v10966_v56 }
0x155a   : > { %v11825_v27 = vunpack.i.h.bf16 %v11823_v38  ;;  %v11824_v21 = vunpack.i.l.bf16 %v11823_v38 }
0x155b   : > { %v9926_v59 = vsel %vm2596_vm0, %v11804_v61, %v11799_v57  ;;  %10667 = vmatmul.mubr.msk.f32.vlgmr.msra.gmra.mrb[236].mxu1 %vm8217_vm10, %v10666_v6 }
0x155c   : > { %v9928_v32 = vsel %vm2596_vm0, %v11805_v30, %v11824_v21  ;;  %v9929_v34 = vsel %vm2596_vm0, %v11824_v21, %v11825_v27  ;;  %v11818_v7 = vpop.permute.xlu0 %11817  ;;  %10971 = vmatpush1.bf16.msk.msra.mxu1 %vm17690_vm7, %v10969_v53  ;;  %10037 = vmatprep.mubr.f32.mxu1 %v16603_v63 }
0x155d   : > { %v10972_v24 = vpack.c.bf16 %v9929_v34, %v9927_v12  ;;  %v10975_v10 = vpack.c.bf16 %v9928_v32, %v9926_v59  ;;  %v11820_v2 = vunpack.i.h.bf16 %v11818_v7  ;;  %v11819_v50 = vunpack.i.l.bf16 %v11818_v7  ;;  %v11828_v28 = vpop.permute.xlu1 %11827 }
0x155e   : > { %v11830_v17 = vunpack.i.h.bf16 %v11828_v28  ;;  %v11829_v47 = vunpack.i.l.bf16 %v11828_v28 }
0x155f   : > { %v9933_v9 = vsel %vm2596_vm0, %v11819_v50, %v11820_v2  ;;  %10974 = vmatprep.subr.msk.bf16.mxu1 %vm17673_vm6, %v10972_v24 }
0x1560   : > { %v10978_v29 = vpack.c.bf16 %v9933_v9, %v9931_v19  ;;  %v9932_v42 = vsel %vm2596_vm0, %v11830_v17, %v11819_v50  ;;  %v9930_v31 = vsel %vm2596_vm0, %v11829_v47, %v11814_v51  ;;  %v11833_v63 = vpop.permute.xlu0 %11832  ;;  %10977 = vmatpush1.bf16.msk.msra.mxu1 %vm17690_vm7, %v10975_v10 }
0x1561   : > { %v10981_v26 = vpack.c.bf16 %v9932_v42, %v9930_v31  ;;  %v11835_v13 = vunpack.i.h.bf16 %v11833_v63  ;;  %v11834_v55 = vunpack.i.l.bf16 %v11833_v63  ;;  %v11838_v62 = vpop.permute.xlu1 %11837 }
0x1562   : > { %v11840_v8 = vunpack.i.h.bf16 %v11838_v62  ;;  %v11839_v25 = vunpack.i.l.bf16 %v11838_v62  ;;  %10980 = vmatprep.subr.msk.bf16.mxu1 %vm17673_vm6, %v10978_v29 }
0x1563   : > { %v9935_v40 = vsel %vm2596_vm0, %v11834_v55, %v11835_v13 }
0x1564   : > { %v9937_v35 = vsel %vm2596_vm0, %v11839_v25, %v11840_v8  ;;  %v11843_v20 = vpop.permute.xlu0 %11842  ;;  %10983 = vmatpush1.bf16.msk.msra.mxu1 %vm17690_vm7, %v10981_v26 }
0x1565   : > { %v10984_v44 = vpack.c.bf16 %v9937_v35, %v9935_v40  ;;  %v11845_v16 = vunpack.i.h.bf16 %v11843_v20  ;;  %v11844_v37 = vunpack.i.l.bf16 %v11843_v20  ;;  %v10050_v23 = vpop.permute.xlu1 %10049 }
0x1567   : > { %v9934_v41 = vsel %vm2596_vm0, %v11844_v37, %v11834_v55  ;;  %v9936_v45 = vsel %vm2596_vm0, %v11845_v16, %v11839_v25  ;;  %10986 = vmatprep.subr.msk.bf16.mxu1 %vm17673_vm6, %v10984_v44 }
0x1568   : > { %v10987_v58 = vpack.c.bf16 %v9936_v45, %v9934_v41 }
0x156a   : > { %10989 = vmatpush1.bf16.msk.msra.mxu1 %vm17690_vm7, %v10987_v58 }
0x156d   : > { %10685 = vmatmul.mubr.msk.f32.vlgmr.msra.gmra.mrb[236].mxu1 %vm8217_vm10, %v10668_v3 }
0x1627   : > { %v8415_v36 = vpop.f32.mrb[124].mxu0 }
0x1628   : > { %v8416_v39 = vadd.f32 %v8415_v36, %v8345_v22  ;;  %v10705_v18 = vpop.f32.mrb[125].mxu0 }
0x162a   : > { %8420 = vst.msk [vmem:[%s640_s0] sm:$0xff] %vm8419_vm2, %v8416_v39 }
0x1640   : > { %v10039_v52 = vpop.f32.mrb[236].mxu1 }
0x1641   : > { %v10052_v15 = vadd.f32 %v10050_v23, %v10039_v52  ;;  %v10041_v1 = vpop.f32.mrb[237].mxu1 }
0x1642   : > { %v10053_v46 = vadd.f32 %v10050_v23, %v10041_v1 }
0x1643   : > { %10054 = vst [vmem:[%s636_s29] sm:$0x1f] %v10052_v15 }
0x1644   : > { %10055 = vst [vmem:[%s636_s29 + $0x8] sm:$0x1f] %v10053_v46 }
0x1645 PF: > { %s31_s1 = sadd.s32 1, %s12665_s1  }
0x1646   : > { %p28_p4 = scmp.ge.s32.totalorder %s31_s1, 4  }
0x1648   :  { %30 = sbr.rel (!%p28_p4) target bundleno = 6 (0x6), region = 169 }

</bundles_post_ra>
